<compile_context>
chip_gen: v5e
topology: v5e:2x2
jax: 0.10.0
libtpu: 0.0.40
codegen_flags: <defaults>
</compile_context>

<pallas_src>
import jax
import jax.numpy as jnp
from jax import lax
from jax.experimental import pallas as pl
from jax.experimental.pallas import tpu as pltpu

# ----------------------------- configuration --------------------------------
B = 2                       # batch
C, H, W = 3, 16, 16         # small stand-in for the 3x224x224 images
INPUT_SIZE = C * H * W      # 768   (real model: 150528 = 1176 * 128)
CLUSTER_SIZES = list(range(2, 128, 4))     # 32 encoders: 2, 6, 10, ..., 126
N_ENCODERS = len(CLUSTER_SIZES)            # 32
TOTAL_CLUSTERS = sum(CLUSTER_SIZES)        # 2048 (fixed by the module)
HIDDEN_SIZES = [64, 32]
NUM_CLASSES = 10
MLP_IN = INPUT_SIZE + N_ENCODERS

BP = 8                      # batch padded to one full f32 sublane tile
BIG = 1e30                  # Python float literal -> never a captured jnp const


# --------------- generation-aware VMEM budget & tile picking -----------------
def _physical_vmem_bytes():
    # v5e/v6e: 128 MiB; v7x: 64 MiB per TensorCore.  Fall back to the
    # smallest (v7x-safe) figure if the query is unavailable (interpret mode).
    try:
        return int(pltpu.get_tpu_info().vmem_capacity_bytes)
    except Exception:
        return 64 * 1024 * 1024


_VMEM_CAP = _physical_vmem_bytes()
# Scoped limit: ~75% of physical, capped at 100 MiB, floor of 32 MiB.
VMEM_LIMIT = max(32 * 1024 * 1024, min(int(_VMEM_CAP * 0.75), 100 * 1024 * 1024))


def _pick_k_tile(total_k, other_dim, bytes_per_elem, budget_bytes):
    """Largest multiple-of-128 divisor of total_k whose double-buffered
    (k_tile, other_dim) block fits in budget_bytes."""
    best = None
    t = 128
    while t <= total_k:
        if total_k % t == 0 and 2 * t * other_dim * bytes_per_elem <= budget_bytes:
            best = t
        t += 128
    if best is None:
        best = total_k          # tiny problems: take the whole axis
    return best


N_TILE = TOTAL_CLUSTERS // 2        # 1024: 2 N tiles -> v7x 2-TC megacore split
# centers (bf16) double buffer gets ~60% of the scoped VMEM limit.
K_TILE = _pick_k_tile(INPUT_SIZE, N_TILE, 2, int(VMEM_LIMIT * 0.6))
# the MLP's w1x (bf16, INPUT_SIZE x 64) stream gets its own, larger K tile.
K_TILE_MLP = _pick_k_tile(INPUT_SIZE, HIDDEN_SIZES[0], 2, 16 * 1024 * 1024)

# Static cluster -> (encoder id, local cluster index) segment maps.
_seg, _loc = [], []
for _e, _n in enumerate(CLUSTER_SIZES):
    _seg += [_e] * _n
    _loc += list(range(_n))
SEG_ID = jnp.asarray(_seg, jnp.int32).reshape(1, 1, TOTAL_CLUSTERS)
LOCAL_IDX = jnp.asarray(_loc, jnp.float32).reshape(1, 1, TOTAL_CLUSTERS)


# --------------------------- Pallas kernel #1 --------------------------------
# "distances" up to a per-row constant, accumulated directly in the resident
# f32 output tile:  o[b, j] += -2 * x_b . c_j|_Kt ; last K step adds ||c_j||^2.
def _dist_kernel(x_ref, c_ref, cn_ref, o_ref):
    k = pl.program_id(1)

    @pl.when(k == 0)
    def _init():
        o_ref[...] = jnp.zeros_like(o_ref)

    # plain A @ B on the MXU (centers pre-transposed to (K, N) at init).
    xc = jnp.dot(x_ref[...], c_ref[...], preferred_element_type=jnp.float32)
    o_ref[...] += -2.0 * xc

    @pl.when(k == pl.num_programs(1) - 1)
    def _done():
        o_ref[...] += cn_ref[...]                         # + ||c_j||^2


def kmeans_distances(x_bf16, centers_t_bf16, cnorm):
    grid = (TOTAL_CLUSTERS // N_TILE, INPUT_SIZE // K_TILE)
    return pl.pallas_call(
        _dist_kernel,
        out_shape=jax.ShapeDtypeStruct((BP, TOTAL_CLUSTERS), jnp.float32),
        grid_spec=pltpu.PrefetchScalarGridSpec(
            num_scalar_prefetch=0,
            grid=grid,
            in_specs=[
                pl.BlockSpec((BP, K_TILE), lambda n, k: (0, k)),       # x
                pl.BlockSpec((K_TILE, N_TILE), lambda n, k: (k, n)),   # centers^T
                pl.BlockSpec((1, N_TILE), lambda n, k: (0, n)),        # ||c||^2
            ],
            out_specs=pl.BlockSpec((BP, N_TILE), lambda n, k: (0, n)),
        ),
        compiler_params=pltpu.CompilerParams(
            dimension_semantics=("parallel", "arbitrary"),
            vmem_limit_bytes=VMEM_LIMIT,
        ),
    )(x_bf16, centers_t_bf16, cnorm)


# --------------------------- Pallas kernel #2 --------------------------------
# per-encoder argmin over its ragged slice of the distance row, done with a
# segment-id mask (one vectorized pass, first-occurrence tie-break like
# np/sklearn).  Output is lane-dense: (BP, N_ENCODERS).
def _argmin_kernel(dist_ref, seg_ref, loc_ref, o_ref):
    dist = dist_ref[...]                                   # (BP, 1, NC) f32
    seg = seg_ref[...]                                     # (1, 1, NC) int32
    loc = loc_ref[...]                                     # (1, 1, NC) f32
    enc = lax.broadcasted_iota(jnp.int32,
                               (1, N_ENCODERS, TOTAL_CLUSTERS), 1)
    mask = seg == enc                                      # (1, NE, NC)
    md = jnp.where(mask, dist, BIG)                        # (BP, NE, NC)
    mval = jnp.min(md, axis=-1, keepdims=True)             # (BP, NE, 1)
    cand = jnp.where(md == mval, loc, BIG)                 # local idx at minima
    o_ref[...] = jnp.min(cand, axis=-1)                    # (BP, NE)


def segmented_argmin(dist):
    vmem = pl.BlockSpec(memory_space=pltpu.MemorySpace.VMEM)
    return pl.pallas_call(
        _argmin_kernel,
        out_shape=jax.ShapeDtypeStruct((BP, N_ENCODERS), jnp.float32),
        in_specs=[vmem, vmem, vmem],
        out_specs=vmem,
        compiler_params=pltpu.CompilerParams(vmem_limit_bytes=32 * 1024 * 1024),
    )(dist[:, None, :], SEG_ID, LOCAL_IDX)


# --------------------------- Pallas kernel #3 --------------------------------
# fused MLP with the concat folded in:
#   h1 = relu( x @ W1x  +  km @ W1k  + b1 );  out = relu(h1 @ W2 + b2) @ W3 + b3
# The wide x @ W1x matmul streams bf16 operands tiled over the feature axis
# with an f32 accumulator in VMEM.
def _mlp_kernel(xf_ref, km_ref, w1x_ref, w1k_ref, b1_ref, w2_ref, b2_ref,
                w3_ref, b3_ref, o_ref, h_acc):
    k = pl.program_id(0)

    @pl.when(k == 0)
    def _init():
        h_acc[...] = jnp.zeros_like(h_acc)

    h_acc[...] += jnp.dot(xf_ref[...], w1x_ref[...],
                          preferred_element_type=jnp.float32)

    @pl.when(k == pl.num_programs(0) - 1)
    def _done():
        h = h_acc[...] + jnp.dot(km_ref[...], w1k_ref[...],
                                 preferred_element_type=jnp.float32) + b1_ref[...]
        h = jnp.maximum(h, 0.0)                                       # ReLU
        h = jnp.dot(h, w2_ref[...],
                    preferred_element_type=jnp.float32) + b2_ref[...]
        h = jnp.maximum(h, 0.0)                                       # ReLU
        o_ref[...] = jnp.dot(h, w3_ref[...],
                             preferred_element_type=jnp.float32) + b3_ref[...]


def mlp_forward(xf_bf16, km_p, params):
    w1x, w1k, b1, w2, b2, w3, b3 = params
    h1, h2 = HIDDEN_SIZES
    grid = (INPUT_SIZE // K_TILE_MLP,)
    return pl.pallas_call(
        _mlp_kernel,
        out_shape=jax.ShapeDtypeStruct((BP, NUM_CLASSES), jnp.float32),
        grid_spec=pltpu.PrefetchScalarGridSpec(
            num_scalar_prefetch=0,
            grid=grid,
            in_specs=[
                pl.BlockSpec((BP, K_TILE_MLP), lambda k: (0, k)),     # x (bf16)
                pl.BlockSpec((BP, N_ENCODERS), lambda k: (0, 0)),     # km
                pl.BlockSpec((K_TILE_MLP, h1), lambda k: (k, 0)),     # w1x (bf16)
                pl.BlockSpec((N_ENCODERS, h1), lambda k: (0, 0)),     # w1k
                pl.BlockSpec((1, h1), lambda k: (0, 0)),              # b1
                pl.BlockSpec((h1, h2), lambda k: (0, 0)),             # w2
                pl.BlockSpec((1, h2), lambda k: (0, 0)),              # b2
                pl.BlockSpec((h2, NUM_CLASSES), lambda k: (0, 0)),    # w3
                pl.BlockSpec((1, NUM_CLASSES), lambda k: (0, 0)),     # b3
            ],
            out_specs=pl.BlockSpec((BP, NUM_CLASSES), lambda k: (0, 0)),
            scratch_shapes=[pltpu.VMEM((BP, h1), jnp.float32)],
        ),
        compiler_params=pltpu.CompilerParams(
            dimension_semantics=("arbitrary",),
            vmem_limit_bytes=VMEM_LIMIT,
        ),
    )(xf_bf16, km_p, w1x, w1k, b1, w2, b2, w3, b3)


# ------------------------------ full forward ---------------------------------
def patnet_forward(x, centers_t_bf16, cnorm, mlp_params):
    # x.view(-1, C*H*W).float()
    xf = x.reshape(-1, INPUT_SIZE).astype(jnp.float32)
    b = xf.shape[0]
    x_bf16 = jnp.pad(xf, ((0, BP - b), (0, 0))).astype(jnp.bfloat16)   # (BP, D)

    # KMeans predict for every encoder: distance matmul + segmented argmin.
    dist = kmeans_distances(x_bf16, centers_t_bf16, cnorm)   # (BP, 2048)
    labels = segmented_argmin(dist)                          # (BP, 32) f32

    # torch.Tensor(np.array([...])).view(-1, len(kmeans)) — faithfully replicate
    # the row-major (n_encoders, B) -> (B, n_encoders) reinterpretation.
    km = labels[:b].T.reshape(b, N_ENCODERS)                 # (B, 32)
    km_p = jnp.pad(km, ((0, BP - b), (0, 0)))                # (BP, 32)

    # fused concat + MLP.
    out = mlp_forward(x_bf16, km_p, mlp_params)              # (BP, 10)
    return out[:b]


# ------------------------------ parameter init --------------------------------
def init_params(key):
    ks = jax.random.split(key, 8)
    centers_f32 = jax.random.normal(ks[0], (TOTAL_CLUSTERS, INPUT_SIZE),
                                    jnp.float32)
    centers_bf16 = centers_f32.astype(jnp.bfloat16)          # halve HBM bytes
    # ||c||^2 from the *bf16-rounded* centers so the distance surrogate is
    # internally consistent with the bf16 dot (no mixed quantizations).
    c32 = centers_bf16.astype(jnp.float32)
    cnorm = jnp.sum(c32 * c32, axis=1)[None, :]              # (1, 2048) f32
    # pre-transpose ONCE (inference constant) to (K, N): the distance kernel
    # then runs a plain A @ B — no A @ B^T lowering / per-tile transpose.
    centers_t_bf16 = centers_bf16.T                          # (INPUT_SIZE, 2048)

    sizes = [MLP_IN] + HIDDEN_SIZES + [NUM_CLASSES]
    raw = []
    for i in range(len(sizes) - 1):
        fan_in = sizes[i]
        scale = fan_in ** -0.5
        w = jax.random.uniform(ks[2 * i + 1], (sizes[i], sizes[i + 1]),
                               jnp.float32, -scale, scale)
        bvec = jax.random.uniform(ks[2 * i + 2], (1, sizes[i + 1]),
                                  jnp.float32, -scale, scale)
        raw += [w, bvec]
    w1, b1, w2, b2, w3, b3 = raw
    # split W1 once at init so the concat fuses inside the MLP kernel; the
    # wide half (the only non-trivial HBM stream in kernel 3) is stored bf16.
    mlp_params = (w1[:INPUT_SIZE].astype(jnp.bfloat16),      # W1x, bf16 stream
                  w1[INPUT_SIZE:], b1, w2, b2, w3, b3)
    return centers_t_bf16, cnorm, mlp_params


if __name__ == "__main__":
    key = jax.random.PRNGKey(0)
    k_x, k_p = jax.random.split(key)
    x = jax.random.normal(k_x, (B, C, H, W), jnp.float32)    # NCHW, like PyTorch
    centers_t_bf16, cnorm, mlp_params = init_params(k_p)

    fwd = jax.jit(patnet_forward)
    out = fwd(x, centers_t_bf16, cnorm, mlp_params)
    jax.block_until_ready(out)

    assert out.shape == (B, NUM_CLASSES), out.shape
    assert out.dtype == jnp.float32
    print("KERNEL_OK")
</pallas_src>

<mosaic_0001>
module attributes {stable_mosaic.version = 11 : i64} {
  func.func @_argmin_kernel(%arg0: memref<8x1x2048xf32, #tpu.memory_space<vmem>>, %arg1: memref<1x1x2048xi32, #tpu.memory_space<vmem>>, %arg2: memref<1x1x2048xf32, #tpu.memory_space<vmem>>, %arg3: memref<8x32xf32, #tpu.memory_space<vmem>>) attributes {dimension_semantics = [], scalar_prefetch = 0 : i64, scratch_operands = 0 : i64, tpu.core_type = #tpu.core_type<tc>} {
    %c0 = arith.constant 0 : index
    %c0_0 = arith.constant 0 : index
    %c0_1 = arith.constant 0 : index
    %0 = vector.load %arg0[%c0, %c0_0, %c0_1] : memref<8x1x2048xf32, #tpu.memory_space<vmem>>, vector<8x1x2048xf32>
    %c0_2 = arith.constant 0 : index
    %c0_3 = arith.constant 0 : index
    %c0_4 = arith.constant 0 : index
    %1 = vector.load %arg1[%c0_2, %c0_3, %c0_4] : memref<1x1x2048xi32, #tpu.memory_space<vmem>>, vector<1x1x2048xi32>
    %c0_5 = arith.constant 0 : index
    %c0_6 = arith.constant 0 : index
    %c0_7 = arith.constant 0 : index
    %2 = vector.load %arg2[%c0_5, %c0_6, %c0_7] : memref<1x1x2048xf32, #tpu.memory_space<vmem>>, vector<1x1x2048xf32>
    %3 = tpu.iota {dimensions = array<i32: 1>} : vector<1x32x2048xi32>
    %4 = vector.broadcast %1 : vector<1x1x2048xi32> to vector<1x32x2048xi32>
    %5 = arith.cmpi eq, %4, %3 : vector<1x32x2048xi32>
    %cst = arith.constant 1.000000e+30 : f32
    %6 = vector.shape_cast %5 : vector<1x32x2048xi1> to vector<1x32x2048xi1>
    %7 = vector.broadcast %6 : vector<1x32x2048xi1> to vector<8x32x2048xi1>
    %8 = vector.shape_cast %0 : vector<8x1x2048xf32> to vector<8x1x2048xf32>
    %9 = vector.broadcast %8 : vector<8x1x2048xf32> to vector<8x32x2048xf32>
    %10 = vector.broadcast %cst : f32 to vector<8x32x2048xf32>
    %11 = arith.select %7, %9, %10 : vector<8x32x2048xi1>, vector<8x32x2048xf32>
    %cst_8 = arith.constant dense<0x7F800000> : vector<8x32xf32>
    %12 = vector.multi_reduction <minimumf>, %11, %cst_8 [2] : vector<8x32x2048xf32> to vector<8x32xf32>
    %13 = vector.shape_cast %12 : vector<8x32xf32> to vector<8x32x1xf32>
    %14 = vector.broadcast %13 : vector<8x32x1xf32> to vector<8x32x2048xf32>
    %15 = arith.cmpf oeq, %11, %14 : vector<8x32x2048xf32>
    %cst_9 = arith.constant 1.000000e+30 : f32
    %16 = vector.shape_cast %2 : vector<1x1x2048xf32> to vector<1x1x2048xf32>
    %17 = vector.broadcast %16 : vector<1x1x2048xf32> to vector<8x32x2048xf32>
    %18 = vector.broadcast %cst_9 : f32 to vector<8x32x2048xf32>
    %19 = arith.select %15, %17, %18 : vector<8x32x2048xi1>, vector<8x32x2048xf32>
    %cst_10 = arith.constant dense<0x7F800000> : vector<8x32xf32>
    %20 = vector.multi_reduction <minimumf>, %19, %cst_10 [2] : vector<8x32x2048xf32> to vector<8x32xf32>
    %c0_11 = arith.constant 0 : index
    %c0_12 = arith.constant 0 : index
    %21 = vector.load %arg3[%c0_11, %c0_12] : memref<8x32xf32, #tpu.memory_space<vmem>>, vector<8x32xf32>
    tpu.vector_store %arg3[%c0_11, %c0_12], %20 {strides = array<i32>} : memref<8x32xf32, #tpu.memory_space<vmem>>, vector<8x32xf32>,
    return
  }
}

module attributes {stable_mosaic.version = 11 : i64} {
  func.func @_dist_kernel(%arg0: i32, %arg1: i32, %arg2: memref<8x768xbf16, #tpu.memory_space<vmem>>, %arg3: memref<768x1024xbf16, #tpu.memory_space<vmem>>, %arg4: memref<1x1024xf32, #tpu.memory_space<vmem>>, %arg5: memref<8x1024xf32, #tpu.memory_space<vmem>>) attributes {dimension_semantics = [#tpu.dimension_semantics<parallel>, #tpu.dimension_semantics<arbitrary>], iteration_bounds = array<i64: 2, 1>, scalar_prefetch = 0 : i64, scratch_operands = 0 : i64, tpu.core_type = #tpu.core_type<tc>, window_params = [{transform_indices = @transform_0, window_bounds = array<i64: 8, 768>}, {transform_indices = @transform_1, window_bounds = array<i64: 768, 1024>}, {transform_indices = @transform_2, window_bounds = array<i64: 1, 1024>}, {transform_indices = @transform_3, window_bounds = array<i64: 8, 1024>}]} {
    %c0_i32 = arith.constant 0 : i32
    %0 = arith.cmpi eq, %arg1, %c0_i32 : i32
    %1 = arith.extui %0 : i1 to i32
    %c0_i32_0 = arith.constant 0 : i32
    %2 = arith.cmpi ne, %1, %c0_i32_0 : i32
    scf.if %2 {
      %cst_11 = arith.constant 0.000000e+00 : f32
      %14 = vector.broadcast %cst_11 : f32 to vector<8x1024xf32>
      %c0_12 = arith.constant 0 : index
      %c0_13 = arith.constant 0 : index
      %15 = vector.load %arg5[%c0_12, %c0_13] : memref<8x1024xf32, #tpu.memory_space<vmem>>, vector<8x1024xf32>
      tpu.vector_store %arg5[%c0_12, %c0_13], %14 {strides = array<i32>} : memref<8x1024xf32, #tpu.memory_space<vmem>>, vector<8x1024xf32>,
    } else {
    }
    %c0 = arith.constant 0 : index
    %c0_1 = arith.constant 0 : index
    %3 = vector.load %arg2[%c0, %c0_1] : memref<8x768xbf16, #tpu.memory_space<vmem>>, vector<8x768xbf16>
    %c0_2 = arith.constant 0 : index
    %c0_3 = arith.constant 0 : index
    %4 = vector.load %arg3[%c0_2, %c0_3] : memref<768x1024xbf16, #tpu.memory_space<vmem>>, vector<768x1024xbf16>
    %cst = arith.constant dense<0.000000e+00> : vector<8x1024xf32>
    %5 = tpu.matmul %3, %4, %cst {dimension_numbers = #tpu.dot_dimension_numbers<[1], [0], [0], [1], [0, 0, 1, 1], [], []>} : vector<8x768xbf16>, vector<768x1024xbf16>, vector<8x1024xf32> -> vector<8x1024xf32>
    %c0_4 = arith.constant 0 : index
    %c0_5 = arith.constant 0 : index
    %6 = vector.load %arg5[%c0_4, %c0_5] : memref<8x1024xf32, #tpu.memory_space<vmem>>, vector<8x1024xf32>
    %cst_6 = arith.constant -2.000000e+00 : f32
    %7 = vector.broadcast %cst_6 : f32 to vector<8x1024xf32>
    %8 = arith.mulf %7, %5 : vector<8x1024xf32>
    %9 = arith.addf %6, %8 : vector<8x1024xf32>
    %c0_7 = arith.constant 0 : index
    %c0_8 = arith.constant 0 : index
    %10 = vector.load %arg5[%c0_7, %c0_8] : memref<8x1024xf32, #tpu.memory_space<vmem>>, vector<8x1024xf32>
    tpu.vector_store %arg5[%c0_7, %c0_8], %9 {strides = array<i32>} : memref<8x1024xf32, #tpu.memory_space<vmem>>, vector<8x1024xf32>,
    %c0_i32_9 = arith.constant 0 : i32
    %11 = arith.cmpi eq, %arg1, %c0_i32_9 : i32
    %12 = arith.extui %11 : i1 to i32
    %c0_i32_10 = arith.constant 0 : i32
    %13 = arith.cmpi ne, %12, %c0_i32_10 : i32
    scf.if %13 {
      %c0_11 = arith.constant 0 : index
      %c0_12 = arith.constant 0 : index
      %14 = vector.load %arg5[%c0_11, %c0_12] : memref<8x1024xf32, #tpu.memory_space<vmem>>, vector<8x1024xf32>
      %c0_13 = arith.constant 0 : index
      %c0_14 = arith.constant 0 : index
      %15 = vector.load %arg4[%c0_13, %c0_14] : memref<1x1024xf32, #tpu.memory_space<vmem>>, vector<1x1024xf32>
      %16 = vector.broadcast %15 : vector<1x1024xf32> to vector<8x1024xf32>
      %17 = arith.addf %14, %16 : vector<8x1024xf32>
      %c0_15 = arith.constant 0 : index
      %c0_16 = arith.constant 0 : index
      %18 = vector.load %arg5[%c0_15, %c0_16] : memref<8x1024xf32, #tpu.memory_space<vmem>>, vector<8x1024xf32>
      tpu.vector_store %arg5[%c0_15, %c0_16], %17 {strides = array<i32>} : memref<8x1024xf32, #tpu.memory_space<vmem>>, vector<8x1024xf32>,
    } else {
    }
    return
  }
  func.func @transform_0(%arg0: i32, %arg1: i32) -> (i32, i32) {
    %c0_i32 = arith.constant 0 : i32
    %c0_i32_0 = arith.constant 0 : i32
    return %c0_i32, %arg1 : i32, i32
  }
  func.func @transform_1(%arg0: i32, %arg1: i32) -> (i32, i32) {
    %c0_i32 = arith.constant 0 : i32
    return %arg1, %arg0 : i32, i32
  }
  func.func @transform_2(%arg0: i32, %arg1: i32) -> (i32, i32) {
    %c0_i32 = arith.constant 0 : i32
    %c0_i32_0 = arith.constant 0 : i32
    return %c0_i32, %arg0 : i32, i32
  }
  func.func @transform_3(%arg0: i32, %arg1: i32) -> (i32, i32) {
    %c0_i32 = arith.constant 0 : i32
    %c0_i32_0 = arith.constant 0 : i32
    return %c0_i32, %arg0 : i32, i32
  }
}

module attributes {stable_mosaic.version = 11 : i64} {
  func.func @_mlp_kernel(%arg0: i32, %arg1: memref<8x768xbf16, #tpu.memory_space<vmem>>, %arg2: memref<8x32xf32, #tpu.memory_space<vmem>>, %arg3: memref<768x64xbf16, #tpu.memory_space<vmem>>, %arg4: memref<32x64xf32, #tpu.memory_space<vmem>>, %arg5: memref<1x64xf32, #tpu.memory_space<vmem>>, %arg6: memref<64x32xf32, #tpu.memory_space<vmem>>, %arg7: memref<1x32xf32, #tpu.memory_space<vmem>>, %arg8: memref<32x10xf32, #tpu.memory_space<vmem>>, %arg9: memref<1x10xf32, #tpu.memory_space<vmem>>, %arg10: memref<8x10xf32, #tpu.memory_space<vmem>>, %arg11: memref<8x64xf32, #tpu.memory_space<vmem>>) attributes {dimension_semantics = [#tpu.dimension_semantics<arbitrary>], iteration_bounds = array<i64: 1>, scalar_prefetch = 0 : i64, scratch_operands = 1 : i64, tpu.core_type = #tpu.core_type<tc>, window_params = [{transform_indices = @transform_0, window_bounds = array<i64: 8, 768>}, {pipeline_mode = #tpu.pipeline_mode<synchronous>, transform_indices = @transform_1, window_bounds = array<i64: 8, 32>}, {transform_indices = @transform_2, window_bounds = array<i64: 768, 64>}, {pipeline_mode = #tpu.pipeline_mode<synchronous>, transform_indices = @transform_3, window_bounds = array<i64: 32, 64>}, {pipeline_mode = #tpu.pipeline_mode<synchronous>, transform_indices = @transform_4, window_bounds = array<i64: 1, 64>}, {pipeline_mode = #tpu.pipeline_mode<synchronous>, transform_indices = @transform_5, window_bounds = array<i64: 64, 32>}, {pipeline_mode = #tpu.pipeline_mode<synchronous>, transform_indices = @transform_6, window_bounds = array<i64: 1, 32>}, {pipeline_mode = #tpu.pipeline_mode<synchronous>, transform_indices = @transform_7, window_bounds = array<i64: 32, 10>}, {pipeline_mode = #tpu.pipeline_mode<synchronous>, transform_indices = @transform_8, window_bounds = array<i64: 1, 10>}, {pipeline_mode = #tpu.pipeline_mode<synchronous>, transform_indices = @transform_9, window_bounds = array<i64: 8, 10>}]} {
    %c0_i32 = arith.constant 0 : i32
    %0 = arith.cmpi eq, %arg0, %c0_i32 : i32
    %1 = arith.extui %0 : i1 to i32
    %c0_i32_0 = arith.constant 0 : i32
    %2 = arith.cmpi ne, %1, %c0_i32_0 : i32
    scf.if %2 {
      %cst_10 = arith.constant 0.000000e+00 : f32
      %12 = vector.broadcast %cst_10 : f32 to vector<8x64xf32>
      %c0_11 = arith.constant 0 : index
      %c0_12 = arith.constant 0 : index
      %13 = vector.load %arg11[%c0_11, %c0_12] : memref<8x64xf32, #tpu.memory_space<vmem>>, vector<8x64xf32>
      tpu.vector_store %arg11[%c0_11, %c0_12], %12 {strides = array<i32>} : memref<8x64xf32, #tpu.memory_space<vmem>>, vector<8x64xf32>,
    } else {
    }
    %c0 = arith.constant 0 : index
    %c0_1 = arith.constant 0 : index
    %3 = vector.load %arg11[%c0, %c0_1] : memref<8x64xf32, #tpu.memory_space<vmem>>, vector<8x64xf32>
    %c0_2 = arith.constant 0 : index
    %c0_3 = arith.constant 0 : index
    %4 = vector.load %arg1[%c0_2, %c0_3] : memref<8x768xbf16, #tpu.memory_space<vmem>>, vector<8x768xbf16>
    %c0_4 = arith.constant 0 : index
    %c0_5 = arith.constant 0 : index
    %5 = vector.load %arg3[%c0_4, %c0_5] : memref<768x64xbf16, #tpu.memory_space<vmem>>, vector<768x64xbf16>
    %cst = arith.constant dense<0.000000e+00> : vector<8x64xf32>
    %6 = tpu.matmul %4, %5, %cst {dimension_numbers = #tpu.dot_dimension_numbers<[1], [0], [0], [1], [0, 0, 1, 1], [], []>} : vector<8x768xbf16>, vector<768x64xbf16>, vector<8x64xf32> -> vector<8x64xf32>
    %7 = arith.addf %3, %6 : vector<8x64xf32>
    %c0_6 = arith.constant 0 : index
    %c0_7 = arith.constant 0 : index
    %8 = vector.load %arg11[%c0_6, %c0_7] : memref<8x64xf32, #tpu.memory_space<vmem>>, vector<8x64xf32>
    tpu.vector_store %arg11[%c0_6, %c0_7], %7 {strides = array<i32>} : memref<8x64xf32, #tpu.memory_space<vmem>>, vector<8x64xf32>,
    %c0_i32_8 = arith.constant 0 : i32
    %9 = arith.cmpi eq, %arg0, %c0_i32_8 : i32
    %10 = arith.extui %9 : i1 to i32
    %c0_i32_9 = arith.constant 0 : i32
    %11 = arith.cmpi ne, %10, %c0_i32_9 : i32
    scf.if %11 {
      %c0_10 = arith.constant 0 : index
      %c0_11 = arith.constant 0 : index
      %12 = vector.load %arg11[%c0_10, %c0_11] : memref<8x64xf32, #tpu.memory_space<vmem>>, vector<8x64xf32>
      %c0_12 = arith.constant 0 : index
      %c0_13 = arith.constant 0 : index
      %13 = vector.load %arg2[%c0_12, %c0_13] : memref<8x32xf32, #tpu.memory_space<vmem>>, vector<8x32xf32>
      %c0_14 = arith.constant 0 : index
      %c0_15 = arith.constant 0 : index
      %14 = vector.load %arg4[%c0_14, %c0_15] : memref<32x64xf32, #tpu.memory_space<vmem>>, vector<32x64xf32>
      %cst_16 = arith.constant dense<0.000000e+00> : vector<8x64xf32>
      %15 = tpu.matmul %13, %14, %cst_16 {dimension_numbers = #tpu.dot_dimension_numbers<[1], [0], [0], [1], [0, 0, 1, 1], [], []>} : vector<8x32xf32>, vector<32x64xf32>, vector<8x64xf32> -> vector<8x64xf32>
      %16 = arith.addf %12, %15 : vector<8x64xf32>
      %c0_17 = arith.constant 0 : index
      %c0_18 = arith.constant 0 : index
      %17 = vector.load %arg5[%c0_17, %c0_18] : memref<1x64xf32, #tpu.memory_space<vmem>>, vector<1x64xf32>
      %18 = vector.broadcast %17 : vector<1x64xf32> to vector<8x64xf32>
      %19 = arith.addf %16, %18 : vector<8x64xf32>
      %cst_19 = arith.constant 0.000000e+00 : f32
      %20 = vector.broadcast %cst_19 : f32 to vector<8x64xf32>
      %21 = arith.maximumf %19, %20 : vector<8x64xf32>
      %c0_20 = arith.constant 0 : index
      %c0_21 = arith.constant 0 : index
      %22 = vector.load %arg6[%c0_20, %c0_21] : memref<64x32xf32, #tpu.memory_space<vmem>>, vector<64x32xf32>
      %cst_22 = arith.constant dense<0.000000e+00> : vector<8x32xf32>
      %23 = tpu.matmul %21, %22, %cst_22 {dimension_numbers = #tpu.dot_dimension_numbers<[1], [0], [0], [1], [0, 0, 1, 1], [], []>} : vector<8x64xf32>, vector<64x32xf32>, vector<8x32xf32> -> vector<8x32xf32>
      %c0_23 = arith.constant 0 : index
      %c0_24 = arith.constant 0 : index
      %24 = vector.load %arg7[%c0_23, %c0_24] : memref<1x32xf32, #tpu.memory_space<vmem>>, vector<1x32xf32>
      %25 = vector.broadcast %24 : vector<1x32xf32> to vector<8x32xf32>
      %26 = arith.addf %23, %25 : vector<8x32xf32>
      %cst_25 = arith.constant 0.000000e+00 : f32
      %27 = vector.broadcast %cst_25 : f32 to vector<8x32xf32>
      %28 = arith.maximumf %26, %27 : vector<8x32xf32>
      %c0_26 = arith.constant 0 : index
      %c0_27 = arith.constant 0 : index
      %29 = vector.load %arg8[%c0_26, %c0_27] : memref<32x10xf32, #tpu.memory_space<vmem>>, vector<32x10xf32>
      %cst_28 = arith.constant dense<0.000000e+00> : vector<8x10xf32>
      %30 = tpu.matmul %28, %29, %cst_28 {dimension_numbers = #tpu.dot_dimension_numbers<[1], [0], [0], [1], [0, 0, 1, 1], [], []>} : vector<8x32xf32>, vector<32x10xf32>, vector<8x10xf32> -> vector<8x10xf32>
      %c0_29 = arith.constant 0 : index
      %c0_30 = arith.constant 0 : index
      %31 = vector.load %arg9[%c0_29, %c0_30] : memref<1x10xf32, #tpu.memory_space<vmem>>, vector<1x10xf32>
      %32 = vector.broadcast %31 : vector<1x10xf32> to vector<8x10xf32>
      %33 = arith.addf %30, %32 : vector<8x10xf32>
      %c0_31 = arith.constant 0 : index
      %c0_32 = arith.constant 0 : index
      %34 = vector.load %arg10[%c0_31, %c0_32] : memref<8x10xf32, #tpu.memory_space<vmem>>, vector<8x10xf32>
      tpu.vector_store %arg10[%c0_31, %c0_32], %33 {strides = array<i32>} : memref<8x10xf32, #tpu.memory_space<vmem>>, vector<8x10xf32>,
    } else {
    }
    return
  }
  func.func @transform_0(%arg0: i32) -> (i32, i32) {
    %c0_i32 = arith.constant 0 : i32
    %c0_i32_0 = arith.constant 0 : i32
    return %c0_i32, %arg0 : i32, i32
  }
  func.func @transform_1(%arg0: i32) -> (i32, i32) {
    %c0_i32 = arith.constant 0 : i32
    %c0_i32_0 = arith.constant 0 : i32
    %c0_i32_1 = arith.constant 0 : i32
    return %c0_i32, %c0_i32_0 : i32, i32
  }
  func.func @transform_2(%arg0: i32) -> (i32, i32) {
    %c0_i32 = arith.constant 0 : i32
    %c0_i32_0 = arith.constant 0 : i32
    return %arg0, %c0_i32 : i32, i32
  }
  func.func @transform_3(%arg0: i32) -> (i32, i32) {
    %c0_i32 = arith.constant 0 : i32
    %c0_i32_0 = arith.constant 0 : i32
    %c0_i32_1 = arith.constant 0 : i32
    return %c0_i32, %c0_i32_0 : i32, i32
  }
  func.func @transform_4(%arg0: i32) -> (i32, i32) {
    %c0_i32 = arith.constant 0 : i32
    %c0_i32_0 = arith.constant 0 : i32
    %c0_i32_1 = arith.constant 0 : i32
    return %c0_i32, %c0_i32_0 : i32, i32
  }
  func.func @transform_5(%arg0: i32) -> (i32, i32) {
    %c0_i32 = arith.constant 0 : i32
    %c0_i32_0 = arith.constant 0 : i32
    %c0_i32_1 = arith.constant 0 : i32
    return %c0_i32, %c0_i32_0 : i32, i32
  }
  func.func @transform_6(%arg0: i32) -> (i32, i32) {
    %c0_i32 = arith.constant 0 : i32
    %c0_i32_0 = arith.constant 0 : i32
    %c0_i32_1 = arith.constant 0 : i32
    return %c0_i32, %c0_i32_0 : i32, i32
  }
  func.func @transform_7(%arg0: i32) -> (i32, i32) {
    %c0_i32 = arith.constant 0 : i32
    %c0_i32_0 = arith.constant 0 : i32
    %c0_i32_1 = arith.constant 0 : i32
    return %c0_i32, %c0_i32_0 : i32, i32
  }
  func.func @transform_8(%arg0: i32) -> (i32, i32) {
    %c0_i32 = arith.constant 0 : i32
    %c0_i32_0 = arith.constant 0 : i32
    %c0_i32_1 = arith.constant 0 : i32
    return %c0_i32, %c0_i32_0 : i32, i32
  }
  func.func @transform_9(%arg0: i32) -> (i32, i32) {
    %c0_i32 = arith.constant 0 : i32
    %c0_i32_0 = arith.constant 0 : i32
    %c0_i32_1 = arith.constant 0 : i32
    return %c0_i32, %c0_i32_0 : i32, i32
  }
}

</mosaic_0001>

<bundles_post_ra>
// kernel: patnet_forward.4
= control target key start
LH: loop header
LB: loop body
LE: loop exit
PB: predicated region body
PF: predicated region fallthrough
CT: control target
= control target key end

     0   :  { %8 = vsyncpa [#allocation3], 0  ;;  %s9646_s0 = inlined_call_operand.vmem [shape: f32[8,1,2048], index: 0, kind: input, shape index: {}]   ;;  %s9647_s1 = inlined_call_operand.hbm [shape: s32[1,1,2048], index: 1, kind: input, shape index: {}]   ;;  %s9648_s2 = inlined_call_operand.hbm [shape: f32[1,1,2048], index: 2, kind: input, shape index: {}]   ;;  %s9649_s3 = inlined_call_operand.vmem [shape: f32[8,32], index: 3, kind: output, shape index: {}]  }
   0x1   :  { %s17_s14 = sshll.u32 %s9647_s1, 4  ;;  %s18_s14 = int_to_ptr.hbm [resolvable:$true] %s17_s14 }
   0x2   :  { %9 = vsyncpa [#allocation5], 0  ;;  %s3378_s15 = smov [#allocation2]   ;;  %s28_s19 = sshll.u32 %s9648_s2, 4  ;;  %s29_s19 = int_to_ptr.hbm [resolvable:$true] %s28_s19 }
   0x3   :  { %s19_s16 = sshll.u32 %s3378_s15, 4  ;;  %s3379_s20 = smov [#allocation4]   ;;  %s20_s16 = int_to_ptr.vmem [resolvable:$true] %s19_s16 }
   0x4   :  { %22 = dma.hbm_to_vmem [thread:$0]  %s18_s14, 256, %s20_s16, [#allocation3]  }
   0x5   :  { %s30_s21 = sshll.u32 %s3379_s20, 4  ;;  %s31_s21 = int_to_ptr.vmem [resolvable:$true] %s30_s21 }
   0x6   :  { %33 = dma.hbm_to_vmem [thread:$0]  %s29_s19, 256, %s31_s21, [#allocation5]  }
   0x7   :  { %3374 = dma.done.wait [#allocation3], 256  }
   0x8   :  { %3375 = vsyncadd [#allocation3], 4294967040 }
   0x9   :  { %3376 = dma.done.wait [#allocation5], 256  }
   0xa   :  { %3377 = vsyncadd [#allocation5], 4294967040  ;;  %v9650_v0 = vlaneseq  ;;  %v58_v1 = vld [vmem:[#allocation2] sm:$0xff]  ;;  %v44_v3 = vld [vmem:[%s9646_s0 + $0x10] sm:$0xff]  ;;  %v10859_v17 = vmov 0  ;;  %v10862_v18 = vmov 0 }
   0xb   :  { %v3412_v4 = vperm.slane %v58_v1, 0  ;;  %v3414_v5 = vperm.slane %v58_v1, 1  ;;  %v3416_v6 = vperm.slane %v58_v1, 2  ;;  %v59_v7 = vld [vmem:[#allocation2 + $0x8] sm:$0xff]  ;;  %v3418_v8 = vperm.slane %v58_v1, 3  ;;  %v45_v39 = vld [vmem:[%s9646_s0 + $0x18] sm:$0xff] }
   0xc   :  { %v3407_v2 = vshrl.u32 %v9650_v0, 7  ;;  %v3420_v9 = vperm.slane %v58_v1, 4  ;;  %v3422_v10 = vperm.slane %v58_v1, 5  ;;  %v3427_v12 = vperm.slane %v58_v1, 6  ;;  %v42_v56 = vld [vmem:[%s9646_s0] sm:$0xff] }
   0xd   :  { %v3429_v13 = vperm.slane %v44_v3, 0  ;;  %v3431_v14 = vperm.slane %v44_v3, 1  ;;  %v3433_v15 = vperm.slane %v44_v3, 2  ;;  %v3435_v16 = vperm.slane %v58_v1, 7 }
   0xe   :  { %v3425_v11 = vadd.s32 16, %v3407_v2  ;;  %vm3439_vm0 = vcmp.eq.s32.totalorder %v3412_v4, %v3407_v2  ;;  %vm3445_vm1 = vcmp.eq.s32.totalorder %v3414_v5, %v3407_v2  ;;  %vm3451_vm2 = vcmp.eq.s32.totalorder %v3416_v6, %v3407_v2 }
   0xf   :  { %10855 = vst [vmem:[#allocation8_spill] sm:$0xff] %v3429_v13  ;;  %v10860_v17 = vsel %vm3439_vm0, 4294967295, %v10859_v17  ;;  %v10863_v18 = vsel %vm3445_vm1, 4294967295, %v10862_v18  ;;  %v10865_v19 = vmov 0  ;;  %v3455_v20 = vperm.slane %v59_v7, 0 }
  0x10   :  { %10856 = vst [vmem:[#allocation9_spill] sm:$0xff] %v3431_v14  ;;  %v10866_v19 = vsel %vm3451_vm2, 4294967295, %v10865_v19  ;;  %v3457_v21 = vperm.slane %v59_v7, 1  ;;  %v3459_v22 = vperm.slane %v59_v7, 2  ;;  %v3461_v23 = vperm.slane %v44_v3, 3 }
  0x11   :  { %10857 = vst [vmem:[#allocation10_spill] sm:$0xff] %v3433_v15  ;;  %v3463_v24 = vperm.slane %v59_v7, 3  ;;  %v3465_v25 = vperm.slane %v59_v7, 4  ;;  %vm3469_vm3 = vcmp.eq.s32.totalorder %v3418_v8, %v3407_v2  ;;  %v10873_v26 = vmov 0 }
  0x12   :  { %10858 = vst [vmem:[#allocation11_spill] sm:$0xff] %v3435_v16  ;;  %v10874_v26 = vsel %vm3469_vm3, 4294967295, %v10873_v26  ;;  %v3473_v27 = vperm.slane %v44_v3, 4  ;;  %v3478_v28 = vsel %vm3439_vm0, %v3429_v13, 1e+30  ;;  %v3490_v31 = vperm.slane %v59_v7, 5 }
  0x13   :  { %10861 = vst [vmem:[#allocation12_spill] sm:$0xff] %v10860_v17  ;;  %v3483_v29 = vsel %vm3445_vm1, %v3431_v14, 1e+30  ;;  %v3488_v30 = vsel %vm3451_vm2, %v3433_v15, 1e+30  ;;  %v3492_v32 = vperm.slane %v59_v7, 6  ;;  %vm3496_vm4 = vcmp.eq.s32.totalorder %v3420_v9, %v3407_v2 }
  0x14   :  { %10864 = vst [vmem:[#allocation13_spill] sm:$0xff] %v10863_v18  ;;  %v10882_v33 = vmov 0  ;;  %v1127_v34 = vmin.f32 %v3478_v28, %v3483_v29  ;;  %v3502_v35 = vperm.slane %v59_v7, 7  ;;  %vm3506_vm5 = vcmp.eq.s32.totalorder %v3422_v10, %v3407_v2 }
  0x15   :  { %10867 = vst [vmem:[#allocation14_spill] sm:$0xff] %v10866_v19  ;;  %v10883_v33 = vsel %vm3496_vm4, 4294967295, %v10882_v33  ;;  %v10885_v36 = vmov 0  ;;  %v3510_v37 = vperm.slane %v44_v3, 5  ;;  %v3515_v38 = vsel %vm3469_vm3, %v3461_v23, 1e+30 }
  0x16   :  { %10868 = vst [vmem:[#allocation15_spill] sm:$0xff] %v3457_v21  ;;  %v10886_v36 = vsel %vm3506_vm5, 4294967295, %v10885_v36  ;;  %vm3522_vm6 = vcmp.eq.s32.totalorder %v3427_v12, %v3407_v2  ;;  %v10890_v40 = vmov 0  ;;  %vm3528_vm7 = vcmp.eq.s32.totalorder %v3435_v16, %v3407_v2 }
  0x17   :  { %10869 = vst [vmem:[#allocation16_spill] sm:$0xff] %v3459_v22  ;;  %v10891_v40 = vsel %vm3522_vm6, 4294967295, %v10890_v40  ;;  %v10893_v41 = vmov 0  ;;  %vm3534_vm8 = vcmp.eq.s32.totalorder %v3455_v20, %v3407_v2  ;;  %v10896_v42 = vmov 0 }
  0x18   :  { %10870 = vst [vmem:[#allocation17_spill] sm:$0xff] %v3461_v23  ;;  %v10894_v41 = vsel %vm3528_vm7, 4294967295, %v10893_v41  ;;  %v10897_v42 = vsel %vm3534_vm8, 4294967295, %v10896_v42  ;;  %v1128_v43 = vmin.f32 %v1127_v34, %v3488_v30  ;;  %vm3541_vm9 = vcmp.eq.s32.totalorder %v3457_v21, %v3407_v2 }
  0x19   :  { %10871 = vst [vmem:[#allocation18_spill] sm:$0xff] %v3463_v24  ;;  %v10899_v44 = vmov 0  ;;  %vm3547_vm10 = vcmp.eq.s32.totalorder %v3459_v22, %v3407_v2  ;;  %v10902_v45 = vmov 0  ;;  %v3551_v46 = vperm.slane %v44_v3, 6 }
  0x1a   :  { %10872 = vst [vmem:[#allocation19_spill] sm:$0xff] %v3465_v25  ;;  %v10900_v44 = vsel %vm3541_vm9, 4294967295, %v10899_v44  ;;  %v10903_v45 = vsel %vm3547_vm10, 4294967295, %v10902_v45  ;;  %v3556_v47 = vsel %vm3496_vm4, %v3473_v27, 1e+30  ;;  %vm3560_vm11 = vcmp.eq.s32.totalorder %v3463_v24, %v3407_v2 }
  0x1b   :  { %10875 = vst [vmem:[#allocation20_spill] sm:$0xff] %v10874_v26  ;;  %v10907_v48 = vmov 0  ;;  %vm3566_vm12 = vcmp.eq.s32.totalorder %v3465_v25, %v3407_v2  ;;  %v10910_v49 = vmov 0  ;;  %vm3572_vm13 = vcmp.eq.s32.totalorder %v3490_v31, %v3407_v2 }
  0x1c   :  { %10876 = vst [vmem:[#allocation21_spill] sm:$0xff] %v3473_v27  ;;  %v10908_v48 = vsel %vm3560_vm11, 4294967295, %v10907_v48  ;;  %v10911_v49 = vsel %vm3566_vm12, 4294967295, %v10910_v49  ;;  %v10913_v50 = vmov 0  ;;  %v1129_v51 = vmin.f32 %v1128_v43, %v3515_v38 }
  0x1d   :  { %10877 = vst [vmem:[#allocation22_spill] sm:$0xff] %v3478_v28  ;;  %v10914_v50 = vsel %vm3572_vm13, 4294967295, %v10913_v50  ;;  %vm3579_vm14 = vcmp.eq.s32.totalorder %v3492_v32, %v3407_v2  ;;  %v10916_v52 = vmov 0  ;;  %v3583_v53 = vperm.slane %v44_v3, 7 }
  0x1e   :  { %10878 = vst [vmem:[#allocation23_spill] sm:$0xff] %v3483_v29  ;;  %v10917_v52 = vsel %vm3579_vm14, 4294967295, %v10916_v52  ;;  %v3585_v54 = vperm.slane %v45_v39, 0  ;;  %v3590_v55 = vsel %vm3506_vm5, %v3510_v37, 1e+30  ;;  %vm3597_vm15 = vcmp.eq.s32.totalorder %v3502_v35, %v3407_v2 }
  0x1f   :  { %10879 = vst [vmem:[#allocation24_spill] sm:$0xff] %v3488_v30  ;;  %v10922_v57 = vmov 0  ;;  %v3601_v58 = vperm.slane %v45_v39, 1  ;;  %v3603_v59 = vperm.slane %v45_v39, 2  ;;  %v1130_v60 = vmin.f32 %v1129_v51, %v3556_v47 }
  0x20   :  { %10880 = vst [vmem:[#allocation25_spill] sm:$0xff] %v3490_v31  ;;  %v10923_v57 = vsel %vm3597_vm15, 4294967295, %v10922_v57  ;;  %v3606_v61 = vperm.slane %v45_v39, 3  ;;  %v3608_v62 = vperm.slane %v45_v39, 4  ;;  %v3610_v63 = vperm.slane %v45_v39, 5 }
  0x21   :  { %10881 = vst [vmem:[#allocation26_spill] sm:$0xff] %v3492_v32  ;;  %v3615_v1 = vsel %vm3522_vm6, %v3551_v46, 1e+30  ;;  %v3617_v3 = vperm.slane %v45_v39, 6  ;;  %v3619_v7 = vperm.slane %v45_v39, 7  ;;  %v1131_v34 = vmin.f32 %v1130_v60, %v3590_v55 }
  0x22   :  { %10884 = vst [vmem:[#allocation27_spill] sm:$0xff] %v10883_v33  ;;  %v3622_v43 = vperm.slane %v42_v56, 0  ;;  %v3627_v51 = vsel %vm3528_vm7, %v3583_v53, 1e+30  ;;  %v3632_v0 = vsel %vm3534_vm8, %v3585_v54, 1e+30  ;;  %vm3636_vm6 = vcmp.eq.s32.totalorder %v3412_v4, %v3425_v11 }
  0x23   :  { %10887 = vst [vmem:[#allocation28_spill] sm:$0xff] %v10886_v36  ;;  %v3640_v39 = vperm.slane %v42_v56, 1  ;;  %v3645_v60 = vsel %vm3541_vm9, %v3601_v58, 1e+30  ;;  %vm3650_vm7 = vcmp.eq.s32.totalorder %v3414_v5, %v3425_v11  ;;  %v3654_v30 = vperm.slane %v42_v56, 2 }
  0x24   :  { %10888 = vst [vmem:[#allocation29_spill] sm:$0xff] %v3510_v37  ;;  %v3659_v29 = vsel %vm3547_vm10, %v3603_v59, 1e+30  ;;  %v3664_v28 = vsel %vm3560_vm11, %v3606_v61, 1e+30  ;;  %vm3673_vm9 = vcmp.eq.s32.totalorder %v3416_v6, %v3425_v11  ;;  %v10976_v37 = vmov 0 }
  0x25   :  { %10889 = vst [vmem:[#allocation30_spill] sm:$0xff] %v3515_v38  ;;  %v10941_v38 = vmov 0  ;;  %vm3767_vm11 = vcmp.eq.s32.totalorder %v3459_v22, %v3425_v11  ;;  %vm3773_vm10 = vcmp.eq.s32.totalorder %v3463_v24, %v3425_v11  ;;  %v10985_v22 = vmov 0 }
  0x26   :  { %10892 = vst [vmem:[#allocation31_spill] sm:$0xff] %v10891_v40  ;;  %v10942_v38 = vsel %vm3650_vm7, 4294967295, %v10941_v38  ;;  %vm3797_vm8 = vcmp.eq.s32.totalorder %v3490_v31, %v3425_v11  ;;  %vm3803_vm5 = vcmp.eq.s32.totalorder %v3492_v32, %v3425_v11  ;;  %v3819_v31 = vsel %vm3439_vm0, %v3622_v43, 1e+30 }
  0x27   :  { %10895 = vst [vmem:[#allocation32_spill] sm:$0xff] %v10894_v41  ;;  %v3824_v32 = vsel %vm3445_vm1, %v3640_v39, 1e+30 }
  0x28   :  { %10898 = vst [vmem:[#allocation33_spill] sm:$0xff] %v10897_v42 }
  0x29   :  { %10901 = vst [vmem:[#allocation34_spill] sm:$0xff] %v10900_v44 }
  0x2a   :  { %10904 = vst [vmem:[#allocation35_spill] sm:$0xff] %v10903_v45 }
  0x2b   :  { %10905 = vst [vmem:[#allocation36_spill] sm:$0xff] %v3551_v46  ;;  %v10972_v46 = vmov 0 }
  0x2c   :  { %10906 = vst [vmem:[#allocation37_spill] sm:$0xff] %v3556_v47  ;;  %v10936_v47 = vmov 0 }
  0x2d   :  { %10909 = vst [vmem:[#allocation38_spill] sm:$0xff] %v10908_v48  ;;  %v10937_v47 = vsel %vm3636_vm6, 4294967295, %v10936_v47 }
  0x2e   :  { %10912 = vst [vmem:[#allocation39_spill] sm:$0xff] %v10911_v49 }
  0x2f   :  { %10915 = vst [vmem:[#allocation40_spill] sm:$0xff] %v10914_v50 }
  0x30   :  { %10918 = vst [vmem:[#allocation41_spill] sm:$0xff] %v10917_v52  ;;  %v3752_v52 = vperm.slane %v42_v56, 5 }
  0x31   :  { %10919 = vst [vmem:[#allocation42_spill] sm:$0xff] %v3583_v53  ;;  %v3698_v53 = vsel %vm3597_vm15, %v3619_v7, 1e+30  ;;  %vm3727_vm15 = vcmp.eq.s32.totalorder %v3422_v10, %v3425_v11 }
  0x32   :  { %10920 = vst [vmem:[#allocation43_spill] sm:$0xff] %v3585_v54  ;;  %v3693_v54 = vsel %vm3579_vm14, %v3617_v3, 1e+30  ;;  %vm3739_vm14 = vcmp.eq.s32.totalorder %v3435_v16, %v3425_v11 }
  0x33   :  { %10921 = vst [vmem:[#allocation44_spill] sm:$0xff] %v3590_v55  ;;  %v1132_v55 = vmin.f32 %v1131_v34, %v3615_v1  ;;  %v3669_v34 = vsel %vm3566_vm12, %v3608_v62, 1e+30  ;;  %vm3761_vm12 = vcmp.eq.s32.totalorder %v3457_v21, %v3425_v11  ;;  %v3788_v21 = vperm.slane %v42_v56, 6 }
  0x34   :  { %10924 = vst [vmem:[#allocation45_spill] sm:$0xff] %v10923_v57  ;;  %v10977_v37 = vsel %vm3761_vm12, 4294967295, %v10976_v37 }
  0x35   :  { %10925 = vst [vmem:[#allocation46_spill] sm:$0xff] %v3601_v58  ;;  %v1133_v58 = vmin.f32 %v1132_v55, %v3627_v51  ;;  %v10955_v55 = vmov 0 }
  0x36   :  { %10926 = vst [vmem:[#allocation47_spill] sm:$0xff] %v3603_v59  ;;  %v3680_v59 = vsel %vm3572_vm13, %v3610_v63, 1e+30  ;;  %vm3702_vm13 = vcmp.eq.s32.totalorder %v3418_v8, %v3425_v11 }
  0x37   :  { %10927 = vst [vmem:[#allocation48_spill] sm:$0xff] %v3606_v61  ;;  %v3683_v61 = vperm.slane %v42_v56, 3  ;;  %v10956_v55 = vsel %vm3702_vm13, 4294967295, %v10955_v55 }
  0x38   :  { %10928 = vst [vmem:[#allocation49_spill] sm:$0xff] %v3608_v62  ;;  %v3688_v62 = vsel %vm3636_vm6, %v3622_v43, 1e+30  ;;  %vm3714_vm6 = vcmp.eq.s32.totalorder %v3420_v9, %v3425_v11 }
  0x39   :  { %10929 = vst [vmem:[#allocation50_spill] sm:$0xff] %v3610_v63  ;;  %v3723_v63 = vsel %vm3673_vm9, %v3654_v30, 1e+30  ;;  %v3757_v16 = vsel %vm3702_vm13, %v3683_v61, 1e+30  ;;  %vm3784_vm13 = vcmp.eq.s32.totalorder %v3465_v25, %v3425_v11 }
  0x3a   :  { %10930 = vst [vmem:[#allocation51_spill] sm:$0xff] %v3615_v1  ;;  %v10948_v1 = vmov 0  ;;  %v10986_v22 = vsel %vm3784_vm13, 4294967295, %v10985_v22  ;;  %v3814_v25 = vsel %vm3727_vm15, %v3752_v52, 1e+30 }
  0x3b   :  { %10931 = vst [vmem:[#allocation52_spill] sm:$0xff] %v3617_v3  ;;  %v10949_v1 = vsel %vm3673_vm9, 4294967295, %v10948_v1  ;;  %v10959_v3 = vmov 0  ;;  %vm3748_vm9 = vcmp.eq.s32.totalorder %v3455_v20, %v3425_v11  ;;  %v3868_v19 = vsel %vm3469_vm3, %v3683_v61, 1e+30 }
  0x3c   :  { %10932 = vst [vmem:[#allocation53_spill] sm:$0xff] %v3619_v7  ;;  %v10960_v3 = vsel %vm3714_vm6, 4294967295, %v10959_v3  ;;  %v3718_v7 = vperm.slane %v42_v56, 4  ;;  %v10973_v46 = vsel %vm3748_vm9, 4294967295, %v10972_v46 }
  0x3d   :  { %10933 = vst [vmem:[#allocation54_spill] sm:$0xff] %v3622_v43 }
  0x3e   :  { %10934 = vst [vmem:[#allocation55_spill] sm:$0xff] %v3627_v51  ;;  %v3709_v51 = vsel %vm3650_vm7, %v3640_v39, 1e+30  ;;  %vm3733_vm7 = vcmp.eq.s32.totalorder %v3427_v12, %v3425_v11  ;;  %v3793_v24 = vsel %vm3714_vm6, %v3718_v7, 1e+30  ;;  %vm11041_vm6 = vnez %v10900_v44  ;;  %v11116_v33 = vld [vmem:[#allocation48_spill] sm:$0xff] }
  0x3f   :  { %10935 = vst [vmem:[#allocation56_spill] sm:$0xff] %v3632_v0  ;;  %v3845_v18 = vsel %vm3733_vm7, %v3788_v21, 1e+30 }
  0x40   :  { %10938 = vst [vmem:[#allocation57_spill] sm:$0xff] %v10937_v47  ;;  %v1134_v47 = vmin.f32 %v1133_v58, %v3632_v0  ;;  %v10966_v58 = vmov 0  ;;  %v10969_v0 = vmov 0 }
  0x41   :  { %10939 = vst [vmem:[#allocation58_spill] sm:$0xff] %v3640_v39  ;;  %v10967_v58 = vsel %vm3733_vm7, 4294967295, %v10966_v58  ;;  %v10970_v0 = vsel %vm3739_vm14, 4294967295, %v10969_v0  ;;  %v3850_v39 = vsel %vm3451_vm2, %v3654_v30, 1e+30  ;;  %vm11039_vm7 = vnez %v10897_v42 }
  0x42   :  { %10940 = vst [vmem:[#allocation59_spill] sm:$0xff] %v3645_v60  ;;  %v1135_v57 = vmin.f32 %v1134_v47, %v3645_v60  ;;  %v10979_v47 = vmov 0  ;;  %v10982_v60 = vmov 0  ;;  %v11084_v42 = vmov 0 }
  0x43   :  { %10943 = vst [vmem:[#allocation60_spill] sm:$0xff] %v10942_v38  ;;  %v10963_v38 = vmov 0  ;;  %v10980_v47 = vsel %vm3767_vm11, 4294967295, %v10979_v47  ;;  %v10983_v60 = vsel %vm3773_vm10, 4294967295, %v10982_v60 }
  0x44   :  { %10944 = vst [vmem:[#allocation61_spill] sm:$0xff] %v3654_v30  ;;  %v10964_v38 = vsel %vm3727_vm15, 4294967295, %v10963_v38  ;;  %vm3836_vm15 = vcmp.eq.s32.totalorder %v3502_v35, %v3425_v11  ;;  %v3871_v30 = vadd.s32 8, %v3407_v2 }
  0x45   :  { %10945 = vst [vmem:[#allocation62_spill] sm:$0xff] %v3659_v29 }
  0x46   :  { %10946 = vst [vmem:[#allocation63_spill] sm:$0xff] %v3664_v28  ;;  %vm4158_vm0 = vcmp.eq.s32.totalorder %v3502_v35, %v3871_v30 }
  0x47   :  { %10947 = vst [vmem:[#allocation64_spill] sm:$0xff] %v3669_v34 }
  0x48   :  { %10950 = vst [vmem:[#allocation65_spill] sm:$0xff] %v10949_v1  ;;  %v1093_v1 = vmin.f32 %v3688_v62, %v3709_v51 }
  0x49   :  { %10951 = vst [vmem:[#allocation66_spill] sm:$0xff] %v3680_v59 }
  0x4a   :  { %10952 = vst [vmem:[#allocation67_spill] sm:$0xff] %v3688_v62  ;;  %v1136_v62 = vmin.f32 %v1135_v57, %v3659_v29  ;;  %v10989_v57 = vmov 0  ;;  %v3807_v29 = vperm.slane %v42_v56, 7 }
  0x4b   :  { %10953 = vst [vmem:[#allocation68_spill] sm:$0xff] %v3693_v54  ;;  %v10990_v57 = vsel %vm3797_vm8, 4294967295, %v10989_v57 }
  0x4c   :  { %10954 = vst [vmem:[#allocation69_spill] sm:$0xff] %v3698_v53 }
  0x4d   :  { %10957 = vst [vmem:[#allocation70_spill] sm:$0xff] %v10956_v55  ;;  %v43_v55 = vld [vmem:[%s9646_s0 + $0x8] sm:$0xff] }
  0x4e   :  { %10958 = vst [vmem:[#allocation71_spill] sm:$0xff] %v3709_v51  ;;  %v1094_v51 = vmin.f32 %v1093_v1, %v3723_v63  ;;  %v10992_v1 = vmov 0  ;;  %v3826_v56 = vperm.slane %v43_v55, 0  ;;  %v3840_v17 = vperm.slane %v43_v55, 3 }
  0x4f   :  { %10961 = vst [vmem:[#allocation72_spill] sm:$0xff] %v10960_v3  ;;  %v10993_v1 = vsel %vm3803_vm5, 4294967295, %v10992_v1  ;;  %v1137_v3 = vmin.f32 %v1136_v62, %v3664_v28  ;;  %v3830_v62 = vperm.slane %v43_v55, 2  ;;  %v3873_v43 = vperm.slane %v43_v55, 6 }
  0x50   :  { %10962 = vst [vmem:[#allocation73_spill] sm:$0xff] %v3723_v63  ;;  %v1095_v63 = vmin.f32 %v1094_v51, %v3757_v16  ;;  %v3828_v51 = vperm.slane %v43_v55, 1 }
  0x51   :  { %10965 = vst [vmem:[#allocation74_spill] sm:$0xff] %v10964_v38  ;;  %v10998_v38 = vmov 0 }
  0x52   :  { %10968 = vst [vmem:[#allocation75_spill] sm:$0xff] %v10967_v58  ;;  %v1096_v28 = vmin.f32 %v1095_v63, %v3793_v24  ;;  %v10999_v38 = vsel %vm3836_vm15, 4294967295, %v10998_v38  ;;  %v3852_v63 = vperm.slane %v43_v55, 4  ;;  %v3863_v58 = vsel %vm3739_vm14, %v3807_v29, 1e+30 }
  0x53   :  { %10971 = vst [vmem:[#allocation76_spill] sm:$0xff] %v10970_v0  ;;  %vm3955_vm14 = vcmp.eq.s32.totalorder %v3418_v8, %v3871_v30  ;;  %v4004_v0 = vsel %vm11039_vm7, %v3826_v56, 1e+30  ;;  %vm11051_vm7 = vnez %v10911_v49  ;;  %v11058_v49 = vld [vmem:[#allocation29_spill] sm:$0xff] }
  0x54   :  { %10974 = vst [vmem:[#allocation77_spill] sm:$0xff] %v10973_v46  ;;  %v1097_v11 = vmin.f32 %v1096_v28, %v3814_v25  ;;  %v3875_v28 = vperm.slane %v43_v55, 7  ;;  %v3999_v46 = vsel %vm3955_vm14, %v3461_v23, 1e+30  ;;  %v11083_v23 = vld [vmem:[#allocation18_spill] sm:$0xff] }
  0x55   :  { %10975 = vst [vmem:[#allocation78_spill] sm:$0xff] %v3757_v16  ;;  %v1138_v16 = vmin.f32 %v1137_v3, %v3669_v34  ;;  %v3854_v3 = vperm.slane %v43_v55, 5  ;;  %v1059_v34 = vmin.f32 %v3819_v31, %v3824_v32  ;;  %v3893_v55 = vsel %vm3496_vm4, %v3718_v7, 1e+30 }
  0x56   :  { %10978 = vst [vmem:[#allocation79_spill] sm:$0xff] %v10977_v37 }
  0x57   :  { %10981 = vst [vmem:[#allocation80_spill] sm:$0xff] %v10980_v47  ;;  %v11012_v47 = vmov 0 }
  0x58   :  { %10984 = vst [vmem:[#allocation81_spill] sm:$0xff] %v10983_v60  ;;  %v11015_v60 = vmov 0 }
  0x59   :  { %10987 = vst [vmem:[#allocation82_spill] sm:$0xff] %v10986_v22 }
  0x5a   :  { %10988 = vst [vmem:[#allocation83_spill] sm:$0xff] %v3793_v24  ;;  %v1139_v24 = vmin.f32 %v1138_v16, %v3680_v59  ;;  %v1060_v16 = vmin.f32 %v1059_v34, %v3850_v39  ;;  %v3898_v34 = vsel %vm3767_vm11, %v3830_v62, 1e+30  ;;  %vm3915_vm11 = vcmp.eq.s32.totalorder %v3412_v4, %v3871_v30 }
  0x5b   :  { %10991 = vst [vmem:[#allocation84_spill] sm:$0xff] %v10990_v57  ;;  %v11013_v47 = vsel %vm3915_vm11, 4294967295, %v11012_v47 }
  0x5c   :  { %10994 = vst [vmem:[#allocation85_spill] sm:$0xff] %v10993_v1  ;;  %v1140_v59 = vmin.f32 %v1139_v24, %v3693_v54  ;;  %v3903_v24 = vsel %vm3773_vm10, %v3840_v17, 1e+30  ;;  %v1061_v54 = vmin.f32 %v1060_v16, %v3868_v19  ;;  %vm3921_vm10 = vcmp.eq.s32.totalorder %v3414_v5, %v3871_v30 }
  0x5d   :  { %10995 = vst [vmem:[#allocation86_spill] sm:$0xff] %v3814_v25  ;;  %v3888_v25 = vsel %vm3761_vm12, %v3828_v51, 1e+30  ;;  %vm11010_vm12 = vnez %v10886_v36  ;;  %v11016_v60 = vsel %vm3921_vm10, 4294967295, %v11015_v60  ;;  %v3969_v1 = vsel %vm3921_vm10, %v3431_v14, 1e+30 }
  0x5e   :  { %10996 = vst [vmem:[#allocation87_spill] sm:$0xff] %v3819_v31  ;;  %v3883_v31 = vsel %vm3748_vm9, %v3826_v56, 1e+30  ;;  %v1062_v16 = vmin.f32 %v1061_v54, %v3893_v55  ;;  %vm3934_vm9 = vcmp.eq.s32.totalorder %v3416_v6, %v3871_v30  ;;  %v11089_v14 = vld [vmem:[#allocation19_spill] sm:$0xff]  ;;  %v11102_v36 = vmov 0 }
  0x5f   :  { %10997 = vst [vmem:[#allocation88_spill] sm:$0xff] %v3824_v32  ;;  %v1098_v32 = vmin.f32 %v1097_v11, %v3845_v18  ;;  %vm4120_vm3 = vcmp.eq.s32.totalorder %v11089_v14, %v3871_v30 }
  0x60   :  { %11000 = vst [vmem:[#allocation89_spill] sm:$0xff] %v10999_v38 }
  0x61   :  { %11001 = vst [vmem:[#allocation90_spill] sm:$0xff] %v3845_v18  ;;  %v1099_v11 = vmin.f32 %v1098_v32, %v3863_v58  ;;  %v3911_v18 = vsel %vm11010_vm12, %v3752_v52, 1e+30  ;;  %v3928_v32 = vsel %vm3784_vm13, %v3852_v63, 1e+30  ;;  %vm11024_vm13 = vnez %v10891_v40 }
  0x62   :  { %11002 = vst [vmem:[#allocation91_spill] sm:$0xff] %v3850_v39  ;;  %v1141_v39 = vmin.f32 %v1140_v59, %v3698_v53  ;;  %v11019_v53 = vmov 0  ;;  %v3951_v54 = vsel %vm11024_vm13, %v3788_v21, 1e+30  ;;  %vm11056_vm13 = vnez %v10914_v50  ;;  %v11070_v50 = vld [vmem:[#allocation36_spill] sm:$0xff] }
  0x63   :  { %11003 = vst [vmem:[#allocation92_spill] sm:$0xff] %v3863_v58  ;;  %v1100_v59 = vmin.f32 %v1099_v11, %v3883_v31  ;;  %v11020_v53 = vsel %vm3934_vm9, 4294967295, %v11019_v53  ;;  %v3946_v58 = vsel %vm3803_vm5, %v3873_v43, 1e+30  ;;  %v11026_v11 = vmov 0 }
  0x64   :  { %11004 = vst [vmem:[#allocation93_spill] sm:$0xff] %v3868_v19  ;;  %1142 = vmin.xlane.f32.xlu2 %v1141_v39  ;;  %v3941_v19 = vsel %vm3797_vm8, %v3854_v3, 1e+30  ;;  %v11027_v11 = vsel %vm3955_vm14, 4294967295, %v11026_v11  ;;  %vm11031_vm5 = vnez %v10894_v41  ;;  %vm3978_vm8 = vcmp.eq.s32.totalorder %v3420_v9, %v3871_v30 }
  0x65   :  { %11005 = vst [vmem:[#allocation94_spill] sm:$0xff] %v3883_v31  ;;  %v1101_v39 = vmin.f32 %v1100_v59, %v3888_v25  ;;  %v3964_v31 = vsel %vm3915_vm11, %v3429_v13, 1e+30  ;;  %v3974_v57 = vsel %vm11031_vm5, %v3807_v29, 1e+30  ;;  %v11033_v59 = vmov 0 }
  0x66   :  { %11006 = vst [vmem:[#allocation95_spill] sm:$0xff] %v3888_v25  ;;  %v11034_v59 = vsel %vm3978_vm8, 4294967295, %v11033_v59  ;;  %v3992_v25 = vsel %vm3836_vm15, %v3875_v28, 1e+30  ;;  %vm4013_vm15 = vcmp.eq.s32.totalorder %v3422_v10, %v3871_v30  ;;  %vm11046_vm5 = vnez %v10903_v45  ;;  %v11060_v45 = vld [vmem:[#allocation41_spill] sm:$0xff] }
  0x67   :  { %11007 = vst [vmem:[#allocation96_spill] sm:$0xff] %v3893_v55  ;;  %v1063_v55 = vmin.f32 %v1062_v16, %v3911_v18  ;;  %v3985_v16 = vsel %vm3934_vm9, %v3433_v15, 1e+30  ;;  %v1102_v22 = vmin.f32 %v1101_v39, %v3898_v34  ;;  %v11043_v39 = vmov 0  ;;  %v11087_v15 = vld [vmem:[#allocation42_spill] sm:$0xff] }
  0x68   :  { %11008 = vst [vmem:[#allocation97_spill] sm:$0xff] %v3898_v34  ;;  %v11044_v39 = vsel %vm4013_vm15, 4294967295, %v11043_v39  ;;  %v4028_v38 = vsel %vm3978_vm8, %v3473_v27, 1e+30  ;;  %v11090_v13 = vmov 0  ;;  %v11099_v40 = vmov 0 }
  0x69   :  { %11009 = vst [vmem:[#allocation98_spill] sm:$0xff] %v3903_v24  ;;  %v1064_v37 = vmin.f32 %v1063_v55, %v3951_v54  ;;  %v11091_v13 = vsel %vm4120_vm3, 4294967295, %v11090_v13 }
  0x6a   :  { %11011 = vst [vmem:[#allocation99_spill] sm:$0xff] %v3911_v18  ;;  %v1144_v18 = vmin.f32 %v3964_v31, %v3969_v1 }
  0x6b   :  { %11014 = vst [vmem:[#allocation100_spill] sm:$0xff] %v11013_v47  ;;  %v1065_v34 = vmin.f32 %v1064_v37, %v3974_v57 }
  0x6c   :  { %11017 = vst [vmem:[#allocation101_spill] sm:$0xff] %v11016_v60  ;;  %v1145_v55 = vmin.f32 %v1144_v18, %v3985_v16  ;;  %v4038_v18 = vsel %vm11051_vm7, %v3852_v63, 1e+30  ;;  %vm11061_vm7 = vnez %v11060_v45  ;;  %v11067_v45 = vmov 0 }
  0x6d   :  { %11018 = vst [vmem:[#allocation102_spill] sm:$0xff] %v3928_v32  ;;  %v4062_v27 = vsel %vm11061_vm7, %v3873_v43, 1e+30 }
  0x6e   :  { %11021 = vst [vmem:[#allocation103_spill] sm:$0xff] %v11020_v53  ;;  %v1146_v37 = vmin.f32 %v1145_v55, %v3999_v46  ;;  %v11063_v55 = vld [vmem:[#allocation11_spill] sm:$0xff] }
  0x6f   :  { %11022 = vst [vmem:[#allocation104_spill] sm:$0xff] %v3941_v19 }
  0x70   :  { %11023 = vst [vmem:[#allocation105_spill] sm:$0xff] %v3946_v58 }
  0x71   :  { %11025 = vst [vmem:[#allocation106_spill] sm:$0xff] %v3951_v54  ;;  %v4022_v54 = vsel %vm11046_vm5, %v3830_v62, 1e+30  ;;  %vm4042_vm5 = vcmp.eq.s32.totalorder %v3427_v12, %v3871_v30 }
  0x72   :  { %11028 = vst [vmem:[#allocation107_spill] sm:$0xff] %v11027_v11 }
  0x73   :  { %11029 = vst [vmem:[#allocation108_spill] sm:$0xff] %v3964_v31  ;;  %v1103_v31 = vmin.f32 %v1102_v22, %v3903_v24  ;;  %v11053_v22 = vmov 0  ;;  %v1066_v24 = vmin.f32 %v1065_v34, %v4004_v0  ;;  %v4072_v34 = vadd.s32 24, %v3407_v2 }
  0x74   :  { %11030 = vst [vmem:[#allocation109_spill] sm:$0xff] %v3969_v1  ;;  %v4009_v1 = vsel %vm11041_vm6, %v3828_v51, 1e+30  ;;  %vm11049_vm6 = vnez %v10908_v48  ;;  %v11054_v22 = vsel %vm4042_vm5, 4294967295, %v11053_v22  ;;  %v4057_v48 = vsel %vm4013_vm15, %v11058_v49, 1e+30 }
  0x75   :  { %11032 = vst [vmem:[#allocation110_spill] sm:$0xff] %v3974_v57  ;;  %v4033_v44 = vsel %vm11049_vm6, %v3840_v17, 1e+30  ;;  %v4051_v57 = vsel %vm11056_vm13, %v3854_v3, 1e+30  ;;  %vm4066_vm6 = vcmp.eq.s32.totalorder %v11063_v55, %v3871_v30  ;;  %vm4078_vm13 = vcmp.eq.s32.totalorder %v3455_v20, %v3871_v30 }
  0x76   :  { %11035 = vst [vmem:[#allocation111_spill] sm:$0xff] %v11034_v59  ;;  %v11068_v45 = vsel %vm4078_vm13, 4294967295, %v11067_v45  ;;  %v4085_v49 = vsel %vm4042_vm5, %v11070_v50, 1e+30  ;;  %v4116_v41 = vsel %vm4066_vm6, %v11087_v15, 1e+30  ;;  %vm4146_vm1 = vcmp.eq.s32.totalorder %v3414_v5, %v4072_v34 }
  0x77   :  { %11036 = vst [vmem:[#allocation112_spill] sm:$0xff] %v3985_v16  ;;  %v1104_v16 = vmin.f32 %v1103_v31, %v3928_v32  ;;  %v11064_v31 = vmov 0  ;;  %v1067_v32 = vmin.f32 %v1066_v24, %v4009_v1  ;;  %v11076_v24 = vmov 0  ;;  %v11284_v59 = vld [vmem:[#allocation36_spill] sm:$0xff] }
  0x78   :  { %11037 = vst [vmem:[#allocation113_spill] sm:$0xff] %v3992_v25  ;;  %v11065_v31 = vsel %vm4066_vm6, 4294967295, %v11064_v31  ;;  %vm4140_vm6 = vcmp.eq.s32.totalorder %v3412_v4, %v4072_v34  ;;  %v11103_v36 = vsel %vm4146_vm1, 4294967295, %v11102_v36  ;;  %v11112_v4 = vld [vmem:[#allocation46_spill] sm:$0xff]  ;;  %vm4181_vm5 = vcmp.eq.s32.totalorder %v3416_v6, %v4072_v34 }
  0x79   :  { %11038 = vst [vmem:[#allocation114_spill] sm:$0xff] %v3999_v46  ;;  %v1147_v46 = vmin.f32 %v1146_v37, %v4028_v38  ;;  %v11072_v37 = vld [vmem:[#allocation45_spill] sm:$0xff]  ;;  %v11100_v40 = vsel %vm4140_vm6, 4294967295, %v11099_v40 }
  0x7a   :  { %11040 = vst [vmem:[#allocation115_spill] sm:$0xff] %v4004_v0  ;;  %v1105_v0 = vmin.f32 %v1104_v16, %v3941_v19  ;;  %vm11073_vm7 = vnez %v11072_v37  ;;  %v11075_v16 = vld [vmem:[#allocation15_spill] sm:$0xff]  ;;  %v1068_v37 = vmin.f32 %v1067_v32, %v4022_v54 }
  0x7b   :  { %11042 = vst [vmem:[#allocation116_spill] sm:$0xff] %v4009_v1  ;;  %v4090_v2 = vsel %vm11073_vm7, %v3875_v28, 1e+30  ;;  %vm4094_vm12 = vcmp.eq.s32.totalorder %v11075_v16, %v3871_v30  ;;  %v11080_v1 = vmov 0  ;;  %v1148_v19 = vmin.f32 %v1147_v46, %v4057_v48  ;;  %v11097_v32 = vld [vmem:[#allocation43_spill] sm:$0xff] }
  0x7c   :  { %11045 = vst [vmem:[#allocation117_spill] sm:$0xff] %v11044_v39  ;;  %v11077_v24 = vsel %vm4094_vm12, 4294967295, %v11076_v24  ;;  %v1106_v50 = vmin.f32 %v1105_v0, %v3946_v58  ;;  %vm4109_vm7 = vcmp.eq.s32.totalorder %v11083_v23, %v3871_v30  ;;  %v11093_v0 = vld [vmem:[#allocation25_spill] sm:$0xff]  ;;  %v11094_v46 = vmov 0 }
  0x7d   :  { %11047 = vst [vmem:[#allocation118_spill] sm:$0xff] %v4022_v54  ;;  %v11085_v42 = vsel %vm4109_vm7, 4294967295, %v11084_v42  ;;  %vm4126_vm2 = vcmp.eq.s32.totalorder %v11093_v0, %v3871_v30  ;;  %v1149_v54 = vmin.f32 %v1148_v19, %v4085_v49  ;;  %v1069_v15 = vmin.f32 %v1068_v37, %v4033_v44 }
  0x7e   :  { %11048 = vst [vmem:[#allocation119_spill] sm:$0xff] %v4028_v38  ;;  %v11079_v38 = vld [vmem:[#allocation16_spill] sm:$0xff]  ;;  %v11095_v46 = vsel %vm4126_vm2, 4294967295, %v11094_v46  ;;  %v1107_v58 = vmin.f32 %v1106_v50, %v3992_v25  ;;  %v11106_v19 = vmov 0  ;;  %v11109_v50 = vmov 0 }
  0x7f   :  { %11050 = vst [vmem:[#allocation120_spill] sm:$0xff] %v4033_v44  ;;  %vm4100_vm4 = vcmp.eq.s32.totalorder %v11079_v38, %v3871_v30  ;;  %v11110_v50 = vsel %vm4158_vm0, 4294967295, %v11109_v50  ;;  %v4165_v37 = vsel %vm4094_vm12, %v11112_v4, 1e+30  ;;  %v1150_v5 = vmin.f32 %v1149_v54, %v4116_v41  ;;  %v11114_v44 = vld [vmem:[#allocation47_spill] sm:$0xff]  ;;  %v11121_v54 = vld [vmem:[#allocation49_spill] sm:$0xff] }
  0x80   :  { %11052 = vst [vmem:[#allocation121_spill] sm:$0xff] %v4038_v18  ;;  %v11081_v1 = vsel %vm4100_vm4, 4294967295, %v11080_v1  ;;  %1108 = vmin.xlane.f32.xlu1 %v1107_v58  ;;  %v4172_v25 = vsel %vm4100_vm4, %v11114_v44, 1e+30  ;;  %v11118_v4 = vmov 0  ;;  %vm4336_vm4 = vcmp.eq.s32.totalorder %v3502_v35, %v4072_v34 }
  0x81   :  { %11055 = vst [vmem:[#allocation122_spill] sm:$0xff] %v11054_v22  ;;  %v11119_v4 = vsel %vm4181_vm5, 4294967295, %v11118_v4 }
  0x82   :  { %11057 = vst [vmem:[#allocation123_spill] sm:$0xff] %v4051_v57 }
  0x83   :  { %11059 = vst [vmem:[#allocation124_spill] sm:$0xff] %v4057_v48  ;;  %v4133_v48 = vsel %vm4078_vm13, %v11097_v32, 1e+30  ;;  %v11105_v32 = vld [vmem:[#allocation26_spill] sm:$0xff] }
  0x84   :  { %11062 = vst [vmem:[#allocation125_spill] sm:$0xff] %v4062_v27  ;;  %vm4152_vm13 = vcmp.eq.s32.totalorder %v11105_v32, %v3871_v30  ;;  %v4177_v30 = vsel %vm4109_vm7, %v11116_v33, 1e+30  ;;  %v1151_v58 = vmin.f32 %v1150_v5, %v4133_v48  ;;  %v11125_v33 = vld [vmem:[#allocation58_spill] sm:$0xff]  ;;  %vm4277_vm7 = vcmp.eq.s32.totalorder %v11079_v38, %v4072_v34 }
  0x85   :  { %11066 = vst [vmem:[#allocation11_spill] sm:$0xff] %v11065_v31  ;;  %v11107_v19 = vsel %vm4152_vm13, 4294967295, %v11106_v19  ;;  %v4199_v44 = vsel %vm4146_vm1, %v11125_v33, 1e+30  ;;  %vm4226_vm1 = vcmp.eq.s32.totalorder %v3420_v9, %v4072_v34  ;;  %v11144_v9 = vmov 0 }
  0x86   :  { %11069 = vst [vmem:[#allocation126_spill] sm:$0xff] %v11068_v45  ;;  %v4296_v38 = vsel %vm3921_vm10, %v11125_v33, 1e+30  ;;  %vm4320_vm10 = vcmp.eq.s32.totalorder %v11105_v32, %v4072_v34 }
  0x87   :  { %11071 = vst [vmem:[#allocation127_spill] sm:$0xff] %v4085_v49  ;;  %v1070_v49 = vmin.f32 %v1069_v15, %v4038_v18  ;;  %v4188_v15 = vsel %vm4120_vm3, %v11121_v54, 1e+30  ;;  %v11129_v54 = vld [vmem:[#allocation52_spill] sm:$0xff]  ;;  %vm4271_vm3 = vcmp.eq.s32.totalorder %v11075_v16, %v4072_v34 }
  0x88   :  { %11074 = vst [vmem:[#allocation128_spill] sm:$0xff] %v4090_v2  ;;  %v4210_v5 = vsel %vm4152_vm13, %v11129_v54, 1e+30  ;;  %v11139_v54 = vld [vmem:[#allocation61_spill] sm:$0xff]  ;;  %vm4238_vm13 = vcmp.eq.s32.totalorder %v3422_v10, %v4072_v34  ;;  %v11150_v10 = vmov 0 }
  0x89   :  { %11078 = vst [vmem:[#allocation15_spill] sm:$0xff] %v11077_v24  ;;  %v1071_v6 = vmin.f32 %v1070_v49, %v4051_v57  ;;  %v1152_v57 = vmin.f32 %v1151_v58, %v4165_v37 }
  0x8a   :  { %11082 = vst [vmem:[#allocation16_spill] sm:$0xff] %v11081_v1 }
  0x8b   :  { %11086 = vst [vmem:[#allocation18_spill] sm:$0xff] %v11085_v42  ;;  %v11127_v42 = vld [vmem:[#allocation50_spill] sm:$0xff] }
  0x8c   :  { %11088 = vst [vmem:[#allocation129_spill] sm:$0xff] %v4116_v41  ;;  %v11123_v41 = vld [vmem:[#allocation54_spill] sm:$0xff] }
  0x8d   :  { %11092 = vst [vmem:[#allocation19_spill] sm:$0xff] %v11091_v13  ;;  %v4194_v18 = vsel %vm4140_vm6, %v11123_v41, 1e+30  ;;  %v4205_v13 = vsel %vm4126_vm2, %v11127_v42, 1e+30  ;;  %vm4214_vm6 = vcmp.eq.s32.totalorder %v3418_v8, %v4072_v34  ;;  %v11136_v42 = vmov 0 }
  0x8e   :  { %11096 = vst [vmem:[#allocation25_spill] sm:$0xff] %v11095_v46  ;;  %v11137_v42 = vsel %vm4226_vm1, 4294967295, %v11136_v42  ;;  %v4233_v8 = vsel %vm4181_vm5, %v11139_v54, 1e+30  ;;  %v1110_v58 = vmin.f32 %v4194_v18, %v4199_v44  ;;  %vm4253_vm5 = vcmp.eq.s32.totalorder %v11063_v55, %v4072_v34 }
  0x8f   :  { %11098 = vst [vmem:[#allocation130_spill] sm:$0xff] %v4133_v48  ;;  %v11131_v48 = vmov 0  ;;  %vm4259_vm2 = vcmp.eq.s32.totalorder %v3455_v20, %v4072_v34  ;;  %v11157_v20 = vmov 0  ;;  %v4291_v16 = vsel %vm3915_vm11, %v11123_v41, 1e+30 }
  0x90   :  { %11101 = vst [vmem:[#allocation131_spill] sm:$0xff] %v11100_v40  ;;  %v11132_v48 = vsel %vm4214_vm6, 4294967295, %v11131_v48  ;;  %v1072_v40 = vmin.f32 %v1071_v6, %v4062_v27  ;;  %v11147_v6 = vmov 0  ;;  %v11151_v10 = vsel %vm4259_vm2, 4294967295, %v11150_v10 }
  0x91   :  { %11104 = vst [vmem:[#allocation132_spill] sm:$0xff] %v11103_v36  ;;  %v11134_v36 = vld [vmem:[#allocation53_spill] sm:$0xff]  ;;  %v11148_v6 = vsel %vm4253_vm5, 4294967295, %v11147_v6  ;;  %v11158_v20 = vsel %vm4277_vm7, 4294967295, %v11157_v20  ;;  %v1111_v55 = vmin.f32 %v1110_v58, %v4233_v8  ;;  %v11166_v58 = vmov 0 }
  0x92   :  { %11108 = vst [vmem:[#allocation26_spill] sm:$0xff] %v11107_v19  ;;  %v4221_v49 = vsel %vm4158_vm0, %v11134_v36, 1e+30  ;;  %v11141_v36 = vmov 0  ;;  %vm4244_vm0 = vcmp.eq.s32.totalorder %v3427_v12, %v4072_v34  ;;  %v4266_v12 = vsel %vm4214_vm6, %v3683_v61, 1e+30 }
  0x93   :  { %11111 = vst [vmem:[#allocation133_spill] sm:$0xff] %v11110_v50  ;;  %v11142_v36 = vsel %vm4238_vm13, 4294967295, %v11141_v36  ;;  %v11145_v9 = vsel %vm4244_vm0, 4294967295, %v11144_v9  ;;  %vm4300_vm6 = vcmp.eq.s32.totalorder %v11083_v23, %v4072_v34  ;;  %vm4312_vm11 = vcmp.eq.s32.totalorder %v11093_v0, %v4072_v34 }
  0x94   :  { %11113 = vst [vmem:[#allocation134_spill] sm:$0xff] %v4165_v37  ;;  %v1153_v37 = vmin.f32 %v1152_v57, %v4172_v25  ;;  %v11154_v57 = vmov 0  ;;  %v11169_v41 = vmov 0  ;;  %v1112_v33 = vmin.f32 %v1111_v55, %v4266_v12 }
  0x95   :  { %11115 = vst [vmem:[#allocation135_spill] sm:$0xff] %v4172_v25  ;;  %v11155_v57 = vsel %vm4271_vm3, 4294967295, %v11154_v57  ;;  %v11170_v41 = vsel %vm4312_vm11, 4294967295, %v11169_v41  ;;  %v11172_v23 = vmov 0  ;;  %v4332_v0 = vsel %vm3934_vm9, %v11139_v54, 1e+30 }
  0x96   :  { %11117 = vst [vmem:[#allocation136_spill] sm:$0xff] %v4177_v30  ;;  %v1154_v25 = vmin.f32 %v1153_v37, %v4177_v30  ;;  %v11163_v37 = vmov 0  ;;  %v11173_v23 = vsel %vm4320_vm10, 4294967295, %v11172_v23  ;;  %v4343_v32 = vsel %vm4244_vm0, %v3788_v21, 1e+30  ;;  %v46_v54 = vld [vmem:[%s9646_s0 + $0x20] sm:$0xff] }
  0x97   :  { %11120 = vst [vmem:[#allocation137_spill] sm:$0xff] %v11119_v4  ;;  %v11164_v37 = vsel %vm4300_vm6, 4294967295, %v11163_v37  ;;  %v4355_v35 = vsel %vm4253_vm5, %v3807_v29, 1e+30  ;;  %v4387_v30 = vperm.slane %v46_v54, 1  ;;  %vm11252_vm9 = vnez %v11132_v48 }
  0x98   :  { %11122 = vst [vmem:[#allocation138_spill] sm:$0xff] %v4188_v15 }
  0x99   :  { %11124 = vst [vmem:[#allocation54_spill] sm:$0xff] %v4194_v18  ;;  %v4392_v18 = vsel %vm4300_vm6, %v3840_v17, 1e+30 }
  0x9a   :  { %11126 = vst [vmem:[#allocation58_spill] sm:$0xff] %v4199_v44  ;;  %v1073_v44 = vmin.f32 %v1072_v40, %v4090_v2  ;;  %v4286_v40 = vsel %vm4226_vm1, %v3718_v7, 1e+30  ;;  %vm4306_vm1 = vcmp.eq.s32.totalorder %v11089_v14, %v4072_v34  ;;  %v4327_v14 = vsel %vm4238_vm13, %v3752_v52, 1e+30  ;;  %v11197_v2 = vld [vmem:[#allocation13_spill] sm:$0xff] }
  0x9b   :  { %11128 = vst [vmem:[#allocation139_spill] sm:$0xff] %v4205_v13  ;;  %v11167_v58 = vsel %vm4306_vm1, 4294967295, %v11166_v58  ;;  %v1113_v55 = vmin.f32 %v1112_v33, %v4286_v40  ;;  %v4360_v34 = vsel %vm4259_vm2, %v3826_v56, 1e+30  ;;  %v4365_v33 = vsel %vm3955_vm14, %v3683_v61, 1e+30 }
  0x9c   :  { %11130 = vst [vmem:[#allocation140_spill] sm:$0xff] %v4210_v5  ;;  %1074 = vmin.xlane.f32.xlu0 %v1073_v44  ;;  %v1155_v44 = vmin.f32 %v1154_v25, %v4188_v15  ;;  %v11177_v25 = vmov 0  ;;  %v4383_v61 = vsel %vm3978_vm8, %v3718_v7, 1e+30  ;;  %v4402_v7 = vsel %vm4306_vm1, %v3852_v63, 1e+30 }
  0x9d   :  { %11133 = vst [vmem:[#allocation141_spill] sm:$0xff] %v11132_v48  ;;  %v11178_v25 = vsel %vm4336_vm4, 4294967295, %v11177_v25  ;;  %vm11192_vm8 = vnez %v11054_v22  ;;  %vm11198_vm14 = vnez %v11197_v2  ;;  %v11314_v48 = vld [vmem:[#allocation48_spill] sm:$0xff] }
  0x9e   :  { %11135 = vst [vmem:[#allocation142_spill] sm:$0xff] %v4221_v49  ;;  %v1156_v15 = vmin.f32 %v1155_v44, %v4205_v13  ;;  %v4375_v44 = vsel %vm4277_vm7, %v3830_v62, 1e+30  ;;  %v4436_v27 = vsel %vm11198_vm14, %v4387_v30, 1e+30  ;;  %vm11204_vm14 = vnez %v11065_v31 }
  0x9f   :  { %11138 = vst [vmem:[#allocation143_spill] sm:$0xff] %v11137_v42  ;;  %v4455_v2 = vsel %vm11204_vm14, %v3807_v29, 1e+30  ;;  %v4476_v29 = vsel %vm4094_vm12, %v3828_v51, 1e+30  ;;  %vm11224_vm14 = vnez %v11107_v19 }
  0xa0   :  { %11140 = vst [vmem:[#allocation61_spill] sm:$0xff] %v4233_v8  ;;  %v1157_v13 = vmin.f32 %v1156_v15, %v4210_v5  ;;  %v4385_v8 = vperm.slane %v46_v54, 0 }
  0xa1   :  { %11143 = vst [vmem:[#allocation144_spill] sm:$0xff] %v11142_v36  ;;  %v11333_v36 = vld [vmem:[#allocation53_spill] sm:$0xff] }
  0xa2   :  { %11146 = vst [vmem:[#allocation145_spill] sm:$0xff] %v11145_v9  ;;  %v1158_v15 = vmin.f32 %v1157_v13, %v4221_v49  ;;  %v4426_v49 = vsel %vm11192_vm8, %v3788_v21, 1e+30 }
  0xa3   :  { %11149 = vst [vmem:[#allocation146_spill] sm:$0xff] %v11148_v6  ;;  %v11354_v6 = vld [vmem:[#allocation82_spill] sm:$0xff] }
  0xa4   :  { %11152 = vst [vmem:[#allocation147_spill] sm:$0xff] %v11151_v10  ;;  %1159 = vmin.xlane.f32.xlu2 %v1158_v15  ;;  %v4440_v15 = vperm.slane %v46_v54, 4 }
  0xa5   :  { %11153 = vst [vmem:[#allocation148_spill] sm:$0xff] %v4266_v12  ;;  %v1076_v12 = vmin.f32 %v4291_v16, %v4296_v38 }
  0xa6   :  { %11156 = vst [vmem:[#allocation149_spill] sm:$0xff] %v11155_v57  ;;  %v11531_v57 = vld [vmem:[#allocation38_spill] sm:$0xff] }
  0xa7   :  { %11159 = vst [vmem:[#allocation150_spill] sm:$0xff] %v11158_v20 }
  0xa8   :  { %11160 = vst [vmem:[#allocation151_spill] sm:$0xff] %v4286_v40  ;;  %v1077_v40 = vmin.f32 %v1076_v12, %v4332_v0 }
  0xa9   :  { %11161 = vst [vmem:[#allocation152_spill] sm:$0xff] %v4291_v16  ;;  %v1114_v16 = vmin.f32 %v1113_v55, %v4327_v14 }
  0xaa   :  { %11162 = vst [vmem:[#allocation153_spill] sm:$0xff] %v4296_v38  ;;  %v4370_v38 = vsel %vm4271_vm3, %v3828_v51, 1e+30  ;;  %v1078_v12 = vmin.f32 %v1077_v40, %v4365_v33  ;;  %v4417_v40 = vsel %vm4320_vm10, %v3873_v43, 1e+30  ;;  %v47_v51 = vld [vmem:[%s9646_s0 + $0x28] sm:$0xff] }
  0xab   :  { %11165 = vst [vmem:[#allocation154_spill] sm:$0xff] %v11164_v37  ;;  %v1115_v55 = vmin.f32 %v1114_v16, %v4343_v32  ;;  %v4412_v16 = vsel %vm4013_vm15, %v3752_v52, 1e+30  ;;  %v11194_v52 = vld [vmem:[#allocation12_spill] sm:$0xff]  ;;  %v4570_v24 = vperm.slane %v47_v51, 4  ;;  %v4589_v22 = vperm.slane %v47_v51, 6 }
  0xac   :  { %11168 = vst [vmem:[#allocation155_spill] sm:$0xff] %v11167_v58  ;;  %vm11195_vm15 = vnez %v11194_v52 }
  0xad   :  { %11171 = vst [vmem:[#allocation156_spill] sm:$0xff] %v11170_v41  ;;  %v1116_v13 = vmin.f32 %v1115_v55, %v4355_v35  ;;  %v4431_v5 = vsel %vm11195_vm15, %v4385_v8, 1e+30  ;;  %vm11206_vm15 = vnez %v11068_v45  ;;  %v4572_v45 = vperm.slane %v47_v51, 5 }
  0xae   :  { %11174 = vst [vmem:[#allocation157_spill] sm:$0xff] %v11173_v23 }
  0xaf   :  { %11175 = vst [vmem:[#allocation158_spill] sm:$0xff] %v4327_v14  ;;  %v4407_v14 = vsel %vm4312_vm11, %v3854_v3, 1e+30  ;;  %v1117_v55 = vmin.f32 %v1116_v13, %v4360_v34  ;;  %v1195_v13 = vmin.f32 %v4431_v5, %v4436_v27 }
  0xb0   :  { %11176 = vst [vmem:[#allocation159_spill] sm:$0xff] %v4332_v0  ;;  %v4396_v0 = vperm.slane %v46_v54, 2 }
  0xb1   :  { %11179 = vst [vmem:[#allocation160_spill] sm:$0xff] %v11178_v25 }
  0xb2   :  { %11180 = vst [vmem:[#allocation161_spill] sm:$0xff] %v4343_v32  ;;  %v4421_v32 = vperm.slane %v46_v54, 3 }
  0xb3   :  { %11181 = vst [vmem:[#allocation162_spill] sm:$0xff] %v4355_v35  ;;  %v4450_v35 = vsel %vm4336_vm4, %v3875_v28, 1e+30  ;;  %vm11259_vm4 = vnez %v11137_v42  ;;  %v11323_v42 = vld [vmem:[#allocation50_spill] sm:$0xff] }
  0xb4   :  { %11182 = vst [vmem:[#allocation163_spill] sm:$0xff] %v4360_v34 }
  0xb5   :  { %11183 = vst [vmem:[#allocation164_spill] sm:$0xff] %v4365_v33  ;;  %v1079_v33 = vmin.f32 %v1078_v12, %v4383_v61 }
  0xb6   :  { %11184 = vst [vmem:[#allocation165_spill] sm:$0xff] %v4370_v38 }
  0xb7   :  { %11185 = vst [vmem:[#allocation166_spill] sm:$0xff] %v4375_v44  ;;  %v1080_v12 = vmin.f32 %v1079_v33, %v4412_v16  ;;  %v4460_v33 = vsel %vm11206_vm15, %v3826_v56, 1e+30  ;;  %vm11211_vm15 = vnez %v11081_v1 }
  0xb8   :  { %11186 = vst [vmem:[#allocation167_spill] sm:$0xff] %v4383_v61  ;;  %v11200_v61 = vld [vmem:[#allocation14_spill] sm:$0xff]  ;;  %v4481_v56 = vsel %vm11211_vm15, %v3830_v62, 1e+30  ;;  %v11216_v62 = vld [vmem:[#allocation27_spill] sm:$0xff] }
  0xb9   :  { %11187 = vst [vmem:[#allocation168_spill] sm:$0xff] %v4392_v18  ;;  %vm11201_vm8 = vnez %v11200_v61  ;;  %v1081_v34 = vmin.f32 %v1080_v12, %v4426_v49  ;;  %v4466_v61 = vperm.slane %v46_v54, 5  ;;  %vm11217_vm15 = vnez %v11216_v62 }
  0xba   :  { %11188 = vst [vmem:[#allocation169_spill] sm:$0xff] %v4402_v7  ;;  %v4445_v21 = vsel %vm11201_vm8, %v4396_v0, 1e+30  ;;  %vm11208_vm8 = vnez %v10874_v26  ;;  %v4499_v26 = vsel %vm11217_vm15, %v4440_v15, 1e+30  ;;  %v4519_v62 = vperm.slane %v46_v54, 7 }
  0xbb   :  { %11189 = vst [vmem:[#allocation170_spill] sm:$0xff] %v4407_v14  ;;  %v4471_v52 = vsel %vm11208_vm8, %v4421_v32, 1e+30  ;;  %v1196_v12 = vmin.f32 %v1195_v13, %v4445_v21  ;;  %v11219_v13 = vld [vmem:[#allocation19_spill] sm:$0xff] }
  0xbc   :  { %11190 = vst [vmem:[#allocation171_spill] sm:$0xff] %v4412_v16  ;;  %v1118_v16 = vmin.f32 %v1117_v55, %v4370_v38  ;;  %v4483_v55 = vperm.slane %v46_v54, 6  ;;  %v1082_v38 = vmin.f32 %v1081_v34, %v4455_v2  ;;  %vm11220_vm12 = vnez %v11219_v13 }
  0xbd   :  { %11191 = vst [vmem:[#allocation172_spill] sm:$0xff] %v4417_v40  ;;  %v4514_v34 = vsel %vm11224_vm14, %v3873_v43, 1e+30  ;;  %v4531_v43 = vperm.slane %v47_v51, 0 }
  0xbe   :  { %11193 = vst [vmem:[#allocation173_spill] sm:$0xff] %v4426_v49 }
  0xbf   :  { %11196 = vst [vmem:[#allocation174_spill] sm:$0xff] %v4431_v5  ;;  %v11213_v5 = vld [vmem:[#allocation18_spill] sm:$0xff] }
  0xc0   :  { %11199 = vst [vmem:[#allocation175_spill] sm:$0xff] %v4436_v27  ;;  %v1119_v27 = vmin.f32 %v1118_v16, %v4375_v44  ;;  %vm11214_vm8 = vnez %v11213_v5  ;;  %v4504_v16 = vsel %vm11220_vm12, %v3852_v63, 1e+30  ;;  %v1083_v44 = vmin.f32 %v1082_v38, %v4460_v33  ;;  %v11226_v63 = vld [vmem:[#allocation28_spill] sm:$0xff] }
  0xc1   :  { %11202 = vst [vmem:[#allocation176_spill] sm:$0xff] %v4445_v21  ;;  %v4490_v49 = vsel %vm11214_vm8, %v3840_v17, 1e+30  ;;  %vm11222_vm8 = vnez %v11095_v46  ;;  %v1197_v21 = vmin.f32 %v1196_v12, %v4471_v52  ;;  %vm11227_vm15 = vnez %v11226_v63  ;;  %v11231_v12 = vld [vmem:[#allocation31_spill] sm:$0xff] }
  0xc2   :  { %11203 = vst [vmem:[#allocation177_spill] sm:$0xff] %v4450_v35  ;;  %v4509_v17 = vsel %vm11222_vm8, %v3854_v3, 1e+30  ;;  %v4524_v13 = vsel %vm11227_vm15, %v4466_v61, 1e+30  ;;  %vm11229_vm8 = vnez %v11110_v50  ;;  %vm11232_vm14 = vnez %v11231_v12  ;;  %v11239_v50 = vld [vmem:[#allocation132_spill] sm:$0xff] }
  0xc3   :  { %11205 = vst [vmem:[#allocation178_spill] sm:$0xff] %v4455_v2  ;;  %v1120_v2 = vmin.f32 %v1119_v27, %v4392_v18  ;;  %v4529_v3 = vsel %vm11229_vm8, %v3875_v28, 1e+30  ;;  %v4536_v27 = vsel %vm11232_vm14, %v4483_v55, 1e+30  ;;  %v1198_v38 = vmin.f32 %v1197_v21, %v4499_v26  ;;  %v11235_v18 = vld [vmem:[#allocation131_spill] sm:$0xff] }
  0xc4   :  { %11207 = vst [vmem:[#allocation179_spill] sm:$0xff] %v4460_v33  ;;  %v11234_v33 = vld [vmem:[#allocation8_spill] sm:$0xff]  ;;  %vm11236_vm15 = vnez %v11235_v18  ;;  %v11238_v28 = vld [vmem:[#allocation9_spill] sm:$0xff]  ;;  %vm11240_vm8 = vnez %v11239_v50  ;;  %v4551_v46 = vperm.slane %v47_v51, 1  ;;  %v4553_v12 = vperm.slane %v47_v51, 2 }
  0xc5   :  { %11209 = vst [vmem:[#allocation180_spill] sm:$0xff] %v4471_v52  ;;  %v1121_v54 = vmin.f32 %v1120_v2, %v4402_v7  ;;  %v1084_v52 = vmin.f32 %v1083_v44, %v4476_v29  ;;  %v4544_v63 = vsel %vm11236_vm15, %v11234_v33, 1e+30  ;;  %v4549_v19 = vsel %vm11240_vm8, %v11238_v28, 1e+30  ;;  %v11245_v7 = vld [vmem:[#allocation10_spill] sm:$0xff] }
  0xc6   :  { %11210 = vst [vmem:[#allocation181_spill] sm:$0xff] %v4476_v29  ;;  %v4555_v5 = vperm.slane %v47_v51, 3  ;;  %v1199_v2 = vmin.f32 %v1198_v38, %v4524_v13  ;;  %vm11246_vm12 = vnez %v11119_v4  ;;  %v11306_v4 = vld [vmem:[#allocation46_spill] sm:$0xff]  ;;  %v4867_v10 = vsel %vm4271_vm3, %v4551_v46, 1e+30 }
  0xc7   :  { %11212 = vst [vmem:[#allocation182_spill] sm:$0xff] %v4481_v56  ;;  %v1122_v44 = vmin.f32 %v1121_v54, %v4407_v14  ;;  %v1085_v21 = vmin.f32 %v1084_v52, %v4481_v56  ;;  %v4568_v1 = vsel %vm11246_vm12, %v11245_v7, 1e+30  ;;  %v1178_v54 = vmin.f32 %v4544_v63, %v4549_v19  ;;  %v11248_v56 = vld [vmem:[#allocation33_spill] sm:$0xff] }
  0xc8   :  { %11215 = vst [vmem:[#allocation183_spill] sm:$0xff] %v4490_v49  ;;  %v1200_v38 = vmin.f32 %v1199_v2, %v4536_v27  ;;  %v4591_v2 = vperm.slane %v47_v51, 7  ;;  %v11261_v51 = vld [vmem:[#allocation35_spill] sm:$0xff]  ;;  %v4724_v18 = vsel %vm4271_vm3, %v11306_v4, 1e+30  ;;  %vm11385_vm3 = vnez %v11178_v25 }
  0xc9   :  { %11218 = vst [vmem:[#allocation184_spill] sm:$0xff] %v4499_v26  ;;  %v11242_v26 = vld [vmem:[#allocation32_spill] sm:$0xff]  ;;  %v1123_v52 = vmin.f32 %v1122_v44, %v4417_v40  ;;  %v1179_v44 = vmin.f32 %v1178_v54, %v4568_v1  ;;  %v11258_v40 = vld [vmem:[#allocation21_spill] sm:$0xff]  ;;  %vm11262_vm10 = vnez %v11261_v51  ;;  %v11264_v54 = vld [vmem:[#allocation38_spill] sm:$0xff] }
  0xca   :  { %11221 = vst [vmem:[#allocation185_spill] sm:$0xff] %v4504_v16  ;;  %vm11243_vm14 = vnez %v11242_v26  ;;  %v11251_v26 = vld [vmem:[#allocation17_spill] sm:$0xff]  ;;  %vm11265_vm11 = vnez %v11264_v54  ;;  %v11272_v54 = vld [vmem:[#allocation60_spill] sm:$0xff] }
  0xcb   :  { %11223 = vst [vmem:[#allocation186_spill] sm:$0xff] %v4509_v17  ;;  %v4563_v29 = vsel %vm11243_vm14, %v4519_v62, 1e+30  ;;  %vm11249_vm14 = vnez %v11248_v56  ;;  %v4587_v31 = vsel %vm11252_vm9, %v11251_v26, 1e+30  ;;  %v11269_v51 = vld [vmem:[#allocation57_spill] sm:$0xff] }
  0xcc   :  { %11225 = vst [vmem:[#allocation187_spill] sm:$0xff] %v4514_v34  ;;  %v4582_v14 = vsel %vm11249_vm14, %v4531_v43, 1e+30  ;;  %v4605_v56 = vsel %vm11259_vm4, %v11258_v40, 1e+30 }
  0xcd   :  { %11228 = vst [vmem:[#allocation188_spill] sm:$0xff] %v4524_v13  ;;  %v1086_v13 = vmin.f32 %v1085_v21, %v4490_v49  ;;  %v1124_v21 = vmin.f32 %v1123_v52, %v4450_v35  ;;  %v4615_v52 = vsel %vm11265_vm11, %v4555_v5, 1e+30  ;;  %vm11273_vm11 = vnez %v11272_v54 }
  0xce   :  { %11230 = vst [vmem:[#allocation189_spill] sm:$0xff] %v4529_v3  ;;  %v4633_v39 = vsel %vm11273_vm11, %v11238_v28, 1e+30 }
  0xcf   :  { %11233 = vst [vmem:[#allocation190_spill] sm:$0xff] %v4536_v27  ;;  %v11255_v27 = vld [vmem:[#allocation34_spill] sm:$0xff]  ;;  %1125 = vmin.xlane.f32.xlu1 %v1124_v21 }
  0xd0   :  { %11237 = vst [vmem:[#allocation8_spill] sm:$0xff] %v4544_v63  ;;  %v1087_v63 = vmin.f32 %v1086_v13, %v4504_v16  ;;  %vm11256_vm14 = vnez %v11255_v27  ;;  %v11267_v16 = vld [vmem:[#allocation29_spill] sm:$0xff] }
  0xd1   :  { %11241 = vst [vmem:[#allocation9_spill] sm:$0xff] %v4549_v19  ;;  %v1201_v19 = vmin.f32 %v1200_v38, %v4563_v29  ;;  %v4600_v49 = vsel %vm11256_vm14, %v4551_v46, 1e+30  ;;  %v4610_v38 = vsel %vm11262_vm10, %v4553_v12, 1e+30  ;;  %vm11270_vm10 = vnez %v11269_v51 }
  0xd2   :  { %11244 = vst [vmem:[#allocation191_spill] sm:$0xff] %v4563_v29  ;;  %v1088_v29 = vmin.f32 %v1087_v63, %v4509_v17  ;;  %v4623_v35 = vsel %vm4238_vm13, %v11267_v16, 1e+30  ;;  %v4628_v27 = vsel %vm11270_vm10, %v11234_v33, 1e+30  ;;  %v11278_v63 = vld [vmem:[#allocation40_spill] sm:$0xff] }
  0xd3   :  { %11247 = vst [vmem:[#allocation10_spill] sm:$0xff] %v4568_v1  ;;  %v1202_v13 = vmin.f32 %v1201_v19, %v4582_v14  ;;  %v1180_v1 = vmin.f32 %v1179_v44, %v4587_v31  ;;  %v11275_v19 = vld [vmem:[#allocation39_spill] sm:$0xff]  ;;  %vm11279_vm1 = vnez %v11278_v63  ;;  %v11281_v17 = vld [vmem:[#allocation41_spill] sm:$0xff] }
  0xd4   :  { %11250 = vst [vmem:[#allocation192_spill] sm:$0xff] %v4582_v14  ;;  %vm11276_vm14 = vnez %v11275_v19  ;;  %v4643_v21 = vsel %vm11279_vm1, %v4572_v45, 1e+30  ;;  %v1089_v14 = vmin.f32 %v1088_v29, %v4514_v34  ;;  %vm11282_vm11 = vnez %v11281_v17  ;;  %v11286_v63 = vld [vmem:[#allocation65_spill] sm:$0xff]  ;;  %v11290_v34 = vld [vmem:[#allocation42_spill] sm:$0xff] }
  0xd5   :  { %11253 = vst [vmem:[#allocation17_spill] sm:$0xff] %v4587_v31  ;;  %v4638_v44 = vsel %vm11276_vm14, %v4570_v24, 1e+30  ;;  %v1203_v31 = vmin.f32 %v1202_v13, %v4600_v49  ;;  %v1181_v33 = vmin.f32 %v1180_v1, %v4605_v56  ;;  %v4651_v28 = vsel %vm11282_vm11, %v4589_v22, 1e+30 }
  0xd6   :  { %11254 = vst [vmem:[#allocation193_spill] sm:$0xff] %v4591_v2  ;;  %v4656_v19 = vsel %vm4244_vm0, %v11284_v59, 1e+30  ;;  %vm11287_vm1 = vnez %v11286_v63  ;;  %v1161_v29 = vmin.f32 %v4628_v27, %v4633_v39  ;;  %v4676_v17 = vsel %vm4253_vm5, %v11290_v34, 1e+30  ;;  %v11431_v63 = vld [vmem:[#allocation18_spill] sm:$0xff] }
  0xd7   :  { %11257 = vst [vmem:[#allocation194_spill] sm:$0xff] %v4600_v49  ;;  %v4661_v11 = vsel %vm11287_vm1, %v11245_v7, 1e+30  ;;  %v1204_v13 = vmin.f32 %v1203_v31, %v4610_v38  ;;  %v1182_v1 = vmin.f32 %v1181_v33, %v4623_v35  ;;  %v1090_v49 = vmin.f32 %v1089_v14, %v4529_v3  ;;  %v11292_v7 = vld [vmem:[#allocation70_spill] sm:$0xff]  ;;  %v11300_v3 = vld [vmem:[#allocation43_spill] sm:$0xff] }
  0xd8   :  { %11260 = vst [vmem:[#allocation21_spill] sm:$0xff] %v4605_v56  ;;  %v4670_v56 = vsel %vm11236_vm15, %v4385_v8, 1e+30  ;;  %vm11293_vm11 = vnez %v11292_v7  ;;  %v4686_v33 = vsel %vm11240_vm8, %v4387_v30, 1e+30  ;;  %v1162_v14 = vmin.f32 %v1161_v29, %v4661_v11 }
  0xd9   :  { %11263 = vst [vmem:[#allocation195_spill] sm:$0xff] %v4610_v38  ;;  %v4681_v31 = vsel %vm11293_vm11, %v11251_v26, 1e+30  ;;  %1091 = vmin.xlane.f32.xlu0 %v1090_v49  ;;  %v11297_v26 = vld [vmem:[#allocation45_spill] sm:$0xff]  ;;  %v4704_v50 = vsel %vm4259_vm2, %v11300_v3, 1e+30  ;;  %v1246_v29 = vmin.f32 %v4670_v56, %v4686_v33  ;;  %vm11327_vm14 = vnez %v11173_v23 }
  0xda   :  { %11266 = vst [vmem:[#allocation196_spill] sm:$0xff] %v4615_v52  ;;  %vm11298_vm15 = vnez %v11297_v26  ;;  %v4748_v26 = vsel %vm4300_vm6, %v11314_v48, 1e+30 }
  0xdb   :  { %11268 = vst [vmem:[#allocation29_spill] sm:$0xff] %v4623_v35  ;;  %v1205_v35 = vmin.f32 %v1204_v13, %v4615_v52  ;;  %v4699_v38 = vsel %vm11298_vm15, %v4591_v2, 1e+30  ;;  %v11302_v13 = vld [vmem:[#allocation72_spill] sm:$0xff]  ;;  %v4719_v52 = vsel %vm11252_vm9, %v4421_v32, 1e+30  ;;  %vm11317_vm9 = vnez %v11167_v58 }
  0xdc   :  { %11271 = vst [vmem:[#allocation197_spill] sm:$0xff] %v4628_v27  ;;  %v4694_v27 = vsel %vm11246_vm12, %v4396_v0, 1e+30  ;;  %vm11303_vm8 = vnez %v11302_v13  ;;  %v11499_v58 = vld [vmem:[#allocation31_spill] sm:$0xff] }
  0xdd   :  { %11274 = vst [vmem:[#allocation198_spill] sm:$0xff] %v4633_v39  ;;  %v1183_v39 = vmin.f32 %v1182_v1, %v4656_v19  ;;  %v4709_v1 = vsel %vm11303_vm8, %v11258_v40, 1e+30  ;;  %v1206_v49 = vmin.f32 %v1205_v35, %v4638_v44  ;;  %v11308_v40 = vld [vmem:[#allocation47_spill] sm:$0xff]  ;;  %v11310_v35 = vld [vmem:[#allocation74_spill] sm:$0xff] }
  0xde   :  { %11277 = vst [vmem:[#allocation199_spill] sm:$0xff] %v4638_v44  ;;  %vm11311_vm12 = vnez %v11310_v35  ;;  %v4743_v44 = vsel %vm11259_vm4, %v4440_v15, 1e+30  ;;  %vm11324_vm4 = vnez %v11170_v41 }
  0xdf   :  { %11280 = vst [vmem:[#allocation200_spill] sm:$0xff] %v4643_v21  ;;  %v4772_v2 = vsel %vm11324_vm4, %v11323_v42, 1e+30 }
  0xe0   :  { %11283 = vst [vmem:[#allocation201_spill] sm:$0xff] %v4651_v28 }
  0xe1   :  { %11285 = vst [vmem:[#allocation36_spill] sm:$0xff] %v4656_v19  ;;  %v1184_v19 = vmin.f32 %v1183_v39, %v4676_v17  ;;  %v4734_v39 = vsel %vm11311_vm12, %v11267_v16, 1e+30  ;;  %v11316_v16 = vld [vmem:[#allocation49_spill] sm:$0xff] }
  0xe2   :  { %11288 = vst [vmem:[#allocation202_spill] sm:$0xff] %v4661_v11  ;;  %v1163_v11 = vmin.f32 %v1162_v14, %v4681_v31  ;;  %v1247_v14 = vmin.f32 %v1246_v29, %v4694_v27  ;;  %v4753_v29 = vsel %vm11317_vm9, %v11316_v16, 1e+30 }
  0xe3   :  { %11289 = vst [vmem:[#allocation203_spill] sm:$0xff] %v4670_v56  ;;  %v1185_v56 = vmin.f32 %v1184_v19, %v4704_v50 }
  0xe4   :  { %11291 = vst [vmem:[#allocation42_spill] sm:$0xff] %v4676_v17  ;;  %v1207_v17 = vmin.f32 %v1206_v49, %v4643_v21  ;;  %v11319_v49 = vld [vmem:[#allocation75_spill] sm:$0xff]  ;;  %v4767_v21 = vsel %vm4238_vm13, %v4466_v61, 1e+30  ;;  %vm11334_vm13 = vnez %v11178_v25 }
  0xe5   :  { %11294 = vst [vmem:[#allocation204_spill] sm:$0xff] %v4681_v31  ;;  %v1164_v31 = vmin.f32 %v1163_v11, %v4709_v1  ;;  %vm11320_vm15 = vnez %v11319_v49  ;;  %v1248_v11 = vmin.f32 %v1247_v14, %v4719_v52  ;;  %v4796_v53 = vsel %vm11334_vm13, %v11333_v36, 1e+30 }
  0xe6   :  { %11295 = vst [vmem:[#allocation205_spill] sm:$0xff] %v4686_v33  ;;  %v4729_v33 = vsel %vm4277_vm7, %v11308_v40, 1e+30  ;;  %v4758_v19 = vsel %vm11320_vm15, %v11284_v59, 1e+30  ;;  %v11326_v59 = vld [vmem:[#allocation52_spill] sm:$0xff] }
  0xe7   :  { %11296 = vst [vmem:[#allocation206_spill] sm:$0xff] %v4694_v27  ;;  %v1186_v27 = vmin.f32 %v1185_v56, %v4724_v18  ;;  %v4777_v14 = vsel %vm11327_vm14, %v11326_v59, 1e+30 }
  0xe8   :  { %11299 = vst [vmem:[#allocation207_spill] sm:$0xff] %v4699_v38 }
  0xe9   :  { %11301 = vst [vmem:[#allocation43_spill] sm:$0xff] %v4704_v50  ;;  %v1208_v50 = vmin.f32 %v1207_v17, %v4651_v28  ;;  %v11329_v17 = vld [vmem:[#allocation76_spill] sm:$0xff]  ;;  %v4791_v28 = vsel %vm4244_vm0, %v4483_v55, 1e+30  ;;  %vm11341_vm0 = vnez %v11272_v54 }
  0xea   :  { %11304 = vst [vmem:[#allocation208_spill] sm:$0xff] %v4709_v1  ;;  %v1165_v1 = vmin.f32 %v1164_v31, %v4734_v39  ;;  %vm11330_vm15 = vnez %v11329_v17  ;;  %v1249_v31 = vmin.f32 %v1248_v11, %v4743_v44 }
  0xeb   :  { %11305 = vst [vmem:[#allocation209_spill] sm:$0xff] %v4719_v52  ;;  %v4782_v56 = vsel %vm11330_vm15, %v11290_v34, 1e+30  ;;  %v1187_v52 = vmin.f32 %v1186_v27, %v4729_v33  ;;  %v11336_v34 = vld [vmem:[#allocation77_spill] sm:$0xff] }
  0xec   :  { %11307 = vst [vmem:[#allocation46_spill] sm:$0xff] %v4724_v18  ;;  %v1209_v18 = vmin.f32 %v1208_v50, %v4699_v38  ;;  %vm11337_vm15 = vnez %v11336_v34  ;;  %v4806_v50 = vsel %vm4253_vm5, %v4519_v62, 1e+30  ;;  %v1250_v27 = vmin.f32 %v1249_v31, %v4767_v21 }
  0xed   :  { %11309 = vst [vmem:[#allocation47_spill] sm:$0xff] %v4729_v33  ;;  %v4801_v11 = vsel %vm11337_vm15, %v11300_v3, 1e+30  ;;  %v4819_v3 = vsel %vm11341_vm0, %v4387_v30, 1e+30  ;;  %vm11355_vm0 = vnez %v11354_v6  ;;  %v11476_v6 = vld [vmem:[#allocation14_spill] sm:$0xff] }
  0xee   :  { %11312 = vst [vmem:[#allocation210_spill] sm:$0xff] %v4734_v39  ;;  %v1166_v39 = vmin.f32 %v1165_v1, %v4758_v19  ;;  %1210 = vmin.xlane.f32.xlu2 %v1209_v18  ;;  %v1188_v1 = vmin.f32 %v1187_v52, %v4748_v26  ;;  %v11346_v18 = vld [vmem:[#allocation80_spill] sm:$0xff] }
  0xef   :  { %11313 = vst [vmem:[#allocation211_spill] sm:$0xff] %v4743_v44  ;;  %v4814_v44 = vsel %vm11270_vm10, %v4385_v8, 1e+30  ;;  %vm11347_vm15 = vnez %v11346_v18 }
  0xf0   :  { %11315 = vst [vmem:[#allocation48_spill] sm:$0xff] %v4748_v26  ;;  %v1167_v33 = vmin.f32 %v1166_v39, %v4782_v56  ;;  %v4829_v52 = vsel %vm11347_vm15, %v11308_v40, 1e+30  ;;  %v11349_v39 = vld [vmem:[#allocation81_spill] sm:$0xff]  ;;  %v1251_v26 = vmin.f32 %v1250_v27, %v4791_v28  ;;  %v4847_v40 = vsel %vm11287_vm1, %v4396_v0, 1e+30 }
  0xf1   :  { %11318 = vst [vmem:[#allocation49_spill] sm:$0xff] %v4753_v29  ;;  %vm11350_vm13 = vnez %v11349_v39  ;;  %v11357_v27 = vld [vmem:[#allocation84_spill] sm:$0xff] }
  0xf2   :  { %11321 = vst [vmem:[#allocation212_spill] sm:$0xff] %v4758_v19  ;;  %v11343_v19 = vld [vmem:[#allocation79_spill] sm:$0xff]  ;;  %v4834_v31 = vsel %vm11350_vm13, %v11314_v48, 1e+30  ;;  %v4852_v48 = vsel %vm11355_vm0, %v11316_v16, 1e+30  ;;  %vm11358_vm10 = vnez %v11357_v27 }
  0xf3   :  { %11322 = vst [vmem:[#allocation213_spill] sm:$0xff] %v4767_v21  ;;  %vm11344_vm5 = vnez %v11343_v19  ;;  %v1189_v21 = vmin.f32 %v1188_v1, %v4753_v29  ;;  %v4857_v1 = vsel %vm11358_vm10, %v11323_v42, 1e+30  ;;  %v1229_v29 = vmin.f32 %v4814_v44, %v4819_v3  ;;  %v11362_v42 = vld [vmem:[#allocation85_spill] sm:$0xff] }
  0xf4   :  { %11325 = vst [vmem:[#allocation50_spill] sm:$0xff] %v4772_v2  ;;  %v4824_v38 = vsel %vm11344_vm5, %v11306_v4, 1e+30  ;;  %v4842_v4 = vsel %vm4259_vm2, %v4531_v43, 1e+30  ;;  %vm11363_vm2 = vnez %v11362_v42 }
  0xf5   :  { %11328 = vst [vmem:[#allocation52_spill] sm:$0xff] %v4777_v14  ;;  %v4872_v16 = vsel %vm11293_vm11, %v4421_v32, 1e+30 }
  0xf6   :  { %11331 = vst [vmem:[#allocation214_spill] sm:$0xff] %v4782_v56  ;;  %v1168_v56 = vmin.f32 %v1167_v33, %v4801_v11  ;;  %v1252_v33 = vmin.f32 %v1251_v26, %v4806_v50  ;;  %v4877_v26 = vsel %vm11363_vm2, %v11326_v59, 1e+30  ;;  %v4896_v59 = vsel %vm11303_vm8, %v4440_v15, 1e+30 }
  0xf7   :  { %11332 = vst [vmem:[#allocation215_spill] sm:$0xff] %v4791_v28  ;;  %v1190_v28 = vmin.f32 %v1189_v21, %v4772_v2 }
  0xf8   :  { %11335 = vst [vmem:[#allocation53_spill] sm:$0xff] %v4796_v53 }
  0xf9   :  { %11338 = vst [vmem:[#allocation216_spill] sm:$0xff] %v4801_v11  ;;  %v1169_v11 = vmin.f32 %v1168_v56, %v4824_v38  ;;  %v1253_v56 = vmin.f32 %v1252_v33, %v4842_v4  ;;  %v1191_v2 = vmin.f32 %v1190_v28, %v4777_v14  ;;  %v4907_v28 = vsel %vm11311_vm12, %v4466_v61, 1e+30 }
  0xfa   :  { %11339 = vst [vmem:[#allocation217_spill] sm:$0xff] %v4806_v50 }
  0xfb   :  { %11340 = vst [vmem:[#allocation218_spill] sm:$0xff] %v4814_v44  ;;  %v1230_v44 = vmin.f32 %v1229_v29, %v4847_v40  ;;  %v1170_v50 = vmin.f32 %v1169_v11, %v4829_v52  ;;  %v1254_v29 = vmin.f32 %v1253_v56, %v4867_v10  ;;  %v1192_v33 = vmin.f32 %v1191_v2, %v4796_v53  ;;  %v11381_v53 = vld [vmem:[#allocation103_spill] sm:$0xff] }
  0xfc   :  { %11342 = vst [vmem:[#allocation219_spill] sm:$0xff] %v4819_v3  ;;  %v11365_v3 = vld [vmem:[#allocation89_spill] sm:$0xff]  ;;  %v4930_v2 = vsel %vm11324_vm4, %v4572_v45, 1e+30  ;;  %vm11382_vm4 = vnez %v11381_v53 }
  0xfd   :  { %11345 = vst [vmem:[#allocation220_spill] sm:$0xff] %v4824_v38  ;;  %vm11366_vm10 = vnez %v11365_v3  ;;  %v4891_v38 = vsel %vm4277_vm7, %v4553_v12, 1e+30  ;;  %v1231_v11 = vmin.f32 %v1230_v44, %v4872_v16  ;;  %vm11372_vm7 = vnez %v11013_v47  ;;  %1193 = vmin.xlane.f32.xlu1 %v1192_v33  ;;  %v11488_v3 = vld [vmem:[#allocation27_spill] sm:$0xff]  ;;  %v11512_v47 = vld [vmem:[#allocation33_spill] sm:$0xff] }
  0xfe   :  { %11348 = vst [vmem:[#allocation221_spill] sm:$0xff] %v4829_v52  ;;  %v4882_v21 = vsel %vm11366_vm10, %v11333_v36, 1e+30  ;;  %v4901_v36 = vsel %vm4300_vm6, %v4555_v5, 1e+30  ;;  %vm11374_vm6 = vnez %v11016_v60  ;;  %v1255_v44 = vmin.f32 %v1254_v29, %v4891_v38  ;;  %v11384_v29 = vld [vmem:[#allocation193_spill] sm:$0xff] }
  0xff   :  { %11351 = vst [vmem:[#allocation222_spill] sm:$0xff] %v4834_v31  ;;  %v4915_v14 = vsel %vm11372_vm7, %v4385_v8, 1e+30  ;;  %v4920_v56 = vsel %vm11374_vm6, %v4387_v30, 1e+30  ;;  %v1232_v8 = vmin.f32 %v1231_v11, %v4896_v59 }
 0x100   :  { %11352 = vst [vmem:[#allocation223_spill] sm:$0xff] %v4842_v4  ;;  %v4938_v30 = vsel %vm11327_vm14, %v4589_v22, 1e+30  ;;  %v4948_v4 = vsel %vm11382_vm4, %v4396_v0, 1e+30  ;;  %vm11387_vm14 = vnez %v11329_v17 }
 0x101   :  { %11353 = vst [vmem:[#allocation224_spill] sm:$0xff] %v4847_v40  ;;  %v1171_v40 = vmin.f32 %v1170_v50, %v4834_v31  ;;  %v4953_v11 = vsel %vm11385_vm3, %v11384_v29, 1e+30  ;;  %v1233_v33 = vmin.f32 %v1232_v8, %v4907_v28  ;;  %v4966_v0 = vsel %vm11387_vm14, %v4519_v62, 1e+30  ;;  %v11391_v8 = vld [vmem:[#allocation107_spill] sm:$0xff] }
 0x102   :  { %11356 = vst [vmem:[#allocation225_spill] sm:$0xff] %v4852_v48  ;;  %vm11389_vm3 = vnez %v11336_v34  ;;  %vm11392_vm4 = vnez %v11391_v8  ;;  %v4990_v31 = vsel %vm11347_vm15, %v4553_v12, 1e+30  ;;  %vm11408_vm15 = vnez %v11272_v54 }
 0x103   :  { %11359 = vst [vmem:[#allocation226_spill] sm:$0xff] %v4857_v1  ;;  %v1172_v50 = vmin.f32 %v1171_v40, %v4852_v48  ;;  %v1256_v40 = vmin.f32 %v1255_v44, %v4901_v36  ;;  %v4971_v44 = vsel %vm11389_vm3, %v4531_v43, 1e+30 }
 0x104   :  { %11360 = vst [vmem:[#allocation227_spill] sm:$0xff] %v4867_v10  ;;  %v4925_v10 = vsel %vm11317_vm9, %v4570_v24, 1e+30  ;;  %vm11379_vm9 = vnez %v11319_v49 }
 0x105   :  { %11361 = vst [vmem:[#allocation228_spill] sm:$0xff] %v4872_v16  ;;  %v4943_v16 = vsel %vm11379_vm9, %v4483_v55, 1e+30  ;;  %v1173_v48 = vmin.f32 %v1172_v50, %v4857_v1  ;;  %v4982_v50 = vsel %vm11344_vm5, %v4551_v46, 1e+30 }
 0x106   :  { %11364 = vst [vmem:[#allocation229_spill] sm:$0xff] %v4877_v26 }
 0x107   :  { %11367 = vst [vmem:[#allocation230_spill] sm:$0xff] %v4882_v21  ;;  %v1174_v1 = vmin.f32 %v1173_v48, %v4877_v26 }
 0x108   :  { %11368 = vst [vmem:[#allocation231_spill] sm:$0xff] %v4891_v38  ;;  %v48_v38 = vld [vmem:[%s9646_s0 + $0x30] sm:$0xff] }
 0x109   :  { %11369 = vst [vmem:[#allocation232_spill] sm:$0xff] %v4896_v59  ;;  %v1212_v59 = vmin.f32 %v4915_v14, %v4920_v56  ;;  %v1175_v48 = vmin.f32 %v1174_v1, %v4882_v21  ;;  %v5015_v25 = vperm.slane %v48_v38, 2  ;;  %v11403_v1 = vld [vmem:[#allocation122_spill] sm:$0xff]  ;;  %v5096_v21 = vsel %vm11366_vm10, %v11384_v29, 1e+30 }
 0x10a   :  { %11370 = vst [vmem:[#allocation233_spill] sm:$0xff] %v4901_v36 }
 0x10b   :  { %11371 = vst [vmem:[#allocation234_spill] sm:$0xff] %v4907_v28  ;;  %v4976_v28 = vsel %vm11392_vm4, %v4421_v32, 1e+30  ;;  %v1213_v36 = vmin.f32 %v1212_v59, %v4948_v4  ;;  %v11396_v32 = vld [vmem:[#allocation111_spill] sm:$0xff]  ;;  %1176 = vmin.xlane.f32.xlu0 %v1175_v48 }
 0x10c   :  { %11373 = vst [vmem:[#allocation235_spill] sm:$0xff] %v4915_v14  ;;  %v1234_v14 = vmin.f32 %v1233_v33, %v4943_v16  ;;  %vm11397_vm4 = vnez %v11396_v32 }
 0x10d   :  { %11375 = vst [vmem:[#allocation236_spill] sm:$0xff] %v4920_v56  ;;  %v1257_v56 = vmin.f32 %v1256_v40, %v4925_v10  ;;  %v4995_v40 = vsel %vm11397_vm4, %v4440_v15, 1e+30  ;;  %v1214_v59 = vmin.f32 %v1213_v36, %v4976_v28  ;;  %v11400_v15 = vld [vmem:[#allocation117_spill] sm:$0xff] }
 0x10e   :  { %11376 = vst [vmem:[#allocation237_spill] sm:$0xff] %v4925_v10  ;;  %v4997_v10 = vperm.slane %v48_v38, 0  ;;  %v1235_v33 = vmin.f32 %v1234_v14, %v4966_v0  ;;  %vm11401_vm4 = vnez %v11400_v15 }
 0x10f   :  { %11377 = vst [vmem:[#allocation238_spill] sm:$0xff] %v4930_v2  ;;  %v1258_v52 = vmin.f32 %v1257_v56, %v4930_v2  ;;  %v5013_v26 = vsel %vm11401_vm4, %v4466_v61, 1e+30  ;;  %v1215_v56 = vmin.f32 %v1214_v59, %v4995_v40  ;;  %v5027_v2 = vperm.slane %v48_v38, 4 }
 0x110   :  { %11378 = vst [vmem:[#allocation239_spill] sm:$0xff] %v4938_v30  ;;  %v1236_v36 = vmin.f32 %v1235_v33, %v4971_v44  ;;  %vm11406_vm4 = vnez %v11269_v51 }
 0x111   :  { %11380 = vst [vmem:[#allocation240_spill] sm:$0xff] %v4943_v16  ;;  %v5002_v16 = vperm.slane %v48_v38, 1  ;;  %v1259_v14 = vmin.f32 %v1258_v52, %v4938_v30  ;;  %v5032_v61 = vsel %vm11406_vm4, %v4997_v10, 1e+30  ;;  %v1216_v59 = vmin.f32 %v1215_v56, %v5013_v26 }
 0x112   :  { %11383 = vst [vmem:[#allocation241_spill] sm:$0xff] %v4948_v4  ;;  %v5008_v4 = vsel %vm11350_vm13, %v4555_v5, 1e+30  ;;  %vm11404_vm13 = vnez %v11403_v1  ;;  %v1237_v33 = vmin.f32 %v1236_v36, %v4982_v50  ;;  %v5091_v30 = vsel %vm11303_vm8, %v5027_v2, 1e+30 }
 0x113   :  { %11386 = vst [vmem:[#allocation193_spill] sm:$0xff] %v4953_v11  ;;  %v1260_v52 = vmin.f32 %v1259_v14, %v4953_v11  ;;  %v5040_v48 = vsel %vm11408_vm15, %v5002_v16, 1e+30  ;;  %v5055_v14 = vsel %vm11287_vm1, %v5015_v25, 1e+30  ;;  %vm11416_vm15 = vnez %v11357_v27 }
 0x114   :  { %11388 = vst [vmem:[#allocation242_spill] sm:$0xff] %v4966_v0  ;;  %v5020_v0 = vperm.slane %v48_v38, 3  ;;  %v1297_v36 = vmin.f32 %v5032_v61, %v5040_v48  ;;  %v1238_v56 = vmin.f32 %v1237_v33, %v4990_v31  ;;  %v5071_v11 = vsel %vm11416_vm15, %v4572_v45, 1e+30  ;;  %v11419_v33 = vld [vmem:[#allocation126_spill] sm:$0xff] }
 0x115   :  { %11390 = vst [vmem:[#allocation243_spill] sm:$0xff] %v4971_v44  ;;  %v11411_v44 = vld [vmem:[#allocation11_spill] sm:$0xff]  ;;  %1261 = vmin.xlane.f32.xlu2 %v1260_v52  ;;  %v5076_v52 = vsel %vm11363_vm2, %v4589_v22, 1e+30  ;;  %vm11420_vm1 = vnez %v11419_v33 }
 0x116   :  { %11393 = vst [vmem:[#allocation244_spill] sm:$0xff] %v4976_v28  ;;  %v5025_v28 = vsel %vm11404_vm13, %v4483_v55, 1e+30  ;;  %v5045_v55 = vsel %vm11355_vm0, %v4570_v24, 1e+30  ;;  %vm11412_vm4 = vnez %v11411_v44  ;;  %v11537_v44 = vld [vmem:[#allocation39_spill] sm:$0xff] }
 0x117   :  { %11394 = vst [vmem:[#allocation245_spill] sm:$0xff] %v4982_v50  ;;  %v1217_v50 = vmin.f32 %v1216_v59, %v5025_v28  ;;  %v5081_v59 = vsel %vm11420_vm1, %v4531_v43, 1e+30  ;;  %v11424_v43 = vld [vmem:[#allocation15_spill] sm:$0xff] }
 0x118   :  { %11395 = vst [vmem:[#allocation246_spill] sm:$0xff] %v4990_v31  ;;  %v1298_v31 = vmin.f32 %v1297_v36, %v5055_v14 }
 0x119   :  { %11398 = vst [vmem:[#allocation247_spill] sm:$0xff] %v4995_v40  ;;  %v5050_v40 = vsel %vm11412_vm4, %v4519_v62, 1e+30  ;;  %v5066_v62 = vsel %vm11293_vm11, %v5020_v0, 1e+30  ;;  %vm11425_vm11 = vnez %v11424_v43 }
 0x11a   :  { %11399 = vst [vmem:[#allocation248_spill] sm:$0xff] %v5008_v4  ;;  %v5101_v36 = vsel %vm11425_vm11, %v4551_v46, 1e+30  ;;  %vm11432_vm11 = vnez %v11431_v63 }
 0x11b   :  { %11402 = vst [vmem:[#allocation249_spill] sm:$0xff] %v5013_v26  ;;  %v5061_v26 = vperm.slane %v48_v38, 5 }
 0x11c   :  { %11405 = vst [vmem:[#allocation250_spill] sm:$0xff] %v5025_v28  ;;  %v5086_v28 = vperm.slane %v48_v38, 6 }
 0x11d   :  { %11407 = vst [vmem:[#allocation251_spill] sm:$0xff] %v5032_v61  ;;  %v1218_v61 = vmin.f32 %v1217_v50, %v5050_v40  ;;  %v49_v50 = vld [vmem:[%s9646_s0 + $0x38] sm:$0xff]  ;;  %v5119_v46 = vsel %vm11311_vm12, %v5061_v26, 1e+30 }
 0x11e   :  { %11409 = vst [vmem:[#allocation252_spill] sm:$0xff] %v5040_v48  ;;  %v1239_v48 = vmin.f32 %v1238_v56, %v5008_v4  ;;  %v5106_v56 = vperm.slane %v48_v38, 7  ;;  %v1299_v4 = vmin.f32 %v1298_v31, %v5066_v62  ;;  %v5124_v38 = vsel %vm11432_vm11, %v4555_v5, 1e+30  ;;  %v11434_v31 = vld [vmem:[#allocation19_spill] sm:$0xff] }
 0x11f   :  { %11410 = vst [vmem:[#allocation253_spill] sm:$0xff] %v5045_v55  ;;  %v1219_v7 = vmin.f32 %v1218_v61, %v5081_v59  ;;  %vm11435_vm1 = vnez %v11434_v31  ;;  %v5139_v35 = vperm.slane %v49_v50, 0  ;;  %v5144_v5 = vsel %vm11379_vm9, %v5086_v28, 1e+30 }
 0x120   :  { %11413 = vst [vmem:[#allocation254_spill] sm:$0xff] %v5050_v40  ;;  %v11427_v40 = vld [vmem:[#allocation16_spill] sm:$0xff]  ;;  %v1300_v61 = vmin.f32 %v1299_v4, %v5091_v30  ;;  %v5156_v4 = vsel %vm11387_vm14, %v5106_v56, 1e+30  ;;  %vm11453_vm9 = vnez %v11381_v53  ;;  %v5193_v49 = vperm.slane %v49_v50, 4 }
 0x121   :  { %11414 = vst [vmem:[#allocation255_spill] sm:$0xff] %v5055_v14  ;;  %v1240_v14 = vmin.f32 %v1239_v48, %v5045_v55  ;;  %vm11428_vm8 = vnez %v11427_v40  ;;  %v5129_v48 = vsel %vm11435_vm1, %v4570_v24, 1e+30  ;;  %v11441_v24 = vld [vmem:[#allocation26_spill] sm:$0xff]  ;;  %v5195_v51 = vperm.slane %v49_v50, 5 }
 0x122   :  { %11415 = vst [vmem:[#allocation256_spill] sm:$0xff] %v5066_v62  ;;  %v5113_v13 = vsel %vm11428_vm8, %v4553_v12, 1e+30  ;;  %v11437_v12 = vld [vmem:[#allocation25_spill] sm:$0xff]  ;;  %vm11442_vm12 = vnez %v11441_v24  ;;  %v5213_v34 = vperm.slane %v49_v50, 7 }
 0x123   :  { %11417 = vst [vmem:[#allocation257_spill] sm:$0xff] %v5071_v11  ;;  %vm11438_vm8 = vnez %v11437_v12  ;;  %v1241_v62 = vmin.f32 %v1240_v14, %v5071_v11  ;;  %v5149_v54 = vsel %vm11442_vm12, %v4589_v22, 1e+30  ;;  %v5169_v22 = vsel %vm11374_vm6, %v5002_v16, 1e+30 }
 0x124   :  { %11418 = vst [vmem:[#allocation258_spill] sm:$0xff] %v5076_v52  ;;  %v5134_v55 = vsel %vm11438_vm8, %v4572_v45, 1e+30  ;;  %v5151_v45 = vperm.slane %v49_v50, 1  ;;  %vm11470_vm8 = vnez %v11349_v39  ;;  %v5282_v27 = vsel %vm11366_vm10, %v5213_v34, 1e+30 }
 0x125   :  { %11421 = vst [vmem:[#allocation259_spill] sm:$0xff] %v5081_v59  ;;  %v1220_v59 = vmin.f32 %v1219_v7, %v5101_v36  ;;  %v1301_v7 = vmin.f32 %v1300_v61, %v5119_v46  ;;  %v1242_v14 = vmin.f32 %v1241_v62, %v5076_v52  ;;  %v5176_v61 = vperm.slane %v49_v50, 2 }
 0x126   :  { %11422 = vst [vmem:[#allocation260_spill] sm:$0xff] %v5091_v30  ;;  %v5164_v30 = vsel %vm11372_vm7, %v4997_v10, 1e+30  ;;  %v5178_v62 = vperm.slane %v49_v50, 3  ;;  %vm11486_vm10 = vnez %v11419_v33 }
 0x127   :  { %11423 = vst [vmem:[#allocation261_spill] sm:$0xff] %v5096_v21  ;;  %v1221_v11 = vmin.f32 %v1220_v59, %v5113_v13  ;;  %v1302_v59 = vmin.f32 %v1301_v7, %v5144_v5  ;;  %v1243_v52 = vmin.f32 %v1242_v14, %v5096_v21  ;;  %v1280_v14 = vmin.f32 %v5164_v30, %v5169_v22 }
 0x128   :  { %11426 = vst [vmem:[#allocation262_spill] sm:$0xff] %v5101_v36  ;;  %v11448_v36 = vld [vmem:[#allocation133_spill] sm:$0xff]  ;;  %v5201_v21 = vperm.slane %v49_v50, 6  ;;  %v5386_v53 = vsel %vm11432_vm11, %v5178_v62, 1e+30 }
 0x129   :  { %11429 = vst [vmem:[#allocation263_spill] sm:$0xff] %v5113_v13  ;;  %vm11449_vm14 = vnez %v11448_v36  ;;  %v5186_v13 = vsel %vm11389_vm3, %v5139_v35, 1e+30  ;;  %v1303_v7 = vmin.f32 %v1302_v59, %v5156_v4  ;;  %1244 = vmin.xlane.f32.xlu1 %v1243_v52  ;;  %vm11458_vm3 = vnez %v11391_v8 }
 0x12a   :  { %11430 = vst [vmem:[#allocation264_spill] sm:$0xff] %v5119_v46  ;;  %v5174_v17 = vsel %vm11449_vm14, %v11384_v29, 1e+30  ;;  %v1222_v46 = vmin.f32 %v1221_v11, %v5124_v38  ;;  %v5191_v29 = vsel %vm11453_vm9, %v5015_v25, 1e+30  ;;  %vm11460_vm14 = vnez %v11346_v18 }
 0x12b   :  { %11433 = vst [vmem:[#allocation265_spill] sm:$0xff] %v5124_v38  ;;  %v5211_v38 = vsel %vm11458_vm3, %v5020_v0, 1e+30  ;;  %v5218_v52 = vsel %vm11460_vm14, %v5176_v61, 1e+30  ;;  %v1281_v59 = vmin.f32 %v1280_v14, %v5191_v29 }
 0x12c   :  { %11436 = vst [vmem:[#allocation266_spill] sm:$0xff] %v5129_v48  ;;  %v1223_v11 = vmin.f32 %v1222_v46, %v5129_v48  ;;  %v1304_v46 = vmin.f32 %v1303_v7, %v5186_v13  ;;  %v11467_v48 = vld [vmem:[#allocation13_spill] sm:$0xff]  ;;  %v5241_v7 = vsel %vm11470_vm8, %v5178_v62, 1e+30  ;;  %v5246_v14 = vsel %vm11355_vm0, %v5193_v49, 1e+30 }
 0x12d   :  { %11439 = vst [vmem:[#allocation267_spill] sm:$0xff] %v5134_v55  ;;  %vm11468_vm14 = vnez %v11467_v48  ;;  %vm11474_vm8 = vnez %v11400_v15  ;;  %vm11477_vm0 = vnez %v11476_v6 }
 0x12e   :  { %11440 = vst [vmem:[#allocation268_spill] sm:$0xff] %v5144_v5  ;;  %v5206_v5 = vsel %vm11344_vm5, %v5151_v45, 1e+30  ;;  %vm11462_vm5 = vnez %v11396_v32  ;;  %v5236_v18 = vsel %vm11468_vm14, %v5002_v16, 1e+30 }
 0x12f   :  { %11443 = vst [vmem:[#allocation269_spill] sm:$0xff] %v5149_v54  ;;  %v5259_v39 = vsel %vm11474_vm8, %v5061_v26, 1e+30  ;;  %v5264_v19 = vsel %vm11477_vm0, %v5015_v25, 1e+30  ;;  %vm11500_vm0 = vnez %v11499_v58 }
 0x130   :  { %11444 = vst [vmem:[#allocation270_spill] sm:$0xff] %v5151_v45 }
 0x131   :  { %11445 = vst [vmem:[#allocation271_spill] sm:$0xff] %v5156_v4  ;;  %v11464_v4 = vld [vmem:[#allocation12_spill] sm:$0xff] }
 0x132   :  { %11446 = vst [vmem:[#allocation272_spill] sm:$0xff] %v5164_v30  ;;  %v5226_v30 = vsel %vm11462_vm5, %v5027_v2, 1e+30  ;;  %vm11465_vm12 = vnez %v11464_v4 }
 0x133   :  { %11447 = vst [vmem:[#allocation273_spill] sm:$0xff] %v5169_v22  ;;  %v1224_v22 = vmin.f32 %v1223_v11, %v5134_v55  ;;  %v5231_v50 = vsel %vm11465_vm12, %v4997_v10, 1e+30  ;;  %v1305_v11 = vmin.f32 %v1304_v46, %v5206_v5  ;;  %v5254_v55 = vsel %vm11416_vm15, %v5195_v51, 1e+30 }
 0x134   :  { %11450 = vst [vmem:[#allocation274_spill] sm:$0xff] %v5174_v17  ;;  %v5269_v46 = vsel %vm11363_vm2, %v5201_v21, 1e+30  ;;  %vm11489_vm15 = vnez %v11488_v3 }
 0x135   :  { %11451 = vst [vmem:[#allocation275_spill] sm:$0xff] %v5176_v61  ;;  %v5310_v42 = vsel %vm11489_vm15, %v5027_v2, 1e+30 }
 0x136   :  { %11452 = vst [vmem:[#allocation276_spill] sm:$0xff] %v5186_v13  ;;  %v1225_v13 = vmin.f32 %v1224_v22, %v5149_v54  ;;  %v1306_v22 = vmin.f32 %v1305_v11, %v5218_v52  ;;  %v5287_v11 = vsel %vm11404_vm13, %v5086_v28, 1e+30 }
 0x137   :  { %11454 = vst [vmem:[#allocation277_spill] sm:$0xff] %v5191_v29  ;;  %v1282_v29 = vmin.f32 %v1281_v59, %v5211_v38 }
 0x138   :  { %11455 = vst [vmem:[#allocation278_spill] sm:$0xff] %v5193_v49  ;;  %v1226_v54 = vmin.f32 %v1225_v13, %v5174_v17  ;;  %v5298_v13 = vsel %vm11412_vm4, %v5106_v56, 1e+30  ;;  %v5305_v17 = vsel %vm11486_vm10, %v5139_v35, 1e+30 }
 0x139   :  { %11456 = vst [vmem:[#allocation279_spill] sm:$0xff] %v5195_v51  ;;  %v1283_v59 = vmin.f32 %v1282_v29, %v5226_v30  ;;  %v11482_v29 = vld [vmem:[#allocation20_spill] sm:$0xff] }
 0x13a   :  { %11457 = vst [vmem:[#allocation280_spill] sm:$0xff] %v5206_v5  ;;  %v50_v5 = vld [vmem:[%s9646_s0 + $0x40] sm:$0xff]  ;;  %vm11483_vm2 = vnez %v11482_v29  ;;  %1227 = vmin.xlane.f32.xlu0 %v1226_v54 }
 0x13b   :  { %11459 = vst [vmem:[#allocation281_spill] sm:$0xff] %v5211_v38  ;;  %v1263_v38 = vmin.f32 %v5231_v50, %v5236_v18 }
 0x13c   :  { %11461 = vst [vmem:[#allocation282_spill] sm:$0xff] %v5218_v52 }
 0x13d   :  { %11463 = vst [vmem:[#allocation283_spill] sm:$0xff] %v5226_v30  ;;  %v5292_v30 = vsel %vm11483_vm2, %v5020_v0, 1e+30  ;;  %v1264_v52 = vmin.f32 %v1263_v38, %v5264_v19  ;;  %v5319_v38 = vperm.slane %v50_v5, 2  ;;  %vm11494_vm2 = vnez %v11424_v43 }
 0x13e   :  { %11466 = vst [vmem:[#allocation284_spill] sm:$0xff] %v5231_v50  ;;  %v1284_v50 = vmin.f32 %v1283_v59, %v5259_v39 }
 0x13f   :  { %11469 = vst [vmem:[#allocation285_spill] sm:$0xff] %v5236_v18  ;;  %v1307_v18 = vmin.f32 %v1306_v22, %v5241_v7  ;;  %v5312_v22 = vperm.slane %v50_v5, 0  ;;  %v1265_v54 = vmin.f32 %v1264_v52, %v5292_v30 }
 0x140   :  { %11471 = vst [vmem:[#allocation286_spill] sm:$0xff] %v5241_v7  ;;  %v5314_v7 = vperm.slane %v50_v5, 1  ;;  %v1285_v59 = vmin.f32 %v1284_v50, %v5287_v11 }
 0x141   :  { %11472 = vst [vmem:[#allocation287_spill] sm:$0xff] %v5246_v14  ;;  %v1308_v23 = vmin.f32 %v1307_v18, %v5246_v14  ;;  %v5334_v18 = vsel %vm11500_vm0, %v5086_v28, 1e+30  ;;  %v5341_v14 = vperm.slane %v50_v5, 4  ;;  %v5346_v37 = vsel %vm11372_vm7, %v5312_v22, 1e+30 }
 0x142   :  { %11473 = vst [vmem:[#allocation288_spill] sm:$0xff] %v5254_v55  ;;  %v1286_v52 = vmin.f32 %v1285_v59, %v5298_v13  ;;  %v5351_v20 = vsel %vm11374_vm6, %v5314_v7, 1e+30  ;;  %vm11505_vm7 = vnez %v11427_v40  ;;  %v11600_v40 = vld [vmem:[#allocation146_spill] sm:$0xff] }
 0x143   :  { %11475 = vst [vmem:[#allocation289_spill] sm:$0xff] %v5259_v39  ;;  %v5324_v39 = vsel %vm11494_vm2, %v5151_v45, 1e+30  ;;  %v1309_v50 = vmin.f32 %v1308_v23, %v5254_v55  ;;  %v11507_v55 = vld [vmem:[#allocation32_spill] sm:$0xff] }
 0x144   :  { %11478 = vst [vmem:[#allocation290_spill] sm:$0xff] %v5264_v19  ;;  %v11496_v19 = vld [vmem:[#allocation28_spill] sm:$0xff]  ;;  %v1287_v59 = vmin.f32 %v1286_v52, %v5305_v17  ;;  %vm11508_vm6 = vnez %v11507_v55 }
 0x145   :  { %11479 = vst [vmem:[#allocation291_spill] sm:$0xff] %v5269_v46  ;;  %vm11497_vm15 = vnez %v11496_v19  ;;  %v1310_v23 = vmin.f32 %v1309_v50, %v5269_v46  ;;  %v5369_v60 = vsel %vm11508_vm6, %v5106_v56, 1e+30  ;;  %v5371_v50 = vperm.slane %v50_v5, 5 }
 0x146   :  { %11480 = vst [vmem:[#allocation292_spill] sm:$0xff] %v5282_v27  ;;  %v5329_v41 = vsel %vm11497_vm15, %v5061_v26, 1e+30 }
 0x147   :  { %11481 = vst [vmem:[#allocation293_spill] sm:$0xff] %v5287_v11  ;;  %v1266_v11 = vmin.f32 %v1265_v54, %v5310_v42  ;;  %v1311_v52 = vmin.f32 %v1310_v23, %v5282_v27  ;;  %v11517_v27 = vld [vmem:[#allocation34_spill] sm:$0xff]  ;;  %v5429_v32 = vsel %vm11474_vm8, %v5371_v50, 1e+30  ;;  %vm11532_vm8 = vnez %v11531_v57 }
 0x148   :  { %11484 = vst [vmem:[#allocation294_spill] sm:$0xff] %v5292_v30  ;;  %v5339_v30 = vperm.slane %v50_v5, 3 }
 0x149   :  { %11485 = vst [vmem:[#allocation295_spill] sm:$0xff] %v5298_v13  ;;  %v1267_v54 = vmin.f32 %v1266_v11, %v5329_v41  ;;  %v5359_v13 = vsel %vm11453_vm9, %v5319_v38, 1e+30  ;;  %v1348_v11 = vmin.f32 %v5346_v37, %v5351_v20  ;;  %vm11513_vm9 = vnez %v11512_v47  ;;  %1312 = vmin.xlane.f32.xlu2 %v1311_v52 }
 0x14a   :  { %11487 = vst [vmem:[#allocation296_spill] sm:$0xff] %v5305_v17  ;;  %v1288_v17 = vmin.f32 %v1287_v59, %v5324_v39  ;;  %v5381_v46 = vsel %vm11458_vm3, %v5339_v30, 1e+30  ;;  %vm11518_vm3 = vnez %v11517_v27 }
 0x14b   :  { %11490 = vst [vmem:[#allocation297_spill] sm:$0xff] %v5310_v42  ;;  %v5364_v42 = vsel %vm11505_vm7, %v5176_v61, 1e+30  ;;  %v1349_v23 = vmin.f32 %v1348_v11, %v5359_v13  ;;  %v5411_v11 = vsel %vm11518_vm3, %v5151_v45, 1e+30  ;;  %vm11523_vm3 = vnez %v11441_v24 }
 0x14c   :  { %11491 = vst [vmem:[#allocation298_spill] sm:$0xff] %v5312_v22  ;;  %v1289_v59 = vmin.f32 %v1288_v17, %v5364_v42  ;;  %v5416_v17 = vperm.slane %v50_v5, 7  ;;  %v5459_v45 = vsel %vm11532_vm8, %v5178_v62, 1e+30 }
 0x14d   :  { %11492 = vst [vmem:[#allocation299_spill] sm:$0xff] %v5314_v7  ;;  %v1350_v52 = vmin.f32 %v1349_v23, %v5381_v46 }
 0x14e   :  { %11493 = vst [vmem:[#allocation300_spill] sm:$0xff] %v5319_v38 }
 0x14f   :  { %11495 = vst [vmem:[#allocation301_spill] sm:$0xff] %v5324_v39  ;;  %v5396_v39 = vperm.slane %v50_v5, 6  ;;  %v5434_v5 = vsel %vm11523_vm3, %v5201_v21, 1e+30 }
 0x150   :  { %11498 = vst [vmem:[#allocation302_spill] sm:$0xff] %v5329_v41  ;;  %v1268_v41 = vmin.f32 %v1267_v54, %v5334_v18 }
 0x151   :  { %11501 = vst [vmem:[#allocation303_spill] sm:$0xff] %v5334_v18  ;;  %v5401_v18 = vsel %vm11462_vm5, %v5341_v14, 1e+30  ;;  %vm11520_vm5 = vnez %v11437_v12  ;;  %v5454_v8 = vsel %vm11404_vm13, %v5396_v39, 1e+30 }
 0x152   :  { %11502 = vst [vmem:[#allocation304_spill] sm:$0xff] %v5346_v37  ;;  %v1269_v54 = vmin.f32 %v1268_v41, %v5369_v60  ;;  %v5406_v37 = vsel %vm11435_vm1, %v5193_v49, 1e+30  ;;  %v51_v41 = vld [vmem:[%s9646_s0 + $0x48] sm:$0xff] }
 0x153   :  { %11503 = vst [vmem:[#allocation305_spill] sm:$0xff] %v5351_v20  ;;  %v5391_v20 = vsel %vm11513_vm9, %v5139_v35, 1e+30  ;;  %vm11525_vm9 = vnez %v11448_v36  ;;  %v5449_v15 = vperm.slane %v51_v41, 0 }
 0x154   :  { %11504 = vst [vmem:[#allocation306_spill] sm:$0xff] %v5359_v13  ;;  %v1290_v13 = vmin.f32 %v1289_v59, %v5386_v53  ;;  %v5439_v23 = vsel %vm11525_vm9, %v5213_v34, 1e+30 }
 0x155   :  { %11506 = vst [vmem:[#allocation307_spill] sm:$0xff] %v5364_v42  ;;  %v5422_v42 = vsel %vm11520_vm5, %v5195_v51, 1e+30 }
 0x156   :  { %11509 = vst [vmem:[#allocation308_spill] sm:$0xff] %v5369_v60  ;;  %v1270_v60 = vmin.f32 %v1269_v54, %v5391_v20  ;;  %v1351_v54 = vmin.f32 %v1350_v52, %v5401_v18 }
 0x157   :  { %11510 = vst [vmem:[#allocation309_spill] sm:$0xff] %v5381_v46  ;;  %v11527_v46 = vld [vmem:[#allocation35_spill] sm:$0xff] }
 0x158   :  { %11511 = vst [vmem:[#allocation310_spill] sm:$0xff] %v5386_v53  ;;  %vm11528_vm6 = vnez %v11527_v46  ;;  %v1291_v53 = vmin.f32 %v1290_v13, %v5406_v37  ;;  %v5466_v13 = vsel %vm11412_vm4, %v5416_v17, 1e+30  ;;  %vm11538_vm4 = vnez %v11537_v44 }
 0x159   :  { %11514 = vst [vmem:[#allocation311_spill] sm:$0xff] %v5391_v20  ;;  %v5444_v59 = vsel %vm11528_vm6, %v5176_v61, 1e+30  ;;  %v1271_v20 = vmin.f32 %v1270_v60, %v5411_v11  ;;  %v5461_v61 = vperm.slane %v51_v41, 1  ;;  %v1352_v60 = vmin.f32 %v1351_v54, %v5429_v32  ;;  %v11540_v54 = vld [vmem:[#allocation40_spill] sm:$0xff] }
 0x15a   :  { %11515 = vst [vmem:[#allocation312_spill] sm:$0xff] %v5401_v18  ;;  %v1292_v52 = vmin.f32 %v1291_v53, %v5422_v42  ;;  %v5474_v18 = vsel %vm11465_vm12, %v5312_v22, 1e+30  ;;  %v5484_v1 = vsel %vm11538_vm4, %v5193_v49, 1e+30  ;;  %vm11541_vm13 = vnez %v11540_v54 }
 0x15b   :  { %11516 = vst [vmem:[#allocation313_spill] sm:$0xff] %v5406_v37  ;;  %v1272_v37 = vmin.f32 %v1271_v20, %v5444_v59  ;;  %v5489_v53 = vsel %vm11541_vm13, %v5195_v51, 1e+30  ;;  %v5491_v20 = vperm.slane %v51_v41, 2  ;;  %v11546_v51 = vld [vmem:[#allocation41_spill] sm:$0xff] }
 0x15c   :  { %11519 = vst [vmem:[#allocation314_spill] sm:$0xff] %v5411_v11  ;;  %v5479_v11 = vsel %vm11468_vm14, %v5314_v7, 1e+30  ;;  %v5499_v7 = vsel %vm11486_vm10, %v5449_v15, 1e+30  ;;  %vm11544_vm14 = vnez %v11476_v6  ;;  %vm11547_vm12 = vnez %v11546_v51 }
 0x15d   :  { %11521 = vst [vmem:[#allocation315_spill] sm:$0xff] %v5422_v42  ;;  %v1353_v42 = vmin.f32 %v1352_v60, %v5454_v8  ;;  %v5504_v22 = vsel %vm11544_vm14, %v5319_v38, 1e+30  ;;  %v5509_v49 = vsel %vm11547_vm12, %v5201_v21, 1e+30  ;;  %v5511_v60 = vperm.slane %v51_v41, 3 }
 0x15e   :  { %11522 = vst [vmem:[#allocation316_spill] sm:$0xff] %v5429_v32  ;;  %v1293_v32 = vmin.f32 %v1292_v52, %v5434_v5  ;;  %vm11551_vm10 = vnez %v11482_v29  ;;  %v11553_v38 = vld [vmem:[#allocation45_spill] sm:$0xff]  ;;  %v5664_v12 = vsel %vm11528_vm6, %v5491_v20, 1e+30  ;;  %vm11597_vm6 = vnez %v11145_v9 }
 0x15f   :  { %11524 = vst [vmem:[#allocation317_spill] sm:$0xff] %v5434_v5  ;;  %v1354_v52 = vmin.f32 %v1353_v42, %v5466_v13  ;;  %v5526_v33 = vsel %vm11551_vm10, %v5339_v30, 1e+30  ;;  %vm11554_vm14 = vnez %v11553_v38 }
 0x160   :  { %11526 = vst [vmem:[#allocation318_spill] sm:$0xff] %v5439_v23  ;;  %v1294_v5 = vmin.f32 %v1293_v32, %v5439_v23  ;;  %v5531_v42 = vsel %vm11554_vm14, %v5213_v34, 1e+30  ;;  %v5538_v23 = vperm.slane %v51_v41, 5 }
 0x161   :  { %11529 = vst [vmem:[#allocation319_spill] sm:$0xff] %v5444_v59  ;;  %v1273_v59 = vmin.f32 %v1272_v37, %v5459_v45  ;;  %v1331_v37 = vmin.f32 %v5474_v18, %v5479_v11  ;;  %v1355_v32 = vmin.f32 %v1354_v52, %v5499_v7 }
 0x162   :  { %11530 = vst [vmem:[#allocation320_spill] sm:$0xff] %v5454_v8  ;;  %1295 = vmin.xlane.f32.xlu1 %v1294_v5  ;;  %v11561_v5 = vld [vmem:[#allocation131_spill] sm:$0xff]  ;;  %v5690_v31 = vsel %vm11541_vm13, %v5538_v23, 1e+30  ;;  %vm11605_vm13 = vnez %v11467_v48  ;;  %v11614_v48 = vld [vmem:[#allocation149_spill] sm:$0xff] }
 0x163   :  { %11533 = vst [vmem:[#allocation321_spill] sm:$0xff] %v5459_v45  ;;  %v1274_v8 = vmin.f32 %v1273_v59, %v5484_v1  ;;  %v5521_v45 = vsel %vm11494_vm2, %v5461_v61, 1e+30  ;;  %v1332_v59 = vmin.f32 %v1331_v37, %v5504_v22  ;;  %vm11559_vm2 = vnez %v11488_v3  ;;  %v11564_v37 = vld [vmem:[#allocation132_spill] sm:$0xff] }
 0x164   :  { %11534 = vst [vmem:[#allocation322_spill] sm:$0xff] %v5466_v13  ;;  %v5543_v13 = vsel %vm11505_vm7, %v5491_v20, 1e+30  ;;  %v1356_v43 = vmin.f32 %v1355_v32, %v5521_v45  ;;  %vm11562_vm10 = vnez %v11561_v5  ;;  %vm11565_vm14 = vnez %v11564_v37 }
 0x165   :  { %11535 = vst [vmem:[#allocation323_spill] sm:$0xff] %v5474_v18  ;;  %v1275_v18 = vmin.f32 %v1274_v8, %v5489_v53  ;;  %v1333_v52 = vmin.f32 %v1332_v59, %v5526_v33  ;;  %v5555_v8 = vsel %vm11562_vm10, %v4997_v10, 1e+30  ;;  %v5568_v32 = vsel %vm11432_vm11, %v5511_v60, 1e+30 }
 0x166   :  { %11536 = vst [vmem:[#allocation324_spill] sm:$0xff] %v5479_v11  ;;  %v5533_v11 = vperm.slane %v51_v41, 4  ;;  %v5573_v59 = vsel %vm11497_vm15, %v5371_v50, 1e+30  ;;  %v5575_v10 = vperm.slane %v51_v41, 7 }
 0x167   :  { %11539 = vst [vmem:[#allocation325_spill] sm:$0xff] %v5484_v1  ;;  %v5548_v1 = vsel %vm11559_vm2, %v5341_v14, 1e+30 }
 0x168   :  { %11542 = vst [vmem:[#allocation326_spill] sm:$0xff] %v5489_v53  ;;  %v5563_v53 = vperm.slane %v51_v41, 6  ;;  %v5588_v63 = vsel %vm11435_vm1, %v5533_v11, 1e+30  ;;  %v5593_v41 = vsel %vm11500_vm0, %v5396_v39, 1e+30  ;;  %vm11581_vm1 = vnez %v11507_v55 }
 0x169   :  { %11543 = vst [vmem:[#allocation327_spill] sm:$0xff] %v5499_v7  ;;  %v1276_v7 = vmin.f32 %v1275_v18, %v5509_v49  ;;  %v11571_v18 = vld [vmem:[#allocation137_spill] sm:$0xff] }
 0x16a   :  { %11545 = vst [vmem:[#allocation328_spill] sm:$0xff] %v5504_v22  ;;  %v5560_v22 = vsel %vm11565_vm14, %v5002_v16, 1e+30  ;;  %v1334_v16 = vmin.f32 %v1333_v52, %v5548_v1  ;;  %vm11572_vm7 = vnez %v11571_v18 }
 0x16b   :  { %11548 = vst [vmem:[#allocation329_spill] sm:$0xff] %v5509_v49  ;;  %v1277_v49 = vmin.f32 %v1276_v7, %v5531_v42 }
 0x16c   :  { %11549 = vst [vmem:[#allocation330_spill] sm:$0xff] %v5511_v60 }
 0x16d   :  { %11550 = vst [vmem:[#allocation331_spill] sm:$0xff] %v5521_v45  ;;  %v5582_v45 = vsel %vm11572_vm7, %v5015_v25, 1e+30  ;;  %v1335_v25 = vmin.f32 %v1334_v16, %v5573_v59  ;;  %1278 = vmin.xlane.f32.xlu0 %v1277_v49  ;;  %v5628_v49 = vsel %vm11525_vm9, %v5575_v10, 1e+30 }
 0x16e   :  { %11552 = vst [vmem:[#allocation332_spill] sm:$0xff] %v5526_v33  ;;  %v1357_v33 = vmin.f32 %v1356_v43, %v5543_v13  ;;  %v1314_v43 = vmin.f32 %v5555_v8, %v5560_v22 }
 0x16f   :  { %11555 = vst [vmem:[#allocation333_spill] sm:$0xff] %v5531_v42  ;;  %v5612_v42 = vsel %vm11520_vm5, %v5538_v23, 1e+30  ;;  %vm11587_vm5 = vnez %v11512_v47 }
 0x170   :  { %11556 = vst [vmem:[#allocation334_spill] sm:$0xff] %v5533_v11  ;;  %v1358_v52 = vmin.f32 %v1357_v33, %v5568_v32  ;;  %v5617_v33 = vsel %vm11523_vm3, %v5563_v53, 1e+30  ;;  %v1315_v16 = vmin.f32 %v1314_v43, %v5582_v45  ;;  %v5640_v24 = vsel %vm11587_vm5, %v5449_v15, 1e+30 }
 0x171   :  { %11557 = vst [vmem:[#allocation335_spill] sm:$0xff] %v5538_v23  ;;  %v11620_v23 = vld [vmem:[#allocation150_spill] sm:$0xff] }
 0x172   :  { %11558 = vst [vmem:[#allocation336_spill] sm:$0xff] %v5543_v13  ;;  %v5607_v13 = vld [vmem:[%s9646_s0 + $0x50] sm:$0xff] }
 0x173   :  { %11560 = vst [vmem:[#allocation337_spill] sm:$0xff] %v5548_v1  ;;  %v11576_v1 = vld [vmem:[#allocation141_spill] sm:$0xff]  ;;  %v5659_v36 = vperm.slane %v5607_v13, 1  ;;  %v5813_v3 = vperm.slane %v5607_v13, 7 }
 0x174   :  { %11563 = vst [vmem:[#allocation131_spill] sm:$0xff] %v5555_v8  ;;  %vm11577_vm11 = vnez %v11576_v1  ;;  %v11584_v8 = vld [vmem:[#allocation143_spill] sm:$0xff] }
 0x175   :  { %11566 = vst [vmem:[#allocation132_spill] sm:$0xff] %v5560_v22  ;;  %v5602_v7 = vsel %vm11577_vm11, %v5020_v0, 1e+30  ;;  %v5622_v0 = vsel %vm11581_vm1, %v5416_v17, 1e+30  ;;  %v1336_v22 = vmin.f32 %v1335_v25, %v5593_v41  ;;  %vm11585_vm3 = vnez %v11584_v8 }
 0x176   :  { %11567 = vst [vmem:[#allocation338_spill] sm:$0xff] %v5563_v53  ;;  %vm11589_vm1 = vnez %v11517_v27  ;;  %v1316_v25 = vmin.f32 %v1315_v16, %v5602_v7 }
 0x177   :  { %11568 = vst [vmem:[#allocation339_spill] sm:$0xff] %v5568_v32  ;;  %v5635_v32 = vsel %vm11585_vm3, %v5027_v2, 1e+30  ;;  %v5645_v43 = vsel %vm11589_vm1, %v5461_v61, 1e+30 }
 0x178   :  { %11569 = vst [vmem:[#allocation340_spill] sm:$0xff] %v5573_v59  ;;  %v1359_v59 = vmin.f32 %v1358_v52, %v5588_v63 }
 0x179   :  { %11570 = vst [vmem:[#allocation341_spill] sm:$0xff] %v5575_v10 }
 0x17a   :  { %11573 = vst [vmem:[#allocation137_spill] sm:$0xff] %v5582_v45  ;;  %v11591_v45 = vld [vmem:[#allocation144_spill] sm:$0xff]  ;;  %v1360_v2 = vmin.f32 %v1359_v59, %v5612_v42  ;;  %v1317_v59 = vmin.f32 %v1316_v25, %v5635_v32 }
 0x17b   :  { %11574 = vst [vmem:[#allocation342_spill] sm:$0xff] %v5588_v63  ;;  %vm11592_vm9 = vnez %v11591_v45  ;;  %v5656_v63 = vperm.slane %v5607_v13, 0 }
 0x17c   :  { %11575 = vst [vmem:[#allocation343_spill] sm:$0xff] %v5593_v41  ;;  %v5650_v52 = vsel %vm11592_vm9, %v5061_v26, 1e+30  ;;  %v1337_v41 = vmin.f32 %v1336_v22, %v5622_v0  ;;  %v5669_v26 = vsel %vm11532_vm8, %v5511_v60, 1e+30  ;;  %v1361_v16 = vmin.f32 %v1360_v2, %v5617_v33 }
 0x17d   :  { %11578 = vst [vmem:[#allocation141_spill] sm:$0xff] %v5602_v7  ;;  %v5674_v22 = vsel %vm11538_vm4, %v5533_v11, 1e+30  ;;  %v5682_v7 = vsel %vm11597_vm6, %v5086_v28, 1e+30  ;;  %vm11601_vm4 = vnez %v11600_v40  ;;  %v5699_v2 = vperm.slane %v5607_v13, 3 }
 0x17e   :  { %11579 = vst [vmem:[#allocation344_spill] sm:$0xff] %v5612_v42  ;;  %v5685_v42 = vperm.slane %v5607_v13, 2  ;;  %v5695_v25 = vsel %vm11601_vm4, %v5106_v56, 1e+30  ;;  %v1362_v28 = vmin.f32 %v1361_v16, %v5628_v49  ;;  %vm11603_vm8 = vnez %v11464_v4  ;;  %v11627_v11 = vld [vmem:[#allocation155_spill] sm:$0xff] }
 0x17f   :  { %11580 = vst [vmem:[#allocation345_spill] sm:$0xff] %v5617_v33  ;;  %v5711_v33 = vsel %vm11605_vm13, %v5659_v36, 1e+30  ;;  %v5716_v56 = vsel %vm11547_vm12, %v5563_v53, 1e+30  ;;  %vm11608_vm4 = vnez %v11553_v38  ;;  %vm11615_vm13 = vnez %v11614_v48 }
 0x180   :  { %11582 = vst [vmem:[#allocation346_spill] sm:$0xff] %v5622_v0  ;;  %v1338_v0 = vmin.f32 %v1337_v41, %v5640_v24  ;;  %v1318_v41 = vmin.f32 %v1317_v59, %v5650_v52  ;;  %v5721_v59 = vsel %vm11608_vm4, %v5575_v10, 1e+30  ;;  %1363 = vmin.xlane.f32.xlu2 %v1362_v28  ;;  %v5736_v53 = vperm.slane %v5607_v13, 4 }
 0x181   :  { %11583 = vst [vmem:[#allocation347_spill] sm:$0xff] %v5628_v49  ;;  %v11613_v49 = vld [vmem:[#allocation270_spill] sm:$0xff]  ;;  %vm11621_vm4 = vnez %v11620_v23 }
 0x182   :  { %11586 = vst [vmem:[#allocation348_spill] sm:$0xff] %v5635_v32  ;;  %v5706_v32 = vsel %vm11603_vm8, %v5656_v63, 1e+30  ;;  %v5733_v4 = vsel %vm11615_vm13, %v11613_v49, 1e+30  ;;  %vm11617_vm8 = vnez %v11476_v6  ;;  %v11626_v6 = vld [vmem:[#allocation278_spill] sm:$0xff] }
 0x183   :  { %11588 = vst [vmem:[#allocation349_spill] sm:$0xff] %v5640_v24  ;;  %v1339_v24 = vmin.f32 %v1338_v0, %v5645_v43  ;;  %v11610_v0 = vld [vmem:[#allocation147_spill] sm:$0xff]  ;;  %v5741_v10 = vsel %vm11617_vm8, %v5685_v42, 1e+30  ;;  %vm11628_vm8 = vnez %v11627_v11  ;;  %v11640_v11 = vld [vmem:[#allocation160_spill] sm:$0xff] }
 0x184   :  { %11590 = vst [vmem:[#allocation350_spill] sm:$0xff] %v5645_v43  ;;  %vm11611_vm6 = vnez %v11610_v0  ;;  %v1319_v43 = vmin.f32 %v1318_v41, %v5682_v7  ;;  %v5760_v60 = vsel %vm11628_vm8, %v11626_v6, 1e+30 }
 0x185   :  { %11593 = vst [vmem:[#allocation351_spill] sm:$0xff] %v5650_v52  ;;  %v5726_v16 = vsel %vm11611_vm6, %v5139_v35, 1e+30  ;;  %v1340_v52 = vmin.f32 %v1339_v24, %v5664_v12  ;;  %v11619_v35 = vld [vmem:[#allocation275_spill] sm:$0xff]  ;;  %v11623_v24 = vld [vmem:[#allocation154_spill] sm:$0xff] }
 0x186   :  { %11594 = vst [vmem:[#allocation352_spill] sm:$0xff] %v5664_v12  ;;  %v5746_v41 = vsel %vm11621_vm4, %v11619_v35, 1e+30  ;;  %vm11624_vm12 = vnez %v11623_v24  ;;  %v1320_v49 = vmin.f32 %v1319_v43, %v5695_v25  ;;  %v1399_v12 = vmin.f32 %v5706_v32, %v5711_v33  ;;  %v11633_v24 = vld [vmem:[#allocation279_spill] sm:$0xff]  ;;  %v11634_v43 = vld [vmem:[#allocation156_spill] sm:$0xff] }
 0x187   :  { %11595 = vst [vmem:[#allocation353_spill] sm:$0xff] %v5669_v26  ;;  %v5751_v28 = vsel %vm11624_vm12, %v5178_v62, 1e+30  ;;  %v5763_v35 = vperm.slane %v5607_v13, 5  ;;  %vm11631_vm4 = vnez %v11482_v29  ;;  %vm11635_vm12 = vnez %v11634_v43 }
 0x188   :  { %11596 = vst [vmem:[#allocation354_spill] sm:$0xff] %v5674_v22  ;;  %v5768_v62 = vsel %vm11631_vm4, %v5699_v2, 1e+30  ;;  %v1321_v6 = vmin.f32 %v1320_v49, %v5726_v16  ;;  %vm11641_vm4 = vnez %v11640_v11  ;;  %v5792_v43 = vperm.slane %v5607_v13, 6 }
 0x189   :  { %11598 = vst [vmem:[#allocation355_spill] sm:$0xff] %v5682_v7  ;;  %v1341_v7 = vmin.f32 %v1340_v52, %v5669_v26  ;;  %v11637_v52 = vld [vmem:[#allocation157_spill] sm:$0xff]  ;;  %v1400_v26 = vmin.f32 %v1399_v12, %v5741_v10  ;;  %v11644_v12 = vld [vmem:[#allocation298_spill] sm:$0xff] }
 0x18a   :  { %11599 = vst [vmem:[#allocation356_spill] sm:$0xff] %v5690_v31  ;;  %vm11638_vm13 = vnez %v11637_v52  ;;  %v1322_v49 = vmin.f32 %v1321_v6, %v5733_v4  ;;  %v11649_v52 = vld [vmem:[#allocation300_spill] sm:$0xff]  ;;  %v5837_v19 = vsel %vm11500_vm0, %v5792_v43, 1e+30  ;;  %vm11653_vm0 = vnez %v11507_v55 }
 0x18b   :  { %11602 = vst [vmem:[#allocation357_spill] sm:$0xff] %v5695_v25  ;;  %v5773_v25 = vsel %vm11635_vm12, %v11633_v24, 1e+30  ;;  %v1342_v29 = vmin.f32 %v1341_v7, %v5674_v22  ;;  %v5789_v24 = vsel %vm11641_vm4, %v5213_v34, 1e+30  ;;  %vm11672_vm4 = vnez %v11531_v57 }
 0x18c   :  { %11604 = vst [vmem:[#allocation358_spill] sm:$0xff] %v5706_v32  ;;  %v53_v32 = vld [vmem:[%s9646_s0 + $0x58] sm:$0xff]  ;;  %v5804_v7 = vsel %vm11562_vm10, %v11644_v12, 1e+30  ;;  %v1323_v6 = vmin.f32 %v1322_v49, %v5746_v41  ;;  %v5856_v58 = vsel %vm11653_vm0, %v5813_v3, 1e+30 }
 0x18d   :  { %11606 = vst [vmem:[#allocation359_spill] sm:$0xff] %v5711_v33  ;;  %v5778_v33 = vsel %vm11638_vm13, %v5201_v21, 1e+30  ;;  %v5797_v21 = vsel %vm11559_vm2, %v5736_v53, 1e+30  ;;  %v1343_v22 = vmin.f32 %v1342_v29, %v5690_v31  ;;  %v5815_v11 = vperm.slane %v53_v32, 0 }
 0x18e   :  { %11607 = vst [vmem:[#allocation360_spill] sm:$0xff] %v5716_v56  ;;  %v5829_v29 = vsel %vm11572_vm7, %v11649_v52, 1e+30  ;;  %v5832_v31 = vperm.slane %v53_v32, 2  ;;  %vm11668_vm2 = vnez %v11145_v9 }
 0x18f   :  { %11609 = vst [vmem:[#allocation361_spill] sm:$0xff] %v5721_v59  ;;  %v1344_v13 = vmin.f32 %v1343_v22, %v5716_v56  ;;  %v5848_v22 = vsel %vm11577_vm11, %v5339_v30, 1e+30 }
 0x190   :  { %11612 = vst [vmem:[#allocation147_spill] sm:$0xff] %v5726_v16  ;;  %v1401_v16 = vmin.f32 %v1400_v26, %v5768_v62  ;;  %v5820_v26 = vsel %vm11497_vm15, %v5763_v35, 1e+30 }
 0x191   :  { %11616 = vst [vmem:[#allocation270_spill] sm:$0xff] %v5733_v4  ;;  %v1345_v56 = vmin.f32 %v1344_v13, %v5721_v59  ;;  %v5871_v13 = vsel %vm11587_vm5, %v5815_v11, 1e+30 }
 0x192   :  { %11618 = vst [vmem:[#allocation149_spill] sm:$0xff] %v5741_v10  ;;  %v11646_v10 = vld [vmem:[#allocation299_spill] sm:$0xff]  ;;  %v1402_v4 = vmin.f32 %v1401_v16, %v5797_v21  ;;  %v5842_v16 = vperm.slane %v53_v32, 3 }
 0x193   :  { %11622 = vst [vmem:[#allocation275_spill] sm:$0xff] %v5746_v41  ;;  %v5809_v34 = vsel %vm11565_vm14, %v11646_v10, 1e+30  ;;  %v1324_v41 = vmin.f32 %v1323_v6, %v5751_v28  ;;  %1346 = vmin.xlane.f32.xlu1 %v1345_v56  ;;  %v5885_v56 = vperm.slane %v53_v32, 6 }
 0x194   :  { %11625 = vst [vmem:[#allocation150_spill] sm:$0xff] %v5751_v28  ;;  %v1382_v49 = vmin.f32 %v5804_v7, %v5809_v34 }
 0x195   :  { %11629 = vst [vmem:[#allocation278_spill] sm:$0xff] %v5760_v60 }
 0x196   :  { %11630 = vst [vmem:[#allocation362_spill] sm:$0xff] %v5763_v35  ;;  %v5851_v35 = vperm.slane %v53_v32, 4  ;;  %v1383_v6 = vmin.f32 %v1382_v49, %v5829_v29  ;;  %v11657_v49 = vld [vmem:[#allocation57_spill] sm:$0xff] }
 0x197   :  { %11632 = vst [vmem:[#allocation363_spill] sm:$0xff] %v5768_v62  ;;  %v5823_v62 = vperm.slane %v53_v32, 1  ;;  %vm11658_vm0 = vnez %v11657_v49 }
 0x198   :  { %11636 = vst [vmem:[#allocation279_spill] sm:$0xff] %v5773_v25  ;;  %v1384_v59 = vmin.f32 %v1383_v6, %v5848_v22  ;;  %v5891_v6 = vsel %vm11592_vm9, %v5371_v50, 1e+30 }
 0x199   :  { %11639 = vst [vmem:[#allocation364_spill] sm:$0xff] %v5778_v33 }
 0x19a   :  { %11642 = vst [vmem:[#allocation365_spill] sm:$0xff] %v5789_v24 }
 0x19b   :  { %11643 = vst [vmem:[#allocation366_spill] sm:$0xff] %v5797_v21  ;;  %v1403_v21 = vmin.f32 %v1402_v4, %v5820_v26 }
 0x19c   :  { %11645 = vst [vmem:[#allocation298_spill] sm:$0xff] %v5804_v7  ;;  %v5860_v7 = vperm.slane %v53_v32, 5 }
 0x19d   :  { %11647 = vst [vmem:[#allocation299_spill] sm:$0xff] %v5809_v34  ;;  %v1325_v34 = vmin.f32 %v1324_v41, %v5760_v60  ;;  %v1404_v4 = vmin.f32 %v1403_v21, %v5837_v19  ;;  %v5877_v41 = vsel %vm11658_vm0, %v11644_v12, 1e+30  ;;  %v11660_v21 = vld [vmem:[#allocation60_spill] sm:$0xff]  ;;  %v5898_v12 = vsel %vm11589_vm1, %v5823_v62, 1e+30 }
 0x19e   :  { %11648 = vst [vmem:[#allocation367_spill] sm:$0xff] %v5820_v26  ;;  %v5866_v26 = vsel %vm11585_vm3, %v5341_v14, 1e+30  ;;  %vm11661_vm15 = vnez %v11660_v21  ;;  %vm11670_vm1 = vnez %v11527_v46  ;;  %v11725_v55 = vld [vmem:[#allocation362_spill] sm:$0xff] }
 0x19f   :  { %11650 = vst [vmem:[#allocation300_spill] sm:$0xff] %v5829_v29  ;;  %v1326_v29 = vmin.f32 %v1325_v34, %v5773_v25  ;;  %v1405_v60 = vmin.f32 %v1404_v4, %v5856_v58  ;;  %v11665_v34 = vld [vmem:[#allocation65_spill] sm:$0xff] }
 0x1a0   :  { %11651 = vst [vmem:[#allocation368_spill] sm:$0xff] %v5837_v19  ;;  %v5882_v19 = vsel %vm11661_vm15, %v11646_v10, 1e+30  ;;  %v1385_v10 = vmin.f32 %v1384_v59, %v5866_v26  ;;  %vm11666_vm5 = vnez %v11665_v34  ;;  %v5918_v59 = vsel %vm11670_vm1, %v5832_v31, 1e+30 }
 0x1a1   :  { %11652 = vst [vmem:[#allocation369_spill] sm:$0xff] %v5848_v22  ;;  %v5893_v22 = vperm.slane %v53_v32, 7  ;;  %v5904_v25 = vsel %vm11666_vm5, %v11649_v52, 1e+30  ;;  %v1327_v4 = vmin.f32 %v1326_v29, %v5778_v33  ;;  %v5911_v32 = vsel %vm11668_vm2, %v5396_v39, 1e+30 }
 0x1a2   :  { %11654 = vst [vmem:[#allocation370_spill] sm:$0xff] %v5856_v58  ;;  %v1406_v58 = vmin.f32 %v1405_v60, %v5871_v13  ;;  %v1365_v28 = vmin.f32 %v5877_v41, %v5882_v19  ;;  %v5923_v52 = vsel %vm11672_vm4, %v5842_v16, 1e+30  ;;  %v1386_v60 = vmin.f32 %v1385_v10, %v5891_v6  ;;  %v11674_v29 = vld [vmem:[#allocation70_spill] sm:$0xff] }
 0x1a3   :  { %11655 = vst [vmem:[#allocation371_spill] sm:$0xff] %v5866_v26  ;;  %vm11675_vm5 = vnez %v11674_v29  ;;  %v1328_v26 = vmin.f32 %v1327_v4, %v5789_v24  ;;  %vm11677_vm1 = vnez %v11600_v40  ;;  %vm11679_vm4 = vnez %v11537_v44 }
 0x1a4   :  { %11656 = vst [vmem:[#allocation372_spill] sm:$0xff] %v5871_v13  ;;  %v5929_v13 = vsel %vm11675_vm5, %v5339_v30, 1e+30  ;;  %v1366_v33 = vmin.f32 %v1365_v28, %v5904_v25  ;;  %v5942_v10 = vsel %vm11679_vm4, %v5851_v35, 1e+30  ;;  %v1387_v4 = vmin.f32 %v1386_v60, %v5911_v32 }
 0x1a5   :  { %11659 = vst [vmem:[#allocation373_spill] sm:$0xff] %v5877_v41  ;;  %v5936_v41 = vsel %vm11677_vm1, %v5416_v17, 1e+30  ;;  %v5947_v30 = vsel %vm11611_vm6, %v5449_v15, 1e+30  ;;  %1329 = vmin.xlane.f32.xlu0 %v1328_v26  ;;  %vm11687_vm4 = vnez %v11540_v54  ;;  %v11691_v26 = vld [vmem:[#allocation74_spill] sm:$0xff] }
 0x1a6   :  { %11662 = vst [vmem:[#allocation374_spill] sm:$0xff] %v5882_v19  ;;  %v1407_v19 = vmin.f32 %v1406_v58, %v5898_v12  ;;  %v11682_v58 = vld [vmem:[#allocation72_spill] sm:$0xff]  ;;  %v5965_v24 = vsel %vm11565_vm14, %v5659_v36, 1e+30  ;;  %vm11694_vm14 = vnez %v11614_v48 }
 0x1a7   :  { %11663 = vst [vmem:[#allocation375_spill] sm:$0xff] %v5891_v6  ;;  %vm11683_vm5 = vnez %v11682_v58  ;;  %v1367_v6 = vmin.f32 %v1366_v33, %v5929_v13  ;;  %v1388_v33 = vmin.f32 %v1387_v4, %v5936_v41 }
 0x1a8   :  { %11664 = vst [vmem:[#allocation376_spill] sm:$0xff] %v5898_v12  ;;  %v5953_v12 = vsel %vm11683_vm5, %v5341_v14, 1e+30  ;;  %v1408_v28 = vmin.f32 %v1407_v19, %v5918_v59  ;;  %v5970_v14 = vsel %vm11687_vm4, %v5860_v7, 1e+30  ;;  %vm11689_vm5 = vnez %v11546_v51 }
 0x1a9   :  { %11667 = vst [vmem:[#allocation377_spill] sm:$0xff] %v5904_v25  ;;  %v5960_v25 = vsel %vm11562_vm10, %v5656_v63, 1e+30  ;;  %v5975_v19 = vsel %vm11689_vm5, %v5885_v56, 1e+30  ;;  %vm11692_vm10 = vnez %v11691_v26  ;;  %vm11697_vm5 = vnez %v11553_v38 }
 0x1aa   :  { %11669 = vst [vmem:[#allocation378_spill] sm:$0xff] %v5911_v32  ;;  %v5981_v60 = vsel %vm11692_vm10, %v5371_v50, 1e+30  ;;  %v1409_v32 = vmin.f32 %v1408_v28, %v5923_v52  ;;  %v5993_v51 = vsel %vm11572_vm7, %v5685_v42, 1e+30  ;;  %v1389_v50 = vmin.f32 %v1388_v33, %v5947_v30  ;;  %v11699_v28 = vld [vmem:[#allocation75_spill] sm:$0xff] }
 0x1ab   :  { %11671 = vst [vmem:[#allocation379_spill] sm:$0xff] %v5918_v59  ;;  %v5987_v59 = vsel %vm11694_vm14, %v5461_v61, 1e+30  ;;  %v5998_v4 = vsel %vm11697_vm5, %v5893_v22, 1e+30  ;;  %vm11700_vm4 = vnez %v11699_v28  ;;  %vm11702_vm7 = vnez %v11620_v23 }
 0x1ac   :  { %11673 = vst [vmem:[#allocation380_spill] sm:$0xff] %v5923_v52  ;;  %v1410_v52 = vmin.f32 %v1409_v32, %v5942_v10  ;;  %v6018_v33 = vsel %vm11577_vm11, %v5699_v2, 1e+30  ;;  %v11709_v32 = vld [vmem:[#allocation76_spill] sm:$0xff] }
 0x1ad   :  { %11676 = vst [vmem:[#allocation381_spill] sm:$0xff] %v5929_v13  ;;  %v1368_v13 = vmin.f32 %v1367_v6, %v5953_v12  ;;  %v1450_v6 = vmin.f32 %v5960_v25, %v5965_v24 }
 0x1ae   :  { %11678 = vst [vmem:[#allocation382_spill] sm:$0xff] %v5936_v41  ;;  %v6004_v41 = vsel %vm11700_vm4, %v5396_v39, 1e+30  ;;  %v11706_v39 = vld [vmem:[#allocation154_spill] sm:$0xff]  ;;  %vm11710_vm4 = vnez %v11709_v32 }
 0x1af   :  { %11680 = vst [vmem:[#allocation383_spill] sm:$0xff] %v5942_v10  ;;  %v1369_v38 = vmin.f32 %v1368_v13, %v5981_v60  ;;  %vm11707_vm5 = vnez %v11706_v39  ;;  %v1451_v10 = vmin.f32 %v1450_v6, %v5993_v51  ;;  %v1411_v13 = vmin.f32 %v1410_v52, %v5970_v14  ;;  %v11719_v52 = vld [vmem:[#allocation77_spill] sm:$0xff] }
 0x1b0   :  { %11681 = vst [vmem:[#allocation384_spill] sm:$0xff] %v5947_v30  ;;  %v11705_v30 = vld [vmem:[#allocation330_spill] sm:$0xff]  ;;  %vm11720_vm11 = vnez %v11719_v52 }
 0x1b1   :  { %11684 = vst [vmem:[#allocation385_spill] sm:$0xff] %v5953_v12  ;;  %v6012_v12 = vsel %vm11702_vm7, %v5491_v20, 1e+30  ;;  %v6023_v54 = vsel %vm11707_vm5, %v11705_v30, 1e+30  ;;  %v1370_v46 = vmin.f32 %v1369_v38, %v6004_v41  ;;  %v1412_v38 = vmin.f32 %v1411_v13, %v5975_v19  ;;  %v11729_v13 = vld [vmem:[#allocation338_spill] sm:$0xff] }
 0x1b2   :  { %11685 = vst [vmem:[#allocation386_spill] sm:$0xff] %v5960_v25  ;;  %v6029_v25 = vsel %vm11710_vm4, %v5416_v17, 1e+30 }
 0x1b3   :  { %11686 = vst [vmem:[#allocation387_spill] sm:$0xff] %v5965_v24  ;;  %v1390_v24 = vmin.f32 %v1389_v50, %v5987_v59  ;;  %v6042_v50 = vsel %vm11585_vm3, %v5736_v53, 1e+30  ;;  %v1371_v8 = vmin.f32 %v1370_v46, %v6029_v25  ;;  %v1413_v46 = vmin.f32 %v1412_v38, %v5998_v4 }
 0x1b4   :  { %11688 = vst [vmem:[#allocation388_spill] sm:$0xff] %v5970_v14  ;;  %v1452_v14 = vmin.f32 %v1451_v10, %v6018_v33  ;;  %v6073_v10 = vsel %vm11658_vm0, %v5656_v63, 1e+30 }
 0x1b5   :  { %11690 = vst [vmem:[#allocation389_spill] sm:$0xff] %v5975_v19  ;;  %v1391_v6 = vmin.f32 %v1390_v24, %v6012_v12  ;;  %v6066_v24 = vsel %vm11592_vm9, %v11725_v55, 1e+30  ;;  %v6084_v19 = vsel %vm11638_vm13, %v11729_v13, 1e+30  ;;  %1414 = vmin.xlane.f32.xlu2 %v1413_v46 }
 0x1b6   :  { %11693 = vst [vmem:[#allocation390_spill] sm:$0xff] %v5981_v60  ;;  %v11712_v60 = vld [vmem:[#allocation334_spill] sm:$0xff] }
 0x1b7   :  { %11695 = vst [vmem:[#allocation391_spill] sm:$0xff] %v5987_v59  ;;  %v6036_v57 = vsel %vm11628_vm8, %v11712_v60, 1e+30  ;;  %v11716_v59 = vld [vmem:[#allocation335_spill] sm:$0xff] }
 0x1b8   :  { %11696 = vst [vmem:[#allocation392_spill] sm:$0xff] %v5993_v51  ;;  %v6047_v17 = vsel %vm11635_vm12, %v11716_v59, 1e+30  ;;  %v6053_v51 = vsel %vm11720_vm11, %v5449_v15, 1e+30  ;;  %v1453_v15 = vmin.f32 %v1452_v14, %v6042_v50 }
 0x1b9   :  { %11698 = vst [vmem:[#allocation393_spill] sm:$0xff] %v5998_v4  ;;  %v6090_v14 = vsel %vm11668_vm2, %v5792_v43, 1e+30 }
 0x1ba   :  { %11701 = vst [vmem:[#allocation394_spill] sm:$0xff] %v6004_v41  ;;  %v11722_v41 = vld [vmem:[#allocation79_spill] sm:$0xff]  ;;  %v1454_v38 = vmin.f32 %v1453_v15, %v6066_v24 }
 0x1bb   :  { %11703 = vst [vmem:[#allocation395_spill] sm:$0xff] %v6012_v12  ;;  %vm11723_vm3 = vnez %v11722_v41  ;;  %v1392_v12 = vmin.f32 %v1391_v6, %v6023_v54  ;;  %v1372_v6 = vmin.f32 %v1371_v8, %v6053_v51  ;;  %v11738_v8 = vld [vmem:[#allocation341_spill] sm:$0xff] }
 0x1bc   :  { %11704 = vst [vmem:[#allocation396_spill] sm:$0xff] %v6018_v33  ;;  %v6060_v47 = vsel %vm11723_vm3, %v5461_v61, 1e+30  ;;  %v6078_v61 = vsel %vm11661_vm15, %v5659_v36, 1e+30  ;;  %vm11736_vm15 = vnez %v11665_v34  ;;  %v1455_v45 = vmin.f32 %v1454_v38, %v6090_v14 }
 0x1bd   :  { %11708 = vst [vmem:[#allocation330_spill] sm:$0xff] %v6023_v54  ;;  %v11733_v54 = vld [vmem:[#allocation80_spill] sm:$0xff]  ;;  %v6102_v4 = vsel %vm11736_vm15, %v5685_v42, 1e+30  ;;  %v1433_v15 = vmin.f32 %v6073_v10, %v6078_v61  ;;  %vm11746_vm15 = vnez %v11674_v29 }
 0x1be   :  { %11711 = vst [vmem:[#allocation154_spill] sm:$0xff] %v6029_v25  ;;  %vm11734_vm9 = vnez %v11733_v54 }
 0x1bf   :  { %11714 = vst [vmem:[#allocation334_spill] sm:$0xff] %v6036_v57  ;;  %v6096_v25 = vsel %vm11734_vm9, %v5491_v20, 1e+30  ;;  %v6113_v20 = vsel %vm11677_vm1, %v5813_v3, 1e+30 }
 0x1c0   :  { %11715 = vst [vmem:[#allocation397_spill] sm:$0xff] %v6042_v50  ;;  %v1393_v50 = vmin.f32 %v1392_v12, %v6036_v57  ;;  %v1373_v12 = vmin.f32 %v1372_v6, %v6060_v47  ;;  %v11743_v57 = vld [vmem:[#allocation81_spill] sm:$0xff]  ;;  %v6127_v6 = vsel %vm11746_vm15, %v5699_v2, 1e+30  ;;  %vm11753_vm15 = vnez %v11682_v58 }
 0x1c1   :  { %11718 = vst [vmem:[#allocation335_spill] sm:$0xff] %v6047_v17  ;;  %vm11744_vm2 = vnez %v11743_v57 }
 0x1c2   :  { %11721 = vst [vmem:[#allocation398_spill] sm:$0xff] %v6053_v51  ;;  %v11739_v51 = vld [vmem:[#allocation160_spill] sm:$0xff]  ;;  %v6121_v46 = vsel %vm11744_vm2, %v11705_v30, 1e+30  ;;  %v1434_v30 = vmin.f32 %v1433_v15, %v6102_v4 }
 0x1c3   :  { %11724 = vst [vmem:[#allocation399_spill] sm:$0xff] %v6060_v47  ;;  %vm11740_vm0 = vnez %v11739_v51  ;;  %v11748_v47 = vld [vmem:[#allocation82_spill] sm:$0xff]  ;;  %v11755_v15 = vld [vmem:[#allocation100_spill] sm:$0xff] }
 0x1c4   :  { %11726 = vst [vmem:[#allocation362_spill] sm:$0xff] %v6066_v24  ;;  %v6107_v9 = vsel %vm11740_vm0, %v11738_v8, 1e+30  ;;  %v1394_v24 = vmin.f32 %v1393_v50, %v6047_v17  ;;  %vm11749_vm1 = vnez %v11748_v47  ;;  %v6138_v50 = vsel %vm11611_vm6, %v5815_v11, 1e+30 }
 0x1c5   :  { %11727 = vst [vmem:[#allocation400_spill] sm:$0xff] %v6073_v10  ;;  %v6132_v40 = vsel %vm11749_vm1, %v11712_v60, 1e+30  ;;  %v1456_v10 = vmin.f32 %v1455_v45, %v6113_v20  ;;  %v6151_v60 = vsel %vm11753_vm15, %v5736_v53, 1e+30  ;;  %v1435_v17 = vmin.f32 %v1434_v30, %v6127_v6 }
 0x1c6   :  { %11728 = vst [vmem:[#allocation401_spill] sm:$0xff] %v6078_v61  ;;  %v1374_v61 = vmin.f32 %v1373_v12, %v6096_v25  ;;  %v1395_v38 = vmin.f32 %v1394_v24, %v6084_v19  ;;  %vm11756_vm6 = vnez %v11755_v15  ;;  %v6175_v30 = vsel %vm11692_vm10, %v11725_v55, 1e+30 }
 0x1c7   :  { %11731 = vst [vmem:[#allocation338_spill] sm:$0xff] %v6084_v19  ;;  %v6158_v24 = vsel %vm11756_vm6, %v5656_v63, 1e+30  ;;  %vm11772_vm10 = vnez %v11699_v28 }
 0x1c8   :  { %11732 = vst [vmem:[#allocation402_spill] sm:$0xff] %v6090_v14  ;;  %v6145_v14 = vsel %vm11694_vm14, %v5823_v62, 1e+30  ;;  %v1375_v12 = vmin.f32 %v1374_v61, %v6121_v46  ;;  %v1396_v45 = vmin.f32 %v1395_v38, %v6107_v9  ;;  %v1457_v61 = vmin.f32 %v1456_v10, %v6138_v50  ;;  %v11769_v10 = vld [vmem:[#allocation85_spill] sm:$0xff] }
 0x1c9   :  { %11735 = vst [vmem:[#allocation403_spill] sm:$0xff] %v6096_v25  ;;  %v1436_v38 = vmin.f32 %v1435_v17, %v6151_v60  ;;  %vm11770_vm6 = vnez %v11769_v10 }
 0x1ca   :  { %11737 = vst [vmem:[#allocation404_spill] sm:$0xff] %v6102_v4  ;;  %v11758_v4 = vld [vmem:[#allocation101_spill] sm:$0xff]  ;;  %v1376_v63 = vmin.f32 %v1375_v12, %v6132_v40  ;;  %1397 = vmin.xlane.f32.xlu1 %v1396_v45  ;;  %v1458_v12 = vmin.f32 %v1457_v61, %v6145_v14  ;;  %v11775_v45 = vld [vmem:[#allocation107_spill] sm:$0xff] }
 0x1cb   :  { %11741 = vst [vmem:[#allocation341_spill] sm:$0xff] %v6107_v9  ;;  %vm11759_vm14 = vnez %v11758_v4  ;;  %v6198_v9 = vsel %vm11772_vm10, %v5792_v43, 1e+30 }
 0x1cc   :  { %11742 = vst [vmem:[#allocation405_spill] sm:$0xff] %v6113_v20  ;;  %v6163_v19 = vsel %vm11759_vm14, %v5659_v36, 1e+30  ;;  %v11761_v20 = vld [vmem:[#allocation84_spill] sm:$0xff]  ;;  %v6181_v36 = vsel %vm11702_vm7, %v5832_v31, 1e+30  ;;  %vm11776_vm7 = vnez %v11775_v45 }
 0x1cd   :  { %11745 = vst [vmem:[#allocation406_spill] sm:$0xff] %v6121_v46  ;;  %vm11762_vm15 = vnez %v11761_v20  ;;  %v1416_v17 = vmin.f32 %v6158_v24, %v6163_v19  ;;  %v6212_v61 = vsel %vm11776_vm7, %v5699_v2, 1e+30  ;;  %v6230_v2 = vsel %vm11628_vm8, %v5851_v35, 1e+30 }
 0x1ce   :  { %11747 = vst [vmem:[#allocation407_spill] sm:$0xff] %v6127_v6  ;;  %v6169_v25 = vsel %vm11762_vm15, %v11716_v59, 1e+30  ;;  %v11766_v6 = vld [vmem:[#allocation103_spill] sm:$0xff] }
 0x1cf   :  { %11750 = vst [vmem:[#allocation408_spill] sm:$0xff] %v6132_v40  ;;  %vm11767_vm14 = vnez %v11766_v6 }
 0x1d0   :  { %11751 = vst [vmem:[#allocation409_spill] sm:$0xff] %v6138_v50  ;;  %v6187_v59 = vsel %vm11767_vm14, %v5685_v42, 1e+30  ;;  %v6192_v50 = vsel %vm11770_vm6, %v11729_v13, 1e+30  ;;  %v1437_v13 = vmin.f32 %v1436_v38, %v6175_v30 }
 0x1d1   :  { %11752 = vst [vmem:[#allocation410_spill] sm:$0xff] %v6145_v14  ;;  %v6206_v42 = vsel %vm11707_vm5, %v5842_v16, 1e+30  ;;  %v11778_v14 = vld [vmem:[#allocation89_spill] sm:$0xff] }
 0x1d2   :  { %11754 = vst [vmem:[#allocation411_spill] sm:$0xff] %v6151_v60  ;;  %v1377_v60 = vmin.f32 %v1376_v63, %v6169_v25  ;;  %vm11779_vm10 = vnez %v11778_v14  ;;  %v6223_v63 = vsel %vm11710_vm4, %v5813_v3, 1e+30 }
 0x1d3   :  { %11757 = vst [vmem:[#allocation100_spill] sm:$0xff] %v6158_v24  ;;  %v6217_v40 = vsel %vm11779_vm10, %v11738_v8, 1e+30  ;;  %v1417_v24 = vmin.f32 %v1416_v17, %v6187_v59  ;;  %v11783_v8 = vld [vmem:[#allocation111_spill] sm:$0xff]  ;;  %v6242_v17 = vsel %vm11720_vm11, %v5815_v11, 1e+30 }
 0x1d4   :  { %11760 = vst [vmem:[#allocation101_spill] sm:$0xff] %v6163_v19  ;;  %v1459_v19 = vmin.f32 %v1458_v12, %v6181_v36  ;;  %v1378_v38 = vmin.f32 %v1377_v60, %v6192_v50  ;;  %vm11784_vm5 = vnez %v11783_v8 }
 0x1d5   :  { %11763 = vst [vmem:[#allocation412_spill] sm:$0xff] %v6169_v25  ;;  %v6236_v12 = vsel %vm11784_vm5, %v5736_v53, 1e+30  ;;  %v1418_v60 = vmin.f32 %v1417_v24, %v6212_v61  ;;  %v6252_v53 = vsel %vm11635_vm12, %v5860_v7, 1e+30 }
 0x1d6   :  { %11764 = vst [vmem:[#allocation413_spill] sm:$0xff] %v6175_v30  ;;  %v1438_v30 = vmin.f32 %v1437_v13, %v6198_v9  ;;  %v1379_v13 = vmin.f32 %v1378_v38, %v6217_v40  ;;  %v6263_v24 = vsel %vm11638_vm13, %v5885_v56, 1e+30  ;;  %v6269_v38 = vsel %vm11723_vm3, %v5823_v62, 1e+30 }
 0x1d7   :  { %11765 = vst [vmem:[#allocation414_spill] sm:$0xff] %v6181_v36  ;;  %v1460_v36 = vmin.f32 %v1459_v19, %v6206_v42 }
 0x1d8   :  { %11768 = vst [vmem:[#allocation103_spill] sm:$0xff] %v6187_v59  ;;  %v54_v59 = vld [vmem:[%s9646_s0 + $0x60] sm:$0xff]  ;;  %v1439_v19 = vmin.f32 %v1438_v30, %v6223_v63  ;;  %1380 = vmin.xlane.f32.xlu0 %v1379_v13  ;;  %v6292_v13 = vsel %vm11740_vm0, %v5893_v22, 1e+30 }
 0x1d9   :  { %11771 = vst [vmem:[#allocation415_spill] sm:$0xff] %v6192_v50  ;;  %v6278_v50 = vperm.slane %v54_v59, 0  ;;  %v6280_v25 = vperm.slane %v54_v59, 1  ;;  %v6391_v51 = vperm.slane %v54_v59, 6 }
 0x1da   :  { %11773 = vst [vmem:[#allocation416_spill] sm:$0xff] %v6198_v9  ;;  %v1440_v30 = vmin.f32 %v1439_v19, %v6242_v17  ;;  %v11798_v19 = vld [vmem:[#allocation11_spill] sm:$0xff] }
 0x1db   :  { %11774 = vst [vmem:[#allocation417_spill] sm:$0xff] %v6206_v42  ;;  %v11788_v42 = vld [vmem:[#allocation117_spill] sm:$0xff]  ;;  %vm11799_vm13 = vnez %v11798_v19 }
 0x1dc   :  { %11777 = vst [vmem:[#allocation107_spill] sm:$0xff] %v6212_v61  ;;  %vm11789_vm8 = vnez %v11788_v42  ;;  %v1461_v61 = vmin.f32 %v1460_v36, %v6230_v2 }
 0x1dd   :  { %11780 = vst [vmem:[#allocation418_spill] sm:$0xff] %v6217_v40  ;;  %v6258_v9 = vsel %vm11789_vm8, %v11725_v55, 1e+30  ;;  %v1419_v40 = vmin.f32 %v1418_v60, %v6236_v12  ;;  %v11793_v55 = vld [vmem:[#allocation122_spill] sm:$0xff] }
 0x1de   :  { %11781 = vst [vmem:[#allocation419_spill] sm:$0xff] %v6223_v63  ;;  %vm11794_vm12 = vnez %v11793_v55  ;;  %v1462_v36 = vmin.f32 %v1461_v61, %v6252_v53  ;;  %v6300_v61 = vperm.slane %v54_v59, 2 }
 0x1df   :  { %11782 = vst [vmem:[#allocation420_spill] sm:$0xff] %v6230_v2  ;;  %v6276_v63 = vsel %vm11794_vm12, %v5792_v43, 1e+30  ;;  %v6286_v2 = vsel %vm11734_vm9, %v5832_v31, 1e+30  ;;  %v1420_v60 = vmin.f32 %v1419_v40, %v6258_v9  ;;  %v1441_v43 = vmin.f32 %v1440_v30, %v6269_v38 }
 0x1e0   :  { %11785 = vst [vmem:[#allocation111_spill] sm:$0xff] %v6236_v12  ;;  %v6306_v40 = vsel %vm11744_vm2, %v5842_v16, 1e+30  ;;  %vm11807_vm2 = vnez %v11660_v21  ;;  %v6522_v42 = vsel %vm11794_vm12, %v6391_v51, 1e+30  ;;  %vm11869_vm12 = vnez %v11798_v19 }
 0x1e1   :  { %11786 = vst [vmem:[#allocation421_spill] sm:$0xff] %v6242_v17  ;;  %v6298_v17 = vsel %vm11799_vm13, %v5813_v3, 1e+30  ;;  %v1421_v30 = vmin.f32 %v1420_v60, %v6276_v63  ;;  %v6315_v3 = vperm.slane %v54_v59, 3  ;;  %vm11805_vm13 = vnez %v11657_v49 }
 0x1e2   :  { %11787 = vst [vmem:[#allocation422_spill] sm:$0xff] %v6252_v53  ;;  %v1463_v53 = vmin.f32 %v1462_v36, %v6263_v24  ;;  %v6320_v36 = vsel %vm11805_vm13, %v6278_v50, 1e+30  ;;  %v6340_v49 = vperm.slane %v54_v59, 4 }
 0x1e3   :  { %11790 = vst [vmem:[#allocation423_spill] sm:$0xff] %v6258_v9  ;;  %v11802_v9 = vld [vmem:[#allocation126_spill] sm:$0xff]  ;;  %v1422_v60 = vmin.f32 %v1421_v30, %v6298_v17 }
 0x1e4   :  { %11791 = vst [vmem:[#allocation424_spill] sm:$0xff] %v6263_v24  ;;  %vm11803_vm0 = vnez %v11802_v9  ;;  %v6325_v24 = vsel %vm11807_vm2, %v6280_v25, 1e+30  ;;  %v1464_v46 = vmin.f32 %v1463_v53, %v6292_v13  ;;  %vm11813_vm2 = vnez %v11665_v34 }
 0x1e5   :  { %11792 = vst [vmem:[#allocation425_spill] sm:$0xff] %v6269_v38  ;;  %v6311_v12 = vsel %vm11803_vm0, %v5815_v11, 1e+30  ;;  %v1442_v38 = vmin.f32 %v1441_v43, %v6286_v2  ;;  %v6331_v11 = vsel %vm11749_vm1, %v5851_v35, 1e+30  ;;  %v1501_v30 = vmin.f32 %v6320_v36, %v6325_v24 }
 0x1e6   :  { %11795 = vst [vmem:[#allocation122_spill] sm:$0xff] %v6276_v63  ;;  %v6345_v53 = vsel %vm11813_vm2, %v6300_v61, 1e+30  ;;  %1465 = vmin.xlane.f32.xlu2 %v1464_v46  ;;  %v6366_v34 = vperm.slane %v54_v59, 5 }
 0x1e7   :  { %11796 = vst [vmem:[#allocation426_spill] sm:$0xff] %v6286_v2  ;;  %v1443_v43 = vmin.f32 %v1442_v38, %v6306_v40  ;;  %v11810_v2 = vld [vmem:[#allocation15_spill] sm:$0xff]  ;;  %v6355_v38 = vsel %vm11770_vm6, %v5885_v56, 1e+30 }
 0x1e8   :  { %11797 = vst [vmem:[#allocation427_spill] sm:$0xff] %v6292_v13  ;;  %vm11811_vm13 = vnez %v11810_v2  ;;  %v6350_v13 = vsel %vm11762_vm15, %v5860_v7, 1e+30 }
 0x1e9   :  { %11800 = vst [vmem:[#allocation11_spill] sm:$0xff] %v6298_v17  ;;  %v6338_v63 = vsel %vm11811_vm13, %v5823_v62, 1e+30  ;;  %v1423_v62 = vmin.f32 %v1422_v60, %v6311_v12  ;;  %v11817_v17 = vld [vmem:[#allocation16_spill] sm:$0xff]  ;;  %vm11820_vm13 = vnez %v11674_v29  ;;  %v6376_v60 = vsel %vm11779_vm10, %v5893_v22, 1e+30 }
 0x1ea   :  { %11801 = vst [vmem:[#allocation428_spill] sm:$0xff] %v6306_v40  ;;  %v1444_v40 = vmin.f32 %v1443_v43, %v6331_v11  ;;  %vm11818_vm2 = vnez %v11817_v17  ;;  %v6371_v21 = vsel %vm11820_vm13, %v6315_v3, 1e+30  ;;  %vm11829_vm10 = vnez %v11682_v58 }
 0x1eb   :  { %11804 = vst [vmem:[#allocation126_spill] sm:$0xff] %v6311_v12  ;;  %v6364_v46 = vsel %vm11818_vm2, %v5832_v31, 1e+30  ;;  %v1424_v31 = vmin.f32 %v1423_v62, %v6338_v63  ;;  %v11826_v12 = vld [vmem:[#allocation19_spill] sm:$0xff]  ;;  %v6396_v33 = vsel %vm11829_vm10, %v6340_v49, 1e+30  ;;  %vm11838_vm2 = vnez %v11691_v26 }
 0x1ec   :  { %11806 = vst [vmem:[#allocation429_spill] sm:$0xff] %v6320_v36  ;;  %v1502_v36 = vmin.f32 %v1501_v30, %v6345_v53  ;;  %vm11827_vm13 = vnez %v11826_v12  ;;  %v55_v62 = vld [vmem:[%s9646_s0 + $0x68] sm:$0xff] }
 0x1ed   :  { %11808 = vst [vmem:[#allocation430_spill] sm:$0xff] %v6325_v24  ;;  %v11823_v24 = vld [vmem:[#allocation18_spill] sm:$0xff]  ;;  %v6389_v29 = vsel %vm11827_vm13, %v5851_v35, 1e+30  ;;  %vm11833_vm13 = vnez %v11758_v4  ;;  %v6526_v44 = vperm.slane %v55_v62, 6 }
 0x1ee   :  { %11809 = vst [vmem:[#allocation431_spill] sm:$0xff] %v6331_v11  ;;  %vm11824_vm6 = vnez %v11823_v24  ;;  %v1445_v11 = vmin.f32 %v1444_v40, %v6350_v13  ;;  %v1503_v40 = vmin.f32 %v1502_v36, %v6371_v21  ;;  %v6411_v30 = vsel %vm11833_vm13, %v6280_v25, 1e+30 }
 0x1ef   :  { %11812 = vst [vmem:[#allocation15_spill] sm:$0xff] %v6338_v63  ;;  %v6381_v43 = vsel %vm11824_vm6, %v5842_v16, 1e+30  ;;  %v1425_v16 = vmin.f32 %v1424_v31, %v6364_v46  ;;  %vm11831_vm6 = vnez %v11755_v15  ;;  %v11835_v31 = vld [vmem:[#allocation25_spill] sm:$0xff]  ;;  %v6424_v36 = vsel %vm11838_vm2, %v6366_v34, 1e+30 }
 0x1f0   :  { %11814 = vst [vmem:[#allocation432_spill] sm:$0xff] %v6345_v53  ;;  %v6406_v35 = vsel %vm11831_vm6, %v6278_v50, 1e+30  ;;  %v1446_v53 = vmin.f32 %v1445_v11, %v6355_v38  ;;  %vm11836_vm10 = vnez %v11835_v31  ;;  %v1504_v11 = vmin.f32 %v1503_v40, %v6396_v33 }
 0x1f1   :  { %11815 = vst [vmem:[#allocation433_spill] sm:$0xff] %v6350_v13  ;;  %v6417_v13 = vsel %vm11836_vm10, %v5860_v7, 1e+30  ;;  %v1426_v58 = vmin.f32 %v1425_v16, %v6381_v43  ;;  %v6436_v7 = vsel %vm11767_vm14, %v6300_v61, 1e+30  ;;  %vm11844_vm2 = vnez %v11699_v28  ;;  %v11846_v16 = vld [vmem:[#allocation133_spill] sm:$0xff] }
 0x1f2   :  { %11816 = vst [vmem:[#allocation434_spill] sm:$0xff] %v6355_v38  ;;  %v6439_v38 = vperm.slane %v55_v62, 0  ;;  %v6444_v26 = vsel %vm11844_vm2, %v6391_v51, 1e+30  ;;  %vm11847_vm13 = vnez %v11846_v16  ;;  %v6462_v28 = vperm.slane %v55_v62, 2 }
 0x1f3   :  { %11819 = vst [vmem:[#allocation16_spill] sm:$0xff] %v6364_v46  ;;  %v6419_v46 = vperm.slane %v54_v59, 7  ;;  %v1447_v59 = vmin.f32 %v1446_v53, %v6376_v60  ;;  %v6451_v40 = vsel %vm11847_vm13, %v5893_v22, 1e+30  ;;  %v6458_v53 = vsel %vm11776_vm7, %v6315_v3, 1e+30 }
 0x1f4   :  { %11821 = vst [vmem:[#allocation435_spill] sm:$0xff] %v6371_v21  ;;  %v11840_v21 = vld [vmem:[#allocation26_spill] sm:$0xff] }
 0x1f5   :  { %11822 = vst [vmem:[#allocation436_spill] sm:$0xff] %v6376_v60  ;;  %vm11841_vm6 = vnez %v11840_v21  ;;  %1448 = vmin.xlane.f32.xlu1 %v1447_v59  ;;  %v6460_v60 = vperm.slane %v55_v62, 1  ;;  %v6477_v59 = vsel %vm11784_vm5, %v6340_v49, 1e+30 }
 0x1f6   :  { %11825 = vst [vmem:[#allocation18_spill] sm:$0xff] %v6381_v43  ;;  %v6429_v63 = vsel %vm11841_vm6, %v5885_v56, 1e+30  ;;  %v1484_v56 = vmin.f32 %v6406_v35, %v6411_v30  ;;  %v1505_v43 = vmin.f32 %v1504_v11, %v6424_v36  ;;  %v6471_v11 = vperm.slane %v55_v62, 3 }
 0x1f7   :  { %11828 = vst [vmem:[#allocation19_spill] sm:$0xff] %v6389_v29  ;;  %v6509_v32 = vsel %vm11723_vm3, %v6460_v60, 1e+30 }
 0x1f8   :  { %11830 = vst [vmem:[#allocation437_spill] sm:$0xff] %v6396_v33  ;;  %v1427_v33 = vmin.f32 %v1426_v58, %v6389_v29  ;;  %v1485_v22 = vmin.f32 %v1484_v56, %v6436_v7  ;;  %v11853_v56 = vld [vmem:[#allocation12_spill] sm:$0xff] }
 0x1f9   :  { %11832 = vst [vmem:[#allocation438_spill] sm:$0xff] %v6406_v35  ;;  %v6482_v35 = vsel %vm11720_vm11, %v6439_v38, 1e+30 }
 0x1fa   :  { %11834 = vst [vmem:[#allocation439_spill] sm:$0xff] %v6411_v30  ;;  %v6467_v30 = vsel %vm11710_vm4, %v6419_v46, 1e+30  ;;  %v1428_v58 = vmin.f32 %v1427_v33, %v6417_v13  ;;  %v1486_v29 = vmin.f32 %v1485_v22, %v6458_v53  ;;  %vm11854_vm4 = vnez %v11853_v56 }
 0x1fb   :  { %11837 = vst [vmem:[#allocation440_spill] sm:$0xff] %v6417_v13  ;;  %v6488_v33 = vsel %vm11854_vm4, %v6278_v50, 1e+30  ;;  %v6496_v13 = vperm.slane %v55_v62, 4  ;;  %v6502_v22 = vsel %vm11789_vm8, %v6366_v34, 1e+30 }
 0x1fc   :  { %11839 = vst [vmem:[#allocation441_spill] sm:$0xff] %v6424_v36  ;;  %v1506_v36 = vmin.f32 %v1505_v43, %v6444_v26  ;;  %v1487_v27 = vmin.f32 %v1486_v29, %v6477_v59  ;;  %v6531_v29 = vsel %vm11734_vm9, %v6462_v28, 1e+30  ;;  %vm11871_vm9 = vnez %v11743_v57 }
 0x1fd   :  { %11842 = vst [vmem:[#allocation26_spill] sm:$0xff] %v6429_v63 }
 0x1fe   :  { %11843 = vst [vmem:[#allocation442_spill] sm:$0xff] %v6436_v7  ;;  %v11856_v7 = vld [vmem:[#allocation13_spill] sm:$0xff]  ;;  %v1507_v52 = vmin.f32 %v1506_v36, %v6467_v30 }
 0x1ff   :  { %11845 = vst [vmem:[#allocation443_spill] sm:$0xff] %v6444_v26  ;;  %vm11857_vm2 = vnez %v11856_v7  ;;  %v1429_v26 = vmin.f32 %v1428_v58, %v6429_v63  ;;  %v11861_v58 = vld [vmem:[#allocation14_spill] sm:$0xff] }
 0x200   :  { %11848 = vst [vmem:[#allocation133_spill] sm:$0xff] %v6451_v40  ;;  %v6493_v43 = vsel %vm11857_vm2, %v6280_v25, 1e+30  ;;  %vm11862_vm11 = vnez %v11861_v58 }
 0x201   :  { %11849 = vst [vmem:[#allocation444_spill] sm:$0xff] %v6458_v53  ;;  %v6504_v53 = vperm.slane %v55_v62, 5  ;;  %v6515_v63 = vsel %vm11862_vm11, %v6300_v61, 1e+30  ;;  %v1430_v36 = vmin.f32 %v1429_v26, %v6451_v40  ;;  %v1467_v41 = vmin.f32 %v6488_v33, %v6493_v43  ;;  %v11866_v26 = vld [vmem:[#allocation20_spill] sm:$0xff] }
 0x202   :  { %11850 = vst [vmem:[#allocation445_spill] sm:$0xff] %v6467_v30  ;;  %v1508_v30 = vmin.f32 %v1507_v52, %v6482_v35  ;;  %vm11867_vm3 = vnez %v11866_v26 }
 0x203   :  { %11851 = vst [vmem:[#allocation446_spill] sm:$0xff] %v6477_v59  ;;  %v1488_v59 = vmin.f32 %v1487_v27, %v6502_v22  ;;  %v6537_v52 = vsel %vm11867_vm3, %v6315_v3, 1e+30  ;;  %1431 = vmin.xlane.f32.xlu0 %v1430_v36  ;;  %v6551_v27 = vsel %vm11871_vm9, %v6471_v11, 1e+30  ;;  %vm11877_vm9 = vnez %v11561_v5 }
 0x204   :  { %11852 = vst [vmem:[#allocation447_spill] sm:$0xff] %v6482_v35  ;;  %v6539_v35 = vperm.slane %v55_v62, 7  ;;  %v1509_v40 = vmin.f32 %v1508_v30, %v6509_v32  ;;  %v6556_v36 = vsel %vm11803_vm0, %v6439_v38, 1e+30  ;;  %v11874_v30 = vld [vmem:[#allocation27_spill] sm:$0xff]  ;;  %vm11879_vm0 = vnez %v11564_v37 }
 0x205   :  { %11855 = vst [vmem:[#allocation12_spill] sm:$0xff] %v6488_v33  ;;  %v1468_v33 = vmin.f32 %v1467_v41, %v6515_v63  ;;  %v1489_v62 = vmin.f32 %v1488_v59, %v6522_v42  ;;  %vm11875_vm3 = vnez %v11874_v30  ;;  %v6574_v57 = vsel %vm11879_vm0, %v6280_v25, 1e+30 }
 0x206   :  { %11858 = vst [vmem:[#allocation13_spill] sm:$0xff] %v6493_v43  ;;  %v6545_v43 = vsel %vm11869_vm12, %v6419_v46, 1e+30  ;;  %v6579_v59 = vsel %vm11749_vm1, %v6496_v13, 1e+30  ;;  %vm11886_vm0 = vnez %v11810_v2  ;;  %vm11890_vm1 = vnez %v11769_v10 }
 0x207   :  { %11859 = vst [vmem:[#allocation448_spill] sm:$0xff] %v6502_v22  ;;  %v1510_v22 = vmin.f32 %v1509_v40, %v6531_v29  ;;  %v1469_v41 = vmin.f32 %v1468_v33, %v6537_v52  ;;  %v6584_v40 = vsel %vm11762_vm15, %v6504_v53, 1e+30  ;;  %v1490_v33 = vmin.f32 %v1489_v62, %v6545_v43 }
 0x208   :  { %11860 = vst [vmem:[#allocation449_spill] sm:$0xff] %v6509_v32  ;;  %v6562_v32 = vsel %vm11875_vm3, %v6340_v49, 1e+30  ;;  %vm11888_vm15 = vnez %v11571_v18  ;;  %v6607_v62 = vsel %vm11890_vm1, %v6526_v44, 1e+30  ;;  %vm11897_vm1 = vnez %v11576_v1 }
 0x209   :  { %11863 = vst [vmem:[#allocation14_spill] sm:$0xff] %v6515_v63  ;;  %v6569_v63 = vsel %vm11877_vm9, %v6278_v50, 1e+30  ;;  %v11883_v50 = vld [vmem:[#allocation28_spill] sm:$0xff]  ;;  %v1511_v25 = vmin.f32 %v1510_v22, %v6551_v27  ;;  %v6602_v20 = vsel %vm11888_vm15, %v6300_v61, 1e+30  ;;  %vm11895_vm15 = vnez %v11817_v17 }
 0x20a   :  { %11864 = vst [vmem:[#allocation450_spill] sm:$0xff] %v6522_v42  ;;  %vm11884_vm9 = vnez %v11883_v50  ;;  %v1470_v42 = vmin.f32 %v1469_v41, %v6562_v32  ;;  %v11892_v22 = vld [vmem:[#allocation31_spill] sm:$0xff]  ;;  %v1518_v41 = vmin.f32 %v6569_v63, %v6574_v57  ;;  %v6621_v61 = vsel %vm11895_vm15, %v6462_v28, 1e+30 }
 0x20b   :  { %11865 = vst [vmem:[#allocation451_spill] sm:$0xff] %v6531_v29  ;;  %v6590_v29 = vsel %vm11884_vm9, %v6366_v34, 1e+30  ;;  %vm11893_vm9 = vnez %v11892_v22 }
 0x20c   :  { %11868 = vst [vmem:[#allocation20_spill] sm:$0xff] %v6537_v52  ;;  %v6596_v52 = vsel %vm11886_vm0, %v6460_v60, 1e+30  ;;  %v1471_v10 = vmin.f32 %v1470_v42, %v6590_v29 }
 0x20d   :  { %11870 = vst [vmem:[#allocation452_spill] sm:$0xff] %v6545_v43  ;;  %v1491_v43 = vmin.f32 %v1490_v33, %v6556_v36  ;;  %v6627_v33 = vsel %vm11897_vm1, %v6315_v3, 1e+30  ;;  %vm11904_vm1 = vnez %v11823_v24  ;;  %v11996_v24 = vld [vmem:[#allocation57_spill] sm:$0xff] }
 0x20e   :  { %11872 = vst [vmem:[#allocation453_spill] sm:$0xff] %v6551_v27  ;;  %v6613_v27 = vsel %vm11893_vm9, %v6391_v51, 1e+30  ;;  %vm11899_vm9 = vnez %v11778_v14  ;;  %v6645_v3 = vsel %vm11904_vm1, %v6471_v11, 1e+30  ;;  %v11906_v14 = vld [vmem:[#allocation143_spill] sm:$0xff] }
 0x20f   :  { %11873 = vst [vmem:[#allocation454_spill] sm:$0xff] %v6556_v36  ;;  %v6632_v36 = vsel %vm11899_vm9, %v6539_v35, 1e+30  ;;  %vm11907_vm9 = vnez %v11906_v14 }
 0x210   :  { %11876 = vst [vmem:[#allocation27_spill] sm:$0xff] %v6562_v32  ;;  %v1512_v32 = vmin.f32 %v1511_v25, %v6579_v59  ;;  %v11901_v25 = vld [vmem:[#allocation32_spill] sm:$0xff] }
 0x211   :  { %11878 = vst [vmem:[#allocation455_spill] sm:$0xff] %v6569_v63  ;;  %vm11902_vm0 = vnez %v11901_v25 }
 0x212   :  { %11880 = vst [vmem:[#allocation456_spill] sm:$0xff] %v6574_v57  ;;  %v1492_v57 = vmin.f32 %v1491_v43, %v6596_v52  ;;  %v6638_v63 = vsel %vm11902_vm0, %v6419_v46, 1e+30  ;;  %v1513_v42 = vmin.f32 %v1512_v32, %v6584_v40  ;;  %v6651_v43 = vsel %vm11907_vm9, %v6340_v49, 1e+30  ;;  %v11911_v32 = vld [vmem:[#allocation33_spill] sm:$0xff] }
 0x213   :  { %11881 = vst [vmem:[#allocation457_spill] sm:$0xff] %v6579_v59  ;;  %v1519_v59 = vmin.f32 %v1518_v41, %v6602_v20  ;;  %vm11909_vm0 = vnez %v11826_v12  ;;  %vm11912_vm15 = vnez %v11911_v32 }
 0x214   :  { %11882 = vst [vmem:[#allocation458_spill] sm:$0xff] %v6584_v40  ;;  %v1493_v41 = vmin.f32 %v1492_v57, %v6621_v61  ;;  %v1514_v49 = vmin.f32 %v1513_v42, %v6607_v62  ;;  %v11921_v42 = vld [vmem:[#allocation145_spill] sm:$0xff] }
 0x215   :  { %11885 = vst [vmem:[#allocation28_spill] sm:$0xff] %v6590_v29  ;;  %v1472_v29 = vmin.f32 %v1471_v10, %v6613_v27  ;;  %v1520_v40 = vmin.f32 %v1519_v59, %v6627_v33  ;;  %v56_v10 = vld [vmem:[%s9646_s0 + $0x70] sm:$0xff] }
 0x216   :  { %11887 = vst [vmem:[#allocation459_spill] sm:$0xff] %v6596_v52  ;;  %v6656_v52 = vsel %vm11909_vm0, %v6496_v13, 1e+30  ;;  %v1494_v59 = vmin.f32 %v1493_v41, %v6645_v3  ;;  %v6701_v41 = vsel %vm11841_vm6, %v6526_v44, 1e+30 }
 0x217   :  { %11889 = vst [vmem:[#allocation460_spill] sm:$0xff] %v6602_v20  ;;  %v6662_v20 = vsel %vm11912_vm15, %v6439_v38, 1e+30  ;;  %v1473_v57 = vmin.f32 %v1472_v29, %v6638_v63  ;;  %vm11922_vm15 = vnez %v11921_v42  ;;  %v1521_v31 = vmin.f32 %v1520_v40, %v6651_v43 }
 0x218   :  { %11891 = vst [vmem:[#allocation461_spill] sm:$0xff] %v6607_v62  ;;  %v6689_v62 = vsel %vm11922_vm15, %v6391_v51, 1e+30  ;;  %v1515_v29 = vmin.f32 %v1514_v49, %v6632_v36  ;;  %v11925_v51 = vld [vmem:[#allocation35_spill] sm:$0xff]  ;;  %v6713_v49 = vsel %vm11847_vm13, %v6539_v35, 1e+30  ;;  %vm11935_vm13 = vnez %v11610_v0 }
 0x219   :  { %11894 = vst [vmem:[#allocation31_spill] sm:$0xff] %v6613_v27  ;;  %v6672_v27 = vsel %vm11836_vm10, %v6504_v53, 1e+30  ;;  %vm11926_vm15 = vnez %v11925_v51 }
 0x21a   :  { %11896 = vst [vmem:[#allocation462_spill] sm:$0xff] %v6621_v61  ;;  %v11915_v61 = vld [vmem:[#allocation144_spill] sm:$0xff]  ;;  %v6707_v42 = vsel %vm11926_vm15, %v6462_v28, 1e+30  ;;  %1516 = vmin.xlane.f32.xlu2 %v1515_v29  ;;  %v6732_v29 = vsel %vm11935_vm13, %v6439_v38, 1e+30 }
 0x21b   :  { %11898 = vst [vmem:[#allocation463_spill] sm:$0xff] %v6627_v33  ;;  %vm11916_vm0 = vnez %v11915_v61  ;;  %v11918_v33 = vld [vmem:[#allocation34_spill] sm:$0xff]  ;;  %v6696_v61 = vperm.slane %v56_v10, 1  ;;  %v11941_v38 = vld [vmem:[#allocation39_spill] sm:$0xff] }
 0x21c   :  { %11900 = vst [vmem:[#allocation464_spill] sm:$0xff] %v6632_v36  ;;  %v6678_v47 = vsel %vm11916_vm0, %v6366_v34, 1e+30  ;;  %vm11919_vm9 = vnez %v11918_v33  ;;  %v6694_v34 = vperm.slane %v56_v10, 0  ;;  %vm11942_vm13 = vnez %v11941_v38 }
 0x21d   :  { %11903 = vst [vmem:[#allocation32_spill] sm:$0xff] %v6638_v63  ;;  %v6684_v54 = vsel %vm11919_vm9, %v6460_v60, 1e+30  ;;  %v1474_v63 = vmin.f32 %v1473_v57, %v6662_v20  ;;  %v1522_v40 = vmin.f32 %v1521_v31, %v6678_v47 }
 0x21e   :  { %11905 = vst [vmem:[#allocation465_spill] sm:$0xff] %v6645_v3  ;;  %v1495_v3 = vmin.f32 %v1494_v59, %v6656_v52  ;;  %v6721_v59 = vperm.slane %v56_v10, 2 }
 0x21f   :  { %11908 = vst [vmem:[#allocation143_spill] sm:$0xff] %v6651_v43  ;;  %v1475_v57 = vmin.f32 %v1474_v63, %v6684_v54  ;;  %v11929_v43 = vld [vmem:[#allocation146_spill] sm:$0xff]  ;;  %v1523_v63 = vmin.f32 %v1522_v40, %v6689_v62  ;;  %v6752_v40 = vsel %vm11942_vm13, %v6496_v13, 1e+30 }
 0x220   :  { %11910 = vst [vmem:[#allocation466_spill] sm:$0xff] %v6656_v52  ;;  %vm11930_vm6 = vnez %v11929_v43  ;;  %v11932_v52 = vld [vmem:[#allocation38_spill] sm:$0xff] }
 0x221   :  { %11913 = vst [vmem:[#allocation33_spill] sm:$0xff] %v6662_v20  ;;  %v6719_v36 = vsel %vm11930_vm6, %v6419_v46, 1e+30  ;;  %v1496_v20 = vmin.f32 %v1495_v3, %v6672_v27  ;;  %vm11933_vm15 = vnez %v11932_v52  ;;  %v6736_v46 = vperm.slane %v56_v10, 3 }
 0x222   :  { %11914 = vst [vmem:[#allocation467_spill] sm:$0xff] %v6672_v27  ;;  %v6727_v31 = vsel %vm11933_vm15, %v6471_v11, 1e+30  ;;  %vm11937_vm6 = vnez %v11755_v15  ;;  %vm11939_vm15 = vnez %v11758_v4  ;;  %v6766_v4 = vsel %vm11767_vm14, %v6721_v59, 1e+30 }
 0x223   :  { %11917 = vst [vmem:[#allocation468_spill] sm:$0xff] %v6678_v47  ;;  %v1476_v47 = vmin.f32 %v1475_v57, %v6707_v42  ;;  %v6741_v3 = vsel %vm11937_vm6, %v6694_v34, 1e+30  ;;  %v1497_v27 = vmin.f32 %v1496_v20, %v6701_v41  ;;  %v1524_v57 = vmin.f32 %v1523_v63, %v6719_v36 }
 0x224   :  { %11920 = vst [vmem:[#allocation34_spill] sm:$0xff] %v6684_v54  ;;  %v6746_v54 = vsel %vm11939_vm15, %v6696_v61, 1e+30  ;;  %vm11944_vm6 = vnez %v11614_v48 }
 0x225   :  { %11923 = vst [vmem:[#allocation469_spill] sm:$0xff] %v6689_v62  ;;  %v1477_v62 = vmin.f32 %v1476_v47, %v6727_v31  ;;  %v6759_v15 = vsel %vm11944_vm6, %v6460_v60, 1e+30  ;;  %v1498_v20 = vmin.f32 %v1497_v27, %v6713_v49  ;;  %v1525_v47 = vmin.f32 %v1524_v57, %v6732_v29  ;;  %v11952_v57 = vld [vmem:[#allocation41_spill] sm:$0xff] }
 0x226   :  { %11924 = vst [vmem:[#allocation470_spill] sm:$0xff] %v6701_v41  ;;  %v11947_v41 = vld [vmem:[#allocation40_spill] sm:$0xff]  ;;  %v1552_v60 = vmin.f32 %v6741_v3, %v6746_v54  ;;  %vm11949_vm6 = vnez %v11620_v23  ;;  %v6788_v27 = vsel %vm11776_vm7, %v6736_v46, 1e+30  ;;  %vm11953_vm14 = vnez %v11952_v57 }
 0x227   :  { %11927 = vst [vmem:[#allocation35_spill] sm:$0xff] %v6707_v42  ;;  %v6761_v42 = vperm.slane %v56_v10, 4  ;;  %vm11948_vm15 = vnez %v11947_v41  ;;  %v6781_v6 = vsel %vm11949_vm6, %v6462_v28, 1e+30  ;;  %1499 = vmin.xlane.f32.xlu1 %v1498_v20  ;;  %v1526_v28 = vmin.f32 %v1525_v47, %v6759_v15  ;;  %v57_v47 = vld [vmem:[%s9646_s0 + $0x78] sm:$0xff] }
 0x228   :  { %11928 = vst [vmem:[#allocation471_spill] sm:$0xff] %v6713_v49  ;;  %v6772_v63 = vsel %vm11948_vm15, %v6504_v53, 1e+30  ;;  %vm11957_vm7 = vnez %v11706_v39  ;;  %v6808_v20 = vperm.slane %v56_v10, 6  ;;  %v12046_v39 = vld [vmem:[#allocation77_spill] sm:$0xff] }
 0x229   :  { %11931 = vst [vmem:[#allocation146_spill] sm:$0xff] %v6719_v36  ;;  %v1478_v36 = vmin.f32 %v1477_v62, %v6752_v40  ;;  %v11955_v62 = vld [vmem:[#allocation45_spill] sm:$0xff]  ;;  %v6806_v45 = vsel %vm11957_vm7, %v6471_v11, 1e+30  ;;  %v6813_v49 = vsel %vm11784_vm5, %v6761_v42, 1e+30 }
 0x22a   :  { %11934 = vst [vmem:[#allocation38_spill] sm:$0xff] %v6727_v31  ;;  %v6783_v31 = vperm.slane %v56_v10, 5  ;;  %vm11956_vm15 = vnez %v11955_v62  ;;  %v1527_v62 = vmin.f32 %v1526_v28, %v6781_v6  ;;  %v6823_v11 = vsel %vm11854_vm4, %v6694_v34, 1e+30  ;;  %v11961_v28 = vld [vmem:[#allocation155_spill] sm:$0xff] }
 0x22b   :  { %11936 = vst [vmem:[#allocation472_spill] sm:$0xff] %v6732_v29  ;;  %v6793_v29 = vsel %vm11953_vm14, %v6526_v44, 1e+30  ;;  %vm11962_vm5 = vnez %v11961_v28 }
 0x22c   :  { %11938 = vst [vmem:[#allocation473_spill] sm:$0xff] %v6741_v3  ;;  %v1553_v3 = vmin.f32 %v1552_v60, %v6766_v4  ;;  %v6828_v60 = vsel %vm11857_vm2, %v6696_v61, 1e+30  ;;  %v6841_v56 = vsel %vm11789_vm8, %v6783_v31, 1e+30  ;;  %vm11968_vm2 = vnez %v11793_v55  ;;  %v11973_v55 = vld [vmem:[#allocation160_spill] sm:$0xff] }
 0x22d   :  { %11940 = vst [vmem:[#allocation474_spill] sm:$0xff] %v6746_v54  ;;  %v6798_v54 = vsel %vm11956_vm15, %v6539_v35, 1e+30 }
 0x22e   :  { %11943 = vst [vmem:[#allocation39_spill] sm:$0xff] %v6752_v40  ;;  %v1479_v40 = vmin.f32 %v1478_v36, %v6772_v63  ;;  %v1554_v36 = vmin.f32 %v1553_v3, %v6788_v27  ;;  %v6861_v3 = vsel %vm11968_vm2, %v6808_v20, 1e+30  ;;  %vm11974_vm2 = vnez %v11973_v55 }
 0x22f   :  { %11945 = vst [vmem:[#allocation475_spill] sm:$0xff] %v6759_v15  ;;  %v6836_v15 = vperm.slane %v56_v10, 7 }
 0x230   :  { %11946 = vst [vmem:[#allocation476_spill] sm:$0xff] %v6766_v4  ;;  %v1480_v8 = vmin.f32 %v1479_v40, %v6793_v29  ;;  %v1528_v4 = vmin.f32 %v1527_v62, %v6806_v45  ;;  %v1555_v40 = vmin.f32 %v1554_v36, %v6813_v49  ;;  %v11969_v62 = vld [vmem:[#allocation157_spill] sm:$0xff] }
 0x231   :  { %11950 = vst [vmem:[#allocation40_spill] sm:$0xff] %v6781_v6  ;;  %v6834_v6 = vsel %vm11962_vm5, %v6496_v13, 1e+30  ;;  %v6853_v13 = vsel %vm11862_vm11, %v6721_v59, 1e+30  ;;  %vm11970_vm8 = vnez %v11969_v62  ;;  %vm11972_vm11 = vnez %v11866_v26 }
 0x232   :  { %11951 = vst [vmem:[#allocation477_spill] sm:$0xff] %v6788_v27  ;;  %v11965_v27 = vld [vmem:[#allocation156_spill] sm:$0xff]  ;;  %v1481_v10 = vmin.f32 %v1480_v8, %v6798_v54  ;;  %v6868_v36 = vsel %vm11970_vm8, %v6526_v44, 1e+30  ;;  %v1529_v58 = vmin.f32 %v1528_v4, %v6834_v6  ;;  %v6875_v8 = vsel %vm11972_vm11, %v6736_v46, 1e+30 }
 0x233   :  { %11954 = vst [vmem:[#allocation41_spill] sm:$0xff] %v6793_v29  ;;  %vm11966_vm4 = vnez %v11965_v27  ;;  %v6856_v29 = vperm.slane %v57_v47, 0  ;;  %v6887_v44 = vsel %vm11869_vm12, %v6836_v15, 1e+30  ;;  %v6891_v26 = vperm.slane %v57_v47, 2 }
 0x234   :  { %11958 = vst [vmem:[#allocation478_spill] sm:$0xff] %v6806_v45  ;;  %v6846_v7 = vsel %vm11966_vm4, %v6504_v53, 1e+30  ;;  %v1535_v53 = vmin.f32 %v6823_v11, %v6828_v60  ;;  %v1556_v45 = vmin.f32 %v1555_v40, %v6841_v56  ;;  %1482 = vmin.xlane.f32.xlu0 %v1481_v10  ;;  %vm11977_vm11 = vnez %v11802_v9 }
 0x235   :  { %11959 = vst [vmem:[#allocation479_spill] sm:$0xff] %v6813_v49  ;;  %v6880_v49 = vsel %vm11974_vm2, %v6539_v35, 1e+30  ;;  %v1530_v40 = vmin.f32 %v1529_v58, %v6846_v7  ;;  %v6897_v35 = vsel %vm11875_vm3, %v6761_v42, 1e+30  ;;  %vm11978_vm12 = vnez %v11561_v5 }
 0x236   :  { %11960 = vst [vmem:[#allocation480_spill] sm:$0xff] %v6828_v60  ;;  %v6882_v60 = vperm.slane %v57_v47, 1  ;;  %v1536_v4 = vmin.f32 %v1535_v53, %v6853_v13  ;;  %v1557_v10 = vmin.f32 %v1556_v45, %v6861_v3  ;;  %v6908_v53 = vsel %vm11978_vm12, %v6694_v34, 1e+30 }
 0x237   :  { %11963 = vst [vmem:[#allocation155_spill] sm:$0xff] %v6834_v6  ;;  %v6902_v6 = vsel %vm11977_vm11, %v6856_v29, 1e+30  ;;  %vm11980_vm2 = vnez %v11564_v37  ;;  %v1531_v30 = vmin.f32 %v1530_v40, %v6868_v36  ;;  %v6916_v58 = vperm.slane %v57_v47, 3 }
 0x238   :  { %11967 = vst [vmem:[#allocation117_spill] sm:$0xff] %v6846_v7  ;;  %v1537_v19 = vmin.f32 %v1536_v4, %v6875_v8  ;;  %v6913_v45 = vsel %vm11980_vm2, %v6696_v61, 1e+30  ;;  %v1558_v9 = vmin.f32 %v1557_v10, %v6887_v44  ;;  %vm11982_vm3 = vnez %v11883_v50 }
 0x239   :  { %11971 = vst [vmem:[#allocation156_spill] sm:$0xff] %v6868_v36  ;;  %v6922_v4 = vsel %vm11982_vm3, %v6783_v31, 1e+30  ;;  %v6924_v7 = vperm.slane %v57_v47, 4  ;;  %vm11983_vm11 = vnez %v11810_v2  ;;  %vm11984_vm2 = vnez %v11571_v18 }
 0x23a   :  { %11975 = vst [vmem:[#allocation157_spill] sm:$0xff] %v6880_v49  ;;  %v6929_v5 = vsel %vm11983_vm11, %v6882_v60, 1e+30  ;;  %v1538_v37 = vmin.f32 %v1537_v19, %v6897_v35  ;;  %v6935_v40 = vsel %vm11984_vm2, %v6721_v59, 1e+30  ;;  %v1532_v10 = vmin.f32 %v1531_v30, %v6880_v49 }
 0x23b   :  { %11976 = vst [vmem:[#allocation160_spill] sm:$0xff] %v6887_v44  ;;  %v1559_v50 = vmin.f32 %v1558_v9, %v6902_v6  ;;  %vm11986_vm12 = vnez %v11892_v22  ;;  %v1586_v2 = vmin.f32 %v6908_v53, %v6913_v45  ;;  %v6946_v44 = vperm.slane %v57_v47, 5 }
 0x23c   :  { %11979 = vst [vmem:[#allocation481_spill] sm:$0xff] %v6908_v53  ;;  %v6942_v36 = vsel %vm11986_vm12, %v6808_v20, 1e+30  ;;  %vm11987_vm3 = vnez %v11817_v17  ;;  %v1539_v19 = vmin.f32 %v1538_v37, %v6922_v4  ;;  %vm11989_vm11 = vnez %v11576_v1  ;;  %1533 = vmin.xlane.f32.xlu2 %v1532_v10 }
 0x23d   :  { %11981 = vst [vmem:[#allocation482_spill] sm:$0xff] %v6913_v45  ;;  %v6951_v18 = vsel %vm11987_vm3, %v6891_v26, 1e+30  ;;  %v6957_v30 = vsel %vm11989_vm11, %v6736_v46, 1e+30  ;;  %v6959_v22 = vperm.slane %v57_v47, 6  ;;  %v1560_v9 = vmin.f32 %v1559_v50, %v6929_v5 }
 0x23e   :  { %11985 = vst [vmem:[#allocation483_spill] sm:$0xff] %v6935_v40  ;;  %vm11991_vm2 = vnez %v11901_v25  ;;  %v1587_v17 = vmin.f32 %v1586_v2, %v6935_v40  ;;  %v6971_v37 = vsel %vm11904_vm1, %v6916_v58, 1e+30  ;;  %vm11993_vm12 = vnez %v11911_v32  ;;  %v11999_v32 = vld [vmem:[#allocation60_spill] sm:$0xff] }
 0x23f   :  { %11988 = vst [vmem:[#allocation484_spill] sm:$0xff] %v6951_v18  ;;  %v6965_v45 = vsel %vm11991_vm2, %v6836_v15, 1e+30  ;;  %v6976_v1 = vsel %vm11993_vm12, %v6856_v29, 1e+30  ;;  %v1540_v10 = vmin.f32 %v1539_v19, %v6942_v36  ;;  %vm11994_vm3 = vnez %v11906_v14 }
 0x240   :  { %11990 = vst [vmem:[#allocation485_spill] sm:$0xff] %v6957_v30  ;;  %v6982_v25 = vsel %vm11994_vm3, %v6761_v42, 1e+30  ;;  %v1561_v50 = vmin.f32 %v1560_v9, %v6951_v18  ;;  %v1588_v2 = vmin.f32 %v1587_v17, %v6957_v30  ;;  %vm11997_vm1 = vnez %v11996_v24 }
 0x241   :  { %11992 = vst [vmem:[#allocation486_spill] sm:$0xff] %v6971_v37  ;;  %v6989_v40 = vsel %vm11997_vm1, %v6694_v34, 1e+30  ;;  %vm12000_vm11 = vnez %v11999_v32  ;;  %v6996_v19 = vperm.slane %v57_v47, 7  ;;  %vm12002_vm2 = vnez %v11826_v12  ;;  %v12006_v12 = vld [vmem:[#allocation65_spill] sm:$0xff] }
 0x242   :  { %11995 = vst [vmem:[#allocation487_spill] sm:$0xff] %v6982_v25  ;;  %v6994_v53 = vsel %vm12000_vm11, %v6696_v61, 1e+30  ;;  %v7001_v14 = vsel %vm12002_vm2, %v6924_v7, 1e+30  ;;  %v1541_v9 = vmin.f32 %v1540_v10, %v6965_v45  ;;  %v1562_v34 = vmin.f32 %v1561_v50, %v6971_v37  ;;  %v12011_v50 = vld [vmem:[#allocation145_spill] sm:$0xff] }
 0x243   :  { %11998 = vst [vmem:[#allocation57_spill] sm:$0xff] %v6989_v40  ;;  %v7007_v24 = vsel %vm11916_vm0, %v6783_v31, 1e+30  ;;  %v7013_v61 = vsel %vm11919_vm9, %v6882_v60, 1e+30  ;;  %v1589_v47 = vmin.f32 %v1588_v2, %v6982_v25  ;;  %vm12007_vm12 = vnez %v12006_v12  ;;  %v12015_v10 = vld [vmem:[#allocation70_spill] sm:$0xff] }
 0x244   :  { %12001 = vst [vmem:[#allocation60_spill] sm:$0xff] %v6994_v53  ;;  %v7019_v32 = vsel %vm12007_vm12, %v6721_v59, 1e+30  ;;  %v7024_v17 = vsel %vm11836_vm10, %v6946_v44, 1e+30  ;;  %v1542_v30 = vmin.f32 %v1541_v9, %v6976_v1  ;;  %vm12012_vm0 = vnez %v12011_v50 }
 0x245   :  { %12003 = vst [vmem:[#allocation488_spill] sm:$0xff] %v7001_v14  ;;  %v7030_v33 = vsel %vm12012_vm0, %v6808_v20, 1e+30  ;;  %v1569_v2 = vmin.f32 %v6989_v40, %v6994_v53  ;;  %v1563_v25 = vmin.f32 %v1562_v34, %v7001_v14  ;;  %vm12014_vm9 = vnez %v11925_v51  ;;  %v12110_v14 = vld [vmem:[#allocation128_spill] sm:$0xff] }
 0x246   :  { %12005 = vst [vmem:[#allocation144_spill] sm:$0xff] %v7007_v24  ;;  %v7038_v59 = vsel %vm12014_vm9, %v6891_v26, 1e+30  ;;  %v1590_v12 = vmin.f32 %v1589_v47, %v7007_v24  ;;  %vm12016_vm10 = vnez %v12015_v10  ;;  %vm12018_vm3 = vnez %v11840_v21  ;;  %v12023_v10 = vld [vmem:[#allocation72_spill] sm:$0xff] }
 0x247   :  { %12008 = vst [vmem:[#allocation65_spill] sm:$0xff] %v7019_v32  ;;  %v7044_v9 = vsel %vm12016_vm10, %v6736_v46, 1e+30  ;;  %v7049_v50 = vsel %vm12018_vm3, %v6959_v22, 1e+30  ;;  %v1543_v49 = vmin.f32 %v1542_v30, %v7013_v61  ;;  %vm12020_vm1 = vnez %v11929_v43 }
 0x248   :  { %12010 = vst [vmem:[#allocation25_spill] sm:$0xff] %v7024_v17  ;;  %v7055_v51 = vsel %vm12020_vm1, %v6836_v15, 1e+30  ;;  %v1570_v34 = vmin.f32 %v1569_v2, %v7019_v32  ;;  %v1564_v47 = vmin.f32 %v1563_v25, %v7024_v17  ;;  %vm12022_vm11 = vnez %v11932_v52  ;;  %v12093_v32 = vld [vmem:[#allocation93_spill] sm:$0xff] }
 0x249   :  { %12013 = vst [vmem:[#allocation145_spill] sm:$0xff] %v7030_v33  ;;  %v7062_v46 = vsel %vm12022_vm11, %v6916_v58, 1e+30  ;;  %v1591_v21 = vmin.f32 %v1590_v12, %v7030_v33  ;;  %vm12024_vm2 = vnez %v12023_v10  ;;  %vm12026_vm12 = vnez %v11846_v16  ;;  %v12030_v10 = vld [vmem:[#allocation74_spill] sm:$0xff]  ;;  %v12078_v33 = vld [vmem:[#allocation83_spill] sm:$0xff] }
 0x24a   :  { %12017 = vst [vmem:[#allocation70_spill] sm:$0xff] %v7044_v9  ;;  %v7068_v30 = vsel %vm12024_vm2, %v6761_v42, 1e+30  ;;  %v7073_v43 = vsel %vm12026_vm12, %v6996_v19, 1e+30  ;;  %v1544_v2 = vmin.f32 %v1543_v49, %v7038_v59  ;;  %vm12028_vm0 = vnez %v11610_v0 }
 0x24b   :  { %12019 = vst [vmem:[#allocation489_spill] sm:$0xff] %v7049_v50  ;;  %v7079_v52 = vsel %vm12028_vm0, %v6856_v29, 1e+30  ;;  %v1571_v25 = vmin.f32 %v1570_v34, %v7044_v9  ;;  %v1565_v12 = vmin.f32 %v1564_v47, %v7049_v50  ;;  %v7086_v42 = vsel %vm11942_vm13, %v6924_v7, 1e+30 }
 0x24c   :  { %12021 = vst [vmem:[#allocation490_spill] sm:$0xff] %v7055_v51  ;;  %v1592_v16 = vmin.f32 %v1591_v21, %v7055_v51  ;;  %vm12031_vm9 = vnez %v12030_v10  ;;  %v1545_v0 = vmin.f32 %v1544_v2, %v7062_v46  ;;  %vm12033_vm10 = vnez %v11614_v48  ;;  %v12054_v51 = vld [vmem:[#allocation67_spill] sm:$0xff] }
 0x24d   :  { %12025 = vst [vmem:[#allocation72_spill] sm:$0xff] %v7068_v30  ;;  %v7092_v49 = vsel %vm12031_vm9, %v6783_v31, 1e+30  ;;  %v7098_v34 = vsel %vm12033_vm10, %v6882_v60, 1e+30  ;;  %v1572_v47 = vmin.f32 %v1571_v25, %v7068_v30  ;;  %v1566_v38 = vmin.f32 %v1565_v12, %v7073_v43  ;;  %v12036_v31 = vld [vmem:[#allocation75_spill] sm:$0xff] }
 0x24e   :  { %12027 = vst [vmem:[#allocation491_spill] sm:$0xff] %v7073_v43  ;;  %vm12035_vm13 = vnez %v11947_v41  ;;  %v1593_v10 = vmin.f32 %v1592_v16, %v7079_v52  ;;  %vm12037_vm3 = vnez %v12036_v31  ;;  %v1546_v48 = vmin.f32 %v1545_v0, %v7086_v42 }
 0x24f   :  { %12029 = vst [vmem:[#allocation492_spill] sm:$0xff] %v7079_v52  ;;  %v7105_v21 = vsel %vm12035_vm13, %v6946_v44, 1e+30  ;;  %v7111_v2 = vsel %vm12037_vm3, %v6808_v20, 1e+30  ;;  %v1573_v12 = vmin.f32 %v1572_v47, %v7092_v49  ;;  %1567 = vmin.xlane.f32.xlu1 %v1566_v38  ;;  %v12040_v20 = vld [vmem:[#allocation76_spill] sm:$0xff] }
 0x250   :  { %12032 = vst [vmem:[#allocation74_spill] sm:$0xff] %v7092_v49  ;;  %v7117_v25 = vsel %vm11949_vm6, %v6891_v26, 1e+30  ;;  %v7123_v41 = vsel %vm11953_vm14, %v6959_v22, 1e+30  ;;  %v1594_v16 = vmin.f32 %v1593_v10, %v7098_v34  ;;  %vm12041_vm1 = vnez %v12040_v20  ;;  %v7138_v38 = vld [vmem:[#allocation4] sm:$0xff] }
 0x251   :  { %12034 = vst [vmem:[#allocation493_spill] sm:$0xff] %v7098_v34  ;;  %v7129_v31 = vsel %vm12041_vm1, %v6836_v15, 1e+30  ;;  %v1547_v0 = vmin.f32 %v1546_v48, %v7105_v21  ;;  %v7135_v23 = vsel %vm11957_vm7, %v6916_v58, 1e+30  ;;  %v1574_v47 = vmin.f32 %v1573_v12, %v7111_v2  ;;  %v7156_v12 = vpop.xlane.xlu1 %1108  ;;  %v12091_v49 = vld [vmem:[#allocation105_spill] sm:$0xff] }
 0x252   :  { %12038 = vst [vmem:[#allocation75_spill] sm:$0xff] %v7111_v2  ;;  %v7143_v10 = vsel %vm11956_vm15, %v6996_v19, 1e+30  ;;  %v7148_v15 = vsel %vm11962_vm5, %v6924_v7, 1e+30  ;;  %v1595_v48 = vmin.f32 %v1594_v16, %v7117_v25  ;;  %vm12047_vm6 = vnez %v12046_v39  ;;  %v12089_v2 = vld [vmem:[#allocation104_spill] sm:$0xff] }
 0x253   :  { %12039 = vst [vmem:[#allocation494_spill] sm:$0xff] %v7117_v25  ;;  %v7154_v20 = vsel %vm12047_vm6, %v6856_v29, 1e+30  ;;  %v1548_v34 = vmin.f32 %v1547_v0, %v7123_v41  ;;  %v7162_v57 = vsel %vm11966_vm4, %v6946_v44, 1e+30  ;;  %v1575_v16 = vmin.f32 %v1574_v47, %v7129_v31  ;;  %v12051_v29 = vld [vmem:[#allocation79_spill] sm:$0xff] }
 0x254   :  { %12042 = vst [vmem:[#allocation76_spill] sm:$0xff] %v7129_v31  ;;  %v7167_v28 = vsel %vm11970_vm8, %v6959_v22, 1e+30  ;;  %v1596_v39 = vmin.f32 %v1595_v48, %v7135_v23  ;;  %vm12052_vm15 = vnez %v12051_v29  ;;  %v7177_v0 = vperm.slane %v7138_v38, 0  ;;  %v12055_v47 = vld [vmem:[#allocation71_spill] sm:$0xff]  ;;  %v12058_v29 = vld [vmem:[#allocation80_spill] sm:$0xff] }
 0x255   :  { %12043 = vst [vmem:[#allocation495_spill] sm:$0xff] %v7135_v23  ;;  %v7174_v25 = vsel %vm12052_vm15, %v6882_v60, 1e+30  ;;  %v7180_v27 = vperm.slane %v7138_v38, 1  ;;  %v1549_v52 = vmin.f32 %v1548_v34, %v7143_v10  ;;  %v1576_v62 = vmin.f32 %v1575_v16, %v7154_v20  ;;  %v12061_v34 = vld [vmem:[#allocation81_spill] sm:$0xff] }
 0x256   :  { %12045 = vst [vmem:[#allocation45_spill] sm:$0xff] %v7148_v15  ;;  %vm1635_vm14 = vcmp.eq.f32.partialorder %v12054_v51, %v7156_v12  ;;  %vm1636_vm7 = vcmp.eq.f32.partialorder %v12055_v47, %v7156_v12  ;;  %vm12056_vm5 = vnez %v11973_v55  ;;  %v1597_v48 = vmin.f32 %v1596_v39, %v7148_v15  ;;  %v12064_v51 = vld [vmem:[#allocation82_spill] sm:$0xff]  ;;  %v12067_v55 = vld [vmem:[#allocation84_spill] sm:$0xff]  ;;  %v7237_v15 = vpop.xlane.xlu0 %1074 }
 0x257   :  { %12048 = vst [vmem:[#allocation77_spill] sm:$0xff] %v7154_v20  ;;  %v7191_v60 = vsel %vm12056_vm5, %v6996_v19, 1e+30  ;;  %vm12059_vm4 = vnez %v12058_v29  ;;  %vm12062_vm8 = vnez %v12061_v34  ;;  %1550 = vmin.xlane.f32.xlu0 %v1549_v52  ;;  %vm12065_vm11 = vnez %v12064_v51  ;;  %v12071_v51 = vld [vmem:[#allocation85_spill] sm:$0xff] }
 0x258   :  { %12049 = vst [vmem:[#allocation496_spill] sm:$0xff] %v7162_v57  ;;  %v7197_v23 = vsel %vm12059_vm4, %v6891_v26, 1e+30  ;;  %v7202_v16 = vsel %vm12062_vm8, %v6916_v58, 1e+30  ;;  %vm12068_vm2 = vnez %v12067_v55  ;;  %v1577_v29 = vmin.f32 %v1576_v62, %v7174_v25  ;;  %v12070_v26 = vld [vmem:[#allocation73_spill] sm:$0xff] }
 0x259   :  { %12050 = vst [vmem:[#allocation497_spill] sm:$0xff] %v7167_v28  ;;  %v7207_v47 = vsel %vm12065_vm11, %v6924_v7, 1e+30  ;;  %v7212_v39 = vsel %vm12068_vm2, %v6946_v44, 1e+30  ;;  %vm1637_vm12 = vcmp.eq.f32.partialorder %v12070_v26, %v7156_v12  ;;  %v1598_v34 = vmin.f32 %v1597_v48, %v7162_v57  ;;  %v12074_v44 = vld [vmem:[#allocation89_spill] sm:$0xff] }
 0x25a   :  { %12053 = vst [vmem:[#allocation79_spill] sm:$0xff] %v7174_v25  ;;  %v7219_v58 = vperm.slane %v7138_v38, 2  ;;  %v2181_v52 = vsel %vm1635_vm14, %v7177_v0, 1e+30  ;;  %v2182_v7 = vsel %vm1636_vm7, %v7180_v27, 1e+30  ;;  %vm12072_vm0 = vnez %v12071_v51 }
 0x25b   :  { %12057 = vst [vmem:[#allocation67_spill] sm:$0xff] %v7191_v60  ;;  %v7226_v55 = vsel %vm12072_vm0, %v6959_v22, 1e+30  ;;  %vm12075_vm9 = vnez %v12074_v44  ;;  %v1578_v26 = vmin.f32 %v1577_v29, %v7197_v23  ;;  %v12077_v48 = vld [vmem:[#allocation78_spill] sm:$0xff]  ;;  %v1599_v57 = vmin.f32 %v1598_v34, %v7167_v28  ;;  %v12081_v28 = vld [vmem:[#allocation92_spill] sm:$0xff] }
 0x25c   :  { %12060 = vst [vmem:[#allocation71_spill] sm:$0xff] %v7197_v23  ;;  %v7231_v62 = vsel %vm12075_vm9, %v6996_v19, 1e+30  ;;  %vm1638_vm10 = vcmp.eq.f32.partialorder %v12077_v48, %v7156_v12  ;;  %vm1639_vm13 = vcmp.eq.f32.partialorder %v12078_v33, %v7156_v12  ;;  %v7242_v22 = vperm.slane %v7138_v38, 3  ;;  %v12079_v44 = vld [vmem:[#allocation86_spill] sm:$0xff] }
 0x25d   :  { %12063 = vst [vmem:[#allocation80_spill] sm:$0xff] %v7202_v16  ;;  %v2183_v51 = vsel %vm1637_vm12, %v7219_v58, 1e+30  ;;  %v1579_v19 = vmin.f32 %v1578_v26, %v7202_v16  ;;  %vm1640_vm3 = vcmp.eq.f32.partialorder %v12079_v44, %v7156_v12  ;;  %v12080_v29 = vld [vmem:[#allocation90_spill] sm:$0xff]  ;;  %v2695_v48 = vmin.f32 %v2181_v52, %v2182_v7  ;;  %v12083_v16 = vld [vmem:[#allocation95_spill] sm:$0xff]  ;;  %v12085_v7 = vld [vmem:[#allocation97_spill] sm:$0xff] }
 0x25e   :  { %12066 = vst [vmem:[#allocation81_spill] sm:$0xff] %v7207_v47  ;;  %vm1641_vm1 = vcmp.eq.f32.partialorder %v12080_v29, %v7156_v12  ;;  %v1600_v34 = vmin.f32 %v1599_v57, %v7191_v60  ;;  %vm1642_vm6 = vcmp.eq.f32.partialorder %v12081_v28, %v7156_v12  ;;  %v7254_v24 = vperm.slane %v7138_v38, 4  ;;  %v12082_v26 = vld [vmem:[#allocation94_spill] sm:$0xff]  ;;  %v12084_v52 = vld [vmem:[#allocation87_spill] sm:$0xff]  ;;  %v7264_v57 = vpop.xlane.xlu2 %1142 }
 0x25f   :  { %12069 = vst [vmem:[#allocation82_spill] sm:$0xff] %v7212_v39  ;;  %v2184_v23 = vsel %vm1638_vm10, %v7242_v22, 1e+30  ;;  %v1580_v25 = vmin.f32 %v1579_v19, %v7207_v47  ;;  %vm1643_vm15 = vcmp.eq.f32.partialorder %v12082_v26, %v7156_v12  ;;  %vm1644_vm14 = vcmp.eq.f32.partialorder %v12083_v16, %v7156_v12  ;;  %v12086_v47 = vld [vmem:[#allocation88_spill] sm:$0xff] }
 0x260   :  { %12073 = vst [vmem:[#allocation84_spill] sm:$0xff] %v7226_v55  ;;  %v2696_v20 = vmin.f32 %v2695_v48, %v2183_v51  ;;  %vm1603_vm7 = vcmp.eq.f32.partialorder %v12084_v52, %v7237_v15  ;;  %1601 = vmin.xlane.f32.xlu1 %v1600_v34  ;;  %vm1645_vm5 = vcmp.eq.f32.partialorder %v12085_v7, %v7156_v12  ;;  %v7269_v60 = vperm.slane %v7138_v38, 5  ;;  %v61_v48 = vld [vmem:[#allocation4 + $0x8] sm:$0xff]  ;;  %v12087_v34 = vld [vmem:[#allocation98_spill] sm:$0xff] }
 0x261   :  { %12076 = vst [vmem:[#allocation73_spill] sm:$0xff] %v7231_v62  ;;  %v2185_v19 = vsel %vm1639_vm13, %v7254_v24, 1e+30  ;;  %vm1604_vm4 = vcmp.eq.f32.partialorder %v12086_v47, %v7237_v15  ;;  %v1581_v51 = vmin.f32 %v1580_v25, %v7212_v39  ;;  %vm1646_vm8 = vcmp.eq.f32.partialorder %v12087_v34, %v7156_v12  ;;  %v12088_v52 = vld [vmem:[#allocation102_spill] sm:$0xff]  ;;  %v12090_v47 = vld [vmem:[#allocation91_spill] sm:$0xff] }
 0x262   :  { %vm1647_vm11 = vcmp.eq.f32.partialorder %v12088_v52, %v7156_v12  ;;  %v2697_v31 = vmin.f32 %v2696_v20, %v2184_v23  ;;  %vm1648_vm2 = vcmp.eq.f32.partialorder %v12089_v2, %v7156_v12  ;;  %v2186_v33 = vsel %vm1640_vm3, %v7269_v60, 1e+30  ;;  %v12092_v23 = vld [vmem:[#allocation113_spill] sm:$0xff]  ;;  %v12097_v7 = vld [vmem:[#allocation110_spill] sm:$0xff] }
 0x263   :  { %vm1605_vm12 = vcmp.eq.f32.partialorder %v12090_v47, %v7237_v15  ;;  %v2149_v25 = vsel %vm1603_vm7, %v7177_v0, 1e+30  ;;  %v1582_v39 = vmin.f32 %v1581_v51, %v7226_v55  ;;  %vm1649_vm0 = vcmp.eq.f32.partialorder %v12091_v49, %v7156_v12  ;;  %v12103_v49 = vld [vmem:[#allocation118_spill] sm:$0xff] }
 0x264   :  { %vm1650_vm9 = vcmp.eq.f32.partialorder %v12092_v23, %v7156_v12  ;;  %v7297_v20 = vperm.slane %v7138_v38, 6  ;;  %v2698_v30 = vmin.f32 %v2697_v31, %v2185_v19  ;;  %v2150_v44 = vsel %vm1604_vm4, %v7180_v27, 1e+30 }
 0x265   :  { %v7301_v9 = vperm.slane %v7138_v38, 7  ;;  %v7303_v47 = vperm.slane %v61_v48, 0  ;;  %vm1606_vm10 = vcmp.eq.f32.partialorder %v12093_v32, %v7237_v15  ;;  %v2661_v51 = vmin.f32 %v2149_v25, %v2150_v44  ;;  %v12094_v38 = vld [vmem:[#allocation96_spill] sm:$0xff]  ;;  %v12095_v44 = vld [vmem:[#allocation99_spill] sm:$0xff] }
 0x266   :  { %v1583_v55 = vmin.f32 %v1582_v39, %v7231_v62  ;;  %v7308_v53 = vperm.slane %v61_v48, 1  ;;  %v2699_v40 = vmin.f32 %v2698_v30, %v2186_v33  ;;  %v2151_v43 = vsel %vm1605_vm12, %v7219_v58, 1e+30 }
 0x267   :  { %v7311_v50 = vperm.slane %v61_v48, 2  ;;  %v2187_v31 = vsel %vm1641_vm1, %v7297_v20, 1e+30  ;;  %vm1607_vm13 = vcmp.eq.f32.partialorder %v12094_v38, %v7237_v15  ;;  %v2662_v19 = vmin.f32 %v2661_v51, %v2151_v43 }
 0x268   :  { %1584 = vmin.xlane.f32.xlu0 %v1583_v55  ;;  %v7319_v32 = vperm.slane %v61_v48, 3  ;;  %v7321_v39 = vperm.slane %v61_v48, 4  ;;  %v2700_v25 = vmin.f32 %v2699_v40, %v2187_v31  ;;  %v2152_v30 = vsel %vm1606_vm10, %v7242_v22, 1e+30  ;;  %v7337_v31 = vpop.xlane.xlu2 %1159 }
 0x269   :  { %v7324_v33 = vperm.slane %v61_v48, 5  ;;  %v2188_v29 = vsel %vm1642_vm6, %v7301_v9, 1e+30  ;;  %vm1608_vm3 = vcmp.eq.f32.partialorder %v12095_v44, %v7237_v15  ;;  %v2663_v38 = vmin.f32 %v2662_v19, %v2152_v30  ;;  %v12096_v19 = vld [vmem:[#allocation106_spill] sm:$0xff] }
 0x26a   :  { %v7332_v43 = vperm.slane %v61_v48, 6  ;;  %v7334_v55 = vperm.slane %v61_v48, 7  ;;  %v2701_v51 = vmin.f32 %v2700_v25, %v2188_v29  ;;  %v2153_v40 = vsel %vm1607_vm13, %v7254_v24, 1e+30 }
 0x26b   :  { %v2189_v62 = vsel %vm1643_vm15, %v7303_v47, 1e+30  ;;  %v2190_v28 = vsel %vm1644_vm14, %v7308_v53, 1e+30  ;;  %vm1609_vm1 = vcmp.eq.f32.partialorder %v12096_v19, %v7237_v15  ;;  %v2664_v48 = vmin.f32 %v2663_v38, %v2153_v40 }
 0x26c   :  { %v2191_v25 = vsel %vm1645_vm5, %v7311_v50, 1e+30  ;;  %v2192_v26 = vsel %vm1646_vm8, %v7319_v32, 1e+30  ;;  %v2702_v30 = vmin.f32 %v2701_v51, %v2189_v62  ;;  %v2154_v29 = vsel %vm1608_vm3, %v7269_v60, 1e+30 }
 0x26d   :  { %v2193_v16 = vsel %vm1647_vm11, %v7321_v39, 1e+30  ;;  %v2194_v44 = vsel %vm1648_vm2, %v7324_v33, 1e+30  ;;  %vm1610_vm6 = vcmp.eq.f32.partialorder %v12097_v7, %v7237_v15  ;;  %v2665_v38 = vmin.f32 %v2664_v48, %v2154_v29  ;;  %v12098_v62 = vld [vmem:[#allocation108_spill] sm:$0xff]  ;;  %v12099_v51 = vld [vmem:[#allocation109_spill] sm:$0xff] }
 0x26e   :  { %v2703_v40 = vmin.f32 %v2702_v30, %v2190_v28  ;;  %v2155_v34 = vsel %vm1609_vm1, %v7297_v20, 1e+30  ;;  %vm1683_vm15 = vcmp.eq.f32.partialorder %v12098_v62, %v7337_v31  ;;  %vm1684_vm14 = vcmp.eq.f32.partialorder %v12099_v51, %v7337_v31  ;;  %v12100_v28 = vld [vmem:[#allocation115_spill] sm:$0xff]  ;;  %v12101_v30 = vld [vmem:[#allocation116_spill] sm:$0xff] }
 0x26f   :  { %v2195_v52 = vsel %vm1649_vm0, %v7332_v43, 1e+30  ;;  %v2196_v2 = vsel %vm1650_vm9, %v7334_v55, 1e+30  ;;  %vm1611_vm7 = vcmp.eq.f32.partialorder %v12100_v28, %v7237_v15  ;;  %v2666_v19 = vmin.f32 %v2665_v38, %v2155_v34  ;;  %v12102_v7 = vld [vmem:[#allocation112_spill] sm:$0xff]  ;;  %v12106_v34 = vld [vmem:[#allocation121_spill] sm:$0xff] }
 0x270   :  { %v2704_v48 = vmin.f32 %v2703_v40, %v2191_v25  ;;  %vm1612_vm5 = vcmp.eq.f32.partialorder %v12101_v30, %v7237_v15  ;;  %v2156_v29 = vsel %vm1610_vm6, %v7301_v9, 1e+30  ;;  %vm1685_vm4 = vcmp.eq.f32.partialorder %v12102_v7, %v7337_v31  ;;  %v12104_v38 = vld [vmem:[#allocation120_spill] sm:$0xff]  ;;  %v12105_v40 = vld [vmem:[#allocation114_spill] sm:$0xff]  ;;  %v12107_v28 = vld [vmem:[#allocation123_spill] sm:$0xff] }
 0x271   :  { %vm1613_vm8 = vcmp.eq.f32.partialorder %v12103_v49, %v7237_v15  ;;  %v2667_v62 = vmin.f32 %v2666_v19, %v2156_v29  ;;  %v2229_v12 = vsel %vm1683_vm15, %v7177_v0, 1e+30  ;;  %v2230_v23 = vsel %vm1684_vm14, %v7180_v27, 1e+30  ;;  %v12111_v30 = vld [vmem:[#allocation124_spill] sm:$0xff] }
 0x272   :  { %v2705_v51 = vmin.f32 %v2704_v48, %v2192_v26  ;;  %vm1614_vm11 = vcmp.eq.f32.partialorder %v12104_v38, %v7237_v15  ;;  %v2157_v25 = vsel %vm1611_vm7, %v7303_v47, 1e+30  ;;  %vm1686_vm2 = vcmp.eq.f32.partialorder %v12105_v40, %v7337_v31  ;;  %v12108_v48 = vld [vmem:[#allocation119_spill] sm:$0xff]  ;;  %v12109_v40 = vld [vmem:[#allocation125_spill] sm:$0xff] }
 0x273   :  { %vm1615_vm12 = vcmp.eq.f32.partialorder %v12106_v34, %v7237_v15  ;;  %vm1616_vm0 = vcmp.eq.f32.partialorder %v12107_v28, %v7237_v15  ;;  %v2668_v19 = vmin.f32 %v2667_v62, %v2157_v25  ;;  %v2231_v29 = vsel %vm1685_vm4, %v7219_v58, 1e+30  ;;  %v12112_v34 = vld [vmem:[#allocation127_spill] sm:$0xff]  ;;  %v12114_v28 = vld [vmem:[#allocation58_spill] sm:$0xff] }
 0x274   :  { %v2706_v7 = vmin.f32 %v2705_v51, %v2193_v16  ;;  %v2158_v26 = vsel %vm1612_vm5, %v7308_v53, 1e+30  ;;  %vm1687_vm9 = vcmp.eq.f32.partialorder %v12108_v48, %v7337_v31  ;;  %v2746_v17 = vmin.f32 %v2229_v12, %v2230_v23  ;;  %v7419_v12 = vpop.xlane.xlu1 %1125 }
 0x275   :  { %vm1617_vm10 = vcmp.eq.f32.partialorder %v12109_v40, %v7237_v15  ;;  %vm1618_vm13 = vcmp.eq.f32.partialorder %v12110_v14, %v7237_v15  ;;  %v2669_v37 = vmin.f32 %v2668_v19, %v2158_v26  ;;  %v2232_v62 = vsel %vm1686_vm2, %v7242_v22, 1e+30  ;;  %v12116_v14 = vld [vmem:[#allocation130_spill] sm:$0xff] }
 0x276   :  { %v2707_v25 = vmin.f32 %v2706_v7, %v2194_v44  ;;  %v2159_v16 = vsel %vm1613_vm8, %v7311_v50, 1e+30  ;;  %vm1688_vm3 = vcmp.eq.f32.partialorder %v12111_v30, %v7337_v31  ;;  %v2747_v51 = vmin.f32 %v2746_v17, %v2231_v29  ;;  %v12117_v15 = vld [vmem:[#allocation134_spill] sm:$0xff]  ;;  %v12119_v30 = vld [vmem:[#allocation136_spill] sm:$0xff] }
 0x277   :  { %v2160_v23 = vsel %vm1614_vm11, %v7319_v32, 1e+30  ;;  %v2161_v44 = vsel %vm1615_vm12, %v7321_v39, 1e+30  ;;  %v2670_v19 = vmin.f32 %v2669_v37, %v2159_v16  ;;  %v2233_v49 = vsel %vm1687_vm9, %v7254_v24, 1e+30 }
 0x278   :  { %v2708_v7 = vmin.f32 %v2707_v25, %v2195_v52  ;;  %v2162_v17 = vsel %vm1616_vm0, %v7324_v33, 1e+30  ;;  %v2163_v29 = vsel %vm1617_vm10, %v7332_v43, 1e+30  ;;  %v2748_v26 = vmin.f32 %v2747_v51, %v2232_v62  ;;  %v12113_v25 = vld [vmem:[#allocation54_spill] sm:$0xff]  ;;  %v12115_v16 = vld [vmem:[#allocation129_spill] sm:$0xff] }
 0x279   :  { %v2164_v38 = vsel %vm1618_vm13, %v7334_v55, 1e+30  ;;  %v2671_v48 = vmin.f32 %v2670_v19, %v2160_v23  ;;  %vm1689_vm1 = vcmp.eq.f32.partialorder %v12112_v34, %v7337_v31  ;;  %v2234_v37 = vsel %vm1688_vm3, %v7269_v60, 1e+30  ;;  %v12120_v23 = vld [vmem:[#allocation61_spill] sm:$0xff] }
 0x27a   :  { %v2709_v52 = vmin.f32 %v2708_v7, %v2196_v2  ;;  %v2749_v40 = vmin.f32 %v2748_v26, %v2233_v49  ;;  %vm1651_vm6 = vcmp.eq.f32.partialorder %v12113_v25, %v7419_v12  ;;  %vm1652_vm15 = vcmp.eq.f32.partialorder %v12114_v28, %v7419_v12  ;;  %v12118_v2 = vld [vmem:[#allocation135_spill] sm:$0xff]  ;;  %v12121_v26 = vld [vmem:[#allocation138_spill] sm:$0xff]  ;;  %v7477_v28 = vpop.xlane.xlu0 %1091 }
 0x27b   :  { %v2672_v62 = vmin.f32 %v2671_v48, %v2161_v44  ;;  %vm1690_vm14 = vcmp.eq.f32.partialorder %v12115_v16, %v7337_v31  ;;  %vm1691_vm7 = vcmp.eq.f32.partialorder %v12116_v14, %v7337_v31  ;;  %vm1692_vm5 = vcmp.eq.f32.partialorder %v12117_v15, %v7337_v31  ;;  %v12122_v48 = vld [vmem:[#allocation139_spill] sm:$0xff] }
 0x27c   :  { %2710 = vmin.xlane.f32.xlu1 %v2709_v52  ;;  %vm1693_vm4 = vcmp.eq.f32.partialorder %v12118_v2, %v7337_v31  ;;  %vm1694_vm8 = vcmp.eq.f32.partialorder %v12119_v30, %v7337_v31  ;;  %v2750_v51 = vmin.f32 %v2749_v40, %v2234_v37  ;;  %vm1653_vm11 = vcmp.eq.f32.partialorder %v12120_v23, %v7419_v12  ;;  %v12123_v52 = vld [vmem:[#allocation148_spill] sm:$0xff]  ;;  %v12126_v23 = vld [vmem:[#allocation151_spill] sm:$0xff] }
 0x27d   :  { %v2673_v44 = vmin.f32 %v2672_v62, %v2162_v17  ;;  %v2235_v19 = vsel %vm1689_vm1, %v7297_v20, 1e+30  ;;  %v2197_v49 = vsel %vm1651_vm6, %v7177_v0, 1e+30  ;;  %v2198_v7 = vsel %vm1652_vm15, %v7180_v27, 1e+30 }
 0x27e   :  { %vm1695_vm2 = vcmp.eq.f32.partialorder %v12121_v26, %v7337_v31  ;;  %vm1696_vm12 = vcmp.eq.f32.partialorder %v12122_v48, %v7337_v31  ;;  %v2751_v37 = vmin.f32 %v2750_v51, %v2235_v19  ;;  %vm1654_vm0 = vcmp.eq.f32.partialorder %v12123_v52, %v7419_v12  ;;  %v12124_v40 = vld [vmem:[#allocation140_spill] sm:$0xff]  ;;  %v12125_v62 = vld [vmem:[#allocation142_spill] sm:$0xff]  ;;  %v12131_v26 = vld [vmem:[#allocation159_spill] sm:$0xff] }
 0x27f   :  { %v2674_v17 = vmin.f32 %v2673_v44, %v2163_v29  ;;  %vm1697_vm9 = vcmp.eq.f32.partialorder %v12124_v40, %v7337_v31  ;;  %v2236_v34 = vsel %vm1690_vm14, %v7301_v9, 1e+30  ;;  %v2199_v25 = vsel %vm1653_vm11, %v7219_v58, 1e+30 }
 0x280   :  { %vm1698_vm10 = vcmp.eq.f32.partialorder %v12125_v62, %v7337_v31  ;;  %v2752_v51 = vmin.f32 %v2751_v37, %v2236_v34  ;;  %vm1655_vm13 = vcmp.eq.f32.partialorder %v12126_v23, %v7419_v12  ;;  %v2712_v29 = vmin.f32 %v2197_v49, %v2198_v7  ;;  %v12128_v7 = vld [vmem:[#allocation152_spill] sm:$0xff]  ;;  %v12136_v62 = vld [vmem:[#allocation167_spill] sm:$0xff] }
 0x281   :  { %v2675_v44 = vmin.f32 %v2674_v17, %v2164_v38  ;;  %v2237_v19 = vsel %vm1691_vm7, %v7303_v47, 1e+30  ;;  %v2238_v16 = vsel %vm1692_vm5, %v7308_v53, 1e+30  ;;  %v2200_v52 = vsel %vm1654_vm0, %v7242_v22, 1e+30 }
 0x282   :  { %v2239_v37 = vsel %vm1693_vm4, %v7311_v50, 1e+30  ;;  %v2753_v34 = vmin.f32 %v2752_v51, %v2237_v19  ;;  %v12127_v38 = vld [vmem:[#allocation158_spill] sm:$0xff]  ;;  %v2713_v49 = vmin.f32 %v2712_v29, %v2199_v25  ;;  %v2240_v14 = vsel %vm1694_vm8, %v7319_v32, 1e+30  ;;  %v12129_v17 = vld [vmem:[#allocation153_spill] sm:$0xff] }
 0x283   :  { %vm1656_vm3 = vcmp.eq.f32.partialorder %v12127_v38, %v7419_v12  ;;  %2676 = vmin.xlane.f32.xlu2 %v2675_v44  ;;  %v2201_v15 = vsel %vm1655_vm13, %v7254_v24, 1e+30  ;;  %vm1619_vm1 = vcmp.eq.f32.partialorder %v12128_v7, %v7477_v28  ;;  %vm1620_vm6 = vcmp.eq.f32.partialorder %v12129_v17, %v7477_v28  ;;  %v12130_v29 = vld [vmem:[#allocation161_spill] sm:$0xff] }
 0x284   :  { %v2241_v2 = vsel %vm1695_vm2, %v7321_v39, 1e+30  ;;  %v2242_v25 = vsel %vm1696_vm12, %v7324_v33, 1e+30  ;;  %v2754_v30 = vmin.f32 %v2753_v34, %v2238_v16  ;;  %v2714_v51 = vmin.f32 %v2713_v49, %v2200_v52  ;;  %v12132_v52 = vld [vmem:[#allocation162_spill] sm:$0xff]  ;;  %v12133_v34 = vld [vmem:[#allocation164_spill] sm:$0xff] }
 0x285   :  { %v2243_v23 = vsel %vm1697_vm9, %v7332_v43, 1e+30  ;;  %vm1657_vm15 = vcmp.eq.f32.partialorder %v12130_v29, %v7419_v12  ;;  %v2202_v44 = vsel %vm1656_vm3, %v7269_v60, 1e+30  ;;  %vm1621_vm14 = vcmp.eq.f32.partialorder %v12131_v26, %v7477_v28 }
 0x286   :  { %v2755_v19 = vmin.f32 %v2754_v30, %v2239_v37  ;;  %v2715_v38 = vmin.f32 %v2714_v51, %v2201_v15  ;;  %v2165_v48 = vsel %vm1619_vm1, %v7177_v0, 1e+30  ;;  %v2166_v16 = vsel %vm1620_vm6, %v7180_v27, 1e+30  ;;  %v12134_v37 = vld [vmem:[#allocation163_spill] sm:$0xff]  ;;  %v12135_v30 = vld [vmem:[#allocation165_spill] sm:$0xff] }
 0x287   :  { %v2244_v40 = vsel %vm1698_vm10, %v7334_v55, 1e+30  ;;  %vm1658_vm7 = vcmp.eq.f32.partialorder %v12132_v52, %v7419_v12  ;;  %vm1622_vm5 = vcmp.eq.f32.partialorder %v12133_v34, %v7477_v28  ;;  %v2678_v49 = vmin.f32 %v2165_v48, %v2166_v16  ;;  %v12139_v48 = vld [vmem:[#allocation171_spill] sm:$0xff] }
 0x288   :  { %v2756_v7 = vmin.f32 %v2755_v19, %v2240_v14  ;;  %vm1659_vm4 = vcmp.eq.f32.partialorder %v12134_v37, %v7419_v12  ;;  %v2716_v15 = vmin.f32 %v2715_v38, %v2202_v44  ;;  %v2167_v17 = vsel %vm1621_vm14, %v7219_v58, 1e+30  ;;  %v12137_v14 = vld [vmem:[#allocation166_spill] sm:$0xff]  ;;  %v12138_v38 = vld [vmem:[#allocation168_spill] sm:$0xff] }
 0x289   :  { %vm1660_vm8 = vcmp.eq.f32.partialorder %v12135_v30, %v7419_v12  ;;  %v2203_v31 = vsel %vm1657_vm15, %v7297_v20, 1e+30  ;;  %vm1623_vm11 = vcmp.eq.f32.partialorder %v12136_v62, %v7477_v28  ;;  %v2679_v51 = vmin.f32 %v2678_v49, %v2167_v17  ;;  %v12142_v17 = vld [vmem:[#allocation173_spill] sm:$0xff] }
 0x28a   :  { %v2757_v26 = vmin.f32 %v2756_v7, %v2241_v2  ;;  %vm1661_vm2 = vcmp.eq.f32.partialorder %v12137_v14, %v7419_v12  ;;  %v2717_v19 = vmin.f32 %v2716_v15, %v2203_v31  ;;  %v2168_v44 = vsel %vm1622_vm5, %v7242_v22, 1e+30  ;;  %v12140_v2 = vld [vmem:[#allocation169_spill] sm:$0xff]  ;;  %v12141_v15 = vld [vmem:[#allocation170_spill] sm:$0xff] }
 0x28b   :  { %vm1662_vm12 = vcmp.eq.f32.partialorder %v12138_v38, %v7419_v12  ;;  %v2204_v29 = vsel %vm1658_vm7, %v7301_v9, 1e+30  ;;  %vm1624_vm0 = vcmp.eq.f32.partialorder %v12139_v48, %v7477_v28  ;;  %v2680_v16 = vmin.f32 %v2679_v51, %v2168_v44  ;;  %v12144_v44 = vld [vmem:[#allocation177_spill] sm:$0xff] }
 0x28c   :  { %v2758_v34 = vmin.f32 %v2757_v26, %v2242_v25  ;;  %vm1663_vm9 = vcmp.eq.f32.partialorder %v12140_v2, %v7419_v12  ;;  %v2718_v49 = vmin.f32 %v2717_v19, %v2204_v29  ;;  %v2169_v7 = vsel %vm1623_vm11, %v7254_v24, 1e+30  ;;  %v12143_v25 = vld [vmem:[#allocation172_spill] sm:$0xff]  ;;  %v7570_v19 = vpop.xlane.xlu2 %1210  ;;  %v12145_v29 = vld [vmem:[#allocation178_spill] sm:$0xff] }
 0x28d   :  { %vm1664_vm10 = vcmp.eq.f32.partialorder %v12141_v15, %v7419_v12  ;;  %v2205_v52 = vsel %vm1659_vm4, %v7303_v47, 1e+30  ;;  %vm1625_vm13 = vcmp.eq.f32.partialorder %v12142_v17, %v7477_v28  ;;  %v2681_v31 = vmin.f32 %v2680_v16, %v2169_v7  ;;  %v12150_v15 = vld [vmem:[#allocation176_spill] sm:$0xff] }
 0x28e   :  { %v2759_v62 = vmin.f32 %v2758_v34, %v2243_v23  ;;  %vm1665_vm3 = vcmp.eq.f32.partialorder %v12143_v25, %v7419_v12  ;;  %v2719_v51 = vmin.f32 %v2718_v49, %v2205_v52  ;;  %v2170_v26 = vsel %vm1624_vm0, %v7269_v60, 1e+30 }
 0x28f   :  { %vm1666_vm1 = vcmp.eq.f32.partialorder %v12144_v44, %v7419_v12  ;;  %v2206_v37 = vsel %vm1660_vm8, %v7308_v53, 1e+30  ;;  %vm1626_vm6 = vcmp.eq.f32.partialorder %v12145_v29, %v7477_v28  ;;  %v2682_v23 = vmin.f32 %v2681_v31, %v2170_v26  ;;  %v12147_v31 = vld [vmem:[#allocation174_spill] sm:$0xff]  ;;  %v12153_v44 = vld [vmem:[#allocation180_spill] sm:$0xff] }
 0x290   :  { %v2760_v48 = vmin.f32 %v2759_v62, %v2244_v40  ;;  %v2207_v16 = vsel %vm1661_vm2, %v7311_v50, 1e+30  ;;  %v2720_v34 = vmin.f32 %v2719_v51, %v2206_v37  ;;  %v2171_v49 = vsel %vm1625_vm13, %v7297_v20, 1e+30  ;;  %v12146_v40 = vld [vmem:[#allocation179_spill] sm:$0xff]  ;;  %v12149_v51 = vld [vmem:[#allocation181_spill] sm:$0xff] }
 0x291   :  { %v2208_v7 = vsel %vm1662_vm12, %v7319_v32, 1e+30  ;;  %v2209_v30 = vsel %vm1663_vm9, %v7321_v39, 1e+30  ;;  %vm1627_vm15 = vcmp.eq.f32.partialorder %v12146_v40, %v7477_v28  ;;  %v2683_v52 = vmin.f32 %v2682_v23, %v2171_v49  ;;  %v12148_v62 = vld [vmem:[#allocation175_spill] sm:$0xff] }
 0x292   :  { %2761 = vmin.xlane.f32.xlu1 %v2760_v48  ;;  %v2721_v14 = vmin.f32 %v2720_v34, %v2207_v16  ;;  %v2172_v17 = vsel %vm1626_vm6, %v7301_v9, 1e+30  ;;  %vm1731_vm14 = vcmp.eq.f32.partialorder %v12147_v31, %v7570_v19  ;;  %vm1732_vm7 = vcmp.eq.f32.partialorder %v12148_v62, %v7570_v19  ;;  %v12151_v48 = vld [vmem:[#allocation182_spill] sm:$0xff]  ;;  %v12152_v40 = vld [vmem:[#allocation183_spill] sm:$0xff]  ;;  %v12156_v62 = vld [vmem:[#allocation184_spill] sm:$0xff] }
 0x293   :  { %v2210_v38 = vsel %vm1664_vm10, %v7324_v33, 1e+30  ;;  %v2211_v2 = vsel %vm1665_vm3, %v7332_v43, 1e+30  ;;  %vm1628_vm5 = vcmp.eq.f32.partialorder %v12149_v51, %v7477_v28  ;;  %v2684_v26 = vmin.f32 %v2683_v52, %v2172_v17  ;;  %v12155_v52 = vld [vmem:[#allocation186_spill] sm:$0xff] }
 0x294   :  { %v2212_v37 = vsel %vm1666_vm1, %v7334_v55, 1e+30  ;;  %v2722_v29 = vmin.f32 %v2721_v14, %v2208_v7  ;;  %v2173_v23 = vsel %vm1627_vm15, %v7303_v47, 1e+30  ;;  %vm1733_vm4 = vcmp.eq.f32.partialorder %v12150_v15, %v7570_v19  ;;  %v12154_v7 = vld [vmem:[#allocation185_spill] sm:$0xff] }
 0x295   :  { %vm1629_vm8 = vcmp.eq.f32.partialorder %v12151_v48, %v7477_v28  ;;  %v2685_v25 = vmin.f32 %v2684_v26, %v2173_v23  ;;  %v2277_v16 = vsel %vm1731_vm14, %v7177_v0, 1e+30  ;;  %v2278_v34 = vsel %vm1732_vm7, %v7180_v27, 1e+30  ;;  %v12157_v26 = vld [vmem:[#allocation187_spill] sm:$0xff] }
 0x296   :  { %v2723_v49 = vmin.f32 %v2722_v29, %v2209_v30  ;;  %vm1630_vm11 = vcmp.eq.f32.partialorder %v12152_v40, %v7477_v28  ;;  %v2174_v12 = vsel %vm1628_vm5, %v7308_v53, 1e+30  ;;  %vm1734_vm2 = vcmp.eq.f32.partialorder %v12153_v44, %v7570_v19  ;;  %v12158_v29 = vld [vmem:[#allocation189_spill] sm:$0xff] }
 0x297   :  { %vm1631_vm12 = vcmp.eq.f32.partialorder %v12154_v7, %v7477_v28  ;;  %vm1632_vm0 = vcmp.eq.f32.partialorder %v12155_v52, %v7477_v28  ;;  %v2686_v14 = vmin.f32 %v2685_v25, %v2174_v12  ;;  %v2279_v17 = vsel %vm1733_vm4, %v7219_v58, 1e+30  ;;  %v12159_v25 = vld [vmem:[#allocation188_spill] sm:$0xff]  ;;  %v12160_v7 = vld [vmem:[#allocation22_spill] sm:$0xff] }
 0x298   :  { %v2724_v31 = vmin.f32 %v2723_v49, %v2210_v38  ;;  %v2175_v30 = vsel %vm1629_vm8, %v7311_v50, 1e+30  ;;  %vm1735_vm9 = vcmp.eq.f32.partialorder %v12156_v62, %v7570_v19  ;;  %v2797_v51 = vmin.f32 %v2277_v16, %v2278_v34  ;;  %v12161_v62 = vld [vmem:[#allocation23_spill] sm:$0xff]  ;;  %v12164_v52 = vld [vmem:[#allocation192_spill] sm:$0xff] }
 0x299   :  { %vm1633_vm10 = vcmp.eq.f32.partialorder %v12157_v26, %v7477_v28  ;;  %vm1634_vm13 = vcmp.eq.f32.partialorder %v12158_v29, %v7477_v28  ;;  %v2687_v23 = vmin.f32 %v2686_v14, %v2175_v30  ;;  %v2280_v15 = vsel %vm1734_vm2, %v7242_v22, 1e+30  ;;  %v12162_v28 = vld [vmem:[#allocation190_spill] sm:$0xff] }
 0x29a   :  { %v2725_v48 = vmin.f32 %v2724_v31, %v2211_v2  ;;  %v2176_v38 = vsel %vm1630_vm11, %v7319_v32, 1e+30  ;;  %vm1736_vm3 = vcmp.eq.f32.partialorder %v12159_v25, %v7570_v19  ;;  %v2798_v49 = vmin.f32 %v2797_v51, %v2279_v17  ;;  %v12165_v29 = vld [vmem:[#allocation194_spill] sm:$0xff] }
 0x29b   :  { %v2177_v16 = vsel %vm1631_vm12, %v7321_v39, 1e+30  ;;  %v2178_v34 = vsel %vm1632_vm0, %v7324_v33, 1e+30  ;;  %v2688_v2 = vmin.f32 %v2687_v23, %v2176_v38  ;;  %v2281_v12 = vsel %vm1735_vm9, %v7254_v24, 1e+30 }
 0x29c   :  { %v2726_v44 = vmin.f32 %v2725_v48, %v2212_v37  ;;  %v2179_v40 = vsel %vm1633_vm10, %v7332_v43, 1e+30  ;;  %v2180_v14 = vsel %vm1634_vm13, %v7334_v55, 1e+30  ;;  %v2799_v31 = vmin.f32 %v2798_v49, %v2280_v15  ;;  %v12163_v37 = vld [vmem:[#allocation191_spill] sm:$0xff]  ;;  %v12167_v15 = vld [vmem:[#allocation24_spill] sm:$0xff] }
 0x29d   :  { %v2689_v17 = vmin.f32 %v2688_v2, %v2177_v16  ;;  %v2282_v30 = vsel %vm1736_vm3, %v7269_v60, 1e+30  ;;  %vm1667_vm1 = vcmp.eq.f32.partialorder %v12160_v7, %v7264_v57  ;;  %vm1668_vm6 = vcmp.eq.f32.partialorder %v12161_v62, %v7264_v57  ;;  %v12166_v23 = vld [vmem:[#allocation195_spill] sm:$0xff]  ;;  %v12168_v48 = vld [vmem:[#allocation196_spill] sm:$0xff]  ;;  %v12173_v62 = vld [vmem:[#allocation37_spill] sm:$0xff] }
 0x29e   :  { %2727 = vmin.xlane.f32.xlu2 %v2726_v44  ;;  %vm1737_vm15 = vcmp.eq.f32.partialorder %v12162_v28, %v7570_v19  ;;  %vm1738_vm14 = vcmp.eq.f32.partialorder %v12163_v37, %v7570_v19  ;;  %vm1739_vm7 = vcmp.eq.f32.partialorder %v12164_v52, %v7570_v19  ;;  %v2800_v51 = vmin.f32 %v2799_v31, %v2281_v12  ;;  %v12170_v12 = vld [vmem:[#allocation30_spill] sm:$0xff]  ;;  %v12171_v44 = vld [vmem:[#allocation200_spill] sm:$0xff]  ;;  %v12172_v31 = vld [vmem:[#allocation201_spill] sm:$0xff] }
 0x29f   :  { %v2690_v26 = vmin.f32 %v2689_v17, %v2178_v34  ;;  %vm1740_vm5 = vcmp.eq.f32.partialorder %v12165_v29, %v7570_v19  ;;  %vm1741_vm4 = vcmp.eq.f32.partialorder %v12166_v23, %v7570_v19  ;;  %vm1669_vm8 = vcmp.eq.f32.partialorder %v12167_v15, %v7264_v57  ;;  %v12169_v34 = vld [vmem:[#allocation199_spill] sm:$0xff] }
 0x2a0   :  { %vm1742_vm11 = vcmp.eq.f32.partialorder %v12168_v48, %v7570_v19  ;;  %v2801_v38 = vmin.f32 %v2800_v51, %v2282_v30  ;;  %v2213_v25 = vsel %vm1667_vm1, %v7177_v0, 1e+30  ;;  %v2214_v49 = vsel %vm1668_vm6, %v7180_v27, 1e+30  ;;  %v12174_v51 = vld [vmem:[#allocation207_spill] sm:$0xff] }
 0x2a1   :  { %v2691_v16 = vmin.f32 %v2690_v26, %v2179_v40  ;;  %vm1743_vm2 = vcmp.eq.f32.partialorder %v12169_v34, %v7570_v19  ;;  %v2283_v2 = vsel %vm1737_vm15, %v7297_v20, 1e+30  ;;  %vm1670_vm12 = vcmp.eq.f32.partialorder %v12170_v12, %v7264_v57 }
 0x2a2   :  { %vm1744_vm0 = vcmp.eq.f32.partialorder %v12171_v44, %v7570_v19  ;;  %vm1745_vm9 = vcmp.eq.f32.partialorder %v12172_v31, %v7570_v19  ;;  %v2802_v17 = vmin.f32 %v2801_v38, %v2283_v2  ;;  %v2215_v30 = vsel %vm1669_vm8, %v7219_v58, 1e+30  ;;  %v7700_v38 = vpop.xlane.xlu0 %1176  ;;  %v12177_v44 = vld [vmem:[#allocation198_spill] sm:$0xff]  ;;  %v12179_v31 = vld [vmem:[#allocation55_spill] sm:$0xff] }
 0x2a3   :  { %v2692_v7 = vmin.f32 %v2691_v16, %v2180_v14  ;;  %v2284_v40 = vsel %vm1738_vm14, %v7301_v9, 1e+30  ;;  %vm1671_vm10 = vcmp.eq.f32.partialorder %v12173_v62, %v7264_v57  ;;  %v2729_v28 = vmin.f32 %v2213_v25, %v2214_v49  ;;  %v12175_v49 = vld [vmem:[#allocation44_spill] sm:$0xff]  ;;  %v12178_v62 = vld [vmem:[#allocation51_spill] sm:$0xff] }
 0x2a4   :  { %vm1746_vm13 = vcmp.eq.f32.partialorder %v12174_v51, %v7570_v19  ;;  %v2285_v26 = vsel %vm1739_vm7, %v7303_v47, 1e+30  ;;  %v2803_v15 = vmin.f32 %v2802_v17, %v2284_v40  ;;  %v2216_v14 = vsel %vm1670_vm12, %v7242_v22, 1e+30  ;;  %v12176_v40 = vld [vmem:[#allocation197_spill] sm:$0xff] }
 0x2a5   :  { %2693 = vmin.xlane.f32.xlu0 %v2692_v7  ;;  %v2286_v37 = vsel %vm1740_vm5, %v7308_v53, 1e+30  ;;  %v2287_v25 = vsel %vm1741_vm4, %v7311_v50, 1e+30  ;;  %vm1672_vm3 = vcmp.eq.f32.partialorder %v12175_v49, %v7264_v57  ;;  %v2730_v52 = vmin.f32 %v2729_v28, %v2215_v30  ;;  %v12180_v28 = vld [vmem:[#allocation56_spill] sm:$0xff] }
 0x2a6   :  { %v2288_v16 = vsel %vm1742_vm11, %v7319_v32, 1e+30  ;;  %v2289_v29 = vsel %vm1743_vm2, %v7321_v39, 1e+30  ;;  %v2804_v2 = vmin.f32 %v2803_v15, %v2285_v26  ;;  %v2217_v12 = vsel %vm1671_vm10, %v7254_v24, 1e+30 }
 0x2a7   :  { %v2290_v23 = vsel %vm1744_vm0, %v7324_v33, 1e+30  ;;  %v2291_v17 = vsel %vm1745_vm9, %v7332_v43, 1e+30  ;;  %v2292_v48 = vsel %vm1746_vm13, %v7334_v55, 1e+30  ;;  %v2731_v34 = vmin.f32 %v2730_v52, %v2216_v14 }
 0x2a8   :  { %v2805_v30 = vmin.f32 %v2804_v2, %v2286_v37  ;;  %v2218_v7 = vsel %vm1672_vm3, %v7269_v60, 1e+30  ;;  %vm1699_vm1 = vcmp.eq.f32.partialorder %v12176_v40, %v7700_v38  ;;  %vm1700_vm6 = vcmp.eq.f32.partialorder %v12177_v44, %v7700_v38  ;;  %v12181_v26 = vld [vmem:[#allocation59_spill] sm:$0xff]  ;;  %v12182_v15 = vld [vmem:[#allocation62_spill] sm:$0xff]  ;;  %v12188_v44 = vld [vmem:[#allocation68_spill] sm:$0xff] }
 0x2a9   :  { %vm1673_vm15 = vcmp.eq.f32.partialorder %v12178_v62, %v7264_v57  ;;  %vm1674_vm14 = vcmp.eq.f32.partialorder %v12179_v31, %v7264_v57  ;;  %vm1675_vm7 = vcmp.eq.f32.partialorder %v12180_v28, %v7264_v57  ;;  %v2732_v19 = vmin.f32 %v2731_v34, %v2217_v12  ;;  %v12183_v14 = vld [vmem:[#allocation202_spill] sm:$0xff]  ;;  %v12184_v37 = vld [vmem:[#allocation63_spill] sm:$0xff]  ;;  %v12186_v34 = vld [vmem:[#allocation204_spill] sm:$0xff] }
 0x2aa   :  { %v2806_v51 = vmin.f32 %v2805_v30, %v2287_v25  ;;  %vm1676_vm5 = vcmp.eq.f32.partialorder %v12181_v26, %v7264_v57  ;;  %vm1677_vm4 = vcmp.eq.f32.partialorder %v12182_v15, %v7264_v57  ;;  %vm1701_vm8 = vcmp.eq.f32.partialorder %v12183_v14, %v7700_v38  ;;  %v12185_v25 = vld [vmem:[#allocation64_spill] sm:$0xff]  ;;  %v12187_v30 = vld [vmem:[#allocation66_spill] sm:$0xff] }
 0x2ab   :  { %vm1678_vm11 = vcmp.eq.f32.partialorder %v12184_v37, %v7264_v57  ;;  %v2733_v49 = vmin.f32 %v2732_v19, %v2218_v7  ;;  %v2245_v52 = vsel %vm1699_vm1, %v7177_v0, 1e+30  ;;  %v2246_v2 = vsel %vm1700_vm6, %v7180_v27, 1e+30 }
 0x2ac   :  { %v2807_v40 = vmin.f32 %v2806_v51, %v2288_v16  ;;  %vm1679_vm2 = vcmp.eq.f32.partialorder %v12185_v25, %v7264_v57  ;;  %v2219_v12 = vsel %vm1673_vm15, %v7297_v20, 1e+30  ;;  %vm1702_vm12 = vcmp.eq.f32.partialorder %v12186_v34, %v7700_v38  ;;  %v12189_v51 = vld [vmem:[#allocation208_spill] sm:$0xff]  ;;  %v12190_v34 = vld [vmem:[#allocation69_spill] sm:$0xff] }
 0x2ad   :  { %vm1680_vm0 = vcmp.eq.f32.partialorder %v12187_v30, %v7264_v57  ;;  %vm1681_vm9 = vcmp.eq.f32.partialorder %v12188_v44, %v7264_v57  ;;  %v2734_v7 = vmin.f32 %v2733_v49, %v2219_v12  ;;  %v2247_v62 = vsel %vm1701_vm8, %v7219_v58, 1e+30  ;;  %v12194_v30 = vld [vmem:[#allocation205_spill] sm:$0xff] }
 0x2ae   :  { %v2808_v19 = vmin.f32 %v2807_v40, %v2289_v29  ;;  %v2220_v16 = vsel %vm1674_vm14, %v7301_v9, 1e+30  ;;  %vm1703_vm10 = vcmp.eq.f32.partialorder %v12189_v51, %v7700_v38  ;;  %v2763_v14 = vmin.f32 %v2245_v52, %v2246_v2  ;;  %v12191_v51 = vld [vmem:[#allocation210_spill] sm:$0xff]  ;;  %v7783_v2 = vpop.xlane.xlu2 %1261 }
 0x2af   :  { %vm1682_vm13 = vcmp.eq.f32.partialorder %v12190_v34, %v7264_v57  ;;  %v2221_v49 = vsel %vm1675_vm7, %v7303_v47, 1e+30  ;;  %v2735_v12 = vmin.f32 %v2734_v7, %v2220_v16  ;;  %v2248_v29 = vsel %vm1702_vm12, %v7242_v22, 1e+30 }
 0x2b0   :  { %v2809_v40 = vmin.f32 %v2808_v19, %v2290_v23  ;;  %v2222_v31 = vsel %vm1676_vm5, %v7308_v53, 1e+30  ;;  %vm1704_vm3 = vcmp.eq.f32.partialorder %v12191_v51, %v7700_v38  ;;  %v2764_v52 = vmin.f32 %v2763_v14, %v2247_v62  ;;  %v12196_v51 = vld [vmem:[#allocation216_spill] sm:$0xff] }
 0x2b1   :  { %v2223_v28 = vsel %vm1677_vm4, %v7311_v50, 1e+30  ;;  %v2224_v23 = vsel %vm1678_vm11, %v7319_v32, 1e+30  ;;  %v2736_v7 = vmin.f32 %v2735_v12, %v2221_v49  ;;  %v2249_v26 = vsel %vm1703_vm10, %v7254_v24, 1e+30 }
 0x2b2   :  { %v2810_v19 = vmin.f32 %v2809_v40, %v2291_v17  ;;  %v2225_v62 = vsel %vm1679_vm2, %v7321_v39, 1e+30  ;;  %v2226_v15 = vsel %vm1680_vm0, %v7324_v33, 1e+30  ;;  %v2765_v16 = vmin.f32 %v2764_v52, %v2248_v29  ;;  %v12192_v49 = vld [vmem:[#allocation212_spill] sm:$0xff]  ;;  %v12193_v40 = vld [vmem:[#allocation203_spill] sm:$0xff] }
 0x2b3   :  { %v2227_v37 = vsel %vm1681_vm9, %v7332_v43, 1e+30  ;;  %v2737_v14 = vmin.f32 %v2736_v7, %v2222_v31  ;;  %vm1705_vm1 = vcmp.eq.f32.partialorder %v12192_v49, %v7700_v38  ;;  %v2250_v17 = vsel %vm1704_vm3, %v7269_v60, 1e+30  ;;  %v12195_v31 = vld [vmem:[#allocation214_spill] sm:$0xff]  ;;  %v12198_v52 = vld [vmem:[#allocation221_spill] sm:$0xff] }
 0x2b4   :  { %v2811_v12 = vmin.f32 %v2810_v19, %v2292_v48  ;;  %v2766_v25 = vmin.f32 %v2765_v16, %v2249_v26  ;;  %vm1779_vm6 = vcmp.eq.f32.partialorder %v12193_v40, %v7783_v2  ;;  %vm1780_vm15 = vcmp.eq.f32.partialorder %v12194_v30, %v7783_v2  ;;  %v12197_v48 = vld [vmem:[#allocation220_spill] sm:$0xff]  ;;  %v12199_v26 = vld [vmem:[#allocation206_spill] sm:$0xff]  ;;  %v12204_v30 = vld [vmem:[#allocation229_spill] sm:$0xff] }
 0x2b5   :  { %v2228_v44 = vsel %vm1682_vm13, %v7334_v55, 1e+30  ;;  %v2738_v29 = vmin.f32 %v2737_v14, %v2223_v28  ;;  %vm1706_vm14 = vcmp.eq.f32.partialorder %v12195_v31, %v7700_v38  ;;  %vm1707_vm7 = vcmp.eq.f32.partialorder %v12196_v51, %v7700_v38  ;;  %v12200_v16 = vld [vmem:[#allocation222_spill] sm:$0xff]  ;;  %v12201_v14 = vld [vmem:[#allocation225_spill] sm:$0xff] }
 0x2b6   :  { %2812 = vmin.xlane.f32.xlu1 %v2811_v12  ;;  %vm1708_vm5 = vcmp.eq.f32.partialorder %v12197_v48, %v7700_v38  ;;  %vm1709_vm4 = vcmp.eq.f32.partialorder %v12198_v52, %v7700_v38  ;;  %v2767_v7 = vmin.f32 %v2766_v25, %v2250_v17  ;;  %vm1781_vm8 = vcmp.eq.f32.partialorder %v12199_v26, %v7783_v2  ;;  %v12202_v12 = vld [vmem:[#allocation209_spill] sm:$0xff]  ;;  %v12203_v25 = vld [vmem:[#allocation226_spill] sm:$0xff] }
 0x2b7   :  { %v2739_v57 = vmin.f32 %v2738_v29, %v2224_v23  ;;  %v2251_v34 = vsel %vm1705_vm1, %v7297_v20, 1e+30  ;;  %v2325_v28 = vsel %vm1779_vm6, %v7177_v0, 1e+30  ;;  %v2326_v19 = vsel %vm1780_vm15, %v7180_v27, 1e+30 }
 0x2b8   :  { %vm1710_vm11 = vcmp.eq.f32.partialorder %v12200_v16, %v7700_v38  ;;  %vm1711_vm2 = vcmp.eq.f32.partialorder %v12201_v14, %v7700_v38  ;;  %v2768_v17 = vmin.f32 %v2767_v7, %v2251_v34  ;;  %vm1782_vm12 = vcmp.eq.f32.partialorder %v12202_v12, %v7783_v2  ;;  %v12205_v7 = vld [vmem:[#allocation211_spill] sm:$0xff]  ;;  %v7850_v34 = vpop.xlane.xlu1 %1193  ;;  %v12210_v16 = vld [vmem:[#allocation10_spill] sm:$0xff] }
 0x2b9   :  { %v2740_v23 = vmin.f32 %v2739_v57, %v2225_v62  ;;  %vm1712_vm0 = vcmp.eq.f32.partialorder %v12203_v25, %v7700_v38  ;;  %v2252_v49 = vsel %vm1706_vm14, %v7301_v9, 1e+30  ;;  %v2327_v40 = vsel %vm1781_vm8, %v7219_v58, 1e+30  ;;  %v12206_v57 = vld [vmem:[#allocation230_spill] sm:$0xff] }
 0x2ba   :  { %vm1713_vm9 = vcmp.eq.f32.partialorder %v12204_v30, %v7700_v38  ;;  %v2769_v29 = vmin.f32 %v2768_v17, %v2252_v49  ;;  %vm1783_vm10 = vcmp.eq.f32.partialorder %v12205_v7, %v7783_v2  ;;  %v2848_v26 = vmin.f32 %v2325_v28, %v2326_v19  ;;  %v12207_v28 = vld [vmem:[#allocation213_spill] sm:$0xff] }
 0x2bb   :  { %v2741_v62 = vmin.f32 %v2740_v23, %v2226_v15  ;;  %vm1714_vm13 = vcmp.eq.f32.partialorder %v12206_v57, %v7700_v38  ;;  %v2253_v31 = vsel %vm1707_vm7, %v7303_v47, 1e+30  ;;  %v2328_v12 = vsel %vm1782_vm12, %v7242_v22, 1e+30  ;;  %v12217_v38 = vld [vmem:[#allocation29_spill] sm:$0xff] }
 0x2bc   :  { %v2254_v17 = vsel %vm1708_vm5, %v7308_v53, 1e+30  ;;  %v2770_v49 = vmin.f32 %v2769_v29, %v2253_v31  ;;  %vm1784_vm3 = vcmp.eq.f32.partialorder %v12207_v28, %v7783_v2  ;;  %v2849_v15 = vmin.f32 %v2848_v26, %v2327_v40  ;;  %v12208_v29 = vld [vmem:[#allocation8_spill] sm:$0xff]  ;;  %v12209_v40 = vld [vmem:[#allocation9_spill] sm:$0xff] }
 0x2bd   :  { %v2742_v19 = vmin.f32 %v2741_v62, %v2227_v37  ;;  %v2255_v23 = vsel %vm1709_vm4, %v7311_v50, 1e+30  ;;  %v2256_v51 = vsel %vm1710_vm11, %v7319_v32, 1e+30  ;;  %v2329_v7 = vsel %vm1783_vm10, %v7254_v24, 1e+30 }
 0x2be   :  { %v2771_v48 = vmin.f32 %v2770_v49, %v2254_v17  ;;  %v2850_v18 = vmin.f32 %v2849_v15, %v2328_v12  ;;  %vm1715_vm1 = vcmp.eq.f32.partialorder %v12208_v29, %v7850_v34  ;;  %vm1716_vm6 = vcmp.eq.f32.partialorder %v12209_v40, %v7850_v34  ;;  %v12211_v12 = vld [vmem:[#allocation215_spill] sm:$0xff]  ;;  %v12212_v17 = vld [vmem:[#allocation17_spill] sm:$0xff] }
 0x2bf   :  { %v2743_v37 = vmin.f32 %v2742_v19, %v2228_v44  ;;  %v2257_v52 = vsel %vm1711_vm2, %v7321_v39, 1e+30  ;;  %v2330_v26 = vsel %vm1784_vm3, %v7269_v60, 1e+30  ;;  %vm1717_vm15 = vcmp.eq.f32.partialorder %v12210_v16, %v7850_v34  ;;  %v12213_v15 = vld [vmem:[#allocation217_spill] sm:$0xff] }
 0x2c0   :  { %v2258_v62 = vsel %vm1712_vm0, %v7324_v33, 1e+30  ;;  %v2772_v31 = vmin.f32 %v2771_v48, %v2255_v23  ;;  %vm1785_vm14 = vcmp.eq.f32.partialorder %v12211_v12, %v7783_v2  ;;  %v2851_v44 = vmin.f32 %v2850_v18, %v2329_v7  ;;  %v12214_v7 = vld [vmem:[#allocation21_spill] sm:$0xff]  ;;  %v12218_v12 = vld [vmem:[#allocation231_spill] sm:$0xff] }
 0x2c1   :  { %2744 = vmin.xlane.f32.xlu0 %v2743_v37  ;;  %v2259_v14 = vsel %vm1713_vm9, %v7332_v43, 1e+30  ;;  %vm1718_vm7 = vcmp.eq.f32.partialorder %v12212_v17, %v7850_v34  ;;  %v2261_v49 = vsel %vm1715_vm1, %v7177_v0, 1e+30  ;;  %v2262_v28 = vsel %vm1716_vm6, %v7180_v27, 1e+30 }
 0x2c2   :  { %v2773_v25 = vmin.f32 %v2772_v31, %v2256_v51  ;;  %vm1786_vm5 = vcmp.eq.f32.partialorder %v12213_v15, %v7783_v2  ;;  %v2852_v19 = vmin.f32 %v2851_v44, %v2330_v26  ;;  %v2263_v18 = vsel %vm1717_vm15, %v7219_v58, 1e+30  ;;  %v12215_v51 = vld [vmem:[#allocation223_spill] sm:$0xff]  ;;  %v12219_v17 = vld [vmem:[#allocation233_spill] sm:$0xff] }
 0x2c3   :  { %v2260_v30 = vsel %vm1714_vm13, %v7334_v55, 1e+30  ;;  %v2331_v23 = vsel %vm1785_vm14, %v7297_v20, 1e+30  ;;  %vm1719_vm4 = vcmp.eq.f32.partialorder %v12214_v7, %v7850_v34  ;;  %v2780_v48 = vmin.f32 %v2261_v49, %v2262_v28  ;;  %v12216_v26 = vld [vmem:[#allocation227_spill] sm:$0xff]  ;;  %v12220_v49 = vld [vmem:[#allocation237_spill] sm:$0xff] }
 0x2c4   :  { %v2774_v29 = vmin.f32 %v2773_v25, %v2257_v52  ;;  %vm1787_vm8 = vcmp.eq.f32.partialorder %v12215_v51, %v7783_v2  ;;  %v2853_v40 = vmin.f32 %v2852_v19, %v2331_v23  ;;  %v2264_v37 = vsel %vm1718_vm7, %v7242_v22, 1e+30  ;;  %v12221_v19 = vld [vmem:[#allocation238_spill] sm:$0xff]  ;;  %v7928_v23 = vpop.xlane.xlu0 %1227  ;;  %v12222_v7 = vld [vmem:[#allocation239_spill] sm:$0xff] }
 0x2c5   :  { %vm1788_vm11 = vcmp.eq.f32.partialorder %v12216_v26, %v7783_v2  ;;  %v2332_v16 = vsel %vm1786_vm5, %v7301_v9, 1e+30  ;;  %vm1720_vm2 = vcmp.eq.f32.partialorder %v12217_v38, %v7850_v34  ;;  %v2781_v57 = vmin.f32 %v2780_v48, %v2263_v18 }
 0x2c6   :  { %v2775_v31 = vmin.f32 %v2774_v29, %v2258_v62  ;;  %vm1789_vm12 = vcmp.eq.f32.partialorder %v12218_v12, %v7783_v2  ;;  %v2854_v52 = vmin.f32 %v2853_v40, %v2332_v16  ;;  %v2265_v44 = vsel %vm1719_vm4, %v7254_v24, 1e+30  ;;  %v12223_v29 = vld [vmem:[#allocation36_spill] sm:$0xff]  ;;  %v12224_v40 = vld [vmem:[#allocation193_spill] sm:$0xff] }
 0x2c7   :  { %vm1790_vm0 = vcmp.eq.f32.partialorder %v12219_v17, %v7783_v2  ;;  %vm1791_vm9 = vcmp.eq.f32.partialorder %v12220_v49, %v7783_v2  ;;  %v2333_v28 = vsel %vm1787_vm8, %v7303_v47, 1e+30  ;;  %v2782_v25 = vmin.f32 %v2781_v57, %v2264_v37 }
 0x2c8   :  { %v2776_v15 = vmin.f32 %v2775_v31, %v2259_v14  ;;  %vm1792_vm10 = vcmp.eq.f32.partialorder %v12221_v19, %v7783_v2  ;;  %v2855_v62 = vmin.f32 %v2854_v52, %v2333_v28  ;;  %v2266_v18 = vsel %vm1720_vm2, %v7269_v60, 1e+30  ;;  %v12226_v52 = vld [vmem:[#allocation235_spill] sm:$0xff] }
 0x2c9   :  { %vm1793_vm13 = vcmp.eq.f32.partialorder %v12222_v7, %v7783_v2  ;;  %v2334_v48 = vsel %vm1788_vm11, %v7308_v53, 1e+30  ;;  %vm1721_vm3 = vcmp.eq.f32.partialorder %v12223_v29, %v7850_v34  ;;  %v2783_v14 = vmin.f32 %v2782_v25, %v2265_v44  ;;  %v12227_v44 = vld [vmem:[#allocation236_spill] sm:$0xff]  ;;  %v12228_v28 = vld [vmem:[#allocation43_spill] sm:$0xff] }
 0x2ca   :  { %v2777_v51 = vmin.f32 %v2776_v15, %v2260_v30  ;;  %vm1794_vm1 = vcmp.eq.f32.partialorder %v12224_v40, %v7783_v2  ;;  %v2335_v37 = vsel %vm1789_vm12, %v7311_v50, 1e+30  ;;  %v2856_v16 = vmin.f32 %v2855_v62, %v2334_v48  ;;  %v12225_v30 = vld [vmem:[#allocation42_spill] sm:$0xff]  ;;  %v12230_v48 = vld [vmem:[#allocation241_spill] sm:$0xff]  ;;  %v12231_v19 = vld [vmem:[#allocation47_spill] sm:$0xff] }
 0x2cb   :  { %v2336_v26 = vsel %vm1790_vm0, %v7319_v32, 1e+30  ;;  %v2337_v38 = vsel %vm1791_vm9, %v7321_v39, 1e+30  ;;  %vm1722_vm6 = vcmp.eq.f32.partialorder %v12225_v30, %v7850_v34  ;;  %v2784_v57 = vmin.f32 %v2783_v14, %v2266_v18  ;;  %v12229_v62 = vld [vmem:[#allocation46_spill] sm:$0xff]  ;;  %v12234_v30 = vld [vmem:[#allocation49_spill] sm:$0xff] }
 0x2cc   :  { %2778 = vmin.xlane.f32.xlu2 %v2777_v51  ;;  %v2857_v31 = vmin.f32 %v2856_v16, %v2335_v37  ;;  %v2267_v12 = vsel %vm1721_vm3, %v7297_v20, 1e+30  ;;  %vm1747_vm15 = vcmp.eq.f32.partialorder %v12226_v52, %v7928_v23  ;;  %vm1748_vm14 = vcmp.eq.f32.partialorder %v12227_v44, %v7928_v23  ;;  %v12232_v37 = vld [vmem:[#allocation48_spill] sm:$0xff]  ;;  %v12236_v44 = vld [vmem:[#allocation247_spill] sm:$0xff] }
 0x2cd   :  { %v2338_v17 = vsel %vm1792_vm10, %v7324_v33, 1e+30  ;;  %v2339_v49 = vsel %vm1793_vm13, %v7332_v43, 1e+30  ;;  %vm1723_vm7 = vcmp.eq.f32.partialorder %v12228_v28, %v7850_v34  ;;  %v2785_v25 = vmin.f32 %v2784_v57, %v2267_v12  ;;  %v12235_v57 = vld [vmem:[#allocation50_spill] sm:$0xff] }
 0x2ce   :  { %v2858_v15 = vmin.f32 %v2857_v31, %v2336_v26  ;;  %vm1724_vm5 = vcmp.eq.f32.partialorder %v12229_v62, %v7850_v34  ;;  %v2268_v18 = vsel %vm1722_vm6, %v7301_v9, 1e+30  ;;  %vm1749_vm4 = vcmp.eq.f32.partialorder %v12230_v48, %v7928_v23  ;;  %v12233_v26 = vld [vmem:[#allocation244_spill] sm:$0xff]  ;;  %v12239_v62 = vld [vmem:[#allocation249_spill] sm:$0xff] }
 0x2cf   :  { %vm1725_vm8 = vcmp.eq.f32.partialorder %v12231_v19, %v7850_v34  ;;  %v2786_v29 = vmin.f32 %v2785_v25, %v2268_v18  ;;  %v2293_v7 = vsel %vm1747_vm15, %v7177_v0, 1e+30  ;;  %v2294_v14 = vsel %vm1748_vm14, %v7180_v27, 1e+30  ;;  %v12237_v25 = vld [vmem:[#allocation52_spill] sm:$0xff] }
 0x2d0   :  { %v2859_v51 = vmin.f32 %v2858_v15, %v2337_v38  ;;  %vm1726_vm11 = vcmp.eq.f32.partialorder %v12232_v37, %v7850_v34  ;;  %v2269_v16 = vsel %vm1723_vm7, %v7303_v47, 1e+30  ;;  %vm1750_vm2 = vcmp.eq.f32.partialorder %v12233_v26, %v7928_v23  ;;  %v12238_v15 = vld [vmem:[#allocation53_spill] sm:$0xff] }
 0x2d1   :  { %vm1727_vm12 = vcmp.eq.f32.partialorder %v12234_v30, %v7850_v34  ;;  %vm1728_vm0 = vcmp.eq.f32.partialorder %v12235_v57, %v7850_v34  ;;  %v2787_v31 = vmin.f32 %v2786_v29, %v2269_v16  ;;  %v2295_v12 = vsel %vm1749_vm4, %v7219_v58, 1e+30 }
 0x2d2   :  { %v2860_v52 = vmin.f32 %v2859_v51, %v2338_v17  ;;  %v2270_v38 = vsel %vm1724_vm5, %v7308_v53, 1e+30  ;;  %vm1751_vm9 = vcmp.eq.f32.partialorder %v12236_v44, %v7928_v23  ;;  %v2814_v28 = vmin.f32 %v2293_v7, %v2294_v14  ;;  %v8005_v7 = vpop.xlane.xlu2 %1312  ;;  %v12241_v44 = vld [vmem:[#allocation251_spill] sm:$0xff] }
 0x2d3   :  { %vm1729_vm10 = vcmp.eq.f32.partialorder %v12237_v25, %v7850_v34  ;;  %vm1730_vm13 = vcmp.eq.f32.partialorder %v12238_v15, %v7850_v34  ;;  %v2788_v18 = vmin.f32 %v2787_v31, %v2270_v38  ;;  %v2296_v48 = vsel %vm1750_vm2, %v7242_v22, 1e+30  ;;  %v12240_v38 = vld [vmem:[#allocation250_spill] sm:$0xff]  ;;  %v12244_v34 = vld [vmem:[#allocation259_spill] sm:$0xff] }
 0x2d4   :  { %v2861_v29 = vmin.f32 %v2860_v52, %v2339_v49  ;;  %v2271_v17 = vsel %vm1725_vm8, %v7311_v50, 1e+30  ;;  %vm1752_vm3 = vcmp.eq.f32.partialorder %v12239_v62, %v7928_v23  ;;  %v2815_v51 = vmin.f32 %v2814_v28, %v2295_v12  ;;  %v12242_v28 = vld [vmem:[#allocation252_spill] sm:$0xff]  ;;  %v12245_v15 = vld [vmem:[#allocation262_spill] sm:$0xff]  ;;  %v12248_v62 = vld [vmem:[#allocation255_spill] sm:$0xff] }
 0x2d5   :  { %v2340_v14 = vsel %vm1794_vm1, %v7334_v55, 1e+30  ;;  %v2272_v49 = vsel %vm1726_vm11, %v7319_v32, 1e+30  ;;  %v2789_v16 = vmin.f32 %v2788_v18, %v2271_v17  ;;  %v2297_v19 = vsel %vm1751_vm9, %v7254_v24, 1e+30 }
 0x2d6   :  { %v2862_v26 = vmin.f32 %v2861_v29, %v2340_v14  ;;  %v2273_v31 = vsel %vm1727_vm12, %v7321_v39, 1e+30  ;;  %v2274_v2 = vsel %vm1728_vm0, %v7324_v33, 1e+30  ;;  %v2816_v40 = vmin.f32 %v2815_v51, %v2296_v48  ;;  %v12243_v18 = vld [vmem:[#allocation254_spill] sm:$0xff]  ;;  %v12246_v48 = vld [vmem:[#allocation263_spill] sm:$0xff] }
 0x2d7   :  { %v2275_v37 = vsel %vm1729_vm10, %v7332_v43, 1e+30  ;;  %v2276_v12 = vsel %vm1730_vm13, %v7334_v55, 1e+30  ;;  %v2790_v52 = vmin.f32 %v2789_v16, %v2272_v49  ;;  %v2298_v30 = vsel %vm1752_vm3, %v7269_v60, 1e+30 }
 0x2d8   :  { %2863 = vmin.xlane.f32.xlu1 %v2862_v26  ;;  %vm1753_vm1 = vcmp.eq.f32.partialorder %v12240_v38, %v7928_v23  ;;  %v2817_v57 = vmin.f32 %v2816_v40, %v2297_v19  ;;  %vm1827_vm6 = vcmp.eq.f32.partialorder %v12241_v44, %v8005_v7  ;;  %vm1828_vm15 = vcmp.eq.f32.partialorder %v12242_v28, %v8005_v7  ;;  %v12247_v29 = vld [vmem:[#allocation265_spill] sm:$0xff]  ;;  %v12249_v19 = vld [vmem:[#allocation266_spill] sm:$0xff]  ;;  %v12250_v26 = vld [vmem:[#allocation267_spill] sm:$0xff] }
 0x2d9   :  { %v2791_v25 = vmin.f32 %v2790_v52, %v2273_v31  ;;  %vm1754_vm14 = vcmp.eq.f32.partialorder %v12243_v18, %v7928_v23  ;;  %vm1755_vm7 = vcmp.eq.f32.partialorder %v12244_v34, %v7928_v23  ;;  %vm1756_vm5 = vcmp.eq.f32.partialorder %v12245_v15, %v7928_v23  ;;  %v12251_v40 = vld [vmem:[#allocation256_spill] sm:$0xff]  ;;  %v12253_v44 = vld [vmem:[#allocation274_spill] sm:$0xff] }
 0x2da   :  { %vm1757_vm4 = vcmp.eq.f32.partialorder %v12246_v48, %v7928_v23  ;;  %vm1758_vm8 = vcmp.eq.f32.partialorder %v12247_v29, %v7928_v23  ;;  %v2818_v17 = vmin.f32 %v2817_v57, %v2298_v30  ;;  %vm1829_vm11 = vcmp.eq.f32.partialorder %v12248_v62, %v8005_v7  ;;  %v12252_v30 = vld [vmem:[#allocation269_spill] sm:$0xff]  ;;  %v8067_v57 = vpop.xlane.xlu1 %1244 }
 0x2db   :  { %v2792_v51 = vmin.f32 %v2791_v25, %v2274_v2  ;;  %v2299_v14 = vsel %vm1753_vm1, %v7297_v20, 1e+30  ;;  %v2373_v49 = vsel %vm1827_vm6, %v7177_v0, 1e+30  ;;  %v2374_v16 = vsel %vm1828_vm15, %v7180_v27, 1e+30 }
 0x2dc   :  { %vm1759_vm2 = vcmp.eq.f32.partialorder %v12249_v19, %v7928_v23  ;;  %vm1760_vm12 = vcmp.eq.f32.partialorder %v12250_v26, %v7928_v23  ;;  %v2819_v31 = vmin.f32 %v2818_v17, %v2299_v14  ;;  %vm1830_vm0 = vcmp.eq.f32.partialorder %v12251_v40, %v8005_v7  ;;  %v12254_v25 = vld [vmem:[#allocation260_spill] sm:$0xff]  ;;  %v12257_v40 = vld [vmem:[#allocation219_spill] sm:$0xff] }
 0x2dd   :  { %v2793_v52 = vmin.f32 %v2792_v51, %v2275_v37  ;;  %vm1761_vm9 = vcmp.eq.f32.partialorder %v12252_v30, %v7928_v23  ;;  %v2300_v2 = vsel %vm1754_vm14, %v7301_v9, 1e+30  ;;  %v2375_v38 = vsel %vm1829_vm11, %v7219_v58, 1e+30 }
 0x2de   :  { %vm1762_vm10 = vcmp.eq.f32.partialorder %v12253_v44, %v7928_v23  ;;  %v2820_v28 = vmin.f32 %v2819_v31, %v2300_v2  ;;  %vm1831_vm13 = vcmp.eq.f32.partialorder %v12254_v25, %v8005_v7  ;;  %v2899_v37 = vmin.f32 %v2373_v49, %v2374_v16  ;;  %v12256_v16 = vld [vmem:[#allocation218_spill] sm:$0xff] }
 0x2df   :  { %v2794_v17 = vmin.f32 %v2793_v52, %v2276_v12  ;;  %v2301_v62 = vsel %vm1755_vm7, %v7303_v47, 1e+30  ;;  %v2302_v18 = vsel %vm1756_vm5, %v7308_v53, 1e+30  ;;  %v2376_v51 = vsel %vm1830_vm0, %v7242_v22, 1e+30 }
 0x2e0   :  { %v2303_v14 = vsel %vm1757_vm4, %v7311_v50, 1e+30  ;;  %v2821_v31 = vmin.f32 %v2820_v28, %v2301_v62  ;;  %v12255_v12 = vld [vmem:[#allocation264_spill] sm:$0xff]  ;;  %v2900_v49 = vmin.f32 %v2899_v37, %v2375_v38  ;;  %v2304_v34 = vsel %vm1758_vm8, %v7319_v32, 1e+30  ;;  %v12266_v23 = vld [vmem:[#allocation282_spill] sm:$0xff] }
 0x2e1   :  { %vm1832_vm3 = vcmp.eq.f32.partialorder %v12255_v12, %v8005_v7  ;;  %2795 = vmin.xlane.f32.xlu0 %v2794_v17  ;;  %v2377_v15 = vsel %vm1831_vm13, %v7254_v24, 1e+30  ;;  %vm1763_vm1 = vcmp.eq.f32.partialorder %v12256_v16, %v8067_v57  ;;  %vm1764_vm6 = vcmp.eq.f32.partialorder %v12257_v40, %v8067_v57  ;;  %v12258_v38 = vld [vmem:[#allocation224_spill] sm:$0xff]  ;;  %v12262_v16 = vld [vmem:[#allocation271_spill] sm:$0xff] }
 0x2e2   :  { %v2305_v48 = vsel %vm1759_vm2, %v7321_v39, 1e+30  ;;  %v2822_v52 = vmin.f32 %v2821_v31, %v2302_v18  ;;  %v2901_v2 = vmin.f32 %v2900_v49, %v2376_v51  ;;  %vm1765_vm15 = vcmp.eq.f32.partialorder %v12258_v38, %v8067_v57  ;;  %v12259_v28 = vld [vmem:[#allocation268_spill] sm:$0xff] }
 0x2e3   :  { %v2306_v29 = vsel %vm1760_vm12, %v7324_v33, 1e+30  ;;  %vm1833_vm14 = vcmp.eq.f32.partialorder %v12259_v28, %v8005_v7  ;;  %v2378_v25 = vsel %vm1832_vm3, %v7269_v60, 1e+30  ;;  %v12260_v37 = vld [vmem:[#allocation228_spill] sm:$0xff]  ;;  %vm1834_vm4 = vcmp.eq.f32.partialorder %v12262_v16, %v8005_v7 }
 0x2e4   :  { %vm1766_vm7 = vcmp.eq.f32.partialorder %v12260_v37, %v8067_v57  ;;  %v2823_v19 = vmin.f32 %v2822_v52, %v2303_v14  ;;  %v2902_v17 = vmin.f32 %v2901_v2, %v2377_v15  ;;  %v2309_v62 = vsel %vm1763_vm1, %v7177_v0, 1e+30  ;;  %v12261_v51 = vld [vmem:[#allocation232_spill] sm:$0xff]  ;;  %v12263_v52 = vld [vmem:[#allocation234_spill] sm:$0xff] }
 0x2e5   :  { %v2310_v18 = vsel %vm1764_vm6, %v7180_v27, 1e+30  ;;  %v2307_v26 = vsel %vm1761_vm9, %v7332_v43, 1e+30  ;;  %vm1767_vm5 = vcmp.eq.f32.partialorder %v12261_v51, %v8067_v57  ;;  %v2311_v31 = vsel %vm1765_vm15, %v7219_v58, 1e+30 }
 0x2e6   :  { %v2831_v12 = vmin.f32 %v2309_v62, %v2310_v18  ;;  %v2824_v49 = vmin.f32 %v2823_v19, %v2304_v34  ;;  %v2903_v14 = vmin.f32 %v2902_v17, %v2378_v25  ;;  %v2312_v15 = vsel %vm1766_vm7, %v7242_v22, 1e+30  ;;  %v12264_v38 = vld [vmem:[#allocation276_spill] sm:$0xff]  ;;  %v12267_v62 = vld [vmem:[#allocation286_spill] sm:$0xff]  ;;  %v12268_v51 = vld [vmem:[#allocation287_spill] sm:$0xff] }
 0x2e7   :  { %v2308_v40 = vsel %vm1762_vm10, %v7334_v55, 1e+30  ;;  %v2379_v30 = vsel %vm1833_vm14, %v7297_v20, 1e+30  ;;  %vm1768_vm8 = vcmp.eq.f32.partialorder %v12263_v52, %v8067_v57  ;;  %vm1835_vm11 = vcmp.eq.f32.partialorder %v12264_v38, %v8005_v7  ;;  %v12265_v19 = vld [vmem:[#allocation280_spill] sm:$0xff] }
 0x2e8   :  { %v2832_v34 = vmin.f32 %v2831_v12, %v2311_v31  ;;  %v2825_v2 = vmin.f32 %v2824_v49, %v2305_v48  ;;  %v2904_v25 = vmin.f32 %v2903_v14, %v2379_v30  ;;  %v2313_v37 = vsel %vm1767_vm5, %v7254_v24, 1e+30  ;;  %v12269_v12 = vld [vmem:[#allocation240_spill] sm:$0xff]  ;;  %v8154_v30 = vpop.xlane.xlu0 %1278 }
 0x2e9   :  { %vm1836_vm2 = vcmp.eq.f32.partialorder %v12265_v19, %v8005_v7  ;;  %vm1837_vm12 = vcmp.eq.f32.partialorder %v12266_v23, %v8005_v7  ;;  %v2380_v44 = vsel %vm1834_vm4, %v7301_v9, 1e+30  ;;  %vm1838_vm0 = vcmp.eq.f32.partialorder %v12267_v62, %v8005_v7  ;;  %v12270_v14 = vld [vmem:[#allocation288_spill] sm:$0xff] }
 0x2ea   :  { %v2833_v28 = vmin.f32 %v2832_v34, %v2312_v15  ;;  %v2826_v17 = vmin.f32 %v2825_v2, %v2306_v29  ;;  %v2905_v48 = vmin.f32 %v2904_v25, %v2380_v44  ;;  %v2314_v18 = vsel %vm1768_vm8, %v7269_v60, 1e+30  ;;  %v12271_v29 = vld [vmem:[#allocation291_spill] sm:$0xff]  ;;  %v12272_v52 = vld [vmem:[#allocation292_spill] sm:$0xff]  ;;  %v12273_v2 = vld [vmem:[#allocation242_spill] sm:$0xff] }
 0x2eb   :  { %vm1839_vm9 = vcmp.eq.f32.partialorder %v12268_v51, %v8005_v7  ;;  %v2381_v31 = vsel %vm1835_vm11, %v7303_v47, 1e+30  ;;  %vm1769_vm10 = vcmp.eq.f32.partialorder %v12269_v12, %v8067_v57  ;;  %vm1840_vm13 = vcmp.eq.f32.partialorder %v12270_v14, %v8005_v7  ;;  %v12277_v12 = vld [vmem:[#allocation245_spill] sm:$0xff]  ;;  %v12278_v14 = vld [vmem:[#allocation290_spill] sm:$0xff] }
 0x2ec   :  { %v2834_v49 = vmin.f32 %v2833_v28, %v2313_v37  ;;  %v2827_v16 = vmin.f32 %v2826_v17, %v2307_v26  ;;  %vm1841_vm3 = vcmp.eq.f32.partialorder %v12271_v29, %v8005_v7  ;;  %v2906_v15 = vmin.f32 %v2905_v48, %v2381_v31  ;;  %v12276_v31 = vld [vmem:[#allocation285_spill] sm:$0xff] }
 0x2ed   :  { %vm1842_vm1 = vcmp.eq.f32.partialorder %v12272_v52, %v8005_v7  ;;  %v2382_v34 = vsel %vm1836_vm2, %v7308_v53, 1e+30  ;;  %vm1770_vm6 = vcmp.eq.f32.partialorder %v12273_v2, %v8067_v57  ;;  %v2383_v25 = vsel %vm1837_vm12, %v7311_v50, 1e+30  ;;  %v12279_v2 = vld [vmem:[#allocation246_spill] sm:$0xff] }
 0x2ee   :  { %v2835_v26 = vmin.f32 %v2834_v49, %v2314_v18  ;;  %v2828_v38 = vmin.f32 %v2827_v16, %v2308_v40  ;;  %v2907_v37 = vmin.f32 %v2906_v15, %v2382_v34  ;;  %v2315_v44 = vsel %vm1769_vm10, %v7297_v20, 1e+30  ;;  %v12274_v40 = vld [vmem:[#allocation243_spill] sm:$0xff]  ;;  %v12275_v18 = vld [vmem:[#allocation284_spill] sm:$0xff]  ;;  %v12281_v52 = vld [vmem:[#allocation294_spill] sm:$0xff] }
 0x2ef   :  { %v2384_v28 = vsel %vm1838_vm0, %v7319_v32, 1e+30  ;;  %v2385_v19 = vsel %vm1839_vm9, %v7321_v39, 1e+30  ;;  %vm1771_vm15 = vcmp.eq.f32.partialorder %v12274_v40, %v8067_v57  ;;  %v2316_v48 = vsel %vm1770_vm6, %v7301_v9, 1e+30 }
 0x2f0   :  { %v2836_v17 = vmin.f32 %v2835_v26, %v2315_v44  ;;  %2829 = vmin.xlane.f32.xlu2 %v2828_v38  ;;  %v2908_v23 = vmin.f32 %v2907_v37, %v2383_v25  ;;  %vm1795_vm14 = vcmp.eq.f32.partialorder %v12275_v18, %v8154_v30  ;;  %vm1796_vm7 = vcmp.eq.f32.partialorder %v12276_v31, %v8154_v30  ;;  %v12280_v37 = vld [vmem:[#allocation248_spill] sm:$0xff]  ;;  %v12282_v44 = vld [vmem:[#allocation253_spill] sm:$0xff]  ;;  %v12285_v31 = vld [vmem:[#allocation258_spill] sm:$0xff] }
 0x2f1   :  { %v2386_v62 = vsel %vm1840_vm13, %v7324_v33, 1e+30  ;;  %v2387_v51 = vsel %vm1841_vm3, %v7332_v43, 1e+30  ;;  %vm1772_vm5 = vcmp.eq.f32.partialorder %v12277_v12, %v8067_v57  ;;  %v2388_v16 = vsel %vm1842_vm1, %v7334_v55, 1e+30 }
 0x2f2   :  { %v2837_v49 = vmin.f32 %v2836_v17, %v2316_v48  ;;  %v2909_v15 = vmin.f32 %v2908_v23, %v2384_v28  ;;  %v2317_v34 = vsel %vm1771_vm15, %v7303_v47, 1e+30  ;;  %vm1797_vm4 = vcmp.eq.f32.partialorder %v12278_v14, %v8154_v30  ;;  %v12283_v28 = vld [vmem:[#allocation257_spill] sm:$0xff] }
 0x2f3   :  { %vm1773_vm8 = vcmp.eq.f32.partialorder %v12279_v2, %v8067_v57  ;;  %v2341_v26 = vsel %vm1795_vm14, %v7177_v0, 1e+30  ;;  %v2342_v38 = vsel %vm1796_vm7, %v7180_v27, 1e+30  ;;  %vm1774_vm11 = vcmp.eq.f32.partialorder %v12280_v37, %v8067_v57  ;;  %v12284_v48 = vld [vmem:[#allocation297_spill] sm:$0xff]  ;;  %v12287_v2 = vld [vmem:[#allocation302_spill] sm:$0xff] }
 0x2f4   :  { %v2838_v29 = vmin.f32 %v2837_v49, %v2317_v34  ;;  %v2910_v25 = vmin.f32 %v2909_v15, %v2385_v19  ;;  %v2318_v7 = vsel %vm1772_vm5, %v7308_v53, 1e+30  ;;  %vm1798_vm2 = vcmp.eq.f32.partialorder %v12281_v52, %v8154_v30  ;;  %v12286_v12 = vld [vmem:[#allocation261_spill] sm:$0xff]  ;;  %v8223_v34 = vpop.xlane.xlu2 %1363 }
 0x2f5   :  { %vm1775_vm12 = vcmp.eq.f32.partialorder %v12282_v44, %v8067_v57  ;;  %vm1776_vm0 = vcmp.eq.f32.partialorder %v12283_v28, %v8067_v57  ;;  %v2343_v17 = vsel %vm1797_vm4, %v7219_v58, 1e+30  ;;  %v2319_v19 = vsel %vm1773_vm8, %v7311_v50, 1e+30  ;;  %v12288_v44 = vld [vmem:[#allocation304_spill] sm:$0xff]  ;;  %v12292_v28 = vld [vmem:[#allocation311_spill] sm:$0xff] }
 0x2f6   :  { %v2839_v40 = vmin.f32 %v2838_v29, %v2318_v7  ;;  %v2911_v23 = vmin.f32 %v2910_v25, %v2386_v62  ;;  %vm1799_vm9 = vcmp.eq.f32.partialorder %v12284_v48, %v8154_v30  ;;  %v2865_v18 = vmin.f32 %v2341_v26, %v2342_v38 }
 0x2f7   :  { %vm1777_vm10 = vcmp.eq.f32.partialorder %v12285_v31, %v8067_v57  ;;  %vm1778_vm13 = vcmp.eq.f32.partialorder %v12286_v12, %v8067_v57  ;;  %v2344_v15 = vsel %vm1798_vm2, %v7242_v22, 1e+30  ;;  %v2320_v62 = vsel %vm1774_vm11, %v7319_v32, 1e+30  ;;  %v12290_v57 = vld [vmem:[#allocation303_spill] sm:$0xff]  ;;  %v12293_v31 = vld [vmem:[#allocation314_spill] sm:$0xff] }
 0x2f8   :  { %v2840_v49 = vmin.f32 %v2839_v40, %v2319_v19  ;;  %v2912_v14 = vmin.f32 %v2911_v23, %v2387_v51  ;;  %vm1800_vm3 = vcmp.eq.f32.partialorder %v12287_v2, %v8154_v30  ;;  %v2866_v29 = vmin.f32 %v2865_v18, %v2343_v17  ;;  %v12289_v19 = vld [vmem:[#allocation305_spill] sm:$0xff]  ;;  %v12294_v12 = vld [vmem:[#allocation319_spill] sm:$0xff] }
 0x2f9   :  { %v2321_v26 = vsel %vm1775_vm12, %v7321_v39, 1e+30  ;;  %v2322_v38 = vsel %vm1776_vm0, %v7324_v33, 1e+30  ;;  %v2345_v25 = vsel %vm1799_vm9, %v7254_v24, 1e+30  ;;  %vm1875_vm1 = vcmp.eq.f32.partialorder %v12288_v44, %v8223_v34 }
 0x2fa   :  { %v2841_v51 = vmin.f32 %v2840_v49, %v2320_v62  ;;  %v2913_v7 = vmin.f32 %v2912_v14, %v2388_v16  ;;  %v2323_v37 = vsel %vm1777_vm10, %v7332_v43, 1e+30  ;;  %v2324_v52 = vsel %vm1778_vm13, %v7334_v55, 1e+30  ;;  %v12291_v16 = vld [vmem:[#allocation308_spill] sm:$0xff]  ;;  %v12295_v49 = vld [vmem:[#allocation306_spill] sm:$0xff] }
 0x2fb   :  { %v2867_v40 = vmin.f32 %v2866_v29, %v2344_v15  ;;  %v2346_v23 = vsel %vm1800_vm3, %v7269_v60, 1e+30  ;;  %vm1876_vm6 = vcmp.eq.f32.partialorder %v12289_v19, %v8223_v34  ;;  %vm1801_vm15 = vcmp.eq.f32.partialorder %v12290_v57, %v8154_v30  ;;  %v12296_v15 = vld [vmem:[#allocation321_spill] sm:$0xff]  ;;  %v12301_v44 = vld [vmem:[#allocation312_spill] sm:$0xff] }
 0x2fc   :  { %v2842_v17 = vmin.f32 %v2841_v51, %v2321_v26  ;;  %2914 = vmin.xlane.f32.xlu1 %v2913_v7  ;;  %vm1802_vm14 = vcmp.eq.f32.partialorder %v12291_v16, %v8154_v30  ;;  %vm1803_vm7 = vcmp.eq.f32.partialorder %v12292_v28, %v8154_v30  ;;  %vm1804_vm5 = vcmp.eq.f32.partialorder %v12293_v31, %v8154_v30  ;;  %v12297_v26 = vld [vmem:[#allocation325_spill] sm:$0xff] }
 0x2fd   :  { %v2868_v48 = vmin.f32 %v2867_v40, %v2345_v25  ;;  %vm1805_vm4 = vcmp.eq.f32.partialorder %v12294_v12, %v8154_v30  ;;  %vm1877_vm8 = vcmp.eq.f32.partialorder %v12295_v49, %v8223_v34  ;;  %vm1806_vm11 = vcmp.eq.f32.partialorder %v12296_v15, %v8154_v30  ;;  %v12298_v51 = vld [vmem:[#allocation309_spill] sm:$0xff]  ;;  %v12299_v25 = vld [vmem:[#allocation326_spill] sm:$0xff]  ;;  %v8286_v49 = vpop.xlane.xlu1 %1295 }
 0x2fe   :  { %v2843_v18 = vmin.f32 %v2842_v17, %v2322_v38  ;;  %v2421_v62 = vsel %vm1875_vm1, %v7177_v0, 1e+30  ;;  %v2422_v2 = vsel %vm1876_vm6, %v7180_v27, 1e+30  ;;  %vm1807_vm2 = vcmp.eq.f32.partialorder %v12297_v26, %v8154_v30  ;;  %v12300_v7 = vld [vmem:[#allocation329_spill] sm:$0xff] }
 0x2ff   :  { %v2869_v14 = vmin.f32 %v2868_v48, %v2346_v23  ;;  %v2347_v38 = vsel %vm1801_vm15, %v7297_v20, 1e+30  ;;  %vm1878_vm12 = vcmp.eq.f32.partialorder %v12298_v51, %v8223_v34  ;;  %vm1808_vm0 = vcmp.eq.f32.partialorder %v12299_v25, %v8154_v30  ;;  %v12302_v57 = vld [vmem:[#allocation333_spill] sm:$0xff] }
 0x300   :  { %v2844_v29 = vmin.f32 %v2843_v18, %v2323_v37  ;;  %vm1809_vm9 = vcmp.eq.f32.partialorder %v12300_v7, %v8154_v30  ;;  %v2423_v17 = vsel %vm1877_vm8, %v7219_v58, 1e+30  ;;  %v2348_v37 = vsel %vm1802_vm14, %v7301_v9, 1e+30  ;;  %v12305_v25 = vld [vmem:[#allocation273_spill] sm:$0xff]  ;;  %v12307_v7 = vld [vmem:[#allocation322_spill] sm:$0xff] }
 0x301   :  { %v2870_v40 = vmin.f32 %v2869_v14, %v2347_v38  ;;  %vm1879_vm10 = vcmp.eq.f32.partialorder %v12301_v44, %v8223_v34  ;;  %v2950_v19 = vmin.f32 %v2421_v62, %v2422_v2  ;;  %vm1810_vm13 = vcmp.eq.f32.partialorder %v12302_v57, %v8154_v30  ;;  %v12303_v62 = vld [vmem:[#allocation316_spill] sm:$0xff]  ;;  %v12308_v44 = vld [vmem:[#allocation327_spill] sm:$0xff] }
 0x302   :  { %v2845_v23 = vmin.f32 %v2844_v29, %v2324_v52  ;;  %v2349_v48 = vsel %vm1803_vm7, %v7303_v47, 1e+30  ;;  %v2424_v52 = vsel %vm1878_vm12, %v7242_v22, 1e+30  ;;  %v2350_v16 = vsel %vm1804_vm5, %v7308_v53, 1e+30 }
 0x303   :  { %v2871_v18 = vmin.f32 %v2870_v40, %v2348_v37  ;;  %v2351_v14 = vsel %vm1805_vm4, %v7311_v50, 1e+30  ;;  %vm1880_vm3 = vcmp.eq.f32.partialorder %v12303_v62, %v8223_v34  ;;  %v2951_v28 = vmin.f32 %v2950_v19, %v2423_v17  ;;  %v12306_v37 = vld [vmem:[#allocation320_spill] sm:$0xff]  ;;  %v12309_v57 = vld [vmem:[#allocation331_spill] sm:$0xff] }
 0x304   :  { %2846 = vmin.xlane.f32.xlu0 %v2845_v23  ;;  %v2352_v2 = vsel %vm1806_vm11, %v7319_v32, 1e+30  ;;  %v2353_v31 = vsel %vm1807_vm2, %v7321_v39, 1e+30  ;;  %v2425_v38 = vsel %vm1879_vm10, %v7254_v24, 1e+30  ;;  %vm1812_vm6 = vcmp.eq.f32.partialorder %v12305_v25, %v8286_v49 }
 0x305   :  { %v2872_v29 = vmin.f32 %v2871_v18, %v2349_v48  ;;  %v2354_v12 = vsel %vm1808_vm0, %v7324_v33, 1e+30  ;;  %v2355_v51 = vsel %vm1809_vm9, %v7332_v43, 1e+30  ;;  %v2356_v15 = vsel %vm1810_vm13, %v7334_v55, 1e+30 }
 0x306   :  { %v2952_v26 = vmin.f32 %v2951_v28, %v2424_v52  ;;  %v2426_v17 = vsel %vm1880_vm3, %v7269_v60, 1e+30  ;;  %v12304_v23 = vld [vmem:[#allocation272_spill] sm:$0xff]  ;;  %vm1881_vm15 = vcmp.eq.f32.partialorder %v12306_v37, %v8223_v34  ;;  %vm1882_vm14 = vcmp.eq.f32.partialorder %v12307_v7, %v8223_v34  ;;  %v12311_v18 = vld [vmem:[#allocation277_spill] sm:$0xff]  ;;  %v12312_v52 = vld [vmem:[#allocation339_spill] sm:$0xff] }
 0x307   :  { %v2873_v40 = vmin.f32 %v2872_v29, %v2350_v16  ;;  %vm1811_vm1 = vcmp.eq.f32.partialorder %v12304_v23, %v8286_v49  ;;  %vm1883_vm7 = vcmp.eq.f32.partialorder %v12308_v44, %v8223_v34  ;;  %vm1884_vm5 = vcmp.eq.f32.partialorder %v12309_v57, %v8223_v34  ;;  %v12310_v48 = vld [vmem:[#allocation336_spill] sm:$0xff]  ;;  %v12316_v23 = vld [vmem:[#allocation345_spill] sm:$0xff] }
 0x308   :  { %v2953_v30 = vmin.f32 %v2952_v26, %v2425_v38  ;;  %vm1885_vm4 = vcmp.eq.f32.partialorder %v12310_v48, %v8223_v34  ;;  %vm1813_vm8 = vcmp.eq.f32.partialorder %v12311_v18, %v8286_v49  ;;  %vm1886_vm11 = vcmp.eq.f32.partialorder %v12312_v52, %v8223_v34  ;;  %v12314_v26 = vld [vmem:[#allocation281_spill] sm:$0xff]  ;;  %v12318_v18 = vld [vmem:[#allocation347_spill] sm:$0xff] }
 0x309   :  { %v2874_v19 = vmin.f32 %v2873_v40, %v2351_v14  ;;  %v2357_v62 = vsel %vm1811_vm1, %v7177_v0, 1e+30  ;;  %v2358_v28 = vsel %vm1812_vm6, %v7180_v27, 1e+30  ;;  %v12313_v14 = vld [vmem:[#allocation342_spill] sm:$0xff]  ;;  %vm1814_vm12 = vcmp.eq.f32.partialorder %v12314_v26, %v8286_v49  ;;  %v12315_v40 = vld [vmem:[#allocation344_spill] sm:$0xff] }
 0x30a   :  { %v2954_v16 = vmin.f32 %v2953_v30, %v2426_v17  ;;  %vm1887_vm2 = vcmp.eq.f32.partialorder %v12313_v14, %v8223_v34  ;;  %v2427_v38 = vsel %vm1881_vm15, %v7297_v20, 1e+30  ;;  %vm1888_vm0 = vcmp.eq.f32.partialorder %v12315_v40, %v8223_v34  ;;  %v12317_v30 = vld [vmem:[#allocation283_spill] sm:$0xff]  ;;  %v12319_v26 = vld [vmem:[#allocation289_spill] sm:$0xff]  ;;  %v12322_v40 = vld [vmem:[#allocation132_spill] sm:$0xff] }
 0x30b   :  { %v2875_v29 = vmin.f32 %v2874_v19, %v2352_v2  ;;  %vm1889_vm9 = vcmp.eq.f32.partialorder %v12316_v23, %v8223_v34  ;;  %v2359_v25 = vsel %vm1813_vm8, %v7219_v58, 1e+30  ;;  %v2428_v2 = vsel %vm1882_vm14, %v7301_v9, 1e+30 }
 0x30c   :  { %v2955_v17 = vmin.f32 %v2954_v16, %v2427_v38  ;;  %vm1815_vm10 = vcmp.eq.f32.partialorder %v12317_v30, %v8286_v49  ;;  %v2882_v19 = vmin.f32 %v2357_v62, %v2358_v28  ;;  %vm1890_vm13 = vcmp.eq.f32.partialorder %v12318_v18, %v8223_v34  ;;  %v8369_v28 = vpop.xlane.xlu0 %1329 }
 0x30d   :  { %v2876_v37 = vmin.f32 %v2875_v29, %v2353_v31  ;;  %v2429_v16 = vsel %vm1883_vm7, %v7303_v47, 1e+30  ;;  %v2360_v31 = vsel %vm1814_vm12, %v7242_v22, 1e+30  ;;  %v2430_v7 = vsel %vm1884_vm5, %v7308_v53, 1e+30 }
 0x30e   :  { %v2956_v38 = vmin.f32 %v2955_v17, %v2428_v2  ;;  %vm1816_vm3 = vcmp.eq.f32.partialorder %v12319_v26, %v8286_v49  ;;  %v2883_v62 = vmin.f32 %v2882_v19, %v2359_v25  ;;  %v2431_v44 = vsel %vm1885_vm4, %v7311_v50, 1e+30  ;;  %v12320_v19 = vld [vmem:[#allocation293_spill] sm:$0xff]  ;;  %v12326_v26 = vld [vmem:[#allocation307_spill] sm:$0xff] }
 0x30f   :  { %v2877_v29 = vmin.f32 %v2876_v37, %v2354_v12  ;;  %v2432_v12 = vsel %vm1886_vm11, %v7319_v32, 1e+30  ;;  %v2361_v57 = vsel %vm1815_vm10, %v7254_v24, 1e+30  ;;  %v2433_v25 = vsel %vm1887_vm2, %v7321_v39, 1e+30 }
 0x310   :  { %v2957_v17 = vmin.f32 %v2956_v38, %v2429_v16  ;;  %v2434_v48 = vsel %vm1888_vm0, %v7324_v33, 1e+30  ;;  %v2884_v2 = vmin.f32 %v2883_v62, %v2360_v31  ;;  %v2435_v52 = vsel %vm1889_vm9, %v7332_v43, 1e+30  ;;  %v12321_v38 = vld [vmem:[#allocation131_spill] sm:$0xff] }
 0x311   :  { %v2878_v37 = vmin.f32 %v2877_v29, %v2355_v51  ;;  %vm1817_vm1 = vcmp.eq.f32.partialorder %v12320_v19, %v8286_v49  ;;  %v2362_v51 = vsel %vm1816_vm3, %v7269_v60, 1e+30  ;;  %vm1843_vm6 = vcmp.eq.f32.partialorder %v12321_v38, %v8369_v28  ;;  %v12323_v29 = vld [vmem:[#allocation295_spill] sm:$0xff]  ;;  %v12332_v38 = vld [vmem:[#allocation317_spill] sm:$0xff] }
 0x312   :  { %v2958_v30 = vmin.f32 %v2957_v17, %v2430_v7  ;;  %v2885_v14 = vmin.f32 %v2884_v2, %v2361_v57  ;;  %vm1844_vm15 = vcmp.eq.f32.partialorder %v12322_v40, %v8369_v28  ;;  %v2436_v23 = vsel %vm1890_vm13, %v7334_v55, 1e+30  ;;  %v12324_v7 = vld [vmem:[#allocation296_spill] sm:$0xff]  ;;  %v12327_v17 = vld [vmem:[#allocation137_spill] sm:$0xff] }
 0x313   :  { %v2879_v16 = vmin.f32 %v2878_v37, %v2356_v15  ;;  %vm1818_vm14 = vcmp.eq.f32.partialorder %v12323_v29, %v8286_v49  ;;  %vm1819_vm7 = vcmp.eq.f32.partialorder %v12324_v7, %v8286_v49  ;;  %v12325_v15 = vld [vmem:[#allocation301_spill] sm:$0xff]  ;;  %vm1821_vm4 = vcmp.eq.f32.partialorder %v12326_v26, %v8286_v49  ;;  %v12328_v37 = vld [vmem:[#allocation310_spill] sm:$0xff] }
 0x314   :  { %v2959_v31 = vmin.f32 %v2958_v30, %v2431_v44  ;;  %vm1820_vm5 = vcmp.eq.f32.partialorder %v12325_v15, %v8286_v49  ;;  %v2886_v62 = vmin.f32 %v2885_v14, %v2362_v51  ;;  %vm1845_vm8 = vcmp.eq.f32.partialorder %v12327_v17, %v8369_v28  ;;  %v12329_v2 = vld [vmem:[#allocation313_spill] sm:$0xff]  ;;  %v8436_v17 = vpop.xlane.xlu1 %1346 }
 0x315   :  { %2880 = vmin.xlane.f32.xlu2 %v2879_v16  ;;  %v2363_v18 = vsel %vm1817_vm1, %v7297_v20, 1e+30  ;;  %v2389_v44 = vsel %vm1843_vm6, %v7177_v0, 1e+30  ;;  %v2390_v57 = vsel %vm1844_vm15, %v7180_v27, 1e+30  ;;  %vm1822_vm11 = vcmp.eq.f32.partialorder %v12328_v37, %v8286_v49 }
 0x316   :  { %v2960_v34 = vmin.f32 %v2959_v31, %v2432_v12  ;;  %vm1823_vm2 = vcmp.eq.f32.partialorder %v12329_v2, %v8286_v49  ;;  %v2887_v30 = vmin.f32 %v2886_v62, %v2363_v18  ;;  %v12330_v51 = vld [vmem:[#allocation141_spill] sm:$0xff]  ;;  %v12331_v16 = vld [vmem:[#allocation315_spill] sm:$0xff]  ;;  %v2364_v19 = vsel %vm1818_vm14, %v7301_v9, 1e+30  ;;  %v12333_v31 = vld [vmem:[#allocation348_spill] sm:$0xff] }
 0x317   :  { %vm1846_vm12 = vcmp.eq.f32.partialorder %v12330_v51, %v8369_v28  ;;  %vm1824_vm0 = vcmp.eq.f32.partialorder %v12331_v16, %v8286_v49  ;;  %v2391_v14 = vsel %vm1845_vm8, %v7219_v58, 1e+30  ;;  %vm1825_vm9 = vcmp.eq.f32.partialorder %v12332_v38, %v8286_v49  ;;  %v12338_v37 = vld [vmem:[#allocation328_spill] sm:$0xff] }
 0x318   :  { %v2961_v12 = vmin.f32 %v2960_v34, %v2433_v25  ;;  %v2888_v40 = vmin.f32 %v2887_v30, %v2364_v19  ;;  %vm1847_vm10 = vcmp.eq.f32.partialorder %v12333_v31, %v8369_v28  ;;  %v2916_v62 = vmin.f32 %v2389_v44, %v2390_v57  ;;  %v12334_v34 = vld [vmem:[#allocation318_spill] sm:$0xff]  ;;  %v12335_v44 = vld [vmem:[#allocation351_spill] sm:$0xff] }
 0x319   :  { %vm1826_vm13 = vcmp.eq.f32.partialorder %v12334_v34, %v8286_v49  ;;  %v2365_v29 = vsel %vm1819_vm7, %v7303_v47, 1e+30  ;;  %v2392_v18 = vsel %vm1846_vm12, %v7242_v22, 1e+30  ;;  %v2366_v30 = vsel %vm1820_vm5, %v7308_v53, 1e+30 }
 0x31a   :  { %v2962_v25 = vmin.f32 %v2961_v12, %v2434_v48  ;;  %v2889_v51 = vmin.f32 %v2888_v40, %v2365_v29  ;;  %vm1848_vm3 = vcmp.eq.f32.partialorder %v12335_v44, %v8369_v28  ;;  %v2917_v48 = vmin.f32 %v2916_v62, %v2391_v14  ;;  %v12336_v40 = vld [vmem:[#allocation323_spill] sm:$0xff]  ;;  %v12337_v14 = vld [vmem:[#allocation324_spill] sm:$0xff] }
 0x31b   :  { %v2367_v12 = vsel %vm1821_vm4, %v7311_v50, 1e+30  ;;  %v2368_v7 = vsel %vm1822_vm11, %v7319_v32, 1e+30  ;;  %v2393_v19 = vsel %vm1847_vm10, %v7254_v24, 1e+30  ;;  %vm1859_vm1 = vcmp.eq.f32.partialorder %v12336_v40, %v8436_v17 }
 0x31c   :  { %v2963_v57 = vmin.f32 %v2962_v25, %v2435_v52  ;;  %v2890_v15 = vmin.f32 %v2889_v51, %v2366_v30  ;;  %v2918_v31 = vmin.f32 %v2917_v48, %v2392_v18  ;;  %vm1860_vm6 = vcmp.eq.f32.partialorder %v12337_v14, %v8436_v17  ;;  %v12339_v18 = vld [vmem:[#allocation355_spill] sm:$0xff]  ;;  %v12340_v30 = vld [vmem:[#allocation332_spill] sm:$0xff]  ;;  %v12341_v48 = vld [vmem:[#allocation357_spill] sm:$0xff] }
 0x31d   :  { %v2369_v26 = vsel %vm1823_vm2, %v7321_v39, 1e+30  ;;  %v2394_v62 = vsel %vm1848_vm3, %v7269_v60, 1e+30  ;;  %vm1861_vm15 = vcmp.eq.f32.partialorder %v12338_v37, %v8436_v17  ;;  %v2370_v25 = vsel %vm1824_vm0, %v7324_v33, 1e+30 }
 0x31e   :  { %v2964_v52 = vmin.f32 %v2963_v57, %v2436_v23  ;;  %v2891_v29 = vmin.f32 %v2890_v15, %v2367_v12  ;;  %vm1849_vm14 = vcmp.eq.f32.partialorder %v12339_v18, %v8369_v28  ;;  %v2919_v23 = vmin.f32 %v2918_v31, %v2393_v19  ;;  %v12342_v15 = vld [vmem:[#allocation337_spill] sm:$0xff]  ;;  %v12345_v49 = vld [vmem:[#allocation340_spill] sm:$0xff]  ;;  %v12346_v18 = vld [vmem:[#allocation275_spill] sm:$0xff] }
 0x31f   :  { %v2371_v2 = vsel %vm1825_vm9, %v7332_v43, 1e+30  ;;  %vm1862_vm7 = vcmp.eq.f32.partialorder %v12340_v30, %v8436_v17  ;;  %v2405_v51 = vsel %vm1859_vm1, %v7177_v0, 1e+30  ;;  %v2406_v44 = vsel %vm1860_vm6, %v7180_v27, 1e+30 }
 0x320   :  { %2965 = vmin.xlane.f32.xlu1 %v2964_v52  ;;  %v2892_v16 = vmin.f32 %v2891_v29, %v2368_v7  ;;  %vm1850_vm5 = vcmp.eq.f32.partialorder %v12341_v48, %v8369_v28  ;;  %v2920_v57 = vmin.f32 %v2919_v23, %v2394_v62  ;;  %v2407_v12 = vsel %vm1861_vm15, %v7219_v58, 1e+30  ;;  %v12343_v7 = vld [vmem:[#allocation147_spill] sm:$0xff]  ;;  %v12344_v62 = vld [vmem:[#allocation270_spill] sm:$0xff] }
 0x321   :  { %v2372_v38 = vsel %vm1826_vm13, %v7334_v55, 1e+30  ;;  %v2395_v19 = vsel %vm1849_vm14, %v7297_v20, 1e+30  ;;  %vm1863_vm4 = vcmp.eq.f32.partialorder %v12342_v15, %v8436_v17  ;;  %v2933_v31 = vmin.f32 %v2405_v51, %v2406_v44  ;;  %v12347_v30 = vld [vmem:[#allocation150_spill] sm:$0xff]  ;;  %v12350_v15 = vld [vmem:[#allocation364_spill] sm:$0xff] }
 0x322   :  { %v2893_v40 = vmin.f32 %v2892_v16, %v2369_v26  ;;  %vm1851_vm8 = vcmp.eq.f32.partialorder %v12343_v7, %v8369_v28  ;;  %v2921_v14 = vmin.f32 %v2920_v57, %v2395_v19  ;;  %v2408_v52 = vsel %vm1862_vm7, %v7242_v22, 1e+30  ;;  %v12348_v51 = vld [vmem:[#allocation278_spill] sm:$0xff]  ;;  %v12349_v57 = vld [vmem:[#allocation279_spill] sm:$0xff]  ;;  %v8514_v19 = vpop.xlane.xlu0 %1380 }
 0x323   :  { %vm1852_vm11 = vcmp.eq.f32.partialorder %v12344_v62, %v8369_v28  ;;  %v2396_v37 = vsel %vm1850_vm5, %v7301_v9, 1e+30  ;;  %vm1864_vm2 = vcmp.eq.f32.partialorder %v12345_v49, %v8436_v17  ;;  %v2934_v34 = vmin.f32 %v2933_v31, %v2407_v12 }
 0x324   :  { %v2894_v29 = vmin.f32 %v2893_v40, %v2370_v25  ;;  %vm1853_vm12 = vcmp.eq.f32.partialorder %v12346_v18, %v8369_v28  ;;  %v2922_v26 = vmin.f32 %v2921_v14, %v2396_v37  ;;  %v2409_v23 = vsel %vm1863_vm4, %v7254_v24, 1e+30  ;;  %v12351_v40 = vld [vmem:[#allocation343_spill] sm:$0xff]  ;;  %v12352_v14 = vld [vmem:[#allocation365_spill] sm:$0xff] }
 0x325   :  { %vm1854_vm0 = vcmp.eq.f32.partialorder %v12347_v30, %v8369_v28  ;;  %vm1855_vm9 = vcmp.eq.f32.partialorder %v12348_v51, %v8369_v28  ;;  %v2397_v44 = vsel %vm1851_vm8, %v7303_v47, 1e+30  ;;  %v2935_v16 = vmin.f32 %v2934_v34, %v2408_v52 }
 0x326   :  { %v2895_v48 = vmin.f32 %v2894_v29, %v2371_v2  ;;  %vm1856_vm10 = vcmp.eq.f32.partialorder %v12349_v57, %v8369_v28  ;;  %v2923_v25 = vmin.f32 %v2922_v26, %v2397_v44  ;;  %v2410_v12 = vsel %vm1864_vm2, %v7269_v60, 1e+30  ;;  %v12354_v26 = vld [vmem:[#allocation373_spill] sm:$0xff]  ;;  %v12359_v57 = vld [vmem:[#allocation352_spill] sm:$0xff] }
 0x327   :  { %vm1857_vm13 = vcmp.eq.f32.partialorder %v12350_v15, %v8369_v28  ;;  %v2398_v31 = vsel %vm1852_vm11, %v7308_v53, 1e+30  ;;  %vm1865_vm3 = vcmp.eq.f32.partialorder %v12351_v40, %v8436_v17  ;;  %v2936_v2 = vmin.f32 %v2935_v16, %v2409_v23  ;;  %v12355_v23 = vld [vmem:[#allocation374_spill] sm:$0xff]  ;;  %v12356_v44 = vld [vmem:[#allocation349_spill] sm:$0xff] }
 0x328   :  { %v2896_v7 = vmin.f32 %v2895_v48, %v2372_v38  ;;  %vm1858_vm1 = vcmp.eq.f32.partialorder %v12352_v14, %v8369_v28  ;;  %v2399_v52 = vsel %vm1853_vm12, %v7311_v50, 1e+30  ;;  %v2924_v37 = vmin.f32 %v2923_v25, %v2398_v31  ;;  %v12353_v38 = vld [vmem:[#allocation346_spill] sm:$0xff]  ;;  %v12358_v31 = vld [vmem:[#allocation377_spill] sm:$0xff] }
 0x329   :  { %v2400_v62 = vsel %vm1854_vm0, %v7319_v32, 1e+30  ;;  %v2401_v49 = vsel %vm1855_vm9, %v7321_v39, 1e+30  ;;  %vm1866_vm6 = vcmp.eq.f32.partialorder %v12353_v38, %v8436_v17  ;;  %v2937_v34 = vmin.f32 %v2936_v2, %v2410_v12  ;;  %v12357_v25 = vld [vmem:[#allocation350_spill] sm:$0xff] }
 0x32a   :  { %2897 = vmin.xlane.f32.xlu0 %v2896_v7  ;;  %v2925_v29 = vmin.f32 %v2924_v37, %v2399_v52  ;;  %v2411_v18 = vsel %vm1865_vm3, %v7297_v20, 1e+30  ;;  %vm1891_vm15 = vcmp.eq.f32.partialorder %v12354_v26, %v8514_v19  ;;  %vm1892_vm14 = vcmp.eq.f32.partialorder %v12355_v23, %v8514_v19  ;;  %v12360_v52 = vld [vmem:[#allocation353_spill] sm:$0xff]  ;;  %v12362_v38 = vld [vmem:[#allocation354_spill] sm:$0xff] }
 0x32b   :  { %v2402_v30 = vsel %vm1856_vm10, %v7324_v33, 1e+30  ;;  %v2403_v51 = vsel %vm1857_vm13, %v7332_v43, 1e+30  ;;  %vm1867_vm7 = vcmp.eq.f32.partialorder %v12356_v44, %v8436_v17  ;;  %v2938_v16 = vmin.f32 %v2937_v34, %v2411_v18  ;;  %v12363_v34 = vld [vmem:[#allocation356_spill] sm:$0xff]  ;;  %v12364_v23 = vld [vmem:[#allocation385_spill] sm:$0xff] }
 0x32c   :  { %v2926_v48 = vmin.f32 %v2925_v29, %v2400_v62  ;;  %vm1868_vm5 = vcmp.eq.f32.partialorder %v12357_v25, %v8436_v17  ;;  %v2412_v12 = vsel %vm1866_vm6, %v7301_v9, 1e+30  ;;  %vm1893_vm4 = vcmp.eq.f32.partialorder %v12358_v31, %v8514_v19  ;;  %v12361_v62 = vld [vmem:[#allocation381_spill] sm:$0xff]  ;;  %v12367_v25 = vld [vmem:[#allocation390_spill] sm:$0xff] }
 0x32d   :  { %vm1869_vm8 = vcmp.eq.f32.partialorder %v12359_v57, %v8436_v17  ;;  %v2939_v40 = vmin.f32 %v2938_v16, %v2412_v12  ;;  %v2437_v15 = vsel %vm1891_vm15, %v7177_v0, 1e+30  ;;  %v2438_v2 = vsel %vm1892_vm14, %v7180_v27, 1e+30  ;;  %v12365_v16 = vld [vmem:[#allocation360_spill] sm:$0xff] }
 0x32e   :  { %v2927_v7 = vmin.f32 %v2926_v48, %v2401_v49  ;;  %vm1870_vm11 = vcmp.eq.f32.partialorder %v12360_v52, %v8436_v17  ;;  %v2413_v37 = vsel %vm1867_vm7, %v7303_v47, 1e+30  ;;  %vm1894_vm2 = vcmp.eq.f32.partialorder %v12361_v62, %v8514_v19  ;;  %v12366_v48 = vld [vmem:[#allocation361_spill] sm:$0xff] }
 0x32f   :  { %vm1871_vm12 = vcmp.eq.f32.partialorder %v12362_v38, %v8436_v17  ;;  %vm1872_vm0 = vcmp.eq.f32.partialorder %v12363_v34, %v8436_v17  ;;  %v2940_v29 = vmin.f32 %v2939_v40, %v2413_v37  ;;  %v2439_v18 = vsel %vm1893_vm4, %v7219_v58, 1e+30 }
 0x330   :  { %v2928_v26 = vmin.f32 %v2927_v7, %v2402_v30  ;;  %v2414_v49 = vsel %vm1868_vm5, %v7308_v53, 1e+30  ;;  %vm1895_vm9 = vcmp.eq.f32.partialorder %v12364_v23, %v8514_v19  ;;  %v2967_v44 = vmin.f32 %v2437_v15, %v2438_v2  ;;  %v8591_v15 = vpop.xlane.xlu2 %1414  ;;  %v12369_v23 = vld [vmem:[#allocation358_spill] sm:$0xff] }
 0x331   :  { %vm1873_vm10 = vcmp.eq.f32.partialorder %v12365_v16, %v8436_v17  ;;  %vm1874_vm13 = vcmp.eq.f32.partialorder %v12366_v48, %v8436_v17  ;;  %v2941_v12 = vmin.f32 %v2940_v29, %v2414_v49  ;;  %v2440_v31 = vsel %vm1894_vm2, %v7242_v22, 1e+30  ;;  %v12368_v49 = vld [vmem:[#allocation394_spill] sm:$0xff]  ;;  %v12373_v48 = vld [vmem:[#allocation399_spill] sm:$0xff] }
 0x332   :  { %v2929_v40 = vmin.f32 %v2928_v26, %v2403_v51  ;;  %v2415_v30 = vsel %vm1869_vm8, %v7311_v50, 1e+30  ;;  %vm1896_vm3 = vcmp.eq.f32.partialorder %v12367_v25, %v8514_v19  ;;  %v2968_v7 = vmin.f32 %v2967_v44, %v2439_v18  ;;  %v12370_v44 = vld [vmem:[#allocation359_spill] sm:$0xff]  ;;  %v12372_v17 = vld [vmem:[#allocation398_spill] sm:$0xff]  ;;  %v12376_v25 = vld [vmem:[#allocation149_spill] sm:$0xff] }
 0x333   :  { %v2404_v2 = vsel %vm1858_vm1, %v7334_v55, 1e+30  ;;  %v2416_v51 = vsel %vm1870_vm11, %v7319_v32, 1e+30  ;;  %v2942_v37 = vmin.f32 %v2941_v12, %v2415_v30  ;;  %v2441_v57 = vsel %vm1895_vm9, %v7254_v24, 1e+30 }
 0x334   :  { %v2930_v62 = vmin.f32 %v2929_v40, %v2404_v2  ;;  %v2417_v29 = vsel %vm1871_vm12, %v7321_v39, 1e+30  ;;  %v2418_v28 = vsel %vm1872_vm0, %v7324_v33, 1e+30  ;;  %v2969_v14 = vmin.f32 %v2968_v7, %v2440_v31  ;;  %v12371_v12 = vld [vmem:[#allocation154_spill] sm:$0xff]  ;;  %v12374_v31 = vld [vmem:[#allocation403_spill] sm:$0xff] }
 0x335   :  { %v2419_v52 = vsel %vm1873_vm10, %v7332_v43, 1e+30  ;;  %v2420_v18 = vsel %vm1874_vm13, %v7334_v55, 1e+30  ;;  %v2943_v26 = vmin.f32 %v2942_v37, %v2416_v51  ;;  %v2442_v38 = vsel %vm1896_vm3, %v7269_v60, 1e+30 }
 0x336   :  { %2931 = vmin.xlane.f32.xlu2 %v2930_v62  ;;  %vm1897_vm1 = vcmp.eq.f32.partialorder %v12368_v49, %v8514_v19  ;;  %v2970_v34 = vmin.f32 %v2969_v14, %v2441_v57  ;;  %vm1923_vm6 = vcmp.eq.f32.partialorder %v12369_v23, %v8591_v15  ;;  %vm1924_vm15 = vcmp.eq.f32.partialorder %v12370_v44, %v8591_v15  ;;  %v12375_v40 = vld [vmem:[#allocation406_spill] sm:$0xff]  ;;  %v12377_v57 = vld [vmem:[#allocation408_spill] sm:$0xff]  ;;  %v12379_v14 = vld [vmem:[#allocation363_spill] sm:$0xff] }
 0x337   :  { %v2944_v16 = vmin.f32 %v2943_v26, %v2417_v29  ;;  %vm1898_vm14 = vcmp.eq.f32.partialorder %v12371_v12, %v8514_v19  ;;  %vm1899_vm7 = vcmp.eq.f32.partialorder %v12372_v17, %v8514_v19  ;;  %vm1900_vm5 = vcmp.eq.f32.partialorder %v12373_v48, %v8514_v19  ;;  %v12378_v62 = vld [vmem:[#allocation412_spill] sm:$0xff]  ;;  %v12381_v23 = vld [vmem:[#allocation418_spill] sm:$0xff] }
 0x338   :  { %vm1901_vm4 = vcmp.eq.f32.partialorder %v12374_v31, %v8514_v19  ;;  %vm1902_vm8 = vcmp.eq.f32.partialorder %v12375_v40, %v8514_v19  ;;  %v2971_v30 = vmin.f32 %v2970_v34, %v2442_v38  ;;  %vm1925_vm11 = vcmp.eq.f32.partialorder %v12376_v25, %v8591_v15  ;;  %v12380_v38 = vld [vmem:[#allocation415_spill] sm:$0xff]  ;;  %v8653_v34 = vpop.xlane.xlu1 %1397 }
 0x339   :  { %v2945_v7 = vmin.f32 %v2944_v16, %v2418_v28  ;;  %v2443_v2 = vsel %vm1897_vm1, %v7297_v20, 1e+30  ;;  %v2469_v51 = vsel %vm1923_vm6, %v7177_v0, 1e+30  ;;  %v2470_v37 = vsel %vm1924_vm15, %v7180_v27, 1e+30 }
 0x33a   :  { %vm1903_vm2 = vcmp.eq.f32.partialorder %v12377_v57, %v8514_v19  ;;  %vm1904_vm12 = vcmp.eq.f32.partialorder %v12378_v62, %v8514_v19  ;;  %v2972_v29 = vmin.f32 %v2971_v30, %v2443_v2  ;;  %vm1926_vm0 = vcmp.eq.f32.partialorder %v12379_v14, %v8591_v15  ;;  %v12382_v16 = vld [vmem:[#allocation366_spill] sm:$0xff]  ;;  %v12385_v14 = vld [vmem:[#allocation299_spill] sm:$0xff] }
 0x33b   :  { %v2946_v26 = vmin.f32 %v2945_v7, %v2419_v52  ;;  %vm1905_vm9 = vcmp.eq.f32.partialorder %v12380_v38, %v8514_v19  ;;  %v2444_v28 = vsel %vm1898_vm14, %v7301_v9, 1e+30  ;;  %v2471_v49 = vsel %vm1925_vm11, %v7219_v58, 1e+30 }
 0x33c   :  { %vm1906_vm10 = vcmp.eq.f32.partialorder %v12381_v23, %v8514_v19  ;;  %v2973_v44 = vmin.f32 %v2972_v29, %v2444_v28  ;;  %vm1927_vm13 = vcmp.eq.f32.partialorder %v12382_v16, %v8591_v15  ;;  %v3001_v52 = vmin.f32 %v2469_v51, %v2470_v37  ;;  %v12384_v37 = vld [vmem:[#allocation298_spill] sm:$0xff]  ;;  %v12394_v19 = vld [vmem:[#allocation379_spill] sm:$0xff] }
 0x33d   :  { %v2947_v30 = vmin.f32 %v2946_v26, %v2420_v18  ;;  %v2445_v25 = vsel %vm1899_vm7, %v7303_v47, 1e+30  ;;  %v2446_v12 = vsel %vm1900_vm5, %v7308_v53, 1e+30  ;;  %v2472_v7 = vsel %vm1926_vm0, %v7242_v22, 1e+30 }
 0x33e   :  { %v2447_v2 = vsel %vm1901_vm4, %v7311_v50, 1e+30  ;;  %v2974_v29 = vmin.f32 %v2973_v44, %v2445_v25  ;;  %v12383_v18 = vld [vmem:[#allocation367_spill] sm:$0xff]  ;;  %v3002_v51 = vmin.f32 %v3001_v52, %v2471_v49  ;;  %v2448_v17 = vsel %vm1902_vm8, %v7319_v32, 1e+30  ;;  %v12386_v49 = vld [vmem:[#allocation300_spill] sm:$0xff] }
 0x33f   :  { %vm1928_vm3 = vcmp.eq.f32.partialorder %v12383_v18, %v8591_v15  ;;  %2948 = vmin.xlane.f32.xlu0 %v2947_v30  ;;  %v2473_v48 = vsel %vm1927_vm13, %v7254_v24, 1e+30  ;;  %vm1907_vm1 = vcmp.eq.f32.partialorder %v12384_v37, %v8653_v34  ;;  %vm1908_vm6 = vcmp.eq.f32.partialorder %v12385_v14, %v8653_v34  ;;  %v12387_v44 = vld [vmem:[#allocation368_spill] sm:$0xff]  ;;  %v12388_v52 = vld [vmem:[#allocation369_spill] sm:$0xff]  ;;  %v12390_v37 = vld [vmem:[#allocation370_spill] sm:$0xff] }
 0x340   :  { %v2449_v31 = vsel %vm1903_vm2, %v7321_v39, 1e+30  ;;  %v2975_v26 = vmin.f32 %v2974_v29, %v2446_v12  ;;  %v3003_v28 = vmin.f32 %v3002_v51, %v2472_v7  ;;  %vm1909_vm15 = vcmp.eq.f32.partialorder %v12386_v49, %v8653_v34  ;;  %v12389_v7 = vld [vmem:[#allocation371_spill] sm:$0xff]  ;;  %v12392_v49 = vld [vmem:[#allocation372_spill] sm:$0xff] }
 0x341   :  { %v2450_v40 = vsel %vm1904_vm12, %v7324_v33, 1e+30  ;;  %vm1929_vm14 = vcmp.eq.f32.partialorder %v12387_v44, %v8591_v15  ;;  %v2474_v16 = vsel %vm1928_vm3, %v7269_v60, 1e+30  ;;  %vm1910_vm7 = vcmp.eq.f32.partialorder %v12388_v52, %v8653_v34 }
 0x342   :  { %v2976_v57 = vmin.f32 %v2975_v26, %v2447_v2  ;;  %v3004_v30 = vmin.f32 %v3003_v28, %v2473_v48  ;;  %v2453_v25 = vsel %vm1907_vm1, %v7177_v0, 1e+30  ;;  %v2454_v12 = vsel %vm1908_vm6, %v7180_v27, 1e+30  ;;  %v12391_v26 = vld [vmem:[#allocation375_spill] sm:$0xff] }
 0x343   :  { %v2451_v62 = vsel %vm1905_vm9, %v7332_v43, 1e+30  ;;  %vm1911_vm5 = vcmp.eq.f32.partialorder %v12389_v7, %v8653_v34  ;;  %v2455_v29 = vsel %vm1909_vm15, %v7219_v58, 1e+30  ;;  %v2984_v18 = vmin.f32 %v2453_v25, %v2454_v12  ;;  %v12395_v25 = vld [vmem:[#allocation380_spill] sm:$0xff]  ;;  %v12396_v7 = vld [vmem:[#allocation383_spill] sm:$0xff] }
 0x344   :  { %v2977_v51 = vmin.f32 %v2976_v57, %v2448_v17  ;;  %vm1930_vm4 = vcmp.eq.f32.partialorder %v12390_v37, %v8591_v15  ;;  %v3005_v2 = vmin.f32 %v3004_v30, %v2474_v16  ;;  %v2456_v48 = vsel %vm1910_vm7, %v7242_v22, 1e+30  ;;  %v12393_v57 = vld [vmem:[#allocation376_spill] sm:$0xff] }
 0x345   :  { %v2452_v14 = vsel %vm1906_vm10, %v7334_v55, 1e+30  ;;  %v2475_v38 = vsel %vm1929_vm14, %v7297_v20, 1e+30  ;;  %vm1912_vm8 = vcmp.eq.f32.partialorder %v12391_v26, %v8653_v34  ;;  %v2985_v17 = vmin.f32 %v2984_v18, %v2455_v29  ;;  %v12397_v18 = vld [vmem:[#allocation378_spill] sm:$0xff]  ;;  %v12400_v26 = vld [vmem:[#allocation393_spill] sm:$0xff] }
 0x346   :  { %v2978_v28 = vmin.f32 %v2977_v51, %v2449_v31  ;;  %vm1931_vm11 = vcmp.eq.f32.partialorder %v12392_v49, %v8591_v15  ;;  %v3006_v16 = vmin.f32 %v3005_v2, %v2475_v38  ;;  %v2457_v52 = vsel %vm1911_vm5, %v7254_v24, 1e+30  ;;  %v12398_v2 = vld [vmem:[#allocation388_spill] sm:$0xff]  ;;  %v8740_v38 = vpop.xlane.xlu0 %1431 }
 0x347   :  { %vm1932_vm2 = vcmp.eq.f32.partialorder %v12393_v57, %v8591_v15  ;;  %vm1933_vm12 = vcmp.eq.f32.partialorder %v12394_v19, %v8591_v15  ;;  %v2476_v23 = vsel %vm1930_vm4, %v7301_v9, 1e+30  ;;  %v2986_v44 = vmin.f32 %v2985_v17, %v2456_v48 }
 0x348   :  { %v2979_v30 = vmin.f32 %v2978_v28, %v2450_v40  ;;  %vm1934_vm0 = vcmp.eq.f32.partialorder %v12395_v25, %v8591_v15  ;;  %v3007_v31 = vmin.f32 %v3006_v16, %v2476_v23  ;;  %v2458_v12 = vsel %vm1912_vm8, %v7269_v60, 1e+30  ;;  %v12399_v40 = vld [vmem:[#allocation389_spill] sm:$0xff]  ;;  %v12401_v28 = vld [vmem:[#allocation382_spill] sm:$0xff] }
 0x349   :  { %vm1935_vm9 = vcmp.eq.f32.partialorder %v12396_v7, %v8591_v15  ;;  %v2477_v29 = vsel %vm1931_vm11, %v7303_v47, 1e+30  ;;  %vm1913_vm10 = vcmp.eq.f32.partialorder %v12397_v18, %v8653_v34  ;;  %v2987_v51 = vmin.f32 %v2986_v44, %v2457_v52  ;;  %v12405_v18 = vld [vmem:[#allocation391_spill] sm:$0xff] }
 0x34a   :  { %v2980_v37 = vmin.f32 %v2979_v30, %v2451_v62  ;;  %vm1936_vm13 = vcmp.eq.f32.partialorder %v12398_v2, %v8591_v15  ;;  %vm1937_vm3 = vcmp.eq.f32.partialorder %v12399_v40, %v8591_v15  ;;  %v3008_v48 = vmin.f32 %v3007_v31, %v2477_v29  ;;  %v12404_v29 = vld [vmem:[#allocation101_spill] sm:$0xff]  ;;  %v12406_v2 = vld [vmem:[#allocation103_spill] sm:$0xff] }
 0x34b   :  { %vm1938_vm1 = vcmp.eq.f32.partialorder %v12400_v26, %v8591_v15  ;;  %v2478_v17 = vsel %vm1932_vm2, %v7308_v53, 1e+30  ;;  %vm1914_vm6 = vcmp.eq.f32.partialorder %v12401_v28, %v8653_v34  ;;  %v2988_v62 = vmin.f32 %v2987_v51, %v2458_v12  ;;  %v12403_v12 = vld [vmem:[#allocation100_spill] sm:$0xff]  ;;  %v12407_v28 = vld [vmem:[#allocation395_spill] sm:$0xff] }
 0x34c   :  { %v2981_v49 = vmin.f32 %v2980_v37, %v2452_v14  ;;  %v2479_v16 = vsel %vm1933_vm12, %v7311_v50, 1e+30  ;;  %v3009_v52 = vmin.f32 %v3008_v48, %v2478_v17  ;;  %v2459_v23 = vsel %vm1913_vm10, %v7297_v20, 1e+30  ;;  %v12402_v14 = vld [vmem:[#allocation384_spill] sm:$0xff]  ;;  %v12409_v26 = vld [vmem:[#allocation107_spill] sm:$0xff] }
 0x34d   :  { %v2480_v44 = vsel %vm1934_vm0, %v7319_v32, 1e+30  ;;  %v2481_v57 = vsel %vm1935_vm9, %v7321_v39, 1e+30  ;;  %vm1915_vm15 = vcmp.eq.f32.partialorder %v12402_v14, %v8653_v34  ;;  %v2989_v30 = vmin.f32 %v2988_v62, %v2459_v23  ;;  %v12410_v23 = vld [vmem:[#allocation334_spill] sm:$0xff] }
 0x34e   :  { %2982 = vmin.xlane.f32.xlu2 %v2981_v49  ;;  %v3010_v19 = vmin.f32 %v3009_v52, %v2479_v16  ;;  %v2460_v31 = vsel %vm1914_vm6, %v7301_v9, 1e+30  ;;  %vm1939_vm14 = vcmp.eq.f32.partialorder %v12403_v12, %v8740_v38  ;;  %vm1940_vm7 = vcmp.eq.f32.partialorder %v12404_v29, %v8740_v38  ;;  %v12408_v52 = vld [vmem:[#allocation330_spill] sm:$0xff] }
 0x34f   :  { %v2482_v25 = vsel %vm1936_vm13, %v7324_v33, 1e+30  ;;  %v2483_v7 = vsel %vm1937_vm3, %v7332_v43, 1e+30  ;;  %vm1916_vm5 = vcmp.eq.f32.partialorder %v12405_v18, %v8653_v34  ;;  %v2990_v51 = vmin.f32 %v2989_v30, %v2460_v31  ;;  %v12412_v31 = vld [vmem:[#allocation111_spill] sm:$0xff]  ;;  %v12413_v29 = vld [vmem:[#allocation338_spill] sm:$0xff] }
 0x350   :  { %v2484_v37 = vsel %vm1938_vm1, %v7334_v55, 1e+30  ;;  %v3011_v48 = vmin.f32 %v3010_v19, %v2480_v44  ;;  %v2461_v17 = vsel %vm1915_vm15, %v7303_v47, 1e+30  ;;  %vm1941_vm4 = vcmp.eq.f32.partialorder %v12406_v2, %v8740_v38  ;;  %v12411_v44 = vld [vmem:[#allocation335_spill] sm:$0xff]  ;;  %v12414_v18 = vld [vmem:[#allocation341_spill] sm:$0xff] }
 0x351   :  { %vm1917_vm8 = vcmp.eq.f32.partialorder %v12407_v28, %v8653_v34  ;;  %v2991_v40 = vmin.f32 %v2990_v51, %v2461_v17  ;;  %v2485_v62 = vsel %vm1939_vm14, %v7177_v0, 1e+30  ;;  %v2486_v49 = vsel %vm1940_vm7, %v7180_v27, 1e+30  ;;  %v8809_v17 = vpop.xlane.xlu1 %1448  ;;  %v12415_v28 = vld [vmem:[#allocation423_spill] sm:$0xff] }
 0x352   :  { %v3012_v16 = vmin.f32 %v3011_v48, %v2481_v57  ;;  %vm1918_vm11 = vcmp.eq.f32.partialorder %v12408_v52, %v8653_v34  ;;  %v2462_v15 = vsel %vm1916_vm5, %v7308_v53, 1e+30  ;;  %vm1942_vm2 = vcmp.eq.f32.partialorder %v12409_v26, %v8740_v38 }
 0x353   :  { %vm1919_vm12 = vcmp.eq.f32.partialorder %v12410_v23, %v8653_v34  ;;  %vm1920_vm0 = vcmp.eq.f32.partialorder %v12411_v44, %v8653_v34  ;;  %v2992_v14 = vmin.f32 %v2991_v40, %v2462_v15  ;;  %v2487_v30 = vsel %vm1941_vm4, %v7219_v58, 1e+30  ;;  %v12416_v23 = vld [vmem:[#allocation400_spill] sm:$0xff]  ;;  %v12420_v44 = vld [vmem:[#allocation126_spill] sm:$0xff] }
 0x354   :  { %v3013_v19 = vmin.f32 %v3012_v16, %v2482_v25  ;;  %v2463_v57 = vsel %vm1917_vm8, %v7311_v50, 1e+30  ;;  %vm1943_vm9 = vcmp.eq.f32.partialorder %v12412_v31, %v8740_v38  ;;  %v3018_v12 = vmin.f32 %v2485_v62, %v2486_v49 }
 0x355   :  { %vm1921_vm10 = vcmp.eq.f32.partialorder %v12413_v29, %v8653_v34  ;;  %vm1922_vm13 = vcmp.eq.f32.partialorder %v12414_v18, %v8653_v34  ;;  %v2993_v51 = vmin.f32 %v2992_v14, %v2463_v57  ;;  %v2488_v48 = vsel %vm1942_vm2, %v7242_v22, 1e+30  ;;  %v12417_v57 = vld [vmem:[#allocation401_spill] sm:$0xff]  ;;  %v12418_v34 = vld [vmem:[#allocation122_spill] sm:$0xff]  ;;  %v12421_v29 = vld [vmem:[#allocation15_spill] sm:$0xff] }
 0x356   :  { %v3014_v2 = vmin.f32 %v3013_v19, %v2483_v7  ;;  %v2464_v25 = vsel %vm1918_vm11, %v7319_v32, 1e+30  ;;  %vm1944_vm3 = vcmp.eq.f32.partialorder %v12415_v28, %v8740_v38  ;;  %v3019_v40 = vmin.f32 %v3018_v12, %v2487_v30  ;;  %v12422_v18 = vld [vmem:[#allocation16_spill] sm:$0xff] }
 0x357   :  { %v2465_v62 = vsel %vm1919_vm12, %v7321_v39, 1e+30  ;;  %v2466_v49 = vsel %vm1920_vm0, %v7324_v33, 1e+30  ;;  %v2994_v7 = vmin.f32 %v2993_v51, %v2464_v25  ;;  %v2489_v16 = vsel %vm1943_vm9, %v7254_v24, 1e+30 }
 0x358   :  { %v3015_v15 = vmin.f32 %v3014_v2, %v2484_v37  ;;  %v2467_v52 = vsel %vm1921_vm10, %v7332_v43, 1e+30  ;;  %v2468_v26 = vsel %vm1922_vm13, %v7334_v55, 1e+30  ;;  %v3020_v14 = vmin.f32 %v3019_v40, %v2488_v48  ;;  %v12419_v37 = vld [vmem:[#allocation11_spill] sm:$0xff]  ;;  %v12423_v51 = vld [vmem:[#allocation404_spill] sm:$0xff] }
 0x359   :  { %v2995_v30 = vmin.f32 %v2994_v7, %v2465_v62  ;;  %v2490_v19 = vsel %vm1944_vm3, %v7269_v60, 1e+30  ;;  %vm1955_vm1 = vcmp.eq.f32.partialorder %v12416_v23, %v8809_v17  ;;  %vm1956_vm6 = vcmp.eq.f32.partialorder %v12417_v57, %v8809_v17  ;;  %v12424_v48 = vld [vmem:[#allocation18_spill] sm:$0xff]  ;;  %v12425_v62 = vld [vmem:[#allocation19_spill] sm:$0xff] }
 0x35a   :  { %3016 = vmin.xlane.f32.xlu0 %v3015_v15  ;;  %vm1945_vm15 = vcmp.eq.f32.partialorder %v12418_v34, %v8740_v38  ;;  %vm1946_vm14 = vcmp.eq.f32.partialorder %v12419_v37, %v8740_v38  ;;  %vm1947_vm7 = vcmp.eq.f32.partialorder %v12420_v44, %v8740_v38  ;;  %v3021_v31 = vmin.f32 %v3020_v14, %v2489_v16  ;;  %v12426_v7 = vld [vmem:[#allocation407_spill] sm:$0xff]  ;;  %v12427_v16 = vld [vmem:[#allocation440_spill] sm:$0xff]  ;;  %v12428_v15 = vld [vmem:[#allocation26_spill] sm:$0xff] }
 0x35b   :  { %v2996_v12 = vmin.f32 %v2995_v30, %v2466_v49  ;;  %vm1948_vm5 = vcmp.eq.f32.partialorder %v12421_v29, %v8740_v38  ;;  %vm1949_vm4 = vcmp.eq.f32.partialorder %v12422_v18, %v8740_v38  ;;  %vm1957_vm8 = vcmp.eq.f32.partialorder %v12423_v51, %v8809_v17  ;;  %v12429_v23 = vld [vmem:[#allocation411_spill] sm:$0xff]  ;;  %v12430_v34 = vld [vmem:[#allocation133_spill] sm:$0xff]  ;;  %v8872_v51 = vpop.xlane.xlu1 %1499 }
 0x35c   :  { %vm1950_vm11 = vcmp.eq.f32.partialorder %v12424_v48, %v8740_v38  ;;  %v3022_v2 = vmin.f32 %v3021_v31, %v2490_v19  ;;  %v2501_v25 = vsel %vm1955_vm1, %v7177_v0, 1e+30  ;;  %v2502_v28 = vsel %vm1956_vm6, %v7180_v27, 1e+30 }
 0x35d   :  { %v2997_v40 = vmin.f32 %v2996_v12, %v2467_v52  ;;  %vm1951_vm2 = vcmp.eq.f32.partialorder %v12425_v62, %v8740_v38  ;;  %v2491_v49 = vsel %vm1945_vm15, %v7297_v20, 1e+30  ;;  %vm1958_vm12 = vcmp.eq.f32.partialorder %v12426_v7, %v8809_v17 }
 0x35e   :  { %vm1952_vm0 = vcmp.eq.f32.partialorder %v12427_v16, %v8740_v38  ;;  %vm1953_vm9 = vcmp.eq.f32.partialorder %v12428_v15, %v8740_v38  ;;  %v3023_v14 = vmin.f32 %v3022_v2, %v2491_v49  ;;  %v2503_v30 = vsel %vm1957_vm8, %v7219_v58, 1e+30  ;;  %v12433_v16 = vld [vmem:[#allocation439_spill] sm:$0xff] }
 0x35f   :  { %v2998_v19 = vmin.f32 %v2997_v40, %v2468_v26  ;;  %v2492_v52 = vsel %vm1946_vm14, %v7301_v9, 1e+30  ;;  %vm1959_vm10 = vcmp.eq.f32.partialorder %v12429_v23, %v8809_v17  ;;  %v3035_v57 = vmin.f32 %v2501_v25, %v2502_v28  ;;  %v12431_v25 = vld [vmem:[#allocation413_spill] sm:$0xff]  ;;  %v12435_v15 = vld [vmem:[#allocation419_spill] sm:$0xff] }
 0x360   :  { %vm1954_vm13 = vcmp.eq.f32.partialorder %v12430_v34, %v8740_v38  ;;  %v2493_v31 = vsel %vm1947_vm7, %v7303_v47, 1e+30  ;;  %v3024_v12 = vmin.f32 %v3023_v14, %v2492_v52  ;;  %v2504_v26 = vsel %vm1958_vm12, %v7242_v22, 1e+30  ;;  %v12434_v52 = vld [vmem:[#allocation416_spill] sm:$0xff]  ;;  %v12436_v23 = vld [vmem:[#allocation421_spill] sm:$0xff] }
 0x361   :  { %2999 = vmin.xlane.f32.xlu2 %v2998_v19  ;;  %v2494_v37 = vsel %vm1948_vm5, %v7308_v53, 1e+30  ;;  %v2495_v2 = vsel %vm1949_vm4, %v7311_v50, 1e+30  ;;  %vm1960_vm3 = vcmp.eq.f32.partialorder %v12431_v25, %v8809_v17  ;;  %v3036_v44 = vmin.f32 %v3035_v57, %v2503_v30  ;;  %v12432_v19 = vld [vmem:[#allocation438_spill] sm:$0xff]  ;;  %v12437_v34 = vld [vmem:[#allocation425_spill] sm:$0xff] }
 0x362   :  { %v2496_v28 = vsel %vm1950_vm11, %v7319_v32, 1e+30  ;;  %v2497_v29 = vsel %vm1951_vm2, %v7321_v39, 1e+30  ;;  %v3025_v40 = vmin.f32 %v3024_v12, %v2493_v31  ;;  %v2505_v49 = vsel %vm1959_vm10, %v7254_v24, 1e+30 }
 0x363   :  { %v2498_v18 = vsel %vm1952_vm0, %v7324_v33, 1e+30  ;;  %v2499_v7 = vsel %vm1953_vm9, %v7332_v43, 1e+30  ;;  %v2500_v48 = vsel %vm1954_vm13, %v7334_v55, 1e+30  ;;  %v3037_v62 = vmin.f32 %v3036_v44, %v2504_v26 }
 0x364   :  { %v3026_v14 = vmin.f32 %v3025_v40, %v2494_v37  ;;  %v2506_v30 = vsel %vm1960_vm3, %v7269_v60, 1e+30  ;;  %vm2003_vm1 = vcmp.eq.f32.partialorder %v12432_v19, %v8872_v51  ;;  %vm2004_vm6 = vcmp.eq.f32.partialorder %v12433_v16, %v8872_v51  ;;  %v12438_v31 = vld [vmem:[#allocation426_spill] sm:$0xff]  ;;  %v12440_v26 = vld [vmem:[#allocation428_spill] sm:$0xff] }
 0x365   :  { %vm1961_vm15 = vcmp.eq.f32.partialorder %v12434_v52, %v8809_v17  ;;  %vm1962_vm14 = vcmp.eq.f32.partialorder %v12435_v15, %v8809_v17  ;;  %vm1963_vm7 = vcmp.eq.f32.partialorder %v12436_v23, %v8809_v17  ;;  %v3038_v38 = vmin.f32 %v3037_v62, %v2505_v49  ;;  %v12439_v12 = vld [vmem:[#allocation442_spill] sm:$0xff]  ;;  %v12442_v62 = vld [vmem:[#allocation444_spill] sm:$0xff] }
 0x366   :  { %v3027_v57 = vmin.f32 %v3026_v14, %v2495_v2  ;;  %vm1964_vm5 = vcmp.eq.f32.partialorder %v12437_v34, %v8809_v17  ;;  %vm1965_vm4 = vcmp.eq.f32.partialorder %v12438_v31, %v8809_v17  ;;  %vm2005_vm8 = vcmp.eq.f32.partialorder %v12439_v12, %v8872_v51  ;;  %v12441_v2 = vld [vmem:[#allocation431_spill] sm:$0xff]  ;;  %v12443_v14 = vld [vmem:[#allocation433_spill] sm:$0xff]  ;;  %v12444_v19 = vld [vmem:[#allocation434_spill] sm:$0xff] }
 0x367   :  { %vm1966_vm11 = vcmp.eq.f32.partialorder %v12440_v26, %v8809_v17  ;;  %v3039_v37 = vmin.f32 %v3038_v38, %v2506_v30  ;;  %v2549_v25 = vsel %vm2003_vm1, %v7177_v0, 1e+30  ;;  %v2550_v44 = vsel %vm2004_vm6, %v7180_v27, 1e+30  ;;  %v12445_v38 = vld [vmem:[#allocation446_spill] sm:$0xff]  ;;  %v12446_v12 = vld [vmem:[#allocation436_spill] sm:$0xff] }
 0x368   :  { %v3028_v40 = vmin.f32 %v3027_v57, %v2496_v28  ;;  %vm1967_vm2 = vcmp.eq.f32.partialorder %v12441_v2, %v8809_v17  ;;  %v2507_v49 = vsel %vm1961_vm15, %v7297_v20, 1e+30  ;;  %vm2006_vm12 = vcmp.eq.f32.partialorder %v12442_v62, %v8872_v51  ;;  %v12447_v62 = vld [vmem:[#allocation448_spill] sm:$0xff] }
 0x369   :  { %vm1968_vm0 = vcmp.eq.f32.partialorder %v12443_v14, %v8809_v17  ;;  %vm1969_vm9 = vcmp.eq.f32.partialorder %v12444_v19, %v8809_v17  ;;  %v3040_v30 = vmin.f32 %v3039_v37, %v2507_v49  ;;  %v2551_v16 = vsel %vm2005_vm8, %v7219_v58, 1e+30  ;;  %v12450_v14 = vld [vmem:[#allocation13_spill] sm:$0xff] }
 0x36a   :  { %v3029_v52 = vmin.f32 %v3028_v40, %v2497_v29  ;;  %v2508_v28 = vsel %vm1962_vm14, %v7301_v9, 1e+30  ;;  %vm2007_vm10 = vcmp.eq.f32.partialorder %v12445_v38, %v8872_v51  ;;  %v3086_v57 = vmin.f32 %v2549_v25, %v2550_v44  ;;  %v8955_v44 = vpop.xlane.xlu0 %1482 }
 0x36b   :  { %vm1970_vm13 = vcmp.eq.f32.partialorder %v12446_v12, %v8809_v17  ;;  %v2509_v37 = vsel %vm1963_vm7, %v7303_v47, 1e+30  ;;  %v3041_v49 = vmin.f32 %v3040_v30, %v2508_v28  ;;  %v2552_v29 = vsel %vm2006_vm12, %v7242_v22, 1e+30 }
 0x36c   :  { %v3030_v40 = vmin.f32 %v3029_v52, %v2498_v18  ;;  %v2510_v15 = vsel %vm1964_vm5, %v7308_v53, 1e+30  ;;  %vm2008_vm3 = vcmp.eq.f32.partialorder %v12447_v62, %v8872_v51  ;;  %v3087_v25 = vmin.f32 %v3086_v57, %v2551_v16  ;;  %v12448_v57 = vld [vmem:[#allocation450_spill] sm:$0xff] }
 0x36d   :  { %v2511_v23 = vsel %vm1965_vm4, %v7311_v50, 1e+30  ;;  %v2512_v18 = vsel %vm1966_vm11, %v7319_v32, 1e+30  ;;  %v3042_v30 = vmin.f32 %v3041_v49, %v2509_v37  ;;  %v2553_v34 = vsel %vm2007_vm10, %v7254_v24, 1e+30 }
 0x36e   :  { %v3031_v52 = vmin.f32 %v3030_v40, %v2499_v7  ;;  %v2513_v16 = vsel %vm1967_vm2, %v7321_v39, 1e+30  ;;  %v2514_v31 = vsel %vm1968_vm0, %v7324_v33, 1e+30  ;;  %v3088_v28 = vmin.f32 %v3087_v25, %v2552_v29  ;;  %v12449_v49 = vld [vmem:[#allocation12_spill] sm:$0xff]  ;;  %v12454_v62 = vld [vmem:[#allocation462_spill] sm:$0xff] }
 0x36f   :  { %v2515_v26 = vsel %vm1969_vm9, %v7332_v43, 1e+30  ;;  %v3043_v38 = vmin.f32 %v3042_v30, %v2510_v15  ;;  %vm2009_vm1 = vcmp.eq.f32.partialorder %v12448_v57, %v8872_v51  ;;  %v2554_v7 = vsel %vm2008_vm3, %v7269_v60, 1e+30  ;;  %v12451_v40 = vld [vmem:[#allocation452_spill] sm:$0xff]  ;;  %v12452_v15 = vld [vmem:[#allocation454_spill] sm:$0xff] }
 0x370   :  { %v3032_v37 = vmin.f32 %v3031_v52, %v2500_v48  ;;  %v3089_v2 = vmin.f32 %v3088_v28, %v2553_v34  ;;  %vm1987_vm6 = vcmp.eq.f32.partialorder %v12449_v49, %v8955_v44  ;;  %vm1988_vm15 = vcmp.eq.f32.partialorder %v12450_v14, %v8955_v44  ;;  %v12453_v48 = vld [vmem:[#allocation459_spill] sm:$0xff]  ;;  %v12455_v30 = vld [vmem:[#allocation14_spill] sm:$0xff]  ;;  %v12456_v52 = vld [vmem:[#allocation465_spill] sm:$0xff] }
 0x371   :  { %v2516_v19 = vsel %vm1970_vm13, %v7334_v55, 1e+30  ;;  %v3044_v29 = vmin.f32 %v3043_v38, %v2511_v23  ;;  %vm2010_vm14 = vcmp.eq.f32.partialorder %v12451_v40, %v8872_v51  ;;  %vm2011_vm7 = vcmp.eq.f32.partialorder %v12452_v15, %v8872_v51  ;;  %v12457_v28 = vld [vmem:[#allocation466_spill] sm:$0xff] }
 0x372   :  { %3033 = vmin.xlane.f32.xlu1 %v3032_v37  ;;  %vm2012_vm5 = vcmp.eq.f32.partialorder %v12453_v48, %v8872_v51  ;;  %vm2013_vm4 = vcmp.eq.f32.partialorder %v12454_v62, %v8872_v51  ;;  %v3090_v25 = vmin.f32 %v3089_v2, %v2554_v7  ;;  %vm1989_vm8 = vcmp.eq.f32.partialorder %v12455_v30, %v8955_v44  ;;  %v12458_v7 = vld [vmem:[#allocation20_spill] sm:$0xff]  ;;  %v12459_v37 = vld [vmem:[#allocation467_spill] sm:$0xff]  ;;  %v12460_v49 = vld [vmem:[#allocation470_spill] sm:$0xff]  ;;  %v9022_v30 = vpop.xlane.xlu2 %1465 }
 0x373   :  { %v3045_v17 = vmin.f32 %v3044_v29, %v2512_v18  ;;  %v2555_v12 = vsel %vm2009_vm1, %v7297_v20, 1e+30  ;;  %v2533_v23 = vsel %vm1987_vm6, %v7177_v0, 1e+30  ;;  %v2534_v34 = vsel %vm1988_vm15, %v7180_v27, 1e+30 }
 0x374   :  { %vm2014_vm11 = vcmp.eq.f32.partialorder %v12456_v52, %v8872_v51  ;;  %vm2015_vm2 = vcmp.eq.f32.partialorder %v12457_v28, %v8872_v51  ;;  %v3091_v38 = vmin.f32 %v3090_v25, %v2555_v12  ;;  %vm1990_vm12 = vcmp.eq.f32.partialorder %v12458_v7, %v8955_v44  ;;  %v12461_v29 = vld [vmem:[#allocation27_spill] sm:$0xff]  ;;  %v12466_v52 = vld [vmem:[#allocation392_spill] sm:$0xff] }
 0x375   :  { %v3046_v18 = vmin.f32 %v3045_v17, %v2513_v16  ;;  %vm2016_vm0 = vcmp.eq.f32.partialorder %v12459_v37, %v8872_v51  ;;  %v2556_v57 = vsel %vm2010_vm14, %v7301_v9, 1e+30  ;;  %v2535_v2 = vsel %vm1989_vm8, %v7219_v58, 1e+30  ;;  %v12462_v17 = vld [vmem:[#allocation471_spill] sm:$0xff] }
 0x376   :  { %vm2017_vm9 = vcmp.eq.f32.partialorder %v12460_v49, %v8872_v51  ;;  %v3092_v14 = vmin.f32 %v3091_v38, %v2556_v57  ;;  %vm1991_vm10 = vcmp.eq.f32.partialorder %v12461_v29, %v8955_v44  ;;  %v3069_v25 = vmin.f32 %v2533_v23, %v2534_v34  ;;  %v12463_v23 = vld [vmem:[#allocation28_spill] sm:$0xff] }
 0x377   :  { %v3047_v16 = vmin.f32 %v3046_v18, %v2514_v31  ;;  %vm2018_vm13 = vcmp.eq.f32.partialorder %v12462_v17, %v8872_v51  ;;  %v2557_v40 = vsel %vm2011_vm7, %v7303_v47, 1e+30  ;;  %v2536_v12 = vsel %vm1990_vm12, %v7242_v22, 1e+30  ;;  %v12473_v51 = vld [vmem:[#allocation362_spill] sm:$0xff] }
 0x378   :  { %v2558_v38 = vsel %vm2012_vm5, %v7308_v53, 1e+30  ;;  %v3093_v7 = vmin.f32 %v3092_v14, %v2557_v40  ;;  %vm1992_vm3 = vcmp.eq.f32.partialorder %v12463_v23, %v8955_v44  ;;  %v3070_v31 = vmin.f32 %v3069_v25, %v2535_v2  ;;  %v12464_v14 = vld [vmem:[#allocation386_spill] sm:$0xff]  ;;  %v12465_v2 = vld [vmem:[#allocation387_spill] sm:$0xff] }
 0x379   :  { %v3048_v34 = vmin.f32 %v3047_v16, %v2515_v26  ;;  %v2559_v18 = vsel %vm2013_vm4, %v7311_v50, 1e+30  ;;  %v2560_v15 = vsel %vm2014_vm11, %v7319_v32, 1e+30  ;;  %v2537_v57 = vsel %vm1991_vm10, %v7254_v24, 1e+30 }
 0x37a   :  { %v3094_v48 = vmin.f32 %v3093_v7, %v2558_v38  ;;  %v3071_v29 = vmin.f32 %v3070_v31, %v2536_v12  ;;  %vm1971_vm1 = vcmp.eq.f32.partialorder %v12464_v14, %v9022_v30  ;;  %vm1972_vm6 = vcmp.eq.f32.partialorder %v12465_v2, %v9022_v30  ;;  %v12467_v12 = vld [vmem:[#allocation31_spill] sm:$0xff]  ;;  %v12468_v38 = vld [vmem:[#allocation396_spill] sm:$0xff] }
 0x37b   :  { %v3049_v26 = vmin.f32 %v3048_v34, %v2516_v19  ;;  %v2561_v62 = vsel %vm2015_vm2, %v7321_v39, 1e+30  ;;  %v2538_v25 = vsel %vm1992_vm3, %v7269_v60, 1e+30  ;;  %vm1973_vm15 = vcmp.eq.f32.partialorder %v12466_v52, %v9022_v30  ;;  %v12469_v31 = vld [vmem:[#allocation32_spill] sm:$0xff] }
 0x37c   :  { %v2562_v16 = vsel %vm2016_vm0, %v7324_v33, 1e+30  ;;  %v3095_v40 = vmin.f32 %v3094_v48, %v2559_v18  ;;  %vm1993_vm14 = vcmp.eq.f32.partialorder %v12467_v12, %v8955_v44  ;;  %v3072_v19 = vmin.f32 %v3071_v29, %v2537_v57  ;;  %v12470_v48 = vld [vmem:[#allocation397_spill] sm:$0xff]  ;;  %v12474_v12 = vld [vmem:[#allocation35_spill] sm:$0xff] }
 0x37d   :  { %3050 = vmin.xlane.f32.xlu0 %v3049_v26  ;;  %v2563_v28 = vsel %vm2017_vm9, %v7332_v43, 1e+30  ;;  %vm1974_vm7 = vcmp.eq.f32.partialorder %v12468_v38, %v9022_v30  ;;  %v2517_v7 = vsel %vm1971_vm1, %v7177_v0, 1e+30  ;;  %v2518_v23 = vsel %vm1972_vm6, %v7180_v27, 1e+30 }
 0x37e   :  { %v3096_v37 = vmin.f32 %v3095_v40, %v2560_v15  ;;  %vm1994_vm5 = vcmp.eq.f32.partialorder %v12469_v31, %v8955_v44  ;;  %v3073_v34 = vmin.f32 %v3072_v19, %v2538_v25  ;;  %v2519_v18 = vsel %vm1973_vm15, %v7219_v58, 1e+30  ;;  %v12471_v15 = vld [vmem:[#allocation33_spill] sm:$0xff]  ;;  %v12472_v25 = vld [vmem:[#allocation34_spill] sm:$0xff] }
 0x37f   :  { %v2564_v49 = vsel %vm2018_vm13, %v7334_v55, 1e+30  ;;  %v2539_v57 = vsel %vm1993_vm14, %v7297_v20, 1e+30  ;;  %vm1975_vm4 = vcmp.eq.f32.partialorder %v12470_v48, %v9022_v30  ;;  %v3052_v29 = vmin.f32 %v2517_v7, %v2518_v23  ;;  %v12475_v38 = vld [vmem:[#allocation38_spill] sm:$0xff] }
 0x380   :  { %v3097_v14 = vmin.f32 %v3096_v37, %v2561_v62  ;;  %vm1995_vm8 = vcmp.eq.f32.partialorder %v12471_v15, %v8955_v44  ;;  %v3074_v2 = vmin.f32 %v3073_v34, %v2539_v57  ;;  %v2520_v26 = vsel %vm1974_vm7, %v7242_v22, 1e+30  ;;  %v12476_v23 = vld [vmem:[#allocation402_spill] sm:$0xff]  ;;  %v12477_v34 = vld [vmem:[#allocation39_spill] sm:$0xff]  ;;  %v9100_v57 = vpop.xlane.xlu2 %1516  ;;  %v12479_v15 = vld [vmem:[#allocation41_spill] sm:$0xff] }
 0x381   :  { %vm1996_vm11 = vcmp.eq.f32.partialorder %v12472_v25, %v8955_v44  ;;  %v2540_v52 = vsel %vm1994_vm5, %v7301_v9, 1e+30  ;;  %vm1976_vm2 = vcmp.eq.f32.partialorder %v12473_v51, %v9022_v30  ;;  %v3053_v17 = vmin.f32 %v3052_v29, %v2519_v18  ;;  %v12478_v29 = vld [vmem:[#allocation405_spill] sm:$0xff] }
 0x382   :  { %v3098_v40 = vmin.f32 %v3097_v14, %v2562_v16  ;;  %vm1997_vm12 = vcmp.eq.f32.partialorder %v12474_v12, %v8955_v44  ;;  %v3075_v62 = vmin.f32 %v3074_v2, %v2540_v52  ;;  %v2521_v19 = vsel %vm1975_vm4, %v7254_v24, 1e+30  ;;  %v12480_v52 = vld [vmem:[#allocation409_spill] sm:$0xff] }
 0x383   :  { %vm1998_vm0 = vcmp.eq.f32.partialorder %v12475_v38, %v8955_v44  ;;  %v2541_v7 = vsel %vm1995_vm8, %v7303_v47, 1e+30  ;;  %vm1977_vm9 = vcmp.eq.f32.partialorder %v12476_v23, %v9022_v30  ;;  %v3054_v37 = vmin.f32 %v3053_v17, %v2520_v26  ;;  %v12484_v38 = vld [vmem:[#allocation432_spill] sm:$0xff] }
 0x384   :  { %v3099_v31 = vmin.f32 %v3098_v40, %v2563_v28  ;;  %vm1999_vm10 = vcmp.eq.f32.partialorder %v12477_v34, %v8955_v44  ;;  %v3076_v16 = vmin.f32 %v3075_v62, %v2541_v7  ;;  %v2522_v18 = vsel %vm1976_vm2, %v7269_v60, 1e+30  ;;  %v12481_v40 = vld [vmem:[#allocation429_spill] sm:$0xff]  ;;  %v12482_v62 = vld [vmem:[#allocation430_spill] sm:$0xff] }
 0x385   :  { %vm2000_vm13 = vcmp.eq.f32.partialorder %v6772_v63, %v8955_v44  ;;  %v2542_v48 = vsel %vm1996_vm11, %v7308_v53, 1e+30  ;;  %vm1978_vm3 = vcmp.eq.f32.partialorder %v12478_v29, %v9022_v30  ;;  %v3055_v28 = vmin.f32 %v3054_v37, %v2521_v19  ;;  %v12483_v7 = vld [vmem:[#allocation410_spill] sm:$0xff] }
 0x386   :  { %v3100_v14 = vmin.f32 %v3099_v31, %v2564_v49  ;;  %vm2001_vm1 = vcmp.eq.f32.partialorder %v12479_v15, %v8955_v44  ;;  %v3077_v2 = vmin.f32 %v3076_v16, %v2542_v48  ;;  %v2523_v26 = vsel %vm1977_vm9, %v7297_v20, 1e+30  ;;  %v12487_v15 = vld [vmem:[#allocation417_spill] sm:$0xff] }
 0x387   :  { %vm2002_vm6 = vcmp.eq.f32.partialorder %v6798_v54, %v8955_v44  ;;  %v2543_v25 = vsel %vm1997_vm12, %v7311_v50, 1e+30  ;;  %vm1979_vm15 = vcmp.eq.f32.partialorder %v12480_v52, %v9022_v30  ;;  %v3056_v51 = vmin.f32 %v3055_v28, %v2522_v18  ;;  %v12489_v54 = vld [vmem:[#allocation437_spill] sm:$0xff] }
 0x388   :  { %3101 = vmin.xlane.f32.xlu2 %v3100_v14  ;;  %v3078_v49 = vmin.f32 %v3077_v2, %v2543_v25  ;;  %v2524_v17 = vsel %vm1978_vm3, %v7301_v9, 1e+30  ;;  %vm2019_vm14 = vcmp.eq.f32.partialorder %v12481_v40, %v9100_v57  ;;  %vm2020_vm7 = vcmp.eq.f32.partialorder %v12482_v62, %v9100_v57  ;;  %v12485_v2 = vld [vmem:[#allocation435_spill] sm:$0xff]  ;;  %v12491_v40 = vld [vmem:[#allocation424_spill] sm:$0xff] }
 0x389   :  { %v2544_v12 = vsel %vm1998_vm0, %v7319_v32, 1e+30  ;;  %v2545_v19 = vsel %vm1999_vm10, %v7321_v39, 1e+30  ;;  %vm1980_vm5 = vcmp.eq.f32.partialorder %v12483_v7, %v9022_v30  ;;  %v3057_v23 = vmin.f32 %v3056_v51, %v2523_v26  ;;  %v12486_v26 = vld [vmem:[#allocation414_spill] sm:$0xff] }
 0x38a   :  { %v2546_v37 = vsel %vm2000_vm13, %v7324_v33, 1e+30  ;;  %v3079_v31 = vmin.f32 %v3078_v49, %v2544_v12  ;;  %v2525_v16 = vsel %vm1979_vm15, %v7303_v47, 1e+30  ;;  %vm2021_vm4 = vcmp.eq.f32.partialorder %v12484_v38, %v9100_v57  ;;  %v12488_v49 = vld [vmem:[#allocation420_spill] sm:$0xff] }
 0x38b   :  { %v2547_v34 = vsel %vm2001_vm1, %v7332_v43, 1e+30  ;;  %v3058_v18 = vmin.f32 %v3057_v23, %v2524_v17  ;;  %v2565_v48 = vsel %vm2019_vm14, %v7177_v0, 1e+30  ;;  %v2566_v29 = vsel %vm2020_vm7, %v7180_v27, 1e+30 }
 0x38c   :  { %v2548_v63 = vsel %vm2002_vm6, %v7334_v55, 1e+30  ;;  %v3080_v28 = vmin.f32 %v3079_v31, %v2545_v19  ;;  %v2526_v14 = vsel %vm1980_vm5, %v7308_v53, 1e+30  ;;  %vm2022_vm8 = vcmp.eq.f32.partialorder %v12485_v2, %v9100_v57  ;;  %v12490_v17 = vld [vmem:[#allocation422_spill] sm:$0xff]  ;;  %v12492_v23 = vld [vmem:[#allocation441_spill] sm:$0xff]  ;;  %v9173_v31 = vpop.xlane.xlu0 %1550 }
 0x38d   :  { %vm1981_vm11 = vcmp.eq.f32.partialorder %v12486_v26, %v9022_v30  ;;  %vm1982_vm2 = vcmp.eq.f32.partialorder %v12487_v15, %v9022_v30  ;;  %v3059_v25 = vmin.f32 %v3058_v18, %v2525_v16  ;;  %v2567_v52 = vsel %vm2021_vm4, %v7219_v58, 1e+30  ;;  %v12493_v16 = vld [vmem:[#allocation427_spill] sm:$0xff] }
 0x38e   :  { %v3081_v51 = vmin.f32 %v3080_v28, %v2546_v37  ;;  %vm1983_vm12 = vcmp.eq.f32.partialorder %v12488_v49, %v9022_v30  ;;  %vm2023_vm0 = vcmp.eq.f32.partialorder %v12489_v54, %v9100_v57  ;;  %v3103_v44 = vmin.f32 %v2565_v48, %v2566_v29  ;;  %v12494_v28 = vld [vmem:[#allocation443_spill] sm:$0xff] }
 0x38f   :  { %vm1984_vm9 = vcmp.eq.f32.partialorder %v12490_v17, %v9022_v30  ;;  %vm1985_vm10 = vcmp.eq.f32.partialorder %v12491_v40, %v9022_v30  ;;  %v3060_v62 = vmin.f32 %v3059_v25, %v2526_v14  ;;  %v2568_v12 = vsel %vm2022_vm8, %v7242_v22, 1e+30  ;;  %v12495_v25 = vld [vmem:[#allocation445_spill] sm:$0xff] }
 0x390   :  { %v3082_v19 = vmin.f32 %v3081_v51, %v2547_v34  ;;  %v2527_v7 = vsel %vm1981_vm11, %v7311_v50, 1e+30  ;;  %vm2024_vm13 = vcmp.eq.f32.partialorder %v12492_v23, %v9100_v57  ;;  %v3104_v37 = vmin.f32 %v3103_v44, %v2567_v52  ;;  %v12496_v51 = vld [vmem:[#allocation480_spill] sm:$0xff]  ;;  %v12497_v44 = vld [vmem:[#allocation447_spill] sm:$0xff]  ;;  %v12498_v40 = vld [vmem:[#allocation449_spill] sm:$0xff] }
 0x391   :  { %vm1986_vm3 = vcmp.eq.f32.partialorder %v12493_v16, %v9022_v30  ;;  %v2528_v38 = vsel %vm1982_vm2, %v7319_v32, 1e+30  ;;  %v3061_v18 = vmin.f32 %v3060_v62, %v2527_v7  ;;  %v2569_v48 = vsel %vm2023_vm0, %v7254_v24, 1e+30  ;;  %v12499_v62 = vld [vmem:[#allocation451_spill] sm:$0xff]  ;;  %v12500_v23 = vld [vmem:[#allocation453_spill] sm:$0xff] }
 0x392   :  { %v3083_v34 = vmin.f32 %v3082_v19, %v2548_v63  ;;  %v2529_v29 = vsel %vm1983_vm12, %v7321_v39, 1e+30  ;;  %vm2025_vm1 = vcmp.eq.f32.partialorder %v12494_v28, %v9100_v57  ;;  %v3105_v14 = vmin.f32 %v3104_v37, %v2568_v12  ;;  %v12501_v37 = vld [vmem:[#allocation457_spill] sm:$0xff] }
 0x393   :  { %v2530_v2 = vsel %vm1984_vm9, %v7324_v33, 1e+30  ;;  %v2531_v26 = vsel %vm1985_vm10, %v7332_v43, 1e+30  ;;  %v3062_v63 = vmin.f32 %v3061_v18, %v2528_v38  ;;  %v2570_v15 = vsel %vm2024_vm13, %v7269_v60, 1e+30 }
 0x394   :  { %3084 = vmin.xlane.f32.xlu1 %v3083_v34  ;;  %vm2026_vm6 = vcmp.eq.f32.partialorder %v12495_v25, %v9100_v57  ;;  %v3106_v52 = vmin.f32 %v3105_v14, %v2569_v48  ;;  %vm2051_vm15 = vcmp.eq.f32.partialorder %v6823_v11, %v9173_v31  ;;  %vm2052_vm14 = vcmp.eq.f32.partialorder %v12496_v51, %v9173_v31  ;;  %v9232_v34 = vpop.xlane.xlu1 %1567 }
 0x395   :  { %v2532_v49 = vsel %vm1986_vm3, %v7334_v55, 1e+30  ;;  %v3063_v54 = vmin.f32 %v3062_v63, %v2529_v29  ;;  %vm2027_vm7 = vcmp.eq.f32.partialorder %v12497_v44, %v9100_v57  ;;  %v2571_v17 = vsel %vm2025_vm1, %v7297_v20, 1e+30  ;;  %v12503_v29 = vld [vmem:[#allocation461_spill] sm:$0xff] }
 0x396   :  { %vm2028_vm5 = vcmp.eq.f32.partialorder %v12498_v40, %v9100_v57  ;;  %vm2029_vm4 = vcmp.eq.f32.partialorder %v12499_v62, %v9100_v57  ;;  %v3107_v11 = vmin.f32 %v3106_v52, %v2570_v15  ;;  %vm2053_vm8 = vcmp.eq.f32.partialorder %v6853_v13, %v9173_v31  ;;  %v12502_v13 = vld [vmem:[#allocation458_spill] sm:$0xff]  ;;  %v12507_v40 = vld [vmem:[#allocation476_spill] sm:$0xff] }
 0x397   :  { %v3064_v12 = vmin.f32 %v3063_v54, %v2530_v2  ;;  %v2572_v30 = vsel %vm2026_vm6, %v7301_v9, 1e+30  ;;  %v2597_v19 = vsel %vm2051_vm15, %v7177_v0, 1e+30  ;;  %v2598_v7 = vsel %vm2052_vm14, %v7180_v27, 1e+30 }
 0x398   :  { %vm2030_vm11 = vcmp.eq.f32.partialorder %v12500_v23, %v9100_v57  ;;  %vm2031_vm2 = vcmp.eq.f32.partialorder %v12501_v37, %v9100_v57  ;;  %v3108_v16 = vmin.f32 %v3107_v11, %v2571_v17  ;;  %vm2054_vm12 = vcmp.eq.f32.partialorder %v6875_v8, %v9173_v31  ;;  %v12504_v2 = vld [vmem:[#allocation464_spill] sm:$0xff]  ;;  %v12506_v54 = vld [vmem:[#allocation474_spill] sm:$0xff] }
 0x399   :  { %v3065_v38 = vmin.f32 %v3064_v12, %v2531_v26  ;;  %vm2032_vm0 = vcmp.eq.f32.partialorder %v12502_v13, %v9100_v57  ;;  %v2573_v18 = vsel %vm2027_vm7, %v7303_v47, 1e+30  ;;  %v2599_v48 = vsel %vm2053_vm8, %v7219_v58, 1e+30  ;;  %v12508_v12 = vld [vmem:[#allocation477_spill] sm:$0xff] }
 0x39a   :  { %vm2033_vm9 = vcmp.eq.f32.partialorder %v12503_v29, %v9100_v57  ;;  %v3109_v28 = vmin.f32 %v3108_v16, %v2572_v30  ;;  %vm2055_vm10 = vcmp.eq.f32.partialorder %v6897_v35, %v9173_v31  ;;  %v3137_v8 = vmin.f32 %v2597_v19, %v2598_v7  ;;  %v12509_v16 = vld [vmem:[#allocation479_spill] sm:$0xff] }
 0x39b   :  { %v3066_v14 = vmin.f32 %v3065_v38, %v2532_v49  ;;  %vm2034_vm13 = vcmp.eq.f32.partialorder %v12504_v2, %v9100_v57  ;;  %v2574_v26 = vsel %vm2028_vm5, %v7308_v53, 1e+30  ;;  %v2600_v63 = vsel %vm2054_vm12, %v7242_v22, 1e+30  ;;  %v12505_v49 = vld [vmem:[#allocation473_spill] sm:$0xff] }
 0x39c   :  { %v2575_v15 = vsel %vm2029_vm4, %v7311_v50, 1e+30  ;;  %v3110_v25 = vmin.f32 %v3109_v28, %v2573_v18  ;;  %vm2056_vm3 = vcmp.eq.f32.partialorder %v6922_v4, %v9173_v31  ;;  %v3138_v35 = vmin.f32 %v3137_v8, %v2599_v48 }
 0x39d   :  { %3067 = vmin.xlane.f32.xlu0 %v3066_v14  ;;  %v2576_v52 = vsel %vm2030_vm11, %v7319_v32, 1e+30  ;;  %v2601_v51 = vsel %vm2055_vm10, %v7254_v24, 1e+30  ;;  %vm2067_vm1 = vcmp.eq.f32.partialorder %v12505_v49, %v9232_v34  ;;  %vm2068_vm6 = vcmp.eq.f32.partialorder %v12506_v54, %v9232_v34 }
 0x39e   :  { %v2577_v4 = vsel %vm2031_vm2, %v7321_v39, 1e+30  ;;  %v3111_v44 = vmin.f32 %v3110_v25, %v2574_v26  ;;  %v3139_v17 = vmin.f32 %v3138_v35, %v2600_v63  ;;  %vm2069_vm15 = vcmp.eq.f32.partialorder %v12507_v40, %v9232_v34 }
 0x39f   :  { %v2578_v62 = vsel %vm2032_vm0, %v7324_v33, 1e+30  ;;  %vm2057_vm14 = vcmp.eq.f32.partialorder %v6942_v36, %v9173_v31  ;;  %v2602_v11 = vsel %vm2056_vm3, %v7269_v60, 1e+30  ;;  %vm2070_vm7 = vcmp.eq.f32.partialorder %v12508_v12, %v9232_v34 }
 0x3a0   :  { %v3112_v30 = vmin.f32 %v3111_v44, %v2575_v15  ;;  %v3140_v19 = vmin.f32 %v3139_v17, %v2601_v51  ;;  %v2613_v7 = vsel %vm2067_vm1, %v7177_v0, 1e+30  ;;  %v2614_v23 = vsel %vm2068_vm6, %v7180_v27, 1e+30  ;;  %v9317_v51 = vpop.xlane.xlu2 %1533 }
 0x3a1   :  { %v2579_v37 = vsel %vm2033_vm9, %v7332_v43, 1e+30  ;;  %vm2071_vm5 = vcmp.eq.f32.partialorder %v12509_v16, %v9232_v34  ;;  %v2615_v38 = vsel %vm2069_vm15, %v7219_v58, 1e+30  ;;  %v3154_v13 = vmin.f32 %v2613_v7, %v2614_v23  ;;  %v12514_v16 = vld [vmem:[#allocation484_spill] sm:$0xff] }
 0x3a2   :  { %v3113_v18 = vmin.f32 %v3112_v30, %v2576_v52  ;;  %vm2058_vm4 = vcmp.eq.f32.partialorder %v6965_v45, %v9173_v31  ;;  %v3141_v48 = vmin.f32 %v3140_v19, %v2602_v11  ;;  %v2616_v28 = vsel %vm2070_vm7, %v7242_v22, 1e+30  ;;  %v12511_v30 = vld [vmem:[#allocation455_spill] sm:$0xff]  ;;  %v12512_v19 = vld [vmem:[#allocation456_spill] sm:$0xff] }
 0x3a3   :  { %v2580_v8 = vsel %vm2034_vm13, %v7334_v55, 1e+30  ;;  %v2603_v29 = vsel %vm2057_vm14, %v7297_v20, 1e+30  ;;  %vm2072_vm8 = vcmp.eq.f32.partialorder %v6841_v56, %v9232_v34  ;;  %v3155_v14 = vmin.f32 %v3154_v13, %v2615_v38 }
 0x3a4   :  { %v3114_v26 = vmin.f32 %v3113_v18, %v2577_v4  ;;  %vm2059_vm11 = vcmp.eq.f32.partialorder %v6976_v1, %v9173_v31  ;;  %v3142_v45 = vmin.f32 %v3141_v48, %v2603_v29  ;;  %v2617_v63 = vsel %vm2071_vm5, %v7254_v24, 1e+30  ;;  %v12515_v18 = vld [vmem:[#allocation486_spill] sm:$0xff]  ;;  %v12517_v48 = vld [vmem:[#allocation488_spill] sm:$0xff] }
 0x3a5   :  { %vm2060_vm2 = vcmp.eq.f32.partialorder %v7013_v61, %v9173_v31  ;;  %vm2061_vm12 = vcmp.eq.f32.partialorder %v7038_v59, %v9173_v31  ;;  %v2604_v36 = vsel %vm2058_vm4, %v7301_v9, 1e+30  ;;  %v3156_v57 = vmin.f32 %v3155_v14, %v2616_v28  ;;  %v12518_v28 = vld [vmem:[#allocation25_spill] sm:$0xff] }
 0x3a6   :  { %v3115_v2 = vmin.f32 %v3114_v26, %v2578_v62  ;;  %vm2062_vm0 = vcmp.eq.f32.partialorder %v7062_v46, %v9173_v31  ;;  %v3143_v56 = vmin.f32 %v3142_v45, %v2604_v36  ;;  %v2618_v15 = vsel %vm2072_vm8, %v7269_v60, 1e+30  ;;  %v12519_v45 = vld [vmem:[#allocation143_spill] sm:$0xff]  ;;  %v12520_v36 = vld [vmem:[#allocation489_spill] sm:$0xff] }
 0x3a7   :  { %vm2063_vm9 = vcmp.eq.f32.partialorder %v7086_v42, %v9173_v31  ;;  %v2605_v1 = vsel %vm2059_vm11, %v7303_v47, 1e+30  ;;  %vm2073_vm10 = vcmp.eq.f32.partialorder %v6861_v3, %v9232_v34  ;;  %v3157_v25 = vmin.f32 %v3156_v57, %v2617_v63  ;;  %v12510_v3 = vld [vmem:[#allocation160_spill] sm:$0xff]  ;;  %v12521_v57 = vld [vmem:[#allocation491_spill] sm:$0xff] }
 0x3a8   :  { %v3116_v35 = vmin.f32 %v3115_v2, %v2579_v37  ;;  %vm2064_vm13 = vcmp.eq.f32.partialorder %v7105_v21, %v9173_v31  ;;  %vm2065_vm3 = vcmp.eq.f32.partialorder %v7123_v41, %v9173_v31  ;;  %v3144_v52 = vmin.f32 %v3143_v56, %v2605_v1  ;;  %v12513_v21 = vld [vmem:[#allocation460_spill] sm:$0xff] }
 0x3a9   :  { %vm2066_vm1 = vcmp.eq.f32.partialorder %v7143_v10, %v9173_v31  ;;  %v2606_v49 = vsel %vm2060_vm2, %v7308_v53, 1e+30  ;;  %vm2074_vm6 = vcmp.eq.f32.partialorder %v12510_v3, %v9232_v34  ;;  %v3158_v54 = vmin.f32 %v3157_v25, %v2618_v15  ;;  %v12516_v31 = vld [vmem:[#allocation463_spill] sm:$0xff]  ;;  %v9386_v15 = vpop.xlane.xlu0 %1584 }
 0x3aa   :  { %v3117_v4 = vmin.f32 %v3116_v35, %v2580_v8  ;;  %v2607_v44 = vsel %vm2061_vm12, %v7311_v50, 1e+30  ;;  %v3145_v17 = vmin.f32 %v3144_v52, %v2606_v49  ;;  %v2619_v40 = vsel %vm2073_vm10, %v7297_v20, 1e+30  ;;  %v12522_v35 = vld [vmem:[#allocation468_spill] sm:$0xff] }
 0x3ab   :  { %v2608_v62 = vsel %vm2062_vm0, %v7319_v32, 1e+30  ;;  %v2609_v61 = vsel %vm2063_vm9, %v7321_v39, 1e+30  ;;  %vm2075_vm15 = vcmp.eq.f32.partialorder %v6902_v6, %v9232_v34  ;;  %v3159_v11 = vmin.f32 %v3158_v54, %v2619_v40  ;;  %v12523_v40 = vld [vmem:[#allocation469_spill] sm:$0xff] }
 0x3ac   :  { %3118 = vmin.xlane.f32.xlu1 %v3117_v4  ;;  %v3146_v59 = vmin.f32 %v3145_v17, %v2607_v44  ;;  %v2620_v12 = vsel %vm2074_vm6, %v7301_v9, 1e+30  ;;  %vm2035_vm14 = vcmp.eq.f32.partialorder %v12511_v30, %v9317_v51  ;;  %vm2036_vm7 = vcmp.eq.f32.partialorder %v12512_v19, %v9317_v51  ;;  %v12526_v19 = vld [vmem:[#allocation146_spill] sm:$0xff] }
 0x3ad   :  { %v2610_v46 = vsel %vm2064_vm13, %v7324_v33, 1e+30  ;;  %v2611_v6 = vsel %vm2065_vm3, %v7332_v43, 1e+30  ;;  %vm2076_vm5 = vcmp.eq.f32.partialorder %v6929_v5, %v9232_v34  ;;  %v3160_v42 = vmin.f32 %v3159_v11, %v2620_v12  ;;  %v12525_v12 = vld [vmem:[#allocation60_spill] sm:$0xff] }
 0x3ae   :  { %v2612_v7 = vsel %vm2066_vm1, %v7334_v55, 1e+30  ;;  %v3147_v23 = vmin.f32 %v3146_v59, %v2608_v62  ;;  %v2621_v37 = vsel %vm2075_vm15, %v7303_v47, 1e+30  ;;  %vm2037_vm4 = vcmp.eq.f32.partialorder %v12513_v21, %v9317_v51  ;;  %v12524_v59 = vld [vmem:[#allocation57_spill] sm:$0xff]  ;;  %v12530_v21 = vld [vmem:[#allocation40_spill] sm:$0xff] }
 0x3af   :  { %vm2077_vm8 = vcmp.eq.f32.partialorder %v12514_v16, %v9232_v34  ;;  %v3161_v41 = vmin.f32 %v3160_v42, %v2621_v37  ;;  %v2581_v38 = vsel %vm2035_vm14, %v7177_v0, 1e+30  ;;  %v2582_v5 = vsel %vm2036_vm7, %v7180_v27, 1e+30  ;;  %v12529_v37 = vld [vmem:[#allocation65_spill] sm:$0xff] }
 0x3b0   :  { %v3148_v13 = vmin.f32 %v3147_v23, %v2609_v61  ;;  %vm2078_vm11 = vcmp.eq.f32.partialorder %v12515_v18, %v9232_v34  ;;  %v2622_v10 = vsel %vm2076_vm5, %v7308_v53, 1e+30  ;;  %vm2038_vm2 = vcmp.eq.f32.partialorder %v12516_v31, %v9317_v51  ;;  %v12532_v18 = vld [vmem:[#allocation70_spill] sm:$0xff]  ;;  %v12534_v31 = vld [vmem:[#allocation117_spill] sm:$0xff] }
 0x3b1   :  { %vm2079_vm12 = vcmp.eq.f32.partialorder %v12517_v48, %v9232_v34  ;;  %vm2080_vm0 = vcmp.eq.f32.partialorder %v12518_v28, %v9232_v34  ;;  %v3162_v8 = vmin.f32 %v3161_v41, %v2622_v10  ;;  %v2583_v29 = vsel %vm2037_vm4, %v7219_v58, 1e+30  ;;  %v12533_v10 = vld [vmem:[#allocation155_spill] sm:$0xff] }
 0x3b2   :  { %v3149_v14 = vmin.f32 %v3148_v13, %v2610_v46  ;;  %v2623_v26 = vsel %vm2077_vm8, %v7311_v50, 1e+30  ;;  %vm2039_vm9 = vcmp.eq.f32.partialorder %v12519_v45, %v9317_v51  ;;  %v3120_v63 = vmin.f32 %v2581_v38, %v2582_v5  ;;  %v12527_v46 = vld [vmem:[#allocation472_spill] sm:$0xff]  ;;  %v12531_v5 = vld [vmem:[#allocation478_spill] sm:$0xff] }
 0x3b3   :  { %vm2081_vm10 = vcmp.eq.f32.partialorder %v12520_v36, %v9232_v34  ;;  %vm2082_vm13 = vcmp.eq.f32.partialorder %v12521_v57, %v9232_v34  ;;  %v3163_v2 = vmin.f32 %v3162_v8, %v2623_v26  ;;  %v2584_v56 = vsel %vm2038_vm2, %v7242_v22, 1e+30  ;;  %v12536_v45 = vld [vmem:[#allocation156_spill] sm:$0xff] }
 0x3b4   :  { %v3150_v1 = vmin.f32 %v3149_v14, %v2611_v6  ;;  %v2624_v25 = vsel %vm2078_vm11, %v7319_v32, 1e+30  ;;  %vm2040_vm3 = vcmp.eq.f32.partialorder %v12522_v35, %v9317_v51  ;;  %v3121_v52 = vmin.f32 %v3120_v63, %v2583_v29  ;;  %v12535_v14 = vld [vmem:[#allocation72_spill] sm:$0xff]  ;;  %v12537_v63 = vld [vmem:[#allocation157_spill] sm:$0xff] }
 0x3b5   :  { %v2625_v49 = vsel %vm2079_vm12, %v7321_v39, 1e+30  ;;  %v2626_v3 = vsel %vm2080_vm0, %v7324_v33, 1e+30  ;;  %v3164_v54 = vmin.f32 %v3163_v2, %v2624_v25  ;;  %v2585_v4 = vsel %vm2039_vm9, %v7254_v24, 1e+30  ;;  %v9449_v2 = vpop.xlane.xlu1 %1601 }
 0x3b6   :  { %v3151_v44 = vmin.f32 %v3150_v1, %v2612_v7  ;;  %v2627_v17 = vsel %vm2081_vm10, %v7332_v43, 1e+30  ;;  %vm2041_vm1 = vcmp.eq.f32.partialorder %v12523_v40, %v9317_v51  ;;  %v3122_v62 = vmin.f32 %v3121_v52, %v2584_v56  ;;  %v12528_v7 = vld [vmem:[#allocation475_spill] sm:$0xff]  ;;  %v12538_v25 = vld [vmem:[#allocation74_spill] sm:$0xff] }
 0x3b7   :  { %v3165_v61 = vmin.f32 %v3164_v54, %v2625_v49  ;;  %v2586_v11 = vsel %vm2040_vm3, %v7269_v60, 1e+30  ;;  %vm2083_vm6 = vcmp.eq.f32.partialorder %v12524_v59, %v9386_v15  ;;  %vm2084_vm15 = vcmp.eq.f32.partialorder %v12525_v12, %v9386_v15  ;;  %v12540_v59 = vld [vmem:[#allocation482_spill] sm:$0xff]  ;;  %v12541_v12 = vld [vmem:[#allocation75_spill] sm:$0xff] }
 0x3b8   :  { %3152 = vmin.xlane.f32.xlu2 %v3151_v44  ;;  %v2628_v30 = vsel %vm2082_vm13, %v7334_v55, 1e+30  ;;  %vm2042_vm14 = vcmp.eq.f32.partialorder %v12526_v19, %v9317_v51  ;;  %vm2043_vm7 = vcmp.eq.f32.partialorder %v12527_v46, %v9317_v51  ;;  %v3123_v6 = vmin.f32 %v3122_v62, %v2585_v4 }
 0x3b9   :  { %v3166_v42 = vmin.f32 %v3165_v61, %v2626_v3  ;;  %vm2044_vm5 = vcmp.eq.f32.partialorder %v12528_v7, %v9317_v51  ;;  %v2587_v23 = vsel %vm2041_vm1, %v7297_v20, 1e+30  ;;  %vm2085_vm4 = vcmp.eq.f32.partialorder %v12529_v37, %v9386_v15  ;;  %v12546_v7 = vld [vmem:[#allocation483_spill] sm:$0xff] }
 0x3ba   :  { %vm2045_vm8 = vcmp.eq.f32.partialorder %v12530_v21, %v9317_v51  ;;  %v3124_v34 = vmin.f32 %v3123_v6, %v2586_v11  ;;  %v2629_v16 = vsel %vm2083_vm6, %v7177_v0, 1e+30  ;;  %v2630_v41 = vsel %vm2084_vm15, %v7180_v27, 1e+30  ;;  %v12539_v11 = vld [vmem:[#allocation481_spill] sm:$0xff]  ;;  %v12544_v6 = vld [vmem:[#allocation79_spill] sm:$0xff] }
 0x3bb   :  { %v3167_v38 = vmin.f32 %v3166_v42, %v2627_v17  ;;  %vm2046_vm11 = vcmp.eq.f32.partialorder %v12531_v5, %v9317_v51  ;;  %v2588_v13 = vsel %vm2042_vm14, %v7301_v9, 1e+30  ;;  %vm2086_vm2 = vcmp.eq.f32.partialorder %v12532_v18, %v9386_v15  ;;  %v12545_v42 = vld [vmem:[#allocation71_spill] sm:$0xff]  ;;  %v12548_v5 = vld [vmem:[#allocation485_spill] sm:$0xff] }
 0x3bc   :  { %vm2047_vm12 = vcmp.eq.f32.partialorder %v12533_v10, %v9317_v51  ;;  %vm2048_vm0 = vcmp.eq.f32.partialorder %v12534_v31, %v9317_v51  ;;  %v3125_v48 = vmin.f32 %v3124_v34, %v2587_v23  ;;  %v2631_v28 = vsel %vm2085_vm4, %v7219_v58, 1e+30  ;;  %v12547_v23 = vld [vmem:[#allocation80_spill] sm:$0xff]  ;;  %v12549_v31 = vld [vmem:[#allocation487_spill] sm:$0xff] }
 0x3bd   :  { %v3168_v8 = vmin.f32 %v3167_v38, %v2628_v30  ;;  %v2589_v29 = vsel %vm2043_vm7, %v7303_v47, 1e+30  ;;  %vm2087_vm9 = vcmp.eq.f32.partialorder %v12535_v14, %v9386_v15  ;;  %v3171_v26 = vmin.f32 %v2629_v16, %v2630_v41  ;;  %v12543_v30 = vld [vmem:[#allocation77_spill] sm:$0xff] }
 0x3be   :  { %vm2049_vm10 = vcmp.eq.f32.partialorder %v12536_v45, %v9317_v51  ;;  %vm2050_vm13 = vcmp.eq.f32.partialorder %v12537_v63, %v9317_v51  ;;  %v3126_v36 = vmin.f32 %v3125_v48, %v2588_v13  ;;  %v2632_v57 = vsel %vm2086_vm2, %v7242_v22, 1e+30  ;;  %v12542_v51 = vld [vmem:[#allocation76_spill] sm:$0xff]  ;;  %v2677_v13 = vpop.xlane.xlu2 %2676 }
 0x3bf   :  { %3169 = vmin.xlane.f32.xlu0 %v3168_v8  ;;  %v2590_v56 = vsel %vm2044_vm5, %v7308_v53, 1e+30  ;;  %v2591_v1 = vsel %vm2045_vm8, %v7311_v50, 1e+30  ;;  %vm2088_vm3 = vcmp.eq.f32.partialorder %v12538_v25, %v9386_v15  ;;  %v3172_v35 = vmin.f32 %v3171_v26, %v2631_v28  ;;  %v2694_v28 = vpop.xlane.xlu0 %2693 }
 0x3c0   :  { %v2592_v52 = vsel %vm2046_vm11, %v7319_v32, 1e+30  ;;  %v2593_v49 = vsel %vm2047_vm12, %v7321_v39, 1e+30  ;;  %v3127_v3 = vmin.f32 %v3126_v36, %v2589_v29  ;;  %v2633_v54 = vsel %vm2087_vm9, %v7254_v24, 1e+30 }
 0x3c1   :  { %v2594_v4 = vsel %vm2048_vm0, %v7324_v33, 1e+30  ;;  %v2595_v44 = vsel %vm2049_vm10, %v7332_v43, 1e+30  ;;  %v9476_v17 = vsel %vm2050_vm13, %v7334_v55, 1e+30  ;;  %v3173_v40 = vmin.f32 %v3172_v35, %v2632_v57 }
 0x3c2   :  { %v3128_v62 = vmin.f32 %v3127_v3, %v2590_v56  ;;  %v2634_v61 = vsel %vm2088_vm3, %v7269_v60, 1e+30  ;;  %vm2099_vm1 = vcmp.eq.f32.partialorder %v12539_v11, %v9449_v2  ;;  %vm2100_vm6 = vcmp.eq.f32.partialorder %v12540_v59, %v9449_v2  ;;  %v12550_v29 = vld [vmem:[#allocation144_spill] sm:$0xff]  ;;  %v12552_v56 = vld [vmem:[#allocation145_spill] sm:$0xff] }
 0x3c3   :  { %vm2089_vm15 = vcmp.eq.f32.partialorder %v12541_v12, %v9386_v15  ;;  %vm2090_vm14 = vcmp.eq.f32.partialorder %v12542_v51, %v9386_v15  ;;  %vm2091_vm7 = vcmp.eq.f32.partialorder %v12543_v30, %v9386_v15  ;;  %v3174_v19 = vmin.f32 %v3173_v40, %v2633_v54 }
 0x3c4   :  { %v3129_v46 = vmin.f32 %v3128_v62, %v2591_v1  ;;  %vm2092_vm5 = vcmp.eq.f32.partialorder %v12544_v6, %v9386_v15  ;;  %vm2093_vm4 = vcmp.eq.f32.partialorder %v12545_v42, %v9386_v15  ;;  %vm2101_vm8 = vcmp.eq.f32.partialorder %v12546_v7, %v9449_v2  ;;  %v12555_v7 = vld [vmem:[#allocation82_spill] sm:$0xff] }
 0x3c5   :  { %vm2094_vm11 = vcmp.eq.f32.partialorder %v12547_v23, %v9386_v15  ;;  %v3175_v37 = vmin.f32 %v3174_v19, %v2634_v61  ;;  %v2645_v21 = vsel %vm2099_vm1, %v7177_v0, 1e+30  ;;  %v2646_v34 = vsel %vm2100_vm6, %v7180_v27, 1e+30  ;;  %v2711_v0 = vpop.xlane.xlu1 %2710 }
 0x3c6   :  { %v3130_v16 = vmin.f32 %v3129_v46, %v2592_v52  ;;  %v2635_v41 = vsel %vm2089_vm15, %v7297_v20, 1e+30  ;;  %v2636_v38 = vsel %vm2090_vm14, %v7301_v9, 1e+30  ;;  %vm2102_vm2 = vcmp.eq.f32.partialorder %v12548_v5, %v9449_v2  ;;  %v2728_v59 = vpop.xlane.xlu2 %2727  ;;  %v12554_v46 = vld [vmem:[#allocation490_spill] sm:$0xff] }
 0x3c7   :  { %v2637_v18 = vsel %vm2091_vm7, %v7303_v47, 1e+30  ;;  %v3176_v10 = vmin.f32 %v3175_v37, %v2635_v41  ;;  %vm2103_vm12 = vcmp.eq.f32.partialorder %v12549_v31, %v9449_v2  ;;  %v2647_v48 = vsel %vm2101_vm8, %v7219_v58, 1e+30  ;;  %v2745_v19 = vpop.xlane.xlu0 %2744  ;;  %v12556_v41 = vld [vmem:[#allocation492_spill] sm:$0xff] }
 0x3c8   :  { %v3131_v27 = vmin.f32 %v3130_v16, %v2593_v49  ;;  %v2638_v8 = vsel %vm2092_vm5, %v7308_v53, 1e+30  ;;  %vm2104_vm0 = vcmp.eq.f32.partialorder %v12550_v29, %v9449_v2  ;;  %v3188_v14 = vmin.f32 %v2645_v21, %v2646_v34 }
 0x3c9   :  { %v2639_v26 = vsel %vm2093_vm4, %v7311_v50, 1e+30  ;;  %v3177_v45 = vmin.f32 %v3176_v10, %v2636_v38  ;;  %v2648_v58 = vsel %vm2102_vm2, %v7242_v22, 1e+30  ;;  %v12551_v63 = vlaneseq }
 0x3ca   :  { %v3132_v57 = vmin.f32 %v3131_v27, %v2594_v4  ;;  %vm2105_vm9 = vcmp.eq.f32.partialorder %v12552_v56, %v9449_v2  ;;  %v2649_v1 = vsel %vm2103_vm12, %v7254_v24, 1e+30  ;;  %v3189_v25 = vmin.f32 %v3188_v14, %v2647_v48  ;;  %v12559_v48 = vld [vmem:[#allocation493_spill] sm:$0xff]  ;;  %v12560_v14 = vld [vmem:[#allocation494_spill] sm:$0xff] }
 0x3cb   :  { %v9519_v36 = vand.u32 127, %v12551_v63  ;;  %v3178_v35 = vmin.f32 %v3177_v45, %v2637_v18  ;;  %v2650_v52 = vsel %vm2104_vm0, %v7269_v60, 1e+30  ;;  %vm3242_vm10 = vcmask 130112   ;;  %v12558_v18 = vld [vmem:[#allocation73_spill] sm:$0xff] }
 0x3cc   :  { %v3133_v22 = vmin.f32 %v3132_v57, %v2595_v44  ;;  %v3190_v54 = vmin.f32 %v3189_v25, %v2648_v58  ;;  %vm3246_vm13 = vcmask 195712   ;;  %vm3250_vm3 = vcmask 261312   ;;  %v12553_v44 = vld [vmem:[#allocation81_spill] sm:$0xff] }
 0x3cd   :  { %v9526_v49 = vadd.s32 4294967280, %v9519_v36  ;;  %v9529_v3 = vadd.s32 4294967288, %v9519_v36  ;;  %v9532_v40 = vadd.s32 4294967272, %v9519_v36  ;;  %v3179_v4 = vmin.f32 %v3178_v35, %v2638_v8  ;;  %v2762_v34 = vpop.xlane.xlu1 %2761 }
 0x3ce   :  { %v3239_v62 = vperm.slane %v2677_v13, %v9519_v36  ;;  %v3134_v60 = vmin.f32 %v3133_v22, %v9476_v17  ;;  %v3191_v61 = vmin.f32 %v3190_v54, %v2649_v1  ;;  %vm2095_vm1 = vcmp.eq.f32.partialorder %v12553_v44, %v9386_v15  ;;  %v12557_v13 = vld [vmem:[#allocation84_spill] sm:$0xff]  ;;  %v12561_v1 = vld [vmem:[#allocation495_spill] sm:$0xff]  ;;  %v12562_v54 = vld [vmem:[#allocation45_spill] sm:$0xff] }
 0x3cf   :  { %v3241_v24 = vperm.slane %v2694_v28, %v9529_v3  ;;  %v3245_v11 = vperm.slane %v2711_v0, %v9526_v49  ;;  %v3180_v12 = vmin.f32 %v3179_v4, %v2639_v26  ;;  %v3249_v51 = vperm.slane %v2728_v59, %v9532_v40  ;;  %v2779_v26 = vpop.xlane.xlu2 %2778  ;;  %v2796_v56 = vpop.xlane.xlu0 %2795 }
 0x3d0   :  { %3135 = vmin.xlane.f32.xlu1 %v3134_v60  ;;  %v2640_v17 = vsel %vm2094_vm11, %v7319_v32, 1e+30  ;;  %vm2106_vm6 = vcmp.eq.f32.partialorder %v12554_v46, %v9449_v2  ;;  %v3192_v6 = vmin.f32 %v3191_v61, %v2650_v52  ;;  %vm2096_vm15 = vcmp.eq.f32.partialorder %v12555_v7, %v9386_v15  ;;  %v12563_v60 = vld [vmem:[#allocation496_spill] sm:$0xff] }
 0x3d1   :  { %v3243_v30 = vsel %vm3242_vm10, %v3241_v24, %v3239_v62  ;;  %v3181_v37 = vmin.f32 %v3180_v12, %v2640_v17  ;;  %v2651_v21 = vsel %vm2105_vm9, %v7297_v20, 1e+30  ;;  %v2641_v23 = vsel %vm2095_vm1, %v7321_v39, 1e+30  ;;  %v12565_v12 = vld [vmem:[#allocation67_spill] sm:$0xff] }
 0x3d2   :  { %v3247_v42 = vsel %vm3246_vm13, %v3245_v11, %v3243_v30  ;;  %vm2107_vm14 = vcmp.eq.f32.partialorder %v12556_v41, %v9449_v2  ;;  %v3193_v38 = vmin.f32 %v3192_v6, %v2651_v21  ;;  %v3252_v5 = vperm.slane %v2745_v19, %v9519_v36 }
 0x3d3   :  { %v3251_v16 = vsel %vm3250_vm3, %v3249_v51, %v3247_v42  ;;  %vm2097_vm7 = vcmp.eq.f32.partialorder %v12557_v13, %v9386_v15  ;;  %vm2098_vm5 = vcmp.eq.f32.partialorder %v12558_v18, %v9386_v15  ;;  %v3182_v10 = vmin.f32 %v3181_v37, %v2641_v23 }
 0x3d4   :  { %v2652_v20 = vsel %vm2106_vm6, %v7301_v9, 1e+30  ;;  %v2642_v31 = vsel %vm2096_vm15, %v7324_v33, 1e+30  ;;  %vm2108_vm4 = vcmp.eq.f32.partialorder %v12559_v48, %v9449_v2  ;;  %v3253_v28 = vperm.slane %v2762_v34, %v9529_v3 }
 0x3d5   :  { %v3194_v0 = vmin.f32 %v3193_v38, %v2652_v20  ;;  %v3183_v27 = vmin.f32 %v3182_v10, %v2642_v31  ;;  %v2653_v8 = vsel %vm2107_vm14, %v7303_v47, 1e+30  ;;  %v2643_v29 = vsel %vm2097_vm7, %v7332_v43, 1e+30  ;;  %v2813_v46 = vpop.xlane.xlu1 %2812 }
 0x3d6   :  { %vm2109_vm8 = vcmp.eq.f32.partialorder %v12560_v14, %v9449_v2  ;;  %v3254_v9 = vsel %vm3242_vm10, %v3253_v28, %v3252_v5  ;;  %v2644_v45 = vsel %vm2098_vm5, %v7334_v55, 1e+30  ;;  %v2654_v63 = vsel %vm2108_vm4, %v7308_v53, 1e+30 }
 0x3d7   :  { %v3195_v15 = vmin.f32 %v3194_v0, %v2653_v8  ;;  %v3184_v58 = vmin.f32 %v3183_v27, %v2643_v29  ;;  %v3255_v57 = vperm.slane %v2779_v26, %v9526_v49  ;;  %vm2110_vm11 = vcmp.eq.f32.partialorder %v12561_v1, %v9449_v2  ;;  %v2830_v6 = vpop.xlane.xlu2 %2829 }
 0x3d8   :  { %vm3301_vm2 = vcmask 1041409   ;;  %v3257_v25 = vperm.slane %v2796_v56, %v9532_v40  ;;  %v2655_v52 = vsel %vm2109_vm8, %v7311_v50, 1e+30  ;;  %vm2111_vm12 = vcmp.eq.f32.partialorder %v12562_v54, %v9449_v2  ;;  %v12564_v50 = vld [vmem:[#allocation497_spill] sm:$0xff] }
 0x3d9   :  { %v3196_v47 = vmin.f32 %v3195_v15, %v2654_v63  ;;  %v3185_v35 = vmin.f32 %v3184_v58, %v2644_v45  ;;  %v3256_v22 = vsel %vm3246_vm13, %v3255_v57, %v3254_v9  ;;  %v2656_v62 = vsel %vm2110_vm11, %v7319_v32, 1e+30 }
 0x3da   :  { %v3258_v53 = vsel %vm3250_vm3, %v3257_v25, %v3256_v22  ;;  %vm2112_vm0 = vcmp.eq.f32.partialorder %v12563_v60, %v9449_v2  ;;  %v2657_v11 = vsel %vm2111_vm12, %v7321_v39, 1e+30  ;;  %vm2113_vm9 = vcmp.eq.f32.partialorder %v12564_v50, %v9449_v2  ;;  %v2847_v39 = vpop.xlane.xlu0 %2846 }
 0x3db   :  { %v3197_v4 = vmin.f32 %v3196_v47, %v2655_v52  ;;  %3186 = vmin.xlane.f32.xlu2 %v3185_v35  ;;  %v9586_v24 = vsel %vm3301_vm2, %v3258_v53, %v3251_v16  ;;  %v2658_v44 = vsel %vm2112_vm0, %v7324_v33, 1e+30  ;;  %vm2114_vm1 = vcmp.eq.f32.partialorder %v12565_v12, %v9449_v2 }
 0x3dc   :  { %v2659_v32 = vsel %vm2113_vm9, %v7332_v43, 1e+30  ;;  %v2660_v19 = vsel %vm2114_vm1, %v7334_v55, 1e+30  ;;  %v3260_v10 = vperm.slane %v2830_v6, %v9529_v3  ;;  %v3262_v20 = vperm.slane %v2847_v39, %v9526_v49 }
 0x3dd   :  { %v3198_v61 = vmin.f32 %v3197_v4, %v2656_v62  ;;  %v2864_v42 = vpop.xlane.xlu1 %2863  ;;  %v3259_v0 = vperm.slane %v2813_v46, %v9519_v36  ;;  %vm3303_vm6 = vcmask 1042434   ;;  %vm3305_vm15 = vcmask 1043459  }
 0x3de   :  { %v3264_v15 = vperm.slane %v2864_v42, %v9532_v40  ;;  %vm3307_vm14 = vcmask 1044484   ;;  %vm3309_vm7 = vcmask 1045509   ;;  %vm3311_vm5 = vcmask 1046534  }
 0x3df   :  { %v3199_v59 = vmin.f32 %v3198_v61, %v2657_v11  ;;  %v2881_v7 = vpop.xlane.xlu2 %2880  ;;  %v3261_v27 = vsel %vm3242_vm10, %v3260_v10, %v3259_v0  ;;  %vm3313_vm4 = vcmask 1047559   ;;  %vm3316_vm8 = vcmask 261120  }
 0x3e0   :  { %v3266_v28 = vperm.slane %v2881_v7, %v9519_v36  ;;  %v3263_v8 = vsel %vm3246_vm13, %v3262_v20, %v3261_v27 }
 0x3e1   :  { %v3200_v51 = vmin.f32 %v3199_v59, %v2658_v44  ;;  %v3265_v58 = vsel %vm3250_vm3, %v3264_v15, %v3263_v8 }
 0x3e2   :  { %v2898_v37 = vpop.xlane.xlu0 %2897  ;;  %v3304_v11 = vsel %vm3303_vm6, %v3265_v58, %v9586_v24 }
 0x3e3   :  { %v3201_v30 = vmin.f32 %v3200_v51, %v2659_v32  ;;  %v3267_v31 = vperm.slane %v2898_v37, %v9529_v3 }
 0x3e5   :  { %v3202_v17 = vmin.f32 %v3201_v30, %v2660_v19  ;;  %v2915_v21 = vpop.xlane.xlu1 %2914  ;;  %v3268_v29 = vsel %vm3242_vm10, %v3267_v31, %v3266_v28 }
 0x3e6   :  { %v3269_v26 = vperm.slane %v2915_v21, %v9526_v49 }
 0x3e7   :  { %3203 = vmin.xlane.f32.xlu0 %v3202_v17  ;;  %v2932_v34 = vpop.xlane.xlu2 %2931 }
 0x3e8   :  { %v3270_v63 = vsel %vm3246_vm13, %v3269_v26, %v3268_v29  ;;  %v3271_v4 = vperm.slane %v2932_v34, %v9532_v40 }
 0x3ea   :  { %v2949_v33 = vpop.xlane.xlu0 %2948  ;;  %v3272_v59 = vsel %vm3250_vm3, %v3271_v4, %v3270_v63 }
 0x3eb   :  { %v3273_v14 = vperm.slane %v2949_v33, %v9519_v36  ;;  %v3306_v6 = vsel %vm3305_vm15, %v3272_v59, %v3304_v11 }
 0x3ed   :  { %v2966_v16 = vpop.xlane.xlu1 %2965 }
 0x3ee   :  { %v3274_v45 = vperm.slane %v2966_v16, %v9529_v3 }
 0x3ef   :  { %v2983_v23 = vpop.xlane.xlu2 %2982 }
 0x3f0   :  { %v3276_v57 = vperm.slane %v2983_v23, %v9526_v49  ;;  %v3275_v56 = vsel %vm3242_vm10, %v3274_v45, %v3273_v14 }
 0x3f2   :  { %v3017_v2 = vpop.xlane.xlu0 %3016  ;;  %v3277_v44 = vsel %vm3246_vm13, %v3276_v57, %v3275_v56 }
 0x3f3   :  { %v3280_v47 = vperm.slane %v3017_v2, %v9519_v36 }
 0x3f5   :  { %v3034_v41 = vpop.xlane.xlu1 %3033 }
 0x3f6   :  { %v3281_v1 = vperm.slane %v3034_v41, %v9529_v3 }
 0x3f7   :  { %v3000_v38 = vpop.xlane.xlu2 %2999 }
 0x3f8   :  { %v3278_v35 = vperm.slane %v3000_v38, %v9532_v40  ;;  %v3282_v12 = vsel %vm3242_vm10, %v3281_v1, %v3280_v47 }
 0x3fa   :  { %v3051_v43 = vpop.xlane.xlu0 %3050  ;;  %v3279_v32 = vsel %vm3250_vm3, %v3278_v35, %v3277_v44 }
 0x3fb   :  { %v3283_v54 = vperm.slane %v3051_v43, %v9526_v49  ;;  %v3308_v42 = vsel %vm3307_vm14, %v3279_v32, %v3306_v6 }
 0x3ff   :  { %v3102_v13 = vpop.xlane.xlu2 %3101 }
 0x400   :  { %v3288_v52 = vperm.slane %v3102_v13, %v9529_v3 }
 0x407   :  { %v3085_v5 = vpop.xlane.xlu1 %3084 }
 0x408   :  { %v3287_v22 = vperm.slane %v3085_v5, %v9519_v36 }
 0x40a   :  { %v3289_v30 = vsel %vm3242_vm10, %v3288_v52, %v3287_v22 }
 0x410   :  { %v3068_v55 = vpop.xlane.xlu0 %3067 }
 0x411   :  { %v3285_v62 = vperm.slane %v3068_v55, %v9532_v40 }
 0x41f   :  { %v3119_v18 = vpop.xlane.xlu1 %3118 }
 0x420   :  { %v3290_v53 = vperm.slane %v3119_v18, %v9526_v49 }
 0x422   :  { %v3291_v19 = vsel %vm3246_vm13, %v3290_v53, %v3289_v30 }
 0x42b   :  { %v3153_v48 = vpop.xlane.xlu2 %3152 }
 0x42c   :  { %v3294_v51 = vperm.slane %v3153_v48, %v9519_v36 }
 0x432   :  { %v3170_v9 = vpop.xlane.xlu0 %3169 }
 0x433   :  { %v3295_v61 = vperm.slane %v3170_v9, %v9529_v3  ;;  %v3284_v3 = vsel %vm3246_vm13, %v3283_v54, %v3282_v12 }
 0x434   :  { %v3286_v17 = vsel %vm3250_vm3, %v3285_v62, %v3284_v3 }
 0x435   :  { %v3296_v46 = vsel %vm3242_vm10, %v3295_v61, %v3294_v51  ;;  %v3310_v37 = vsel %vm3309_vm7, %v3286_v17, %v3308_v42 }
 0x443   :  { %v3136_v25 = vpop.xlane.xlu1 %3135 }
 0x444   :  { %v3292_v50 = vperm.slane %v3136_v25, %v9532_v40 }
 0x446   :  { %v3293_v39 = vsel %vm3250_vm3, %v3292_v50, %v3291_v19 }
 0x447   :  { %v3312_v21 = vsel %vm3311_vm5, %v3293_v39, %v3310_v37 }
 0x44e   :  { %v3187_v60 = vpop.xlane.xlu2 %3186 }
 0x44f   :  { %v3297_v24 = vperm.slane %v3187_v60, %v9526_v49 }
 0x451   :  { %v3298_v49 = vsel %vm3246_vm13, %v3297_v24, %v3296_v46 }
 0x45a   :  { %v3204_v36 = vpop.xlane.xlu0 %3203 }
 0x45b   :  { %v3299_v7 = vperm.slane %v3204_v36, %v9532_v40 }
 0x45d   :  { %v3300_v34 = vsel %vm3250_vm3, %v3299_v7, %v3298_v49 }
 0x45e   :  { %v3314_v33 = vsel %vm3313_vm4, %v3300_v34, %v3312_v21 }
 0x45f   :  { %3317 = vst.msk [vmem:[%s9649_s3] sm:$0xff] %vm3316_vm8, %v3314_v33 }
 0x460   :  { %3322 = vsyncpa [#allocation3], 1 }
 0x461   :  { %3323 = vsyncpa [#allocation5], 1 }

// kernel: patnet_forward.5
= control target key start
LH: loop header
LB: loop body
LE: loop exit
PB: predicated region body
PF: predicated region fallthrough
CT: control target
= control target key end

     0   :  { %14 = vsyncpa [#allocation4], 0  ;;  %s1325_s0 = inlined_call_operand.vmem [shape: bf16[8,768], index: 0, kind: input, shape index: {}]   ;;  %s1326_s1 = inlined_call_operand.vmem [shape: f32[8,32], index: 1, kind: input, shape index: {}]   ;;  %s1327_s2 = inlined_call_operand.vmem [shape: bf16[768,64], index: 2, kind: input, shape index: {}]   ;;  %s1328_s3 = inlined_call_operand.hbm [shape: f32[32,64], index: 3, kind: input, shape index: {}]   ;;  %s1329_s4 = inlined_call_operand.hbm [shape: f32[1,64], index: 4, kind: input, shape index: {}]   ;;  %s1330_s5 = inlined_call_operand.vmem [shape: f32[64,32], index: 5, kind: input, shape index: {}]   ;;  %s1331_s6 = inlined_call_operand.hbm [shape: f32[1,32], index: 6, kind: input, shape index: {}]   ;;  %s1332_s7 = inlined_call_operand.vmem [shape: f32[32,10], index: 7, kind: input, shape index: {}]   ;;  %s1333_s8 = inlined_call_operand.hbm [shape: f32[1,10], index: 8, kind: input, shape index: {}]   ;;  %s1334_s9 = inlined_call_operand.vmem [shape: f32[8,10], index: 9, kind: output, shape index: {}]  }
   0x1   :  { %15 = vsyncpa [#allocation6], 0  ;;  %s41_s11 = sshll.u32 %s1329_s4, 4  ;;  %s42_s11 = int_to_ptr.hbm [resolvable:$true] %s41_s11 }
   0x2   :  { %16 = vsyncpa [#allocation9], 0  ;;  %s1056_s12 = smov [#allocation5]   ;;  %s27_s16 = sshll.u32 %s1328_s3, 4  ;;  %s28_s16 = int_to_ptr.hbm [resolvable:$true] %s27_s16 }
   0x3   :  { %s43_s13 = sshll.u32 %s1056_s12, 4  ;;  %s1057_s17 = smov [#allocation3]   ;;  %s44_s13 = int_to_ptr.vmem [resolvable:$true] %s43_s13 }
   0x4   :  { %46 = dma.hbm_to_vmem [thread:$0]  %s42_s11, 16, %s44_s13, [#allocation6]  }
   0x5   :  { %s29_s18 = sshll.u32 %s1057_s17, 4  ;;  %s1058_s19 = smov 128   ;;  %s30_s18 = int_to_ptr.vmem [resolvable:$true] %s29_s18 }
   0x6   :  { %s1059_s20 = smov 8   ;;  %s54_s4 = sshll.u32 %s1331_s6, 4  ;;  %s55_s4 = int_to_ptr.hbm [resolvable:$true] %s54_s4 }
   0x7   :  { %35 = dma.hbm_to_vmem [thread:$0]  %s28_s16, 512, %s30_s18, [#allocation4], %s1058_s19, %s1058_s19, %s1059_s20  }
   0x8   :  { %s1060_s23 = smov [#allocation7]   ;;  %s67_s3 = sshll.u32 %s1333_s8, 4  ;;  %s68_s3 = int_to_ptr.hbm [resolvable:$true] %s67_s3 }
   0x9   :  { %s56_s24 = sshll.u32 %s1060_s23, 4  ;;  %s1061_s27 = smov [#allocation8]   ;;  %s57_s24 = int_to_ptr.vmem [resolvable:$true] %s56_s24 }
   0xa   :  { %59 = dma.hbm_to_vmem [thread:$0]  %s55_s4, 16, %s57_s24, [#allocation6]  }
   0xb   :  { %s69_s28 = sshll.u32 %s1061_s27, 4  ;;  %s70_s28 = int_to_ptr.vmem [resolvable:$true] %s69_s28 }
   0xc   :  { %72 = dma.hbm_to_vmem [thread:$0]  %s68_s3, 16, %s70_s28, [#allocation9]  }
   0xd   :  { %1050 = dma.done.wait [#allocation4], 512  }
   0xe   :  { %1051 = vsyncadd [#allocation4], 4294966784 }
   0xf   :  { %1052 = dma.done.wait [#allocation6], 32  }
  0x10   :  { %1053 = vsyncadd [#allocation6], 4294967264 }
  0x11   :  { %1054 = dma.done.wait [#allocation9], 16  }
  0x12   :  { %1055 = vsyncadd [#allocation9], 4294967280  ;;  %v903_v0 = vld [vmem:[%s1327_s2 + $0x38] sm:$0xff]  ;;  %v902_v2 = vld [vmem:[%s1327_s2 + $0x30] sm:$0xff]  ;;  %vm594_vm0 = vcmask 261120   ;;  %vm93_vm1 = vcmask 523264  }
  0x13   :  { %v911_v1 = vld [vmem:[%s1327_s2 + $0x78] sm:$0xff]  ;;  %504 = vmatpush.bf16.msra.mxu0 %v903_v0  ;;  %v910_v3 = vld [vmem:[%s1327_s2 + $0x70] sm:$0xff]  ;;  %v901_v8 = vld [vmem:[%s1327_s2 + $0x28] sm:$0xff]  ;;  %vm692_vm2 = vcmask 80896  }
  0x14   :  { %517 = vmatpush.bf16.msra.mxu1 %v911_v1  ;;  %v919_v4 = vld [vmem:[%s1327_s2 + $0xb8] sm:$0xff]  ;;  %v918_v6 = vld [vmem:[%s1327_s2 + $0xb0] sm:$0xff]  ;;  %v909_v9 = vld [vmem:[%s1327_s2 + $0x68] sm:$0xff] }
  0x15   :  { %v927_v5 = vld [vmem:[%s1327_s2 + $0xf8] sm:$0xff]  ;;  %530 = vmatpush.bf16.msra.mxu2 %v919_v4  ;;  %v926_v7 = vld [vmem:[%s1327_s2 + $0xf0] sm:$0xff]  ;;  %v917_v10 = vld [vmem:[%s1327_s2 + $0xa8] sm:$0xff]  ;;  %v1062_v4 = vmov 0.0  }
  0x16   :  { %543 = vmatpush.bf16.msra.mxu3 %v927_v5  ;;  %v925_v11 = vld [vmem:[%s1327_s2 + $0xe8] sm:$0xff]  ;;  %v900_v12 = vld [vmem:[%s1327_s2 + $0x20] sm:$0xff]  ;;  %v899_v16 = vld [vmem:[%s1327_s2 + $0x18] sm:$0xff]  ;;  %94 = vst.msk [vmem:[#allocation2] sm:$0xff] %vm93_vm1, %v1062_v4 }
  0x17   :  { %505 = vmatpush.bf16.msra.mxu0 %v902_v2  ;;  %v908_v13 = vld [vmem:[%s1327_s2 + $0x60] sm:$0xff]  ;;  %v907_v17 = vld [vmem:[%s1327_s2 + $0x58] sm:$0xff]  ;;  %v898_v20 = vld [vmem:[%s1327_s2 + $0x10] sm:$0xff] }
  0x18   :  { %518 = vmatpush.bf16.msra.mxu1 %v910_v3  ;;  %v916_v14 = vld [vmem:[%s1327_s2 + $0xa0] sm:$0xff]  ;;  %v915_v18 = vld [vmem:[%s1327_s2 + $0x98] sm:$0xff]  ;;  %v906_v21 = vld [vmem:[%s1327_s2 + $0x50] sm:$0xff] }
  0x19   :  { %531 = vmatpush.bf16.msra.mxu2 %v918_v6  ;;  %v924_v15 = vld [vmem:[%s1327_s2 + $0xe0] sm:$0xff]  ;;  %v923_v19 = vld [vmem:[%s1327_s2 + $0xd8] sm:$0xff]  ;;  %v914_v22 = vld [vmem:[%s1327_s2 + $0x90] sm:$0xff] }
  0x1a   :  { %544 = vmatpush.bf16.msra.mxu3 %v926_v7  ;;  %v922_v23 = vld [vmem:[%s1327_s2 + $0xd0] sm:$0xff]  ;;  %v897_v24 = vld [vmem:[%s1327_s2 + $0x8] sm:$0xff]  ;;  %v96_v26 = vld [vmem:[%s1325_s0] sm:$0xff] }
  0x1b   :  { %506 = vmatpush.bf16.msra.mxu0 %v901_v8  ;;  %v905_v25 = vld [vmem:[%s1327_s2 + $0x48] sm:$0xff]  ;;  %v198_v29 = vunpack.c.l.b16 %v96_v26  ;;  %v199_v30 = vunpack.c.h.b16 %v96_v26  ;;  %v896_v32 = vld [vmem:[%s1327_s2] sm:$0xff]  ;;  %v935_v34 = vld [vmem:[%s1327_s2 + $0x138] sm:$0xff] }
  0x1c   :  { %519 = vmatpush.bf16.msra.mxu1 %v909_v9  ;;  %v913_v27 = vld [vmem:[%s1327_s2 + $0x88] sm:$0xff]  ;;  %v904_v33 = vld [vmem:[%s1327_s2 + $0x40] sm:$0xff]  ;;  %v943_v35 = vld [vmem:[%s1327_s2 + $0x178] sm:$0xff] }
  0x1d   :  { %532 = vmatpush.bf16.msra.mxu2 %v917_v10  ;;  %v921_v28 = vld [vmem:[%s1327_s2 + $0xc8] sm:$0xff]  ;;  %v912_v36 = vld [vmem:[%s1327_s2 + $0x80] sm:$0xff]  ;;  %v204_v40 = vpack.c.b16 %v198_v29, %v198_v29  ;;  %v205_v41 = vpack.c.b16 %v199_v30, %v199_v30  ;;  %v934_v42 = vld [vmem:[%s1327_s2 + $0x130] sm:$0xff] }
  0x1e   :  { %545 = vmatpush.bf16.msra.mxu3 %v925_v11  ;;  %v97_v31 = vld [vmem:[%s1325_s0 + $0x8] sm:$0xff]  ;;  %v920_v37 = vld [vmem:[%s1327_s2 + $0xc0] sm:$0xff]  ;;  %v942_v43 = vld [vmem:[%s1327_s2 + $0x170] sm:$0xff] }
  0x1f   :  { %507 = vmatpush.bf16.msra.mxu0 %v900_v12  ;;  %v200_v38 = vunpack.c.l.b16 %v97_v31  ;;  %v201_v39 = vunpack.c.h.b16 %v97_v31  ;;  %v593_v44 = vld [vmem:[#allocation3 + $0x18] sm:$0xff]  ;;  %v592_v47 = vld [vmem:[#allocation3 + $0x10] sm:$0xff]  ;;  %v933_v48 = vld [vmem:[%s1327_s2 + $0x128] sm:$0xff] }
  0x20   :  { %520 = vmatpush.bf16.msra.mxu1 %v908_v13  ;;  %v941_v49 = vld [vmem:[%s1327_s2 + $0x168] sm:$0xff]  ;;  %v591_v50 = vld [vmem:[#allocation3 + $0x8] sm:$0xff]  ;;  %v932_v51 = vld [vmem:[%s1327_s2 + $0x120] sm:$0xff] }
  0x21   :  { %533 = vmatpush.bf16.msra.mxu2 %v916_v14  ;;  %v206_v45 = vpack.c.b16 %v200_v38, %v200_v38  ;;  %v207_v46 = vpack.c.b16 %v201_v39, %v201_v39  ;;  %v940_v52 = vld [vmem:[%s1327_s2 + $0x160] sm:$0xff]  ;;  %v590_v53 = vld [vmem:[#allocation3] sm:$0xff]  ;;  %v931_v54 = vld [vmem:[%s1327_s2 + $0x118] sm:$0xff] }
  0x22   :  { %546 = vmatpush.bf16.msra.mxu3 %v924_v15  ;;  %v939_v55 = vld [vmem:[%s1327_s2 + $0x158] sm:$0xff]  ;;  %v930_v56 = vld [vmem:[%s1327_s2 + $0x110] sm:$0xff]  ;;  %v589_v58 = vld [vmem:[%s1326_s1] sm:$0xff] }
  0x23   :  { %508 = vmatpush.bf16.msra.mxu0 %v899_v16  ;;  %v938_v57 = vld [vmem:[%s1327_s2 + $0x150] sm:$0xff]  ;;  %v929_v59 = vld [vmem:[%s1327_s2 + $0x108] sm:$0xff]  ;;  %v928_v0 = vld [vmem:[%s1327_s2 + $0x100] sm:$0xff] }
  0x24   :  { %521 = vmatpush.bf16.msra.mxu1 %v907_v17  ;;  %v937_v60 = vld [vmem:[%s1327_s2 + $0x148] sm:$0xff]  ;;  %v98_v61 = vld [vmem:[%s1325_s0 + $0x10] sm:$0xff]  ;;  %v936_v1 = vld [vmem:[%s1327_s2 + $0x140] sm:$0xff] }
  0x25   :  { %534 = vmatpush.bf16.msra.mxu2 %v915_v18  ;;  %v202_v62 = vunpack.c.l.b16 %v98_v61  ;;  %v203_v63 = vunpack.c.h.b16 %v98_v61  ;;  %v632_v7 = vld [vmem:[%s1330_s5 + $0x38] sm:$0xff]  ;;  %v631_v8 = vld [vmem:[%s1330_s5 + $0x30] sm:$0xff]  ;;  %v630_v9 = vld [vmem:[%s1330_s5 + $0x28] sm:$0xff] }
  0x26   :  { %547 = vmatpush.bf16.msra.mxu3 %v923_v19  ;;  %v629_v10 = vld [vmem:[%s1330_s5 + $0x20] sm:$0xff]  ;;  %v628_v13 = vld [vmem:[%s1330_s5 + $0x18] sm:$0xff]  ;;  %v627_v16 = vld [vmem:[%s1330_s5 + $0x10] sm:$0xff] }
  0x27   :  { %509 = vmatpush.bf16.msra.mxu0 %v898_v20  ;;  %v208_v2 = vpack.c.b16 %v202_v62, %v202_v62  ;;  %v209_v3 = vpack.c.b16 %v203_v63, %v203_v63  ;;  %v626_v17 = vld [vmem:[%s1330_s5 + $0x8] sm:$0xff]  ;;  %v625_v18 = vld [vmem:[%s1330_s5] sm:$0xff] }
  0x28   :  { %522 = vmatpush.bf16.msra.mxu1 %v906_v21  ;;  %v664_v21 = vld [vmem:[%s1332_s7 + $0x18] sm:$0xff]  ;;  %v95_v29 = vld [vmem:[#allocation2] sm:$0xff] }
  0x29   :  { %535 = vmatpush.bf16.msra.mxu2 %v914_v22  ;;  %v663_v22 = vld [vmem:[%s1332_s7 + $0x10] sm:$0xff] }
  0x2a   :  { %548 = vmatpush.bf16.msra.mxu3 %v922_v23 }
  0x2b   :  { %510 = vmatpush.bf16.msra.mxu0 %v897_v24 }
  0x2c   :  { %523 = vmatpush.bf16.msra.mxu1 %v905_v25 }
  0x2d   :  { %536 = vmatpush.bf16.msra.mxu2 %v913_v27 }
  0x2e   :  { %549 = vmatpush.bf16.msra.mxu3 %v921_v28 }
  0x2f   :  { %511 = vmatpush.bf16.msra.mxu0 %v896_v32 }
  0x30   :  { %524 = vmatpush.bf16.msra.mxu1 %v904_v33 }
  0x31   :  { %537 = vmatpush.bf16.msra.mxu2 %v912_v36 }
  0x32   :  { %550 = vmatpush.bf16.msra.mxu3 %v920_v37  ;;  %512 = vmatmul.bf16.vlgmr.msra.gmra.mxu0 %v204_v40  ;;  %v662_v40 = vld [vmem:[%s1332_s7 + $0x8] sm:$0xff] }
  0x33   :  { %556 = vmatpush.bf16.msrb.mxu0 %v935_v34  ;;  %525 = vmatmul.bf16.vlgmr.msra.gmra.mxu1 %v205_v41  ;;  %v661_v41 = vld [vmem:[%s1332_s7] sm:$0xff] }
  0x34   :  { %569 = vmatpush.bf16.msrb.mxu1 %v943_v35  ;;  %538 = vmatmul.bf16.vlgmr.msra.gmra.mxu2 %v206_v45  ;;  %v951_v35 = vld [vmem:[#allocation5] ss:$0 sm:$0xff] }
  0x35   :  { %610 = vmatpush.msrb.mxu2 %v593_v44  ;;  %551 = vmatmul.bf16.vlgmr.msra.gmra.mxu3 %v207_v46  ;;  %v953_v46 = vld [vmem:[#allocation8] ss:$0 sm:$0xff] }
  0x36   :  { %648 = vmatpush.msrb.mxu3 %v632_v7 }
  0x37   :  { %557 = vmatpush.bf16.msrb.mxu0 %v934_v42  ;;  %611 = vmatpush.msrb.mxu2 %v592_v47  ;;  %v952_v42 = vld [vmem:[#allocation7] ss:$0 sm:$0xff] }
  0x38   :  { %570 = vmatpush.bf16.msrb.mxu1 %v942_v43  ;;  %649 = vmatpush.msrb.mxu3 %v631_v8 }
  0x39   :  { %612 = vmatpush.msrb.mxu2 %v591_v50 }
  0x3a   :  { %650 = vmatpush.msrb.mxu3 %v630_v9 }
  0x3b   :  { %558 = vmatpush.bf16.msrb.mxu0 %v933_v48  ;;  %613 = vmatpush.msrb.mxu2 %v590_v53 }
  0x3c   :  { %571 = vmatpush.bf16.msrb.mxu1 %v941_v49  ;;  %651 = vmatpush.msrb.mxu3 %v629_v10 }
  0x3d   :  { %684 = vmatpush.msra.mxu2 %v664_v21 }
  0x3e   :  { %652 = vmatpush.msrb.mxu3 %v628_v13 }
  0x3f   :  { %559 = vmatpush.bf16.msrb.mxu0 %v932_v51  ;;  %685 = vmatpush.msra.mxu2 %v663_v22 }
  0x40   :  { %572 = vmatpush.bf16.msrb.mxu1 %v940_v52  ;;  %653 = vmatpush.msrb.mxu3 %v627_v16 }
  0x41   :  { %686 = vmatpush.msra.mxu2 %v662_v40 }
  0x42   :  { %654 = vmatpush.msrb.mxu3 %v626_v17 }
  0x43   :  { %560 = vmatpush.bf16.msrb.mxu0 %v931_v54  ;;  %687 = vmatpush.msra.mxu2 %v661_v41 }
  0x44   :  { %573 = vmatpush.bf16.msrb.mxu1 %v939_v55  ;;  %893 = vmatmul.msk.f32.vlgmr.msrb.gmra.mxu2 %vm594_vm0, %v589_v58 }
  0x45   :  { %655 = vmatpush.msrb.mxu3 %v625_v18 }
  0x47   :  { %561 = vmatpush.bf16.msrb.mxu0 %v930_v56 }
  0x48   :  { %574 = vmatpush.bf16.msrb.mxu1 %v938_v57 }
  0x4b   :  { %562 = vmatpush.bf16.msrb.mxu0 %v929_v59 }
  0x4c   :  { %575 = vmatpush.bf16.msrb.mxu1 %v937_v60 }
  0x4f   :  { %563 = vmatpush.bf16.msrb.mxu0 %v928_v0 }
  0x50   :  { %576 = vmatpush.bf16.msrb.mxu1 %v936_v1 }
  0x52   :  { %564 = vmatmul.bf16.vlgmr.msrb.gmra.mxu0 %v208_v2 }
  0x53   :  { %577 = vmatmul.bf16.vlgmr.msrb.gmra.mxu1 %v209_v3 }
  0xaf   :  { %v513_v5 = vpop.f32.mrf.mxu0 }
  0xb0   :  { %v526_v6 = vpop.f32.mrf.mxu1 }
  0xb1   :  { %v527_v23 = vadd.f32 %v526_v6, %v513_v5 }
  0xb7   :  { %v515_v11 = vpop.f32.mrf.mxu0  ;;  %v539_v14 = vpop.f32.mrf.mxu2 }
  0xb8   :  { %v528_v12 = vpop.f32.mrf.mxu1  ;;  %v552_v15 = vpop.f32.mrf.mxu3  ;;  %v540_v24 = vadd.f32 %v539_v14, %v527_v23 }
  0xba   :  { %v553_v25 = vadd.f32 %v552_v15, %v540_v24 }
  0xbf   :  { %v541_v19 = vpop.f32.mrf.mxu2 }
  0xc0   :  { %v554_v20 = vpop.f32.mrf.mxu3 }
  0xc7   :  { %v615_v34 = vpop.f32.mrf.mxu2 }
  0xcf   :  { %v565_v26 = vpop.f32.mrf.mxu0 }
  0xd0   :  { %v578_v27 = vpop.f32.mrf.mxu1  ;;  %v566_v28 = vadd.f32 %v565_v26, %v553_v25 }
  0xd2   :  { %v579_v30 = vadd.f32 %v578_v27, %v566_v28 }
  0xd4   :  { %v582_v31 = vadd.f32 %v579_v30, %v95_v29 }
  0xd6   :  { %584 = vst.msk [vmem:[#allocation2] sm:$0xff] %vm93_vm1, %v582_v31 }
  0xd7   :  { %v567_v32 = vpop.f32.mrf.mxu0 }
  0xd8   :  { %v580_v33 = vpop.f32.mrf.mxu1 }
  0xdd   :  { %v588_v36 = vld [vmem:[#allocation2] sm:$0xff] }
  0xde   :  { %v618_v37 = vadd.f32 %v615_v34, %v588_v36 }
  0xe0   :  { %v623_v38 = vadd.f32 %v951_v35, %v618_v37 }
  0xe2   :  { %v624_v39 = vmax.f32 %v623_v38, 0.0 }
  0xe4   :  { %894 = vmatmul.msk.f32.vlgmr.msrb.gmra.mxu3 %vm93_vm1, %v624_v39 }
 0x167   :  { %v657_v43 = vpop.f32.mrf.mxu3 }
 0x168   :  { %v658_v44 = vadd.f32 %v952_v42, %v657_v43 }
 0x16a   :  { %v660_v45 = vmax.f32 %v658_v44, 0.0 }
 0x16c   :  { %895 = vmatmul.msk.f32.vlgmr.msra.gmra.mxu2 %vm594_vm0, %v660_v45 }
 0x1ef   :  { %v689_v47 = vpop.f32.mrf.mxu2 }
 0x1f0   :  { %v690_v48 = vadd.f32 %v953_v46, %v689_v47 }
 0x1f2   :  { %693 = vst.msk [vmem:[%s1334_s9] sm:$0xff] %vm692_vm2, %v690_v48 }
 0x1f3   :  { %698 = vsyncpa [#allocation4], 1 }
 0x1f4   :  { %699 = vsyncpa [#allocation6], 1 }
 0x1f5   :  { %700 = vsyncpa [#allocation9], 1 }

// kernel: patnet_forward.3
= control target key start
LH: loop header
LB: loop body
LE: loop exit
PB: predicated region body
PF: predicated region fallthrough
CT: control target
= control target key end

     0   :  { %8 = vsyncpa [#allocation3], 0  ;;  %s6586_s0 = inlined_call_operand.vmem [shape: bf16[8,768], index: 0, kind: input, shape index: {}]   ;;  %s6587_s1 = inlined_call_operand.hbm [shape: bf16[768,2048], index: 1, kind: input, shape index: {}]   ;;  %s6588_s2 = inlined_call_operand.hbm [shape: f32[1,2048], index: 2, kind: input, shape index: {}]   ;;  %s6589_s3 = inlined_call_operand.vmem [shape: f32[8,2048], index: 3, kind: output, shape index: {}]  }
   0x1   :  { %10 = vsyncpa [#allocation3 + $0x1], 0 }
   0x2   :  { %11 = vsyncpa [#allocation5], 0 }
   0x3   :  { %13 = vsyncpa [#allocation5 + $0x1], 0  ;;  %s5575_s12 = smov 0   ;;  %s5577_s13 = smov 0  }
   0x4   :  { %s5579_s14 = smov 0   ;;  %s5581_s15 = smov 0  }
   0x5   :  { %s5583_s16 = smov 0   ;;  %s5585_s17 = smov 0  }
   0x6 LB: > { %s3433_s18 = sadd.s32 4294967295, %s5550_s17   ;;  %s31_s19 = sadd.s32 1, %s5546_s16  ;;  %s5550_s17 = sphi %s5585_s17, %s19_s17   ;;  %s5546_s16 = sphi %s5583_s16, %s6597_s16   ;;  %s5542_s15 = sphi %s5581_s15, %s6596_s15   ;;  %s5538_s14 = sphi %s5579_s14, %s6595_s14   ;;  %s5534_s13 = sphi %s5577_s13, %s6594_s13   ;;  %s5530_s12 = sphi %s5575_s12, %s6593_s12  }
   0x7   : > { %p33_p0 = scmp.ge.s32.totalorder %s31_s19, 2  ;;  %s66_s20 = sadd.s32 1, %s5538_s14 }
   0x8   : > { %p73_p1 = scmp.ne.s32.totalorder %s5538_s14, %s5534_s13  ;;  %p74_p2 = scmp.eq.s32.totalorder %s5550_s17, 0 }
   0x9   : > { %s6599_s19 = smov (%p33_p0, %s31_s19), 0  ;;  %p79_p4 = scmp.ne.s32.totalorder %s5534_s13, %s5530_s12 }
   0xa   : > { %p75_p3 = por %p74_p2, %p73_p1  ;;  %s62_s21 = ssub.s32 %s5546_s16, %s6599_s19 }
   0xb   : > { %p80_p5 = scmp.eq.s32.totalorder %s3433_s18, 0  ;;  %p64_p6 = scmp.eq.s32.totalorder %s62_s21, 0 }
   0xc   : > { %p5382_p8 = scmp.lt.s32.totalorder %s5550_s17, 2  ;;  %s5623_s24 = sand.u32 1, %s5538_s14  }
   0xd   : > { %p5614_p7 = por %p80_p5, %p79_p4  ;;  %s4984_s25 = sshll.u32 %s5546_s16, 5 }
   0xe   : > { %s5620_s23 = scalar_select %p64_p6, %s5538_s14, %s66_s20  }
   0xf   : > { %s5369_s26 = smul.u32 3072, %s5623_s24  ;;  %s176_s29 = scalar_lea.hbm %s6587_s1, %s4984_s25 }
  0x10   : > { %p5630_p9 = pnand %p5382_p8, %p75_p3  ;;  %s177_s4 = sshll.u32 %s176_s29, 4  ;;  %s178_s4 = int_to_ptr.hbm [resolvable:$true] %s177_s4 }
  0x11   : > { %s168_s5 = scalar_lea.vmem [#allocation2], %s5369_s26  ;;  %p3442_p10 = scmp.ge.s32.totalorder %s5550_s17, 1 }
  0x12   : > { %s179_s6 = sshll.u32 %s168_s5, 4  ;;  %s165_s7 = scalar_lea.sflag [#allocation3], %s5623_s24  ;;  %s180_s6 = int_to_ptr.vmem [resolvable:$true] %s179_s6 }
  0x13   : > { %s5552_s8 = smov 1024   ;;  %s5553_s9 = smov 512  }
  0x14   : > { %s5554_s10 = smov 32   ;;  %p206_p11 = scmp.lt.s32.totalorder %s5550_s17, 3 }
  0x15   : > { %5378 = dma.hbm_to_vmem [thread:$0]  (!%p5630_p9), %s178_s4, 49152, %s180_s6, %s165_s7, %s5552_s8, %s5553_s9, %s5554_s10  }
  0x16   : > { %s3440_s11 = sshll.u32 %s5623_s24, 3  ;;  %s3441_s12 = sshll.u32 %s5546_s16, 3 }
  0x17   : > { %p207_p12 = pnand %p3442_p10, %p206_p11  ;;  %s197_s21 = scalar_lea.hbm %s6588_s2, %s3441_s12 }
  0x18   : > { %s193_s25 = scalar_lea.vmem [#allocation4], %s3440_s11  ;;  %s199_s27 = sshll.u32 %s197_s21, 4  ;;  %s200_s27 = int_to_ptr.hbm [resolvable:$true] %s199_s27 }
  0x19   : > { %s201_s26 = sshll.u32 %s193_s25, 4  ;;  %s190_s28 = scalar_lea.sflag [#allocation5], %s5623_s24  ;;  %s202_s26 = int_to_ptr.vmem [resolvable:$true] %s201_s26 }
  0x1a   : > { %5381 = dma.hbm_to_vmem [thread:$0]  (!%p5630_p9), %s200_s27, 128, %s202_s26, %s190_s28  }
  0x1b   : > { %210 = sbr.rel (%p207_p12) target bundleno = 645 (0x285), region = 32  ;;  %s212_s29 = sand.u32 (!%p207_p12), 1, %s5534_s13  }
  0x1c   : > { %s5370_s4 = smul.u32 (!%p207_p12), 3072, %s212_s29  ;;  %s213_s5 = scalar_lea.sflag (!%p207_p12), [#allocation3], %s212_s29 }
  0x1e   : > { %s5648_s6 = scalar_lea.vmem (!%p207_p12), [#allocation2], %s5370_s4 }
  0x20   : > { %5521 = dma.done.wait (%p5614_p7), %s213_s5, 49152  }
  0x21   : > { %5523 = vsyncadd (%p5614_p7), %s213_s5, 4294918144  ;;  %s3443_s7 = sshll.u32 %s212_s29, 3  ;;  %s223_s8 = scalar_lea.sflag [#allocation5], %s212_s29 }
  0x22   : > { %s5654_s9 = scalar_lea.vmem [#allocation4], %s3443_s7 }
  0x23   : > { %5525 = dma.done.wait (%p5614_p7), %s223_s8, 128  }
  0x24   : > { %5527 = vsyncadd (%p5614_p7), %s223_s8, 4294967168  ;;  %v3672_v0 = vld [vmem:[%s5648_s6 + $0x1c0] sm:$0xf]  ;;  %s3444_s18 = sshll.u32 %s5542_s15, 3 }
  0x25   : > { %v5045_v1 = vld [vmem:[%s5648_s6 + $0x1dc] sm:$0xf0]  ;;  %p6116_p13 = scmp.lt.s32.totalorder %s3444_s18, 15 }
  0x26   : > { %v3928_v2 = vld [vmem:[%s5648_s6 + $0x3c0] sm:$0xf]  ;;  %v3673_v3 = vor.u32 %v5045_v1, %v3672_v0 }
  0x27   : > { %v5109_v4 = vld [vmem:[%s5648_s6 + $0x3dc] sm:$0xf0]  ;;  %s6601_s18 = smov (!%p6116_p13, %s3444_s18), 15 }
  0x28   : > { %v4184_v5 = vld [vmem:[%s5648_s6 + $0x5c0] sm:$0xf]  ;;  %v3929_v7 = vor.u32 %v5109_v4, %v3928_v2  ;;  %2615 = vmatpush.bf16.msra.mxu0 %v3673_v3  ;;  %s3445_s15 = sshll.u32 %s6601_s18, 3 }
  0x29   : > { %v5173_v6 = vld [vmem:[%s5648_s6 + $0x5dc] sm:$0xf0]  ;;  %s6158_s26 = scalar_lea.vmem %s6589_s3, %s3445_s15 }
  0x2a   : > { %v4185_v8 = vor.u32 %v5173_v6, %v4184_v5  ;;  %v4440_v9 = vld [vmem:[%s5648_s6 + $0x7c0] sm:$0xf]  ;;  %2628 = vmatpush.bf16.msra.mxu1 %v3929_v7 }
  0x2b   : > { %v5237_v10 = vld [vmem:[%s5648_s6 + $0x7dc] sm:$0xf0] }
  0x2c   : > { %v3640_v11 = vld [vmem:[%s5648_s6 + $0x180] sm:$0xf]  ;;  %v4441_v12 = vor.u32 %v5237_v10, %v4440_v9  ;;  %2641 = vmatpush.bf16.msra.mxu2 %v4185_v8 }
  0x2d   : > { %v5037_v13 = vld [vmem:[%s5648_s6 + $0x19c] sm:$0xf0] }
  0x2e   : > { %v3896_v14 = vld [vmem:[%s5648_s6 + $0x380] sm:$0xf]  ;;  %v3641_v16 = vor.u32 %v5037_v13, %v3640_v11  ;;  %2654 = vmatpush.bf16.msra.mxu3 %v4441_v12 }
  0x2f   : > { %v5101_v15 = vld [vmem:[%s5648_s6 + $0x39c] sm:$0xf0] }
  0x30   : > { %v3897_v17 = vor.u32 %v5101_v15, %v3896_v14  ;;  %v4152_v18 = vld [vmem:[%s5648_s6 + $0x580] sm:$0xf]  ;;  %2616 = vmatpush.bf16.msra.mxu0 %v3641_v16 }
  0x31   : > { %v5165_v19 = vld [vmem:[%s5648_s6 + $0x59c] sm:$0xf0] }
  0x32   : > { %v4408_v20 = vld [vmem:[%s5648_s6 + $0x780] sm:$0xf]  ;;  %v4153_v21 = vor.u32 %v5165_v19, %v4152_v18  ;;  %2629 = vmatpush.bf16.msra.mxu1 %v3897_v17 }
  0x33   : > { %v5229_v22 = vld [vmem:[%s5648_s6 + $0x79c] sm:$0xf0] }
  0x34   : > { %v3608_v23 = vld [vmem:[%s5648_s6 + $0x140] sm:$0xf]  ;;  %v4409_v25 = vor.u32 %v5229_v22, %v4408_v20  ;;  %2642 = vmatpush.bf16.msra.mxu2 %v4153_v21 }
  0x35   : > { %v5029_v24 = vld [vmem:[%s5648_s6 + $0x15c] sm:$0xf0] }
  0x36   : > { %v3864_v26 = vld [vmem:[%s5648_s6 + $0x340] sm:$0xf]  ;;  %v3609_v29 = vor.u32 %v5029_v24, %v3608_v23  ;;  %2655 = vmatpush.bf16.msra.mxu3 %v4409_v25 }
  0x37   : > { %v5093_v27 = vld [vmem:[%s5648_s6 + $0x35c] sm:$0xf0] }
  0x38   : > { %v4120_v28 = vld [vmem:[%s5648_s6 + $0x540] sm:$0xf]  ;;  %v3865_v33 = vor.u32 %v5093_v27, %v3864_v26  ;;  %2617 = vmatpush.bf16.msra.mxu0 %v3609_v29 }
  0x39   : > { %v5157_v30 = vld [vmem:[%s5648_s6 + $0x55c] sm:$0xf0] }
  0x3a   : > { %v4376_v31 = vld [vmem:[%s5648_s6 + $0x740] sm:$0xf]  ;;  %v4121_v34 = vor.u32 %v5157_v30, %v4120_v28  ;;  %2630 = vmatpush.bf16.msra.mxu1 %v3865_v33  ;;  %v5041_v33 = vld [vmem:[%s5648_s6 + $0x1c4] sm:$0xf] }
  0x3b   : > { %v5221_v32 = vld [vmem:[%s5648_s6 + $0x75c] sm:$0xf0] }
  0x3c   : > { %v3576_v35 = vld [vmem:[%s5648_s6 + $0x100] sm:$0xf]  ;;  %v4377_v38 = vor.u32 %v5221_v32, %v4376_v31  ;;  %2643 = vmatpush.bf16.msra.mxu2 %v4121_v34  ;;  %v3674_v34 = vld [vmem:[%s5648_s6 + $0x1e0] sm:$0xf0] }
  0x3d   : > { %v5021_v36 = vld [vmem:[%s5648_s6 + $0x11c] sm:$0xf0] }
  0x3e   : > { %v3832_v37 = vld [vmem:[%s5648_s6 + $0x300] sm:$0xf]  ;;  %v3577_v44 = vor.u32 %v5021_v36, %v3576_v35  ;;  %2656 = vmatpush.bf16.msra.mxu3 %v4377_v38  ;;  %v3930_v38 = vld [vmem:[%s5648_s6 + $0x3e0] sm:$0xf0] }
  0x3f   : > { %v5085_v39 = vld [vmem:[%s5648_s6 + $0x31c] sm:$0xf0] }
  0x40   : > { %v4088_v40 = vld [vmem:[%s5648_s6 + $0x500] sm:$0xf]  ;;  %v3833_v45 = vor.u32 %v5085_v39, %v3832_v37  ;;  %2618 = vmatpush.bf16.msra.mxu0 %v3577_v44  ;;  %v5105_v37 = vld [vmem:[%s5648_s6 + $0x3c4] sm:$0xf] }
  0x41   : > { %v5149_v41 = vld [vmem:[%s5648_s6 + $0x51c] sm:$0xf0] }
  0x42   : > { %v4344_v42 = vld [vmem:[%s5648_s6 + $0x700] sm:$0xf]  ;;  %v4089_v46 = vor.u32 %v5149_v41, %v4088_v40  ;;  %2631 = vmatpush.bf16.msra.mxu1 %v3833_v45 }
  0x43   : > { %v5213_v43 = vld [vmem:[%s5648_s6 + $0x71c] sm:$0xf0] }
  0x44   : > { %v3544_v47 = vld [vmem:[%s5648_s6 + $0xc0] sm:$0xf]  ;;  %v4345_v50 = vor.u32 %v5213_v43, %v4344_v42  ;;  %2644 = vmatpush.bf16.msra.mxu2 %v4089_v46  ;;  %v3677_v42 = vor.u32 %v5041_v33, %v3674_v34  ;;  %v3933_v46 = vor.u32 %v5105_v37, %v3930_v38  ;;  %v3802_v33 = vld [vmem:[%s5648_s6 + $0x2e0] sm:$0xf0] }
  0x45   : > { %v5013_v48 = vld [vmem:[%s5648_s6 + $0xdc] sm:$0xf0] }
  0x46   : > { %v3800_v49 = vld [vmem:[%s5648_s6 + $0x2c0] sm:$0xf]  ;;  %v3545_v56 = vor.u32 %v5013_v48, %v3544_v47  ;;  %2657 = vmatpush.bf16.msra.mxu3 %v4345_v50  ;;  %v5033_v48 = vld [vmem:[%s5648_s6 + $0x184] sm:$0xf] }
  0x47   : > { %v5077_v51 = vld [vmem:[%s5648_s6 + $0x2dc] sm:$0xf0]  ;;  %v5097_v50 = vld [vmem:[%s5648_s6 + $0x384] sm:$0xf] }
  0x48   : > { %v4056_v52 = vld [vmem:[%s5648_s6 + $0x4c0] sm:$0xf]  ;;  %v3801_v57 = vor.u32 %v5077_v51, %v3800_v49  ;;  %2619 = vmatpush.bf16.msra.mxu0 %v3545_v56  ;;  %v3642_v49 = vld [vmem:[%s5648_s6 + $0x1a0] sm:$0xf0] }
  0x49   : > { %v5141_v53 = vld [vmem:[%s5648_s6 + $0x4dc] sm:$0xf0]  ;;  %v3898_v51 = vld [vmem:[%s5648_s6 + $0x3a0] sm:$0xf0] }
  0x4a   : > { %v4312_v54 = vld [vmem:[%s5648_s6 + $0x6c0] sm:$0xf]  ;;  %v4057_v58 = vor.u32 %v5141_v53, %v4056_v52  ;;  %2632 = vmatpush.bf16.msra.mxu1 %v3801_v57 }
  0x4b   : > { %v5205_v55 = vld [vmem:[%s5648_s6 + $0x6dc] sm:$0xf0] }
  0x4c   : > { %v3512_v59 = vld [vmem:[%s5648_s6 + $0x80] sm:$0xf]  ;;  %v4313_v62 = vor.u32 %v5205_v55, %v4312_v54  ;;  %2645 = vmatpush.bf16.msra.mxu2 %v4057_v58  ;;  %v3645_v55 = vor.u32 %v5033_v48, %v3642_v49 }
  0x4d   : > { %v5005_v60 = vld [vmem:[%s5648_s6 + $0x9c] sm:$0xf0] }
  0x4e   : > { %v3768_v61 = vld [vmem:[%s5648_s6 + $0x280] sm:$0xf]  ;;  %v3513_v4 = vor.u32 %v5005_v60, %v3512_v59  ;;  %2658 = vmatpush.bf16.msra.mxu3 %v4313_v62  ;;  %v3901_v59 = vor.u32 %v5097_v50, %v3898_v51  ;;  %v5025_v60 = vld [vmem:[%s5648_s6 + $0x144] sm:$0xf] }
  0x4f   : > { %v5069_v63 = vld [vmem:[%s5648_s6 + $0x29c] sm:$0xf0]  ;;  %v5089_v62 = vld [vmem:[%s5648_s6 + $0x344] sm:$0xf] }
  0x50   : > { %v4024_v0 = vld [vmem:[%s5648_s6 + $0x480] sm:$0xf]  ;;  %v3769_v5 = vor.u32 %v5069_v63, %v3768_v61  ;;  %2620 = vmatpush.bf16.msra.mxu0 %v3513_v4  ;;  %v3610_v61 = vld [vmem:[%s5648_s6 + $0x160] sm:$0xf0] }
  0x51   : > { %v5133_v1 = vld [vmem:[%s5648_s6 + $0x49c] sm:$0xf0]  ;;  %v3866_v63 = vld [vmem:[%s5648_s6 + $0x360] sm:$0xf0]  ;;  %v3613_v4 = vor.u32 %v5025_v60, %v3610_v61 }
  0x52   : > { %v4280_v2 = vld [vmem:[%s5648_s6 + $0x680] sm:$0xf]  ;;  %v4025_v6 = vor.u32 %v5133_v1, %v4024_v0  ;;  %2633 = vmatpush.bf16.msra.mxu1 %v3769_v5 }
  0x53   : > { %v5197_v3 = vld [vmem:[%s5648_s6 + $0x69c] sm:$0xf0] }
  0x54   : > { %v3480_v7 = vld [vmem:[%s5648_s6 + $0x40] sm:$0xf]  ;;  %v4281_v10 = vor.u32 %v5197_v3, %v4280_v2  ;;  %2646 = vmatpush.bf16.msra.mxu2 %v4025_v6  ;;  %v288_v3 = vld [vmem:[%s6586_s0 + $0x8] sm:$0xff] }
  0x55   : > { %v4997_v8 = vld [vmem:[%s5648_s6 + $0x5c] sm:$0xf0] }
  0x56   : > { %v3736_v9 = vld [vmem:[%s5648_s6 + $0x240] sm:$0xf]  ;;  %v3481_v16 = vor.u32 %v4997_v8, %v3480_v7  ;;  %2659 = vmatpush.bf16.msra.mxu3 %v4281_v10 }
  0x57   : > { %v5061_v11 = vld [vmem:[%s5648_s6 + $0x25c] sm:$0xf0] }
  0x58   : > { %v3992_v12 = vld [vmem:[%s5648_s6 + $0x440] sm:$0xf]  ;;  %v3737_v19 = vor.u32 %v5061_v11, %v3736_v9  ;;  %2621 = vmatpush.bf16.msra.mxu0 %v3481_v16  ;;  %v679_v9 = vunpack.c.l.b16 %v288_v3  ;;  %v3869_v11 = vor.u32 %v5089_v62, %v3866_v63  ;;  %v5081_v16 = vld [vmem:[%s5648_s6 + $0x304] sm:$0xf] }
  0x59   : > { %v5125_v13 = vld [vmem:[%s5648_s6 + $0x45c] sm:$0xf0] }
  0x5a   : > { %v4248_v14 = vld [vmem:[%s5648_s6 + $0x640] sm:$0xf]  ;;  %v3993_v20 = vor.u32 %v5125_v13, %v3992_v12  ;;  %2634 = vmatpush.bf16.msra.mxu1 %v3737_v19  ;;  %v5017_v13 = vld [vmem:[%s5648_s6 + $0x104] sm:$0xf]  ;;  %v5764_v19 = vpack.c.b16 %v679_v9, %v679_v9 }
  0x5b   : > { %v5189_v15 = vld [vmem:[%s5648_s6 + $0x65c] sm:$0xf0]  ;;  %v5233_v9 = vld [vmem:[%s5648_s6 + $0x7c4] sm:$0xf] }
  0x5c   : > { %v3448_v17 = vld [vmem:[%s5648_s6] sm:$0xf]  ;;  %v4249_v24 = vor.u32 %v5189_v15, %v4248_v14  ;;  %2647 = vmatpush.bf16.msra.mxu2 %v3993_v20  ;;  %v3578_v14 = vld [vmem:[%s5648_s6 + $0x120] sm:$0xf0]  ;;  %v680_v15 = vunpack.c.h.b16 %v288_v3 }
  0x5d   : > { %v4989_v18 = vld [vmem:[%s5648_s6 + $0x1c] sm:$0xf0] }
  0x5e   : > { %v3704_v21 = vld [vmem:[%s5648_s6 + $0x200] sm:$0xf]  ;;  %v3449_v31 = vor.u32 %v4989_v18, %v3448_v17  ;;  %2660 = vmatpush.bf16.msra.mxu3 %v4249_v24  ;;  %v3834_v17 = vld [vmem:[%s5648_s6 + $0x320] sm:$0xf0]  ;;  %v3581_v24 = vor.u32 %v5017_v13, %v3578_v14 }
  0x5f   : > { %v5053_v22 = vld [vmem:[%s5648_s6 + $0x21c] sm:$0xf0]  ;;  %v4698_v13 = vld [vmem:[%s5648_s6 + $0x9e0] sm:$0xf0] }
  0x60   : > { %v3960_v23 = vld [vmem:[%s5648_s6 + $0x400] sm:$0xf]  ;;  %v3705_v35 = vor.u32 %v5053_v22, %v3704_v21  ;;  %2622 = vmatpush.bf16.msra.mxu0 %v3449_v31  ;;  %v5768_v22 = vpack.c.b16 %v680_v15, %v680_v15  ;;  %v3546_v31 = vld [vmem:[%s5648_s6 + $0xe0] sm:$0xf0] }
  0x61   : > { %v5117_v25 = vld [vmem:[%s5648_s6 + $0x41c] sm:$0xf0] }
  0x62   : > { %v4216_v26 = vld [vmem:[%s5648_s6 + $0x600] sm:$0xf]  ;;  %v3961_v36 = vor.u32 %v5117_v25, %v3960_v23  ;;  %2635 = vmatpush.bf16.msra.mxu1 %v3705_v35 }
  0x63   : > { %v5181_v27 = vld [vmem:[%s5648_s6 + $0x61c] sm:$0xf0] }
  0x64   : > { %v4696_v28 = vld [vmem:[%s5648_s6 + $0x9c0] sm:$0xf]  ;;  %v4217_v39 = vor.u32 %v5181_v27, %v4216_v26  ;;  %2648 = vmatpush.bf16.msra.mxu2 %v3961_v36 }
  0x65   : > { %v5301_v29 = vld [vmem:[%s5648_s6 + $0x9dc] sm:$0xf0] }
  0x66   : > { %v4952_v30 = vld [vmem:[%s5648_s6 + $0xbc0] sm:$0xf]  ;;  %v4697_v40 = vor.u32 %v5301_v29, %v4696_v28  ;;  %2661 = vmatpush.bf16.msra.mxu3 %v4217_v39  ;;  %v3837_v28 = vor.u32 %v5081_v16, %v3834_v17  ;;  %v5361_v17 = vld [vmem:[%s5648_s6 + $0xbc4] sm:$0xf] }
  0x67   : > { %v5365_v32 = vld [vmem:[%s5648_s6 + $0xbdc] sm:$0xf0]  ;;  %2649 = vmatmul.bf16.vlgmr.msra.gmra.mxu2 %v5764_v19 }
  0x68   : > { %v4953_v41 = vor.u32 %v5365_v32, %v4952_v30  ;;  %v4664_v43 = vld [vmem:[%s5648_s6 + $0x980] sm:$0xf]  ;;  %2667 = vmatpush.bf16.msrb.mxu0 %v4697_v40  ;;  %2693 = vmatpush.bf16.msrb.mxu2 %v3677_v42  ;;  %v5009_v30 = vld [vmem:[%s5648_s6 + $0xc4] sm:$0xf] }
  0x69   : > { %v5293_v44 = vld [vmem:[%s5648_s6 + $0x99c] sm:$0xf0]  ;;  %v5073_v32 = vld [vmem:[%s5648_s6 + $0x2c4] sm:$0xf]  ;;  %2662 = vmatmul.bf16.vlgmr.msra.gmra.mxu3 %v5768_v22  ;;  %v3549_v36 = vor.u32 %v5009_v30, %v3546_v31 }
  0x6a   : > { %v4920_v45 = vld [vmem:[%s5648_s6 + $0xb80] sm:$0xf]  ;;  %v4665_v52 = vor.u32 %v5293_v44, %v4664_v43  ;;  %2680 = vmatpush.bf16.msrb.mxu1 %v4953_v41  ;;  %2706 = vmatpush.bf16.msrb.mxu3 %v3933_v46  ;;  %v3805_v40 = vor.u32 %v5073_v32, %v3802_v33  ;;  %v5001_v42 = vld [vmem:[%s5648_s6 + $0x84] sm:$0xf] }
  0x6b   : > { %v5357_v47 = vld [vmem:[%s5648_s6 + $0xb9c] sm:$0xf0]  ;;  %v3514_v43 = vld [vmem:[%s5648_s6 + $0xa0] sm:$0xf0] }
  0x6c   : > { %v4632_v53 = vld [vmem:[%s5648_s6 + $0x940] sm:$0xf]  ;;  %v4921_v54 = vor.u32 %v5357_v47, %v4920_v45  ;;  %2668 = vmatpush.bf16.msrb.mxu0 %v4665_v52  ;;  %2694 = vmatpush.bf16.msrb.mxu2 %v3645_v55  ;;  %v5065_v44 = vld [vmem:[%s5648_s6 + $0x284] sm:$0xf]  ;;  %v3517_v48 = vor.u32 %v5001_v42, %v3514_v43 }
  0x6d   : > { %v5285_v56 = vld [vmem:[%s5648_s6 + $0x95c] sm:$0xf0]  ;;  %v3770_v45 = vld [vmem:[%s5648_s6 + $0x2a0] sm:$0xf0] }
  0x6e   : > { %v4888_v57 = vld [vmem:[%s5648_s6 + $0xb40] sm:$0xf]  ;;  %v4633_v0 = vor.u32 %v5285_v56, %v4632_v53  ;;  %2681 = vmatpush.bf16.msrb.mxu1 %v4921_v54  ;;  %2707 = vmatpush.bf16.msrb.mxu3 %v3901_v59  ;;  %v3773_v52 = vor.u32 %v5065_v44, %v3770_v45  ;;  %v4993_v54 = vld [vmem:[%s5648_s6 + $0x44] sm:$0xf] }
  0x6f   : > { %v5349_v58 = vld [vmem:[%s5648_s6 + $0xb5c] sm:$0xf0]  ;;  %v3482_v55 = vld [vmem:[%s5648_s6 + $0x60] sm:$0xf0] }
  0x70   : > { %v4889_v1 = vor.u32 %v5349_v58, %v4888_v57  ;;  %v287_v2 = vld [vmem:[%s6586_s0] sm:$0xff]  ;;  %2669 = vmatpush.bf16.msrb.mxu0 %v4633_v0  ;;  %2695 = vmatpush.bf16.msrb.mxu2 %v3613_v4  ;;  %v3485_v63 = vor.u32 %v4993_v54, %v3482_v55 }
  0x71   : > { %v4600_v5 = vld [vmem:[%s5648_s6 + $0x900] sm:$0xf]  ;;  %v677_v8 = vunpack.c.l.b16 %v287_v2  ;;  %v678_v10 = vunpack.c.h.b16 %v287_v2  ;;  %v5057_v56 = vld [vmem:[%s5648_s6 + $0x244] sm:$0xf]  ;;  %v289_v2 = vld [vmem:[%s6586_s0 + $0x10] sm:$0xff] }
  0x72   : > { %v5277_v6 = vld [vmem:[%s5648_s6 + $0x91c] sm:$0xf0]  ;;  %2682 = vmatpush.bf16.msrb.mxu1 %v4889_v1  ;;  %2708 = vmatpush.bf16.msrb.mxu3 %v3869_v11  ;;  %v3738_v57 = vld [vmem:[%s5648_s6 + $0x260] sm:$0xf0]  ;;  %v681_v14 = vunpack.c.l.b16 %v289_v2 }
  0x73   : > { %v4856_v7 = vld [vmem:[%s5648_s6 + $0xb00] sm:$0xf]  ;;  %v5762_v18 = vpack.c.b16 %v677_v8, %v677_v8  ;;  %v5766_v20 = vpack.c.b16 %v678_v10, %v678_v10  ;;  %v4601_v21 = vor.u32 %v5277_v6, %v4600_v5  ;;  %v4985_v1 = vld [vmem:[%s5648_s6 + $0x4] sm:$0xf]  ;;  %v3741_v3 = vor.u32 %v5057_v56, %v3738_v57 }
  0x74   : > { %v5341_v12 = vld [vmem:[%s5648_s6 + $0xb1c] sm:$0xf0]  ;;  %2696 = vmatpush.bf16.msrb.mxu2 %v3581_v24  ;;  %v3450_v4 = vld [vmem:[%s5648_s6 + $0x20] sm:$0xf0] }
  0x75   : > { %v4857_v23 = vor.u32 %v5341_v12, %v4856_v7  ;;  %v4568_v25 = vld [vmem:[%s5648_s6 + $0x8c0] sm:$0xf]  ;;  %2623 = vmatmul.bf16.vlgmr.msra.gmra.mxu0 %v5762_v18  ;;  %2636 = vmatmul.bf16.vlgmr.msra.gmra.mxu1 %v5766_v20  ;;  %v5049_v5 = vld [vmem:[%s5648_s6 + $0x204] sm:$0xf]  ;;  %v3453_v16 = vor.u32 %v4985_v1, %v3450_v4 }
  0x76   : > { %v5269_v26 = vld [vmem:[%s5648_s6 + $0x8dc] sm:$0xf0]  ;;  %2670 = vmatpush.bf16.msrb.mxu0 %v4601_v21  ;;  %2709 = vmatpush.bf16.msrb.mxu3 %v3837_v28  ;;  %v3706_v6 = vld [vmem:[%s5648_s6 + $0x220] sm:$0xf0] }
  0x77   : > { %v4824_v27 = vld [vmem:[%s5648_s6 + $0xac0] sm:$0xf]  ;;  %v4569_v34 = vor.u32 %v5269_v26, %v4568_v25  ;;  %2683 = vmatpush.bf16.msrb.mxu1 %v4857_v23  ;;  %v5169_v7 = vld [vmem:[%s5648_s6 + $0x5c4] sm:$0xf]  ;;  %v682_v23 = vunpack.c.h.b16 %v289_v2  ;;  %v3709_v24 = vor.u32 %v5049_v5, %v3706_v6 }
  0x78   : > { %v5333_v29 = vld [vmem:[%s5648_s6 + $0xadc] sm:$0xf0]  ;;  %2697 = vmatpush.bf16.msrb.mxu2 %v3549_v36  ;;  %v4186_v8 = vld [vmem:[%s5648_s6 + $0x5e0] sm:$0xf0] }
  0x79   : > { %v4825_v35 = vor.u32 %v5333_v29, %v4824_v27  ;;  %v4536_v37 = vld [vmem:[%s5648_s6 + $0x880] sm:$0xf]  ;;  %v4442_v11 = vld [vmem:[%s5648_s6 + $0x7e0] sm:$0xf0]  ;;  %v4189_v25 = vor.u32 %v5169_v7, %v4186_v8 }
  0x7a   : > { %v5261_v38 = vld [vmem:[%s5648_s6 + $0x89c] sm:$0xf0]  ;;  %2671 = vmatpush.bf16.msrb.mxu0 %v4569_v34  ;;  %2710 = vmatpush.bf16.msrb.mxu3 %v3805_v40  ;;  %v5297_v12 = vld [vmem:[%s5648_s6 + $0x9c4] sm:$0xf]  ;;  %v4445_v26 = vor.u32 %v5233_v9, %v4442_v11 }
  0x7b   : > { %v4792_v39 = vld [vmem:[%s5648_s6 + $0xa80] sm:$0xf]  ;;  %v4537_v46 = vor.u32 %v5261_v38, %v4536_v37  ;;  %2684 = vmatpush.bf16.msrb.mxu1 %v4825_v35  ;;  %v4954_v21 = vld [vmem:[%s5648_s6 + $0xbe0] sm:$0xf0]  ;;  %v4701_v27 = vor.u32 %v5297_v12, %v4698_v13  ;;  %v5823_v35 = vpack.c.b16 %v681_v14, %v681_v14  ;;  %v5827_v38 = vpack.c.b16 %v682_v23, %v682_v23 }
  0x7c   : > { %v5325_v41 = vld [vmem:[%s5648_s6 + $0xa9c] sm:$0xf0]  ;;  %2698 = vmatpush.bf16.msrb.mxu2 %v3517_v48  ;;  %v5161_v28 = vld [vmem:[%s5648_s6 + $0x584] sm:$0xf]  ;;  %v4957_v31 = vor.u32 %v5361_v17, %v4954_v21 }
  0x7d   : > { %v4793_v47 = vor.u32 %v5325_v41, %v4792_v39  ;;  %v4504_v49 = vld [vmem:[%s5648_s6 + $0x840] sm:$0xf]  ;;  %v4154_v29 = vld [vmem:[%s5648_s6 + $0x5a0] sm:$0xf0] }
  0x7e   : > { %v5253_v50 = vld [vmem:[%s5648_s6 + $0x85c] sm:$0xf0]  ;;  %2672 = vmatpush.bf16.msrb.mxu0 %v4537_v46  ;;  %2711 = vmatpush.bf16.msrb.mxu3 %v3773_v52  ;;  %v5225_v30 = vld [vmem:[%s5648_s6 + $0x784] sm:$0xf]  ;;  %v4157_v39 = vor.u32 %v5161_v28, %v4154_v29 }
  0x7f   : > { %v4760_v51 = vld [vmem:[%s5648_s6 + $0xa40] sm:$0xf]  ;;  %v4505_v58 = vor.u32 %v5253_v50, %v4504_v49  ;;  %2685 = vmatpush.bf16.msrb.mxu1 %v4793_v47  ;;  %v4410_v32 = vld [vmem:[%s5648_s6 + $0x7a0] sm:$0xf0] }
  0x80   : > { %v5317_v53 = vld [vmem:[%s5648_s6 + $0xa5c] sm:$0xf0]  ;;  %2699 = vmatpush.bf16.msrb.mxu2 %v3485_v63  ;;  %v5289_v33 = vld [vmem:[%s5648_s6 + $0x984] sm:$0xf]  ;;  %v4413_v40 = vor.u32 %v5225_v30, %v4410_v32 }
  0x81   : > { %v4472_v59 = vld [vmem:[%s5648_s6 + $0x800] sm:$0xf]  ;;  %v4761_v62 = vor.u32 %v5317_v53, %v4760_v51  ;;  %v4666_v34 = vld [vmem:[%s5648_s6 + $0x9a0] sm:$0xf0] }
  0x82   : > { %v5245_v60 = vld [vmem:[%s5648_s6 + $0x81c] sm:$0xf0]  ;;  %2673 = vmatpush.bf16.msrb.mxu0 %v4505_v58  ;;  %2712 = vmatpush.bf16.msrb.mxu3 %v3741_v3  ;;  %v5353_v36 = vld [vmem:[%s5648_s6 + $0xb84] sm:$0xf]  ;;  %v4669_v41 = vor.u32 %v5289_v33, %v4666_v34 }
  0x83   : > { %v4728_v61 = vld [vmem:[%s5648_s6 + $0xa00] sm:$0xf]  ;;  %v4473_v10 = vor.u32 %v5245_v60, %v4472_v59  ;;  %2686 = vmatpush.bf16.msrb.mxu1 %v4761_v62  ;;  %v4922_v37 = vld [vmem:[%s5648_s6 + $0xba0] sm:$0xf0] }
  0x84   : > { %v5309_v0 = vld [vmem:[%s5648_s6 + $0xa1c] sm:$0xf0]  ;;  %2700 = vmatpush.bf16.msrb.mxu2 %v3453_v16  ;;  %v5153_v42 = vld [vmem:[%s5648_s6 + $0x544] sm:$0xf]  ;;  %v4925_v45 = vor.u32 %v5353_v36, %v4922_v37 }
  0x85   : > { %v4729_v15 = vor.u32 %v5309_v0, %v4728_v61  ;;  %v4122_v43 = vld [vmem:[%s5648_s6 + $0x560] sm:$0xf0] }
  0x86   : > { %2674 = vmatpush.bf16.msrb.mxu0 %v4473_v10  ;;  %2713 = vmatpush.bf16.msrb.mxu3 %v3709_v24  ;;  %v5217_v44 = vld [vmem:[%s5648_s6 + $0x744] sm:$0xf]  ;;  %v4125_v51 = vor.u32 %v5153_v42, %v4122_v43 }
  0x87   : > { %2687 = vmatpush.bf16.msrb.mxu1 %v4729_v15  ;;  %v4378_v46 = vld [vmem:[%s5648_s6 + $0x760] sm:$0xf0]  ;;  %2701 = vmatmul.bf16.vlgmr.msrb.gmra.mxu2 %v5762_v18 }
  0x88   : > { %2745 = vmatpush.bf16.msra.mxu2 %v4701_v27  ;;  %v5281_v47 = vld [vmem:[%s5648_s6 + $0x944] sm:$0xf]  ;;  %v4381_v52 = vor.u32 %v5217_v44, %v4378_v46 }
  0x89   : > { %2675 = vmatmul.bf16.vlgmr.msrb.gmra.mxu0 %v5823_v35  ;;  %v4634_v48 = vld [vmem:[%s5648_s6 + $0x960] sm:$0xf0]  ;;  %2714 = vmatmul.bf16.vlgmr.msrb.gmra.mxu3 %v5766_v20 }
  0x8a   : > { %2719 = vmatpush.bf16.msra.mxu0 %v4189_v25  ;;  %2758 = vmatpush.bf16.msra.mxu3 %v4957_v31  ;;  %v5345_v49 = vld [vmem:[%s5648_s6 + $0xb44] sm:$0xf]  ;;  %v4637_v53 = vor.u32 %v5281_v47, %v4634_v48 }
  0x8b   : > { %2732 = vmatpush.bf16.msra.mxu1 %v4445_v26  ;;  %v4890_v50 = vld [vmem:[%s5648_s6 + $0xb60] sm:$0xf0] }
  0x8c   : > { %2688 = vmatmul.bf16.vlgmr.msrb.gmra.mxu1 %v5827_v38  ;;  %2746 = vmatpush.bf16.msra.mxu2 %v4669_v41  ;;  %v5145_v54 = vld [vmem:[%s5648_s6 + $0x504] sm:$0xf]  ;;  %v4893_v57 = vor.u32 %v5345_v49, %v4890_v50 }
  0x8d   : > { %v4090_v55 = vld [vmem:[%s5648_s6 + $0x520] sm:$0xf0] }
  0x8e   : > { %2720 = vmatpush.bf16.msra.mxu0 %v4157_v39  ;;  %v5209_v56 = vld [vmem:[%s5648_s6 + $0x704] sm:$0xf]  ;;  %2759 = vmatpush.bf16.msra.mxu3 %v4925_v45  ;;  %v4093_v63 = vor.u32 %v5145_v54, %v4090_v55  ;;  %v5046_v54 = vld [vmem:[%s5648_s6 + $0x1e4] sm:$0xf0] }
  0x8f   : > { %2733 = vmatpush.bf16.msra.mxu1 %v4413_v40  ;;  %v4346_v58 = vld [vmem:[%s5648_s6 + $0x720] sm:$0xf0]  ;;  %v3936_v55 = vld [vmem:[%s5648_s6 + $0x3c8] sm:$0xf] }
  0x90   : > { %v5273_v59 = vld [vmem:[%s5648_s6 + $0x904] sm:$0xf]  ;;  %2747 = vmatpush.bf16.msra.mxu2 %v4637_v53  ;;  %v4349_v0 = vor.u32 %v5209_v56, %v4346_v58  ;;  %v3680_v53 = vld [vmem:[%s5648_s6 + $0x1c8] sm:$0xf] }
  0x91   : > { %v4602_v60 = vld [vmem:[%s5648_s6 + $0x920] sm:$0xf0]  ;;  %v4192_v58 = vld [vmem:[%s5648_s6 + $0x5c8] sm:$0xf] }
  0x92   : > { %v5337_v61 = vld [vmem:[%s5648_s6 + $0xb04] sm:$0xf]  ;;  %2721 = vmatpush.bf16.msra.mxu0 %v4125_v51  ;;  %v4605_v1 = vor.u32 %v5273_v59, %v4602_v60  ;;  %2760 = vmatpush.bf16.msra.mxu3 %v4893_v57  ;;  %v5110_v57 = vld [vmem:[%s5648_s6 + $0x3e4] sm:$0xf0] }
  0x93   : > { %v4858_v62 = vld [vmem:[%s5648_s6 + $0xb20] sm:$0xf0]  ;;  %2734 = vmatpush.bf16.msra.mxu1 %v4381_v52  ;;  %v5174_v59 = vld [vmem:[%s5648_s6 + $0x5e4] sm:$0xf0] }
  0x94   : > { %v5137_v2 = vld [vmem:[%s5648_s6 + $0x4c4] sm:$0xf]  ;;  %v4861_v5 = vor.u32 %v5337_v61, %v4858_v62  ;;  %2748 = vmatpush.bf16.msra.mxu2 %v4605_v1  ;;  %v4448_v62 = vld [vmem:[%s5648_s6 + $0x7c8] sm:$0xf]  ;;  %v3681_v1 = vor.u32 %v5046_v54, %v3680_v53 }
  0x95   : > { %v4058_v3 = vld [vmem:[%s5648_s6 + $0x4e0] sm:$0xf0]  ;;  %v4320_v53 = vld [vmem:[%s5648_s6 + $0x6c8] sm:$0xf] }
  0x96   : > { %v5201_v4 = vld [vmem:[%s5648_s6 + $0x6c4] sm:$0xf]  ;;  %2722 = vmatpush.bf16.msra.mxu0 %v4093_v63  ;;  %v4061_v11 = vor.u32 %v5137_v2, %v4058_v3  ;;  %2761 = vmatpush.bf16.msra.mxu3 %v4861_v5  ;;  %v5238_v63 = vld [vmem:[%s5648_s6 + $0x7e4] sm:$0xf0]  ;;  %v3937_v2 = vor.u32 %v5110_v57, %v3936_v55  ;;  %v4193_v3 = vor.u32 %v5174_v59, %v4192_v58 }
  0x97   : > { %v4314_v6 = vld [vmem:[%s5648_s6 + $0x6e0] sm:$0xf0]  ;;  %2735 = vmatpush.bf16.msra.mxu1 %v4349_v0  ;;  %v5038_v5 = vld [vmem:[%s5648_s6 + $0x1a4] sm:$0xf0] }
  0x98   : > { %v5265_v7 = vld [vmem:[%s5648_s6 + $0x8c4] sm:$0xf]  ;;  %v4317_v12 = vor.u32 %v5201_v4, %v4314_v6  ;;  %v3648_v4 = vld [vmem:[%s5648_s6 + $0x188] sm:$0xf] }
  0x99   : > { %v4570_v8 = vld [vmem:[%s5648_s6 + $0x8e0] sm:$0xf0]  ;;  %v3904_v6 = vld [vmem:[%s5648_s6 + $0x388] sm:$0xf] }
  0x9a   : > { %v5329_v9 = vld [vmem:[%s5648_s6 + $0xac4] sm:$0xf]  ;;  %v4573_v13 = vor.u32 %v5265_v7, %v4570_v8  ;;  %2723 = vmatpush.bf16.msra.mxu0 %v4061_v11  ;;  %v4449_v7 = vor.u32 %v5238_v63, %v4448_v62  ;;  %v5102_v8 = vld [vmem:[%s5648_s6 + $0x3a4] sm:$0xf0] }
  0x9b   : > { %v4826_v10 = vld [vmem:[%s5648_s6 + $0xae0] sm:$0xf0]  ;;  %2736 = vmatpush.bf16.msra.mxu1 %v4317_v12  ;;  %v4416_v11 = vld [vmem:[%s5648_s6 + $0x788] sm:$0xf] }
  0x9c   : > { %v5129_v14 = vld [vmem:[%s5648_s6 + $0x484] sm:$0xf]  ;;  %v4829_v17 = vor.u32 %v5329_v9, %v4826_v10  ;;  %2749 = vmatpush.bf16.msra.mxu2 %v4573_v13  ;;  %v4160_v9 = vld [vmem:[%s5648_s6 + $0x588] sm:$0xf]  ;;  %v3649_v13 = vor.u32 %v5038_v5, %v3648_v4 }
  0x9d   : > { %v4026_v15 = vld [vmem:[%s5648_s6 + $0x4a0] sm:$0xf0]  ;;  %v5166_v10 = vld [vmem:[%s5648_s6 + $0x5a4] sm:$0xf0] }
  0x9e   : > { %v5193_v16 = vld [vmem:[%s5648_s6 + $0x684] sm:$0xf]  ;;  %v4029_v27 = vor.u32 %v5129_v14, %v4026_v15  ;;  %2762 = vmatpush.bf16.msra.mxu3 %v4829_v17  ;;  %v5230_v12 = vld [vmem:[%s5648_s6 + $0x7a4] sm:$0xf0]  ;;  %v3905_v14 = vor.u32 %v5102_v8, %v3904_v6  ;;  %v4161_v15 = vor.u32 %v5166_v10, %v4160_v9 }
  0x9f   : > { %v4282_v21 = vld [vmem:[%s5648_s6 + $0x6a0] sm:$0xf0]  ;;  %v5030_v17 = vld [vmem:[%s5648_s6 + $0x164] sm:$0xf0] }
  0xa0   : > { %v5257_v23 = vld [vmem:[%s5648_s6 + $0x884] sm:$0xf]  ;;  %v4285_v28 = vor.u32 %v5193_v16, %v4282_v21  ;;  %2724 = vmatpush.bf16.msra.mxu0 %v4029_v27  ;;  %v3616_v16 = vld [vmem:[%s5648_s6 + $0x148] sm:$0xf] }
  0xa1   : > { %v4538_v24 = vld [vmem:[%s5648_s6 + $0x8a0] sm:$0xf0]  ;;  %v3872_v21 = vld [vmem:[%s5648_s6 + $0x348] sm:$0xf] }
  0xa2   : > { %v5321_v25 = vld [vmem:[%s5648_s6 + $0xa84] sm:$0xf]  ;;  %v4541_v29 = vor.u32 %v5257_v23, %v4538_v24  ;;  %2737 = vmatpush.bf16.msra.mxu1 %v4285_v28  ;;  %v4417_v23 = vor.u32 %v5230_v12, %v4416_v11  ;;  %v5094_v24 = vld [vmem:[%s5648_s6 + $0x364] sm:$0xf0] }
  0xa3   : > { %v4794_v26 = vld [vmem:[%s5648_s6 + $0xaa0] sm:$0xf0]  ;;  %v4384_v27 = vld [vmem:[%s5648_s6 + $0x748] sm:$0xf] }
  0xa4   : > { %v5121_v30 = vld [vmem:[%s5648_s6 + $0x444] sm:$0xf]  ;;  %v4797_v33 = vor.u32 %v5321_v25, %v4794_v26  ;;  %2750 = vmatpush.bf16.msra.mxu2 %v4541_v29  ;;  %v4128_v25 = vld [vmem:[%s5648_s6 + $0x548] sm:$0xf]  ;;  %v3617_v29 = vor.u32 %v5030_v17, %v3616_v16 }
  0xa5   : > { %v3994_v31 = vld [vmem:[%s5648_s6 + $0x460] sm:$0xf0]  ;;  %v5158_v26 = vld [vmem:[%s5648_s6 + $0x564] sm:$0xf0] }
  0xa6   : > { %v5185_v32 = vld [vmem:[%s5648_s6 + $0x644] sm:$0xf]  ;;  %v3997_v41 = vor.u32 %v5121_v30, %v3994_v31  ;;  %2763 = vmatpush.bf16.msra.mxu3 %v4797_v33  ;;  %v5222_v28 = vld [vmem:[%s5648_s6 + $0x764] sm:$0xf0]  ;;  %v3873_v30 = vor.u32 %v5094_v24, %v3872_v21  ;;  %v4129_v31 = vor.u32 %v5158_v26, %v4128_v25 }
  0xa7   : > { %v4250_v34 = vld [vmem:[%s5648_s6 + $0x660] sm:$0xf0]  ;;  %v5022_v33 = vld [vmem:[%s5648_s6 + $0x124] sm:$0xf0] }
  0xa8   : > { %v5249_v36 = vld [vmem:[%s5648_s6 + $0x844] sm:$0xf]  ;;  %v4253_v44 = vor.u32 %v5185_v32, %v4250_v34  ;;  %2725 = vmatpush.bf16.msra.mxu0 %v3997_v41  ;;  %v3584_v32 = vld [vmem:[%s5648_s6 + $0x108] sm:$0xf] }
  0xa9   : > { %v4506_v37 = vld [vmem:[%s5648_s6 + $0x860] sm:$0xf0]  ;;  %v3840_v34 = vld [vmem:[%s5648_s6 + $0x308] sm:$0xf] }
  0xaa   : > { %v5313_v39 = vld [vmem:[%s5648_s6 + $0xa44] sm:$0xf]  ;;  %v4509_v45 = vor.u32 %v5249_v36, %v4506_v37  ;;  %2738 = vmatpush.bf16.msra.mxu1 %v4253_v44  ;;  %v4385_v36 = vor.u32 %v5222_v28, %v4384_v27  ;;  %v5086_v37 = vld [vmem:[%s5648_s6 + $0x324] sm:$0xf0] }
  0xab   : > { %v4762_v40 = vld [vmem:[%s5648_s6 + $0xa60] sm:$0xf0]  ;;  %v4352_v41 = vld [vmem:[%s5648_s6 + $0x708] sm:$0xf]  ;;  %v3841_v44 = vor.u32 %v5086_v37, %v3840_v34  ;;  %v5042_v37 = vld [vmem:[%s5648_s6 + $0x1cc] sm:$0xf] }
  0xac   : > { %v5113_v42 = vld [vmem:[%s5648_s6 + $0x404] sm:$0xf]  ;;  %v4765_v49 = vor.u32 %v5313_v39, %v4762_v40  ;;  %2751 = vmatpush.bf16.msra.mxu2 %v4509_v45  ;;  %v4096_v39 = vld [vmem:[%s5648_s6 + $0x508] sm:$0xf] }
  0xad   : > { %v3962_v43 = vld [vmem:[%s5648_s6 + $0x420] sm:$0xf0]  ;;  %v5150_v40 = vld [vmem:[%s5648_s6 + $0x524] sm:$0xf0] }
  0xae   : > { %v5177_v46 = vld [vmem:[%s5648_s6 + $0x604] sm:$0xf]  ;;  %v3965_v56 = vor.u32 %v5113_v42, %v3962_v43  ;;  %2764 = vmatpush.bf16.msra.mxu3 %v4765_v49  ;;  %v5214_v42 = vld [vmem:[%s5648_s6 + $0x724] sm:$0xf0]  ;;  %v3585_v43 = vor.u32 %v5022_v33, %v3584_v32  ;;  %v4097_v45 = vor.u32 %v5150_v40, %v4096_v39  ;;  %v3682_v39 = vld [vmem:[%s5648_s6 + $0x1e8] sm:$0xf0] }
  0xaf   : > { %v4218_v47 = vld [vmem:[%s5648_s6 + $0x620] sm:$0xf0]  ;;  %v4353_v49 = vor.u32 %v5214_v42, %v4352_v41  ;;  %v5206_v54 = vld [vmem:[%s5648_s6 + $0x6e4] sm:$0xf0]  ;;  %v5106_v42 = vld [vmem:[%s5648_s6 + $0x3cc] sm:$0xf] }
  0xb0   : > { %v5241_v48 = vld [vmem:[%s5648_s6 + $0x804] sm:$0xf]  ;;  %v4221_v60 = vor.u32 %v5177_v46, %v4218_v47  ;;  %2726 = vmatpush.bf16.msra.mxu0 %v3965_v56  ;;  %v3552_v46 = vld [vmem:[%s5648_s6 + $0xc8] sm:$0xf] }
  0xb1   : > { %v4474_v50 = vld [vmem:[%s5648_s6 + $0x820] sm:$0xf0]  ;;  %v5014_v47 = vld [vmem:[%s5648_s6 + $0xe4] sm:$0xf0] }
  0xb2   : > { %v5305_v51 = vld [vmem:[%s5648_s6 + $0xa04] sm:$0xf]  ;;  %v4477_v61 = vor.u32 %v5241_v48, %v4474_v50  ;;  %2739 = vmatpush.bf16.msra.mxu1 %v4221_v60  ;;  %v3808_v48 = vld [vmem:[%s5648_s6 + $0x2c8] sm:$0xf]  ;;  %v3553_v55 = vor.u32 %v5014_v47, %v3552_v46  ;;  %v3685_v47 = vor.u32 %v5042_v37, %v3682_v39 }
  0xb3   : > { %v4730_v52 = vld [vmem:[%s5648_s6 + $0xa20] sm:$0xf0]  ;;  %2727 = vmatmul.bf16.vlgmr.msra.gmra.mxu0 %v5764_v19  ;;  %v5078_v50 = vld [vmem:[%s5648_s6 + $0x2e4] sm:$0xf0] }
  0xb4   : > { %v4733_v0 = vor.u32 %v5305_v51, %v4730_v52  ;;  %2752 = vmatpush.bf16.msra.mxu2 %v4477_v61  ;;  %2771 = vmatpush.bf16.msrb.mxu0 %v3681_v1  ;;  %v4064_v51 = vld [vmem:[%s5648_s6 + $0x4c8] sm:$0xf]  ;;  %v3809_v56 = vor.u32 %v5078_v50, %v3808_v48  ;;  %v4321_v61 = vor.u32 %v5206_v54, %v4320_v53  ;;  %v5034_v53 = vld [vmem:[%s5648_s6 + $0x18c] sm:$0xf] }
  0xb5   : > { %2740 = vmatmul.bf16.vlgmr.msra.gmra.mxu1 %v5768_v22  ;;  %v5142_v52 = vld [vmem:[%s5648_s6 + $0x4e4] sm:$0xf0]  ;;  %v3650_v54 = vld [vmem:[%s5648_s6 + $0x1a8] sm:$0xf0] }
  0xb6   : > { %2765 = vmatpush.bf16.msra.mxu3 %v4733_v0  ;;  %2784 = vmatpush.bf16.msrb.mxu1 %v3937_v2  ;;  %v4065_v57 = vor.u32 %v5142_v52, %v4064_v51  ;;  %v3520_v58 = vld [vmem:[%s5648_s6 + $0x88] sm:$0xf] }
  0xb7   : > { %2753 = vmatmul.bf16.vlgmr.msra.gmra.mxu2 %v5823_v35  ;;  %v5006_v59 = vld [vmem:[%s5648_s6 + $0xa4] sm:$0xf0] }
  0xb8   : > { %2797 = vmatpush.bf16.msrb.mxu2 %v4193_v3  ;;  %2772 = vmatpush.bf16.msrb.mxu0 %v3649_v13  ;;  %v3776_v60 = vld [vmem:[%s5648_s6 + $0x288] sm:$0xf]  ;;  %v3521_v3 = vor.u32 %v5006_v59, %v3520_v58  ;;  %v3653_v59 = vor.u32 %v5034_v53, %v3650_v54 }
  0xb9   : > { %2766 = vmatmul.bf16.vlgmr.msra.gmra.mxu3 %v5827_v38  ;;  %v5070_v62 = vld [vmem:[%s5648_s6 + $0x2a4] sm:$0xf0] }
  0xba   : > { %2810 = vmatpush.bf16.msrb.mxu3 %v4449_v7  ;;  %2785 = vmatpush.bf16.msrb.mxu1 %v3905_v14  ;;  %v4032_v63 = vld [vmem:[%s5648_s6 + $0x488] sm:$0xf]  ;;  %v3777_v4 = vor.u32 %v5070_v62, %v3776_v60 }
  0xbb   : > { %v5134_v0 = vld [vmem:[%s5648_s6 + $0x4a4] sm:$0xf0] }
  0xbc   : > { %2798 = vmatpush.bf16.msrb.mxu2 %v4161_v15  ;;  %2773 = vmatpush.bf16.msrb.mxu0 %v3617_v29  ;;  %v4288_v1 = vld [vmem:[%s5648_s6 + $0x688] sm:$0xf]  ;;  %v4033_v5 = vor.u32 %v5134_v0, %v4032_v63 }
  0xbd   : > { %v5198_v2 = vld [vmem:[%s5648_s6 + $0x6a4] sm:$0xf0] }
  0xbe   : > { %2811 = vmatpush.bf16.msrb.mxu3 %v4417_v23  ;;  %2786 = vmatpush.bf16.msrb.mxu1 %v3873_v30  ;;  %v3488_v6 = vld [vmem:[%s5648_s6 + $0x48] sm:$0xf]  ;;  %v4289_v9 = vor.u32 %v5198_v2, %v4288_v1  ;;  %v5026_v1 = vld [vmem:[%s5648_s6 + $0x14c] sm:$0xf] }
  0xbf   : > { %v4998_v7 = vld [vmem:[%s5648_s6 + $0x64] sm:$0xf0]  ;;  %v3618_v2 = vld [vmem:[%s5648_s6 + $0x168] sm:$0xf0] }
  0xc0   : > { %2799 = vmatpush.bf16.msrb.mxu2 %v4129_v31  ;;  %2774 = vmatpush.bf16.msrb.mxu0 %v3585_v43  ;;  %v3744_v8 = vld [vmem:[%s5648_s6 + $0x248] sm:$0xf]  ;;  %v3489_v15 = vor.u32 %v4998_v7, %v3488_v6  ;;  %v3938_v43 = vld [vmem:[%s5648_s6 + $0x3e8] sm:$0xf0]  ;;  %v3621_v7 = vor.u32 %v5026_v1, %v3618_v2 }
  0xc1   : > { %v5062_v10 = vld [vmem:[%s5648_s6 + $0x264] sm:$0xf0]  ;;  %v3941_v51 = vor.u32 %v5106_v42, %v3938_v43  ;;  %v5002_v43 = vld [vmem:[%s5648_s6 + $0x8c] sm:$0xf] }
  0xc2   : > { %2812 = vmatpush.bf16.msrb.mxu3 %v4385_v36  ;;  %2787 = vmatpush.bf16.msrb.mxu1 %v3841_v44  ;;  %v4000_v11 = vld [vmem:[%s5648_s6 + $0x448] sm:$0xf]  ;;  %v3745_v21 = vor.u32 %v5062_v10, %v3744_v8  ;;  %v4986_v2 = vld [vmem:[%s5648_s6 + $0xc] sm:$0xf] }
  0xc3   : > { %v5126_v12 = vld [vmem:[%s5648_s6 + $0x464] sm:$0xf0] }
  0xc4   : > { %2800 = vmatpush.bf16.msrb.mxu2 %v4097_v45  ;;  %2775 = vmatpush.bf16.msrb.mxu0 %v3553_v55  ;;  %v4256_v13 = vld [vmem:[%s5648_s6 + $0x648] sm:$0xf]  ;;  %v4001_v23 = vor.u32 %v5126_v12, %v4000_v11  ;;  %v5098_v55 = vld [vmem:[%s5648_s6 + $0x38c] sm:$0xf] }
  0xc5   : > { %v5190_v14 = vld [vmem:[%s5648_s6 + $0x664] sm:$0xf0] }
  0xc6   : > { %2813 = vmatpush.bf16.msrb.mxu3 %v4353_v49  ;;  %2788 = vmatpush.bf16.msrb.mxu1 %v3809_v56  ;;  %v3456_v16 = vld [vmem:[%s5648_s6 + $0x8] sm:$0xf]  ;;  %v4257_v27 = vor.u32 %v5190_v14, %v4256_v13  ;;  %v3906_v56 = vld [vmem:[%s5648_s6 + $0x3a8] sm:$0xf0] }
  0xc7   : > { %v4990_v17 = vld [vmem:[%s5648_s6 + $0x24] sm:$0xf0]  ;;  %v3909_v63 = vor.u32 %v5098_v55, %v3906_v56  ;;  %v5018_v13 = vld [vmem:[%s5648_s6 + $0x10c] sm:$0xf] }
  0xc8   : > { %2801 = vmatpush.bf16.msrb.mxu2 %v4065_v57  ;;  %2776 = vmatpush.bf16.msrb.mxu0 %v3521_v3  ;;  %v3712_v24 = vld [vmem:[%s5648_s6 + $0x208] sm:$0xf]  ;;  %v3457_v34 = vor.u32 %v4990_v17, %v3456_v16  ;;  %v5090_v3 = vld [vmem:[%s5648_s6 + $0x34c] sm:$0xf] }
  0xc9   : > { %v5054_v25 = vld [vmem:[%s5648_s6 + $0x224] sm:$0xf0]  ;;  %v3586_v14 = vld [vmem:[%s5648_s6 + $0x128] sm:$0xf0] }
  0xca   : > { %2814 = vmatpush.bf16.msrb.mxu3 %v4321_v61  ;;  %2789 = vmatpush.bf16.msrb.mxu1 %v3777_v4  ;;  %v3968_v26 = vld [vmem:[%s5648_s6 + $0x408] sm:$0xf]  ;;  %v3713_v40 = vor.u32 %v5054_v25, %v3712_v24  ;;  %v3874_v4 = vld [vmem:[%s5648_s6 + $0x368] sm:$0xf0] }
  0xcb   : > { %v5118_v28 = vld [vmem:[%s5648_s6 + $0x424] sm:$0xf0]  ;;  %v3877_v11 = vor.u32 %v5090_v3, %v3874_v4  ;;  %v3842_v16 = vld [vmem:[%s5648_s6 + $0x328] sm:$0xf0] }
  0xcc   : > { %2802 = vmatpush.bf16.msrb.mxu2 %v4033_v5  ;;  %v4224_v29 = vld [vmem:[%s5648_s6 + $0x608] sm:$0xf]  ;;  %2777 = vmatpush.bf16.msrb.mxu0 %v3489_v15  ;;  %v3969_v41 = vor.u32 %v5118_v28, %v3968_v26  ;;  %v5082_v15 = vld [vmem:[%s5648_s6 + $0x30c] sm:$0xf] }
  0xcd   : > { %v5182_v30 = vld [vmem:[%s5648_s6 + $0x624] sm:$0xf0]  ;;  %v4994_v55 = vld [vmem:[%s5648_s6 + $0x4c] sm:$0xf] }
  0xce   : > { %2815 = vmatpush.bf16.msrb.mxu3 %v4289_v9  ;;  %v4704_v31 = vld [vmem:[%s5648_s6 + $0x9c8] sm:$0xf]  ;;  %2790 = vmatpush.bf16.msrb.mxu1 %v3745_v21  ;;  %v4225_v44 = vor.u32 %v5182_v30, %v4224_v29  ;;  %v5010_v29 = vld [vmem:[%s5648_s6 + $0xcc] sm:$0xf] }
  0xcf   : > { %v5302_v32 = vld [vmem:[%s5648_s6 + $0x9e4] sm:$0xf0]  ;;  %v3554_v30 = vld [vmem:[%s5648_s6 + $0xe8] sm:$0xf0] }
  0xd0   : > { %v4960_v33 = vld [vmem:[%s5648_s6 + $0xbc8] sm:$0xf]  ;;  %2803 = vmatpush.bf16.msrb.mxu2 %v4001_v23  ;;  %v4705_v45 = vor.u32 %v5302_v32, %v4704_v31  ;;  %2778 = vmatpush.bf16.msrb.mxu0 %v3457_v34  ;;  %v3589_v23 = vor.u32 %v5018_v13, %v3586_v14  ;;  %v5074_v31 = vld [vmem:[%s5648_s6 + $0x2cc] sm:$0xf] }
  0xd1   : > { %v5366_v36 = vld [vmem:[%s5648_s6 + $0xbe4] sm:$0xf0]  ;;  %v3810_v32 = vld [vmem:[%s5648_s6 + $0x2e8] sm:$0xf0] }
  0xd2   : > { %2816 = vmatpush.bf16.msrb.mxu3 %v4257_v27  ;;  %v4961_v46 = vor.u32 %v5366_v36, %v4960_v33  ;;  %v4672_v48 = vld [vmem:[%s5648_s6 + $0x988] sm:$0xf]  ;;  %2791 = vmatpush.bf16.msrb.mxu1 %v3713_v40  ;;  %v3845_v27 = vor.u32 %v5082_v15, %v3842_v16  ;;  %v3557_v36 = vor.u32 %v5010_v29, %v3554_v30  ;;  %v3490_v56 = vld [vmem:[%s5648_s6 + $0x68] sm:$0xf0] }
  0xd3   : > { %v5294_v49 = vld [vmem:[%s5648_s6 + $0x9a4] sm:$0xf0]  ;;  %2779 = vmatmul.bf16.vlgmr.msrb.gmra.mxu0 %v5762_v18  ;;  %v3458_v4 = vld [vmem:[%s5648_s6 + $0x28] sm:$0xf0] }
  0xd4   : > { %v4928_v50 = vld [vmem:[%s5648_s6 + $0xb88] sm:$0xf]  ;;  %2804 = vmatpush.bf16.msrb.mxu2 %v3969_v41  ;;  %2823 = vmatpush.bf16.msra.mxu0 %v4705_v45  ;;  %v4673_v57 = vor.u32 %v5294_v49, %v4672_v48  ;;  %v3813_v41 = vor.u32 %v5074_v31, %v3810_v32  ;;  %v5066_v45 = vld [vmem:[%s5648_s6 + $0x28c] sm:$0xf]  ;;  %v3461_v15 = vor.u32 %v4986_v2, %v3458_v4 }
  0xd5   : > { %v5358_v52 = vld [vmem:[%s5648_s6 + $0xba4] sm:$0xf0]  ;;  %2792 = vmatmul.bf16.vlgmr.msrb.gmra.mxu1 %v5766_v20  ;;  %v4706_v13 = vld [vmem:[%s5648_s6 + $0x9e8] sm:$0xf0] }
  0xd6   : > { %2817 = vmatpush.bf16.msrb.mxu3 %v4225_v44  ;;  %2836 = vmatpush.bf16.msra.mxu1 %v4961_v46  ;;  %v4929_v58 = vor.u32 %v5358_v52, %v4928_v50  ;;  %v4640_v60 = vld [vmem:[%s5648_s6 + $0x948] sm:$0xf]  ;;  %v3522_v44 = vld [vmem:[%s5648_s6 + $0xa8] sm:$0xf0] }
  0xd7   : > { %v5286_v61 = vld [vmem:[%s5648_s6 + $0x964] sm:$0xf0]  ;;  %2805 = vmatmul.bf16.vlgmr.msrb.gmra.mxu2 %v5764_v19  ;;  %v3778_v46 = vld [vmem:[%s5648_s6 + $0x2a8] sm:$0xf0]  ;;  %v3525_v49 = vor.u32 %v5002_v43, %v3522_v44 }
  0xd8   : > { %2849 = vmatpush.bf16.msra.mxu2 %v3685_v47  ;;  %v4896_v62 = vld [vmem:[%s5648_s6 + $0xb48] sm:$0xf]  ;;  %2824 = vmatpush.bf16.msra.mxu0 %v4673_v57  ;;  %v4641_v5 = vor.u32 %v5286_v61, %v4640_v60  ;;  %v3781_v53 = vor.u32 %v5066_v45, %v3778_v46  ;;  %v5058_v57 = vld [vmem:[%s5648_s6 + $0x24c] sm:$0xf] }
  0xd9   : > { %v5350_v0 = vld [vmem:[%s5648_s6 + $0xb64] sm:$0xf0]  ;;  %2818 = vmatmul.bf16.vlgmr.msrb.gmra.mxu3 %v5768_v22  ;;  %v5362_v16 = vld [vmem:[%s5648_s6 + $0xbcc] sm:$0xf] }
  0xda   : > { %2862 = vmatpush.bf16.msra.mxu3 %v3941_v51  ;;  %2837 = vmatpush.bf16.msra.mxu1 %v4929_v58  ;;  %v4897_v6 = vor.u32 %v5350_v0, %v4896_v62  ;;  %v4608_v8 = vld [vmem:[%s5648_s6 + $0x908] sm:$0xf]  ;;  %v3746_v58 = vld [vmem:[%s5648_s6 + $0x268] sm:$0xf0] }
  0xdb   : > { %v5278_v9 = vld [vmem:[%s5648_s6 + $0x924] sm:$0xf0]  ;;  %v3749_v3 = vor.u32 %v5058_v57, %v3746_v58  ;;  %v4418_v30 = vld [vmem:[%s5648_s6 + $0x7a8] sm:$0xf0] }
  0xdc   : > { %2850 = vmatpush.bf16.msra.mxu2 %v3653_v59  ;;  %v4864_v10 = vld [vmem:[%s5648_s6 + $0xb08] sm:$0xf]  ;;  %2825 = vmatpush.bf16.msra.mxu0 %v4641_v5  ;;  %v4609_v17 = vor.u32 %v5278_v9, %v4608_v8  ;;  %v5050_v5 = vld [vmem:[%s5648_s6 + $0x20c] sm:$0xf] }
  0xdd   : > { %v5342_v12 = vld [vmem:[%s5648_s6 + $0xb24] sm:$0xf0]  ;;  %v4194_v8 = vld [vmem:[%s5648_s6 + $0x5e8] sm:$0xf0] }
  0xde   : > { %2863 = vmatpush.bf16.msra.mxu3 %v3909_v63  ;;  %2838 = vmatpush.bf16.msra.mxu1 %v4897_v6  ;;  %v4865_v21 = vor.u32 %v5342_v12, %v4864_v10  ;;  %v4576_v24 = vld [vmem:[%s5648_s6 + $0x8c8] sm:$0xf]  ;;  %v3493_v63 = vor.u32 %v4994_v55, %v3490_v56  ;;  %v3714_v6 = vld [vmem:[%s5648_s6 + $0x228] sm:$0xf0] }
  0xdf   : > { %v5270_v25 = vld [vmem:[%s5648_s6 + $0x8e4] sm:$0xf0]  ;;  %v5234_v9 = vld [vmem:[%s5648_s6 + $0x7cc] sm:$0xf] }
  0xe0   : > { %2851 = vmatpush.bf16.msra.mxu2 %v3621_v7  ;;  %v4832_v26 = vld [vmem:[%s5648_s6 + $0xac8] sm:$0xf]  ;;  %2826 = vmatpush.bf16.msra.mxu0 %v4609_v17  ;;  %v4577_v33 = vor.u32 %v5270_v25, %v4576_v24  ;;  %v5170_v7 = vld [vmem:[%s5648_s6 + $0x5cc] sm:$0xf] }
  0xe1   : > { %v5334_v28 = vld [vmem:[%s5648_s6 + $0xae4] sm:$0xf0]  ;;  %v5298_v12 = vld [vmem:[%s5648_s6 + $0x9cc] sm:$0xf] }
  0xe2   : > { %2864 = vmatpush.bf16.msra.mxu3 %v3877_v11  ;;  %2839 = vmatpush.bf16.msra.mxu1 %v4865_v21  ;;  %v4833_v34 = vor.u32 %v5334_v28, %v4832_v26  ;;  %v4544_v37 = vld [vmem:[%s5648_s6 + $0x888] sm:$0xf]  ;;  %v4450_v11 = vld [vmem:[%s5648_s6 + $0x7e8] sm:$0xf0]  ;;  %v3717_v21 = vor.u32 %v5050_v5, %v3714_v6  ;;  %v4709_v25 = vor.u32 %v5298_v12, %v4706_v13 }
  0xe3   : > { %v5262_v39 = vld [vmem:[%s5648_s6 + $0x8a4] sm:$0xf0]  ;;  %v4962_v17 = vld [vmem:[%s5648_s6 + $0xbe8] sm:$0xf0]  ;;  %v4453_v24 = vor.u32 %v5234_v9, %v4450_v11 }
  0xe4   : > { %2852 = vmatpush.bf16.msra.mxu2 %v3589_v23  ;;  %v4800_v40 = vld [vmem:[%s5648_s6 + $0xa88] sm:$0xf]  ;;  %2827 = vmatpush.bf16.msra.mxu0 %v4577_v33  ;;  %v4545_v47 = vor.u32 %v5262_v39, %v4544_v37  ;;  %v4197_v23 = vor.u32 %v5170_v7, %v4194_v8  ;;  %v5162_v26 = vld [vmem:[%s5648_s6 + $0x58c] sm:$0xf]  ;;  %v4965_v29 = vor.u32 %v5362_v16, %v4962_v17 }
  0xe5   : > { %v5326_v42 = vld [vmem:[%s5648_s6 + $0xaa4] sm:$0xf0]  ;;  %v5226_v28 = vld [vmem:[%s5648_s6 + $0x78c] sm:$0xf] }
  0xe6   : > { %2865 = vmatpush.bf16.msra.mxu3 %v3845_v27  ;;  %2840 = vmatpush.bf16.msra.mxu1 %v4833_v34  ;;  %v4801_v48 = vor.u32 %v5326_v42, %v4800_v40  ;;  %v4512_v50 = vld [vmem:[%s5648_s6 + $0x848] sm:$0xf]  ;;  %v4162_v27 = vld [vmem:[%s5648_s6 + $0x5a8] sm:$0xf0]  ;;  %v4421_v37 = vor.u32 %v5226_v28, %v4418_v30 }
  0xe7   : > { %v5254_v51 = vld [vmem:[%s5648_s6 + $0x864] sm:$0xf0]  ;;  %v5290_v31 = vld [vmem:[%s5648_s6 + $0x98c] sm:$0xf] }
  0xe8   : > { %2853 = vmatpush.bf16.msra.mxu2 %v3557_v36  ;;  %v4768_v52 = vld [vmem:[%s5648_s6 + $0xa48] sm:$0xf]  ;;  %2828 = vmatpush.bf16.msra.mxu0 %v4545_v47  ;;  %v4513_v59 = vor.u32 %v5254_v51, %v4512_v50  ;;  %v4674_v32 = vld [vmem:[%s5648_s6 + $0x9a8] sm:$0xf0]  ;;  %v4165_v36 = vor.u32 %v5162_v26, %v4162_v27 }
  0xe9   : > { %v5318_v54 = vld [vmem:[%s5648_s6 + $0xa64] sm:$0xf0]  ;;  %v5354_v33 = vld [vmem:[%s5648_s6 + $0xb8c] sm:$0xf]  ;;  %v4677_v39 = vor.u32 %v5290_v31, %v4674_v32 }
  0xea   : > { %2866 = vmatpush.bf16.msra.mxu3 %v3813_v41  ;;  %v4480_v60 = vld [vmem:[%s5648_s6 + $0x808] sm:$0xf]  ;;  %2841 = vmatpush.bf16.msra.mxu1 %v4801_v48  ;;  %v4769_v62 = vor.u32 %v5318_v54, %v4768_v52  ;;  %v4930_v34 = vld [vmem:[%s5648_s6 + $0xba8] sm:$0xf0] }
  0xeb   : > { %v5246_v61 = vld [vmem:[%s5648_s6 + $0x824] sm:$0xf0]  ;;  %v5154_v40 = vld [vmem:[%s5648_s6 + $0x54c] sm:$0xf]  ;;  %v4933_v43 = vor.u32 %v5354_v33, %v4930_v34 }
  0xec   : > { %2854 = vmatpush.bf16.msra.mxu2 %v3525_v49  ;;  %v4736_v0 = vld [vmem:[%s5648_s6 + $0xa08] sm:$0xf]  ;;  %2829 = vmatpush.bf16.msra.mxu0 %v4513_v59  ;;  %v4481_v10 = vor.u32 %v5246_v61, %v4480_v60  ;;  %v4130_v41 = vld [vmem:[%s5648_s6 + $0x568] sm:$0xf0] }
  0xed   : > { %v5310_v1 = vld [vmem:[%s5648_s6 + $0xa24] sm:$0xf0]  ;;  %v5218_v42 = vld [vmem:[%s5648_s6 + $0x74c] sm:$0xf]  ;;  %v4133_v49 = vor.u32 %v5154_v40, %v4130_v41 }
  0xee   : > { %2867 = vmatpush.bf16.msra.mxu3 %v3781_v53  ;;  %2842 = vmatpush.bf16.msra.mxu1 %v4769_v62  ;;  %v4737_v14 = vor.u32 %v5310_v1, %v4736_v0  ;;  %v4386_v44 = vld [vmem:[%s5648_s6 + $0x768] sm:$0xf0] }
  0xef   : > { %v5282_v45 = vld [vmem:[%s5648_s6 + $0x94c] sm:$0xf]  ;;  %v4389_v50 = vor.u32 %v5218_v42, %v4386_v44 }
  0xf0   : > { %2855 = vmatpush.bf16.msra.mxu2 %v3493_v63  ;;  %2830 = vmatpush.bf16.msra.mxu0 %v4481_v10  ;;  %v4642_v46 = vld [vmem:[%s5648_s6 + $0x968] sm:$0xf0] }
  0xf1   : > { %v5346_v47 = vld [vmem:[%s5648_s6 + $0xb4c] sm:$0xf]  ;;  %v4645_v51 = vor.u32 %v5282_v45, %v4642_v46 }
  0xf2   : > { %2868 = vmatpush.bf16.msra.mxu3 %v3749_v3  ;;  %2843 = vmatpush.bf16.msra.mxu1 %v4737_v14  ;;  %v4898_v48 = vld [vmem:[%s5648_s6 + $0xb68] sm:$0xf0]  ;;  %v2637_v27 = vpop.f32.mrf.mxu1 }
  0xf3   : > { %2831 = vmatmul.bf16.vlgmr.msra.gmra.mxu0 %v5823_v35  ;;  %v5146_v52 = vld [vmem:[%s5648_s6 + $0x50c] sm:$0xf]  ;;  %v4901_v55 = vor.u32 %v5346_v47, %v4898_v48 }
  0xf4   : > { %2856 = vmatpush.bf16.msra.mxu2 %v3461_v15  ;;  %2875 = vmatpush.bf16.msrb.mxu0 %v4197_v23  ;;  %v4098_v53 = vld [vmem:[%s5648_s6 + $0x528] sm:$0xf0] }
  0xf5   : > { %2844 = vmatmul.bf16.vlgmr.msra.gmra.mxu1 %v5827_v38  ;;  %v5210_v54 = vld [vmem:[%s5648_s6 + $0x70c] sm:$0xf]  ;;  %v4101_v61 = vor.u32 %v5146_v52, %v4098_v53  ;;  %v2650_v53 = vpop.f32.mrf.mxu2 }
  0xf6   : > { %2869 = vmatpush.bf16.msra.mxu3 %v3717_v21  ;;  %2888 = vmatpush.bf16.msrb.mxu1 %v4453_v24  ;;  %v4354_v56 = vld [vmem:[%s5648_s6 + $0x728] sm:$0xf0] }
  0xf7   : > { %2857 = vmatmul.bf16.vlgmr.msra.gmra.mxu2 %v5762_v18  ;;  %v5274_v57 = vld [vmem:[%s5648_s6 + $0x90c] sm:$0xf]  ;;  %v4357_v62 = vor.u32 %v5210_v54, %v4354_v56  ;;  %v3688_v54 = vld [vmem:[%s5648_s6 + $0x1d0] sm:$0xf] }
  0xf8   : > { %2901 = vmatpush.bf16.msrb.mxu2 %v4709_v25  ;;  %2876 = vmatpush.bf16.msrb.mxu0 %v4165_v36  ;;  %v4610_v58 = vld [vmem:[%s5648_s6 + $0x928] sm:$0xf0]  ;;  %v2624_v25 = vpop.f32.mrf.mxu0  ;;  %v3944_v56 = vld [vmem:[%s5648_s6 + $0x3d0] sm:$0xf] }
  0xf9   : > { %2870 = vmatmul.bf16.vlgmr.msra.gmra.mxu3 %v5766_v20  ;;  %v5338_v59 = vld [vmem:[%s5648_s6 + $0xb0c] sm:$0xf]  ;;  %v4613_v63 = vor.u32 %v5274_v57, %v4610_v58  ;;  %v2663_v58 = vpop.f32.mrf.mxu3 }
  0xfa   : > { %2914 = vmatpush.bf16.msrb.mxu3 %v4965_v29  ;;  %2889 = vmatpush.bf16.msrb.mxu1 %v4421_v37  ;;  %v4866_v60 = vld [vmem:[%s5648_s6 + $0xb28] sm:$0xf0] }
  0xfb   : > { %v5138_v0 = vld [vmem:[%s5648_s6 + $0x4cc] sm:$0xf]  ;;  %v4869_v3 = vor.u32 %v5338_v59, %v4866_v60  ;;  %v5111_v60 = vld [vmem:[%s5648_s6 + $0x3ec] sm:$0xf0] }
  0xfc   : > { %2902 = vmatpush.bf16.msrb.mxu2 %v4677_v39  ;;  %2877 = vmatpush.bf16.msrb.mxu0 %v4133_v49  ;;  %v4066_v1 = vld [vmem:[%s5648_s6 + $0x4e8] sm:$0xf0] }
  0xfd   : > { %v5202_v2 = vld [vmem:[%s5648_s6 + $0x6cc] sm:$0xf]  ;;  %v4069_v9 = vor.u32 %v5138_v0, %v4066_v1 }
  0xfe   : > { %2915 = vmatpush.bf16.msrb.mxu3 %v4933_v43  ;;  %2890 = vmatpush.bf16.msrb.mxu1 %v4389_v50  ;;  %v4322_v4 = vld [vmem:[%s5648_s6 + $0x6e8] sm:$0xf0] }
  0xff   : > { %v5266_v5 = vld [vmem:[%s5648_s6 + $0x8cc] sm:$0xf]  ;;  %v4325_v10 = vor.u32 %v5202_v2, %v4322_v4  ;;  %v4456_v2 = vld [vmem:[%s5648_s6 + $0x7d0] sm:$0xf] }
 0x100   : > { %2903 = vmatpush.bf16.msrb.mxu2 %v4645_v51  ;;  %v4578_v6 = vld [vmem:[%s5648_s6 + $0x8e8] sm:$0xf0]  ;;  %2878 = vmatpush.bf16.msrb.mxu0 %v4101_v61  ;;  %v2626_v57 = vpop.f32.mrf.mxu0  ;;  %v4200_v61 = vld [vmem:[%s5648_s6 + $0x5d0] sm:$0xf] }
 0x101   : > { %v5330_v7 = vld [vmem:[%s5648_s6 + $0xacc] sm:$0xf]  ;;  %v4581_v11 = vor.u32 %v5266_v5, %v4578_v6  ;;  %v2638_v6 = vadd.f32 %v2637_v27, %v2624_v25  ;;  %v3624_v27 = vld [vmem:[%s5648_s6 + $0x150] sm:$0xf] }
 0x102   : > { %2916 = vmatpush.bf16.msrb.mxu3 %v4901_v55  ;;  %v4834_v8 = vld [vmem:[%s5648_s6 + $0xae8] sm:$0xf0]  ;;  %2891 = vmatpush.bf16.msrb.mxu1 %v4357_v62  ;;  %v5047_v55 = vld [vmem:[%s5648_s6 + $0x1ec] sm:$0xf0] }
 0x103   : > { %v5130_v12 = vld [vmem:[%s5648_s6 + $0x48c] sm:$0xf]  ;;  %v4837_v15 = vor.u32 %v5330_v7, %v4834_v8  ;;  %v5175_v62 = vld [vmem:[%s5648_s6 + $0x5ec] sm:$0xf0]  ;;  %v3689_v5 = vor.u32 %v5047_v55, %v3688_v54  ;;  %v3945_v7 = vor.u32 %v5111_v60, %v3944_v56 }
 0x104   : > { %2904 = vmatpush.bf16.msrb.mxu2 %v4613_v63  ;;  %v4034_v13 = vld [vmem:[%s5648_s6 + $0x4a8] sm:$0xf0]  ;;  %2879 = vmatpush.bf16.msrb.mxu0 %v4069_v9  ;;  %v2639_v63 = vpop.f32.mrf.mxu1  ;;  %v4201_v8 = vor.u32 %v5175_v62, %v4200_v61  ;;  %v3656_v9 = vld [vmem:[%s5648_s6 + $0x190] sm:$0xf] }
 0x105   : > { %v5194_v14 = vld [vmem:[%s5648_s6 + $0x68c] sm:$0xf]  ;;  %v4037_v26 = vor.u32 %v5130_v12, %v4034_v13  ;;  %v5103_v13 = vld [vmem:[%s5648_s6 + $0x3ac] sm:$0xf0] }
 0x106   : > { %2917 = vmatpush.bf16.msrb.mxu3 %v4869_v3  ;;  %v4290_v16 = vld [vmem:[%s5648_s6 + $0x6a8] sm:$0xf0]  ;;  %2892 = vmatpush.bf16.msrb.mxu1 %v4325_v10  ;;  %v5239_v3 = vld [vmem:[%s5648_s6 + $0x7ec] sm:$0xf0] }
 0x107   : > { %v5258_v17 = vld [vmem:[%s5648_s6 + $0x88c] sm:$0xf]  ;;  %v4293_v28 = vor.u32 %v5194_v14, %v4290_v16  ;;  %v5039_v10 = vld [vmem:[%s5648_s6 + $0x1ac] sm:$0xf0]  ;;  %v4457_v12 = vor.u32 %v5239_v3, %v4456_v2 }
 0x108   : > { %v4546_v21 = vld [vmem:[%s5648_s6 + $0x8a8] sm:$0xf0]  ;;  %2905 = vmatpush.bf16.msrb.mxu2 %v4581_v11  ;;  %2880 = vmatpush.bf16.msrb.mxu0 %v4037_v26  ;;  %v3912_v11 = vld [vmem:[%s5648_s6 + $0x390] sm:$0xf] }
 0x109   : > { %v5322_v23 = vld [vmem:[%s5648_s6 + $0xa8c] sm:$0xf]  ;;  %v4549_v29 = vor.u32 %v5258_v17, %v4546_v21  ;;  %v4168_v14 = vld [vmem:[%s5648_s6 + $0x590] sm:$0xf]  ;;  %v3657_v21 = vor.u32 %v5039_v10, %v3656_v9  ;;  %v3913_v25 = vor.u32 %v5103_v13, %v3912_v11 }
 0x10a   : > { %v4802_v24 = vld [vmem:[%s5648_s6 + $0xaa8] sm:$0xf0]  ;;  %2918 = vmatpush.bf16.msrb.mxu3 %v4837_v15  ;;  %2893 = vmatpush.bf16.msrb.mxu1 %v4293_v28  ;;  %v5167_v15 = vld [vmem:[%s5648_s6 + $0x5ac] sm:$0xf0] }
 0x10b   : > { %v5122_v30 = vld [vmem:[%s5648_s6 + $0x44c] sm:$0xf]  ;;  %v4805_v33 = vor.u32 %v5322_v23, %v4802_v24  ;;  %v4424_v16 = vld [vmem:[%s5648_s6 + $0x790] sm:$0xf]  ;;  %v2651_v23 = vadd.f32 %v2650_v53, %v2638_v6  ;;  %v2652_v24 = vpop.f32.mrf.mxu2  ;;  %v4169_v26 = vor.u32 %v5167_v15, %v4168_v14 }
 0x10c   : > { %v4002_v31 = vld [vmem:[%s5648_s6 + $0x468] sm:$0xf0]  ;;  %2906 = vmatpush.bf16.msrb.mxu2 %v4549_v29  ;;  %v5231_v17 = vld [vmem:[%s5648_s6 + $0x7ac] sm:$0xf0]  ;;  %v2689_v56 = vpop.f32.mrf.mxu1 }
 0x10d   : > { %v5186_v32 = vld [vmem:[%s5648_s6 + $0x64c] sm:$0xf]  ;;  %v4005_v41 = vor.u32 %v5122_v30, %v4002_v31  ;;  %v5031_v28 = vld [vmem:[%s5648_s6 + $0x16c] sm:$0xf0]  ;;  %v2665_v30 = vpop.f32.mrf.mxu3  ;;  %v4425_v31 = vor.u32 %v5231_v17, %v4424_v16 }
 0x10e   : > { %v4258_v34 = vld [vmem:[%s5648_s6 + $0x668] sm:$0xf0]  ;;  %2919 = vmatpush.bf16.msrb.mxu3 %v4805_v33  ;;  %v3880_v29 = vld [vmem:[%s5648_s6 + $0x350] sm:$0xf] }
 0x10f   : > { %v5250_v36 = vld [vmem:[%s5648_s6 + $0x84c] sm:$0xf]  ;;  %v4261_v44 = vor.u32 %v5186_v32, %v4258_v34  ;;  %2881 = vmatpush.bf16.msrb.mxu0 %v4005_v41  ;;  %v5095_v32 = vld [vmem:[%s5648_s6 + $0x36c] sm:$0xf0] }
 0x110   : > { %v4514_v37 = vld [vmem:[%s5648_s6 + $0x868] sm:$0xf0]  ;;  %v4136_v33 = vld [vmem:[%s5648_s6 + $0x550] sm:$0xf]  ;;  %v3881_v41 = vor.u32 %v5095_v32, %v3880_v29 }
 0x111   : > { %v5314_v39 = vld [vmem:[%s5648_s6 + $0xa4c] sm:$0xf]  ;;  %v4517_v45 = vor.u32 %v5250_v36, %v4514_v37  ;;  %2894 = vmatpush.bf16.msrb.mxu1 %v4261_v44  ;;  %v5159_v34 = vld [vmem:[%s5648_s6 + $0x56c] sm:$0xf0] }
 0x112   : > { %v4770_v40 = vld [vmem:[%s5648_s6 + $0xa68] sm:$0xf0]  ;;  %v4392_v36 = vld [vmem:[%s5648_s6 + $0x750] sm:$0xf] }
 0x113   : > { %v5114_v42 = vld [vmem:[%s5648_s6 + $0x40c] sm:$0xf]  ;;  %v4773_v49 = vor.u32 %v5314_v39, %v4770_v40  ;;  %2907 = vmatpush.bf16.msrb.mxu2 %v4517_v45  ;;  %v5223_v37 = vld [vmem:[%s5648_s6 + $0x76c] sm:$0xf0]  ;;  %v3625_v39 = vor.u32 %v5031_v28, %v3624_v27  ;;  %v2664_v40 = vadd.f32 %v2663_v58, %v2651_v23  ;;  %v6153_v17 = vpop.f32.mrf.mxu2 }
 0x114   : > { %v3970_v43 = vld [vmem:[%s5648_s6 + $0x428] sm:$0xf0]  ;;  %v5023_v44 = vld [vmem:[%s5648_s6 + $0x12c] sm:$0xf0]  ;;  %v2691_v28 = vpop.f32.mrf.mxu1 }
 0x115   : > { %v5178_v46 = vld [vmem:[%s5648_s6 + $0x60c] sm:$0xf]  ;;  %v3973_v59 = vor.u32 %v5114_v42, %v3970_v43  ;;  %2920 = vmatpush.bf16.msrb.mxu3 %v4773_v49  ;;  %v4137_v42 = vor.u32 %v5159_v34, %v4136_v33  ;;  %v3592_v43 = vld [vmem:[%s5648_s6 + $0x110] sm:$0xf]  ;;  %v6162_v24 = vpop.f32.mrf.mxu3 }
 0x116   : > { %v4226_v47 = vld [vmem:[%s5648_s6 + $0x628] sm:$0xf0]  ;;  %v3848_v45 = vld [vmem:[%s5648_s6 + $0x310] sm:$0xf]  ;;  %v3593_v53 = vor.u32 %v5023_v44, %v3592_v43 }
 0x117   : > { %v5242_v48 = vld [vmem:[%s5648_s6 + $0x80c] sm:$0xf]  ;;  %v4229_v0 = vor.u32 %v5178_v46, %v4226_v47  ;;  %2882 = vmatpush.bf16.msrb.mxu0 %v3973_v59  ;;  %v4393_v46 = vor.u32 %v5223_v37, %v4392_v36  ;;  %v5087_v47 = vld [vmem:[%s5648_s6 + $0x32c] sm:$0xf0] }
 0x118   : > { %v4482_v50 = vld [vmem:[%s5648_s6 + $0x828] sm:$0xf0]  ;;  %v5151_v49 = vld [vmem:[%s5648_s6 + $0x52c] sm:$0xf0]  ;;  %v3849_v57 = vor.u32 %v5087_v47, %v3848_v45 }
 0x119   : > { %v5306_v51 = vld [vmem:[%s5648_s6 + $0xa0c] sm:$0xf]  ;;  %v4485_v1 = vor.u32 %v5242_v48, %v4482_v50  ;;  %2895 = vmatpush.bf16.msrb.mxu1 %v4229_v0  ;;  %v4104_v48 = vld [vmem:[%s5648_s6 + $0x510] sm:$0xf] }
 0x11a   : > { %v4738_v52 = vld [vmem:[%s5648_s6 + $0xa28] sm:$0xf0]  ;;  %2883 = vmatmul.bf16.vlgmr.msrb.gmra.mxu0 %v5764_v19  ;;  %v4360_v50 = vld [vmem:[%s5648_s6 + $0x710] sm:$0xf]  ;;  %v4105_v58 = vor.u32 %v5151_v49, %v4104_v48 }
 0x11b   : > { %v4741_v4 = vor.u32 %v5306_v51, %v4738_v52  ;;  %2908 = vmatpush.bf16.msrb.mxu2 %v4485_v1  ;;  %2927 = vmatpush.bf16.msra.mxu0 %v3689_v5  ;;  %v5215_v51 = vld [vmem:[%s5648_s6 + $0x72c] sm:$0xf0]  ;;  %v2676_v52 = vpop.f32.mrf.mxu0  ;;  %v6138_v61 = vld [vmem:[%s5654_s9] sm:$0xff] }
 0x11c   : > { %2896 = vmatmul.bf16.vlgmr.msrb.gmra.mxu1 %v5768_v22  ;;  %v3560_v54 = vld [vmem:[%s5648_s6 + $0xd0] sm:$0xf]  ;;  %v2677_v55 = vadd.f32 %v2676_v52, %v2664_v40  ;;  %v4361_v62 = vor.u32 %v5215_v51, %v4360_v50 }
 0x11d   : > { %2921 = vmatpush.bf16.msrb.mxu3 %v4741_v4  ;;  %2940 = vmatpush.bf16.msra.mxu1 %v3945_v7  ;;  %v5015_v59 = vld [vmem:[%s5648_s6 + $0xec] sm:$0xf0]  ;;  %v3284_v7 = vperm.slane %v6138_v61, 0 }
 0x11e   : > { %2909 = vmatmul.bf16.vlgmr.msrb.gmra.mxu2 %v5823_v35  ;;  %v3816_v60 = vld [vmem:[%s5648_s6 + $0x2d0] sm:$0xf]  ;;  %v2690_v2 = vadd.f32 %v2689_v56, %v2677_v55  ;;  %v3561_v5 = vor.u32 %v5015_v59, %v3560_v54  ;;  %v2704_v54 = vpop.f32.mrf.mxu2 }
 0x11f   : > { %2953 = vmatpush.bf16.msra.mxu2 %v4201_v8  ;;  %2928 = vmatpush.bf16.msra.mxu0 %v3657_v21  ;;  %v5079_v63 = vld [vmem:[%s5648_s6 + $0x2ec] sm:$0xf0] }
 0x120   : > { %2922 = vmatmul.bf16.vlgmr.msrb.gmra.mxu3 %v5827_v38  ;;  %v4072_v0 = vld [vmem:[%s5648_s6 + $0x4d0] sm:$0xf]  ;;  %v3247_v6 = vmul.f32 -2.0, %v2690_v2  ;;  %v3817_v8 = vor.u32 %v5079_v63, %v3816_v60  ;;  %v3690_v63 = vld [vmem:[%s5648_s6 + $0x1f0] sm:$0xf0] }
 0x121   : > { %2966 = vmatpush.bf16.msra.mxu3 %v4457_v12  ;;  %2941 = vmatpush.bf16.msra.mxu1 %v3913_v25  ;;  %v5143_v1 = vld [vmem:[%s5648_s6 + $0x4ec] sm:$0xf0]  ;;  %v5107_v2 = vld [vmem:[%s5648_s6 + $0x3d4] sm:$0xf] }
 0x122   : > { %v4328_v3 = vld [vmem:[%s5648_s6 + $0x6d0] sm:$0xf]  ;;  %v4073_v9 = vor.u32 %v5143_v1, %v4072_v0 }
 0x123   : > { %2954 = vmatpush.bf16.msra.mxu2 %v4169_v26  ;;  %2929 = vmatpush.bf16.msra.mxu0 %v3625_v39  ;;  %v5207_v4 = vld [vmem:[%s5648_s6 + $0x6ec] sm:$0xf0]  ;;  %v2678_v25 = vpop.f32.mrf.mxu0  ;;  %v3300_v26 = vadd.f32 %v3284_v7, %v3247_v6 }
 0x124   : > { %v3528_v10 = vld [vmem:[%s5648_s6 + $0x90] sm:$0xf]  ;;  %v4329_v13 = vor.u32 %v5207_v4, %v4328_v3  ;;  %v3946_v3 = vld [vmem:[%s5648_s6 + $0x3f0] sm:$0xf0] }
 0x125   : > { %2967 = vmatpush.bf16.msra.mxu3 %v4425_v31  ;;  %2942 = vmatpush.bf16.msra.mxu1 %v3881_v41  ;;  %v5007_v11 = vld [vmem:[%s5648_s6 + $0xac] sm:$0xf0]  ;;  %3308 = vst [vmem:[%s6158_s26] sm:$0xff] %v3300_v26 }
 0x126   : > { %v3784_v12 = vld [vmem:[%s5648_s6 + $0x290] sm:$0xf]  ;;  %v3529_v27 = vor.u32 %v5007_v11, %v3528_v10  ;;  %v3949_v11 = vor.u32 %v5107_v2, %v3946_v3 }
 0x127   : > { %2955 = vmatpush.bf16.msra.mxu2 %v4137_v42  ;;  %2930 = vmatpush.bf16.msra.mxu0 %v3593_v53  ;;  %v5071_v14 = vld [vmem:[%s5648_s6 + $0x2ac] sm:$0xf0] }
 0x128   : > { %v4040_v15 = vld [vmem:[%s5648_s6 + $0x490] sm:$0xf]  ;;  %v3785_v29 = vor.u32 %v5071_v14, %v3784_v12  ;;  %v3658_v14 = vld [vmem:[%s5648_s6 + $0x1b0] sm:$0xf0] }
 0x129   : > { %2968 = vmatpush.bf16.msra.mxu3 %v4393_v46  ;;  %2943 = vmatpush.bf16.msra.mxu1 %v3849_v57  ;;  %v5135_v16 = vld [vmem:[%s5648_s6 + $0x4ac] sm:$0xf0] }
 0x12a   : > { %v4296_v21 = vld [vmem:[%s5648_s6 + $0x690] sm:$0xf]  ;;  %v4041_v30 = vor.u32 %v5135_v16, %v4040_v15  ;;  %v5099_v15 = vld [vmem:[%s5648_s6 + $0x394] sm:$0xf] }
 0x12b   : > { %2956 = vmatpush.bf16.msra.mxu2 %v4105_v58  ;;  %v5199_v23 = vld [vmem:[%s5648_s6 + $0x6ac] sm:$0xf0]  ;;  %2931 = vmatpush.bf16.msra.mxu0 %v3561_v5  ;;  %v2717_v58 = vpop.f32.mrf.mxu3  ;;  %v3914_v16 = vld [vmem:[%s5648_s6 + $0x3b0] sm:$0xf0] }
 0x12c   : > { %v3496_v31 = vld [vmem:[%s5648_s6 + $0x50] sm:$0xf]  ;;  %v4297_v34 = vor.u32 %v5199_v23, %v4296_v21 }
 0x12d   : > { %2969 = vmatpush.bf16.msra.mxu3 %v4361_v62  ;;  %2944 = vmatpush.bf16.msra.mxu1 %v3817_v8  ;;  %v4999_v32 = vld [vmem:[%s5648_s6 + $0x6c] sm:$0xf0]  ;;  %v5043_v62 = vld [vmem:[%s5648_s6 + $0x1d4] sm:$0xf] }
 0x12e   : > { %v3752_v33 = vld [vmem:[%s5648_s6 + $0x250] sm:$0xf]  ;;  %v3497_v42 = vor.u32 %v4999_v32, %v3496_v31  ;;  %v3693_v7 = vor.u32 %v5043_v62, %v3690_v63  ;;  %v5027_v31 = vld [vmem:[%s5648_s6 + $0x154] sm:$0xf] }
 0x12f   : > { %2957 = vmatpush.bf16.msra.mxu2 %v4073_v9  ;;  %v5063_v36 = vld [vmem:[%s5648_s6 + $0x26c] sm:$0xf0]  ;;  %2932 = vmatpush.bf16.msra.mxu0 %v3529_v27  ;;  %v3626_v32 = vld [vmem:[%s5648_s6 + $0x170] sm:$0xf0] }
 0x130   : > { %v4008_v37 = vld [vmem:[%s5648_s6 + $0x450] sm:$0xf]  ;;  %v3753_v45 = vor.u32 %v5063_v36, %v3752_v33  ;;  %v5091_v33 = vld [vmem:[%s5648_s6 + $0x354] sm:$0xf] }
 0x131   : > { %2970 = vmatpush.bf16.msra.mxu3 %v4329_v13  ;;  %v5127_v39 = vld [vmem:[%s5648_s6 + $0x46c] sm:$0xf0]  ;;  %2945 = vmatpush.bf16.msra.mxu1 %v3785_v29  ;;  %v5035_v13 = vld [vmem:[%s5648_s6 + $0x194] sm:$0xf]  ;;  %v3917_v29 = vor.u32 %v5099_v15, %v3914_v16 }
 0x132   : > { %v4264_v40 = vld [vmem:[%s5648_s6 + $0x650] sm:$0xf]  ;;  %v4009_v46 = vor.u32 %v5127_v39, %v4008_v37  ;;  %v3661_v25 = vor.u32 %v5035_v13, %v3658_v14  ;;  %v2716_v37 = vadd.f32 %v6162_v24, %v6153_v17  ;;  %v2728_v24 = vpop.f32.mrf.mxu0  ;;  %v5075_v62 = vld [vmem:[%s5648_s6 + $0x2d4] sm:$0xf] }
 0x133   : > { %v5191_v41 = vld [vmem:[%s5648_s6 + $0x66c] sm:$0xf0]  ;;  %2958 = vmatpush.bf16.msra.mxu2 %v4041_v30  ;;  %2933 = vmatpush.bf16.msra.mxu0 %v3497_v42  ;;  %v3818_v63 = vld [vmem:[%s5648_s6 + $0x2f0] sm:$0xf0] }
 0x134   : > { %v3464_v43 = vld [vmem:[%s5648_s6 + $0x10] sm:$0xf]  ;;  %v4265_v50 = vor.u32 %v5191_v41, %v4264_v40  ;;  %v3629_v40 = vor.u32 %v5027_v31, %v3626_v32  ;;  %v5067_v14 = vld [vmem:[%s5648_s6 + $0x294] sm:$0xf] }
 0x135   : > { %v4991_v44 = vld [vmem:[%s5648_s6 + $0x2c] sm:$0xf0]  ;;  %2971 = vmatpush.bf16.msra.mxu3 %v4297_v34  ;;  %2946 = vmatpush.bf16.msra.mxu1 %v3753_v45  ;;  %v3882_v34 = vld [vmem:[%s5648_s6 + $0x370] sm:$0xf0] }
 0x136   : > { %v3720_v47 = vld [vmem:[%s5648_s6 + $0x210] sm:$0xf]  ;;  %v3465_v59 = vor.u32 %v4991_v44, %v3464_v43  ;;  %v3885_v44 = vor.u32 %v5091_v33, %v3882_v34  ;;  %v3786_v15 = vld [vmem:[%s5648_s6 + $0x2b0] sm:$0xf0]  ;;  %v3285_v34 = vperm.slane %v6138_v61, 1 }
 0x137   : > { %v5055_v48 = vld [vmem:[%s5648_s6 + $0x22c] sm:$0xf0]  ;;  %2959 = vmatpush.bf16.msra.mxu2 %v4009_v46  ;;  %v5019_v46 = vld [vmem:[%s5648_s6 + $0x114] sm:$0xf]  ;;  %v3789_v32 = vor.u32 %v5067_v14, %v3786_v15 }
 0x138   : > { %v3976_v49 = vld [vmem:[%s5648_s6 + $0x410] sm:$0xf]  ;;  %v3721_v0 = vor.u32 %v5055_v48, %v3720_v47  ;;  %2934 = vmatpush.bf16.msra.mxu0 %v3465_v59  ;;  %v3594_v47 = vld [vmem:[%s5648_s6 + $0x130] sm:$0xf0] }
 0x139   : > { %v5119_v51 = vld [vmem:[%s5648_s6 + $0x42c] sm:$0xf0]  ;;  %2972 = vmatpush.bf16.msra.mxu3 %v4265_v50  ;;  %v5083_v48 = vld [vmem:[%s5648_s6 + $0x314] sm:$0xf] }
 0x13a   : > { %v4232_v52 = vld [vmem:[%s5648_s6 + $0x610] sm:$0xf]  ;;  %v3977_v1 = vor.u32 %v5119_v51, %v3976_v49  ;;  %2947 = vmatpush.bf16.msra.mxu1 %v3721_v0  ;;  %v3850_v49 = vld [vmem:[%s5648_s6 + $0x330] sm:$0xf0]  ;;  %v3597_v51 = vor.u32 %v5019_v46, %v3594_v47 }
 0x13b   : > { %v5183_v53 = vld [vmem:[%s5648_s6 + $0x62c] sm:$0xf0]  ;;  %2935 = vmatmul.bf16.vlgmr.msra.gmra.mxu0 %v5762_v18  ;;  %v5011_v59 = vld [vmem:[%s5648_s6 + $0xd4] sm:$0xf] }
 0x13c   : > { %v4712_v55 = vld [vmem:[%s5648_s6 + $0x9d0] sm:$0xf]  ;;  %v4233_v4 = vor.u32 %v5183_v53, %v4232_v52  ;;  %2960 = vmatpush.bf16.msra.mxu2 %v3977_v1  ;;  %v2767_v13 = vpop.f32.mrf.mxu3  ;;  %v4938_v14 = vld [vmem:[%s5648_s6 + $0xbb0] sm:$0xf0] }
 0x13d   : > { %v5303_v56 = vld [vmem:[%s5648_s6 + $0x9ec] sm:$0xf0]  ;;  %2948 = vmatmul.bf16.vlgmr.msra.gmra.mxu1 %v5766_v20 }
 0x13e   : > { %v4968_v57 = vld [vmem:[%s5648_s6 + $0xbd0] sm:$0xf]  ;;  %v4713_v5 = vor.u32 %v5303_v56, %v4712_v55  ;;  %2973 = vmatpush.bf16.msra.mxu3 %v4233_v4  ;;  %v2729_v55 = vadd.f32 %v2728_v24, %v2716_v37  ;;  %v2741_v56 = vpop.f32.mrf.mxu1  ;;  %v3498_v37 = vld [vmem:[%s5648_s6 + $0x70] sm:$0xf0] }
 0x13f   : > { %v5367_v60 = vld [vmem:[%s5648_s6 + $0xbec] sm:$0xf0]  ;;  %2961 = vmatmul.bf16.vlgmr.msra.gmra.mxu2 %v5764_v19 }
 0x140   : > { %v4969_v6 = vor.u32 %v5367_v60, %v4968_v57  ;;  %v4680_v8 = vld [vmem:[%s5648_s6 + $0x990] sm:$0xf]  ;;  %2979 = vmatpush.bf16.msrb.mxu0 %v4713_v5  ;;  %3005 = vmatpush.bf16.msrb.mxu2 %v3693_v7  ;;  %v3853_v57 = vor.u32 %v5083_v48, %v3850_v49  ;;  %v3562_v60 = vld [vmem:[%s5648_s6 + $0xf0] sm:$0xf0]  ;;  %v2742_v0 = vadd.f32 %v2741_v56, %v2729_v55  ;;  %v2754_v7 = vpop.f32.mrf.mxu2 }
 0x141   : > { %v5295_v9 = vld [vmem:[%s5648_s6 + $0x9ac] sm:$0xf0]  ;;  %2974 = vmatmul.bf16.vlgmr.msra.gmra.mxu3 %v5768_v22  ;;  %v3565_v3 = vor.u32 %v5011_v59, %v3562_v60  ;;  %v4987_v48 = vld [vmem:[%s5648_s6 + $0x14] sm:$0xf] }
 0x142   : > { %v4936_v10 = vld [vmem:[%s5648_s6 + $0xb90] sm:$0xf]  ;;  %v4681_v21 = vor.u32 %v5295_v9, %v4680_v8  ;;  %2992 = vmatpush.bf16.msrb.mxu1 %v4969_v6  ;;  %3018 = vmatpush.bf16.msrb.mxu3 %v3949_v11  ;;  %v3821_v8 = vor.u32 %v5075_v62, %v3818_v63  ;;  %v3530_v11 = vld [vmem:[%s5648_s6 + $0xb0] sm:$0xf0] }
 0x143   : > { %v5359_v12 = vld [vmem:[%s5648_s6 + $0xbac] sm:$0xf0]  ;;  %v3466_v49 = vld [vmem:[%s5648_s6 + $0x30] sm:$0xf0] }
 0x144   : > { %v4937_v23 = vor.u32 %v5359_v12, %v4936_v10  ;;  %v4648_v26 = vld [vmem:[%s5648_s6 + $0x950] sm:$0xf]  ;;  %2980 = vmatpush.bf16.msrb.mxu0 %v4681_v21  ;;  %3006 = vmatpush.bf16.msrb.mxu2 %v3661_v25  ;;  %v5003_v10 = vld [vmem:[%s5648_s6 + $0x94] sm:$0xf]  ;;  %v2755_v12 = vadd.f32 %v2754_v7, %v2742_v0  ;;  %v2730_v25 = vpop.f32.mrf.mxu0  ;;  %v3469_v63 = vor.u32 %v4987_v48, %v3466_v49 }
 0x145   : > { %v5287_v27 = vld [vmem:[%s5648_s6 + $0x96c] sm:$0xf0]  ;;  %v4202_v55 = vld [vmem:[%s5648_s6 + $0x5f0] sm:$0xf0] }
 0x146   : > { %v4904_v28 = vld [vmem:[%s5648_s6 + $0xb50] sm:$0xf]  ;;  %v4649_v36 = vor.u32 %v5287_v27, %v4648_v26  ;;  %2993 = vmatpush.bf16.msrb.mxu1 %v4937_v23  ;;  %3019 = vmatpush.bf16.msrb.mxu3 %v3917_v29  ;;  %v2768_v21 = vadd.f32 %v2767_v13, %v2755_v12  ;;  %v3533_v27 = vor.u32 %v5003_v10, %v3530_v11  ;;  %v2743_v31 = vpop.f32.mrf.mxu1  ;;  %v5235_v56 = vld [vmem:[%s5648_s6 + $0x7d4] sm:$0xf] }
 0x147   : > { %v5351_v30 = vld [vmem:[%s5648_s6 + $0xb6c] sm:$0xf0]  ;;  %v5299_v59 = vld [vmem:[%s5648_s6 + $0x9d4] sm:$0xf] }
 0x148   : > { %v4905_v39 = vor.u32 %v5351_v30, %v4904_v28  ;;  %v4616_v41 = vld [vmem:[%s5648_s6 + $0x910] sm:$0xf]  ;;  %2981 = vmatpush.bf16.msrb.mxu0 %v4649_v36  ;;  %3007 = vmatpush.bf16.msrb.mxu2 %v3629_v40  ;;  %v3248_v33 = vmul.f32 -2.0, %v2768_v21  ;;  %v4995_v36 = vld [vmem:[%s5648_s6 + $0x54] sm:$0xf] }
 0x149   : > { %v5279_v42 = vld [vmem:[%s5648_s6 + $0x92c] sm:$0xf0]  ;;  %v3754_v40 = vld [vmem:[%s5648_s6 + $0x270] sm:$0xf0]  ;;  %v3501_v46 = vor.u32 %v4995_v36, %v3498_v37 }
 0x14a   : > { %v4872_v43 = vld [vmem:[%s5648_s6 + $0xb10] sm:$0xf]  ;;  %v4617_v17 = vor.u32 %v5279_v42, %v4616_v41  ;;  %2994 = vmatpush.bf16.msrb.mxu1 %v4905_v39  ;;  %3020 = vmatpush.bf16.msrb.mxu3 %v3885_v44  ;;  %v5059_v39 = vld [vmem:[%s5648_s6 + $0x254] sm:$0xf]  ;;  %v3301_v24 = vadd.f32 %v3285_v34, %v3248_v33 }
 0x14b   : > { %v5343_v45 = vld [vmem:[%s5648_s6 + $0xb2c] sm:$0xf0]  ;;  %v4714_v60 = vld [vmem:[%s5648_s6 + $0x9f0] sm:$0xf0] }
 0x14c   : > { %v4873_v50 = vor.u32 %v5343_v45, %v4872_v43  ;;  %v4584_v52 = vld [vmem:[%s5648_s6 + $0x8d0] sm:$0xf]  ;;  %2982 = vmatpush.bf16.msrb.mxu0 %v4617_v17  ;;  %3008 = vmatpush.bf16.msrb.mxu2 %v3597_v51  ;;  %v2756_v17 = vpop.f32.mrf.mxu2  ;;  %v5051_v51 = vld [vmem:[%s5648_s6 + $0x214] sm:$0xf]  ;;  %3309 = vst [vmem:[%s6158_s26 + $0x8] sm:$0xff] %v3301_v24 }
 0x14d   : > { %v5271_v53 = vld [vmem:[%s5648_s6 + $0x8ec] sm:$0xf0]  ;;  %v5363_v0 = vld [vmem:[%s5648_s6 + $0xbd4] sm:$0xf] }
 0x14e   : > { %v4840_v54 = vld [vmem:[%s5648_s6 + $0xad0] sm:$0xf]  ;;  %v4585_v1 = vor.u32 %v5271_v53, %v4584_v52  ;;  %2995 = vmatpush.bf16.msrb.mxu1 %v4873_v50  ;;  %3021 = vmatpush.bf16.msrb.mxu3 %v3853_v57  ;;  %v3757_v50 = vor.u32 %v5059_v39, %v3754_v40  ;;  %v3722_v52 = vld [vmem:[%s5648_s6 + $0x230] sm:$0xf0] }
 0x14f   : > { %v5335_v58 = vld [vmem:[%s5648_s6 + $0xaec] sm:$0xf0]  ;;  %v5171_v53 = vld [vmem:[%s5648_s6 + $0x5d4] sm:$0xf] }
 0x150   : > { %v4841_v2 = vor.u32 %v5335_v58, %v4840_v54  ;;  %v4552_v4 = vld [vmem:[%s5648_s6 + $0x890] sm:$0xf]  ;;  %2983 = vmatpush.bf16.msrb.mxu0 %v4585_v1  ;;  %3009 = vmatpush.bf16.msrb.mxu2 %v3565_v3  ;;  %v2769_v54 = vpop.f32.mrf.mxu3  ;;  %v4458_v57 = vld [vmem:[%s5648_s6 + $0x7f0] sm:$0xf0]  ;;  %v4205_v3 = vor.u32 %v5171_v53, %v4202_v55 }
 0x151   : > { %v5263_v5 = vld [vmem:[%s5648_s6 + $0x8ac] sm:$0xf0]  ;;  %v4970_v1 = vld [vmem:[%s5648_s6 + $0xbf0] sm:$0xf0] }
 0x152   : > { %v4808_v6 = vld [vmem:[%s5648_s6 + $0xa90] sm:$0xf]  ;;  %v4553_v16 = vor.u32 %v5263_v5, %v4552_v4  ;;  %2996 = vmatpush.bf16.msrb.mxu1 %v4841_v2  ;;  %3022 = vmatpush.bf16.msrb.mxu3 %v3821_v8  ;;  %v3725_v2 = vor.u32 %v5051_v51, %v3722_v52  ;;  %v4461_v4 = vor.u32 %v5235_v56, %v4458_v57  ;;  %v4170_v7 = vld [vmem:[%s5648_s6 + $0x5b0] sm:$0xf0]  ;;  %v6291_v49 = vpop.f32.mrf.mxu1 }
 0x153   : > { %v5327_v9 = vld [vmem:[%s5648_s6 + $0xaac] sm:$0xf0]  ;;  %v4717_v5 = vor.u32 %v5299_v59, %v4714_v60  ;;  %v5227_v8 = vld [vmem:[%s5648_s6 + $0x794] sm:$0xf] }
 0x154   : > { %v4520_v23 = vld [vmem:[%s5648_s6 + $0x850] sm:$0xf]  ;;  %v4809_v26 = vor.u32 %v5327_v9, %v4808_v6  ;;  %2984 = vmatpush.bf16.msrb.mxu0 %v4553_v16  ;;  %3010 = vmatpush.bf16.msrb.mxu2 %v3533_v27  ;;  %v5163_v6 = vld [vmem:[%s5648_s6 + $0x594] sm:$0xf]  ;;  %v4973_v9 = vor.u32 %v5363_v0, %v4970_v1 }
 0x155   : > { %v5255_v28 = vld [vmem:[%s5648_s6 + $0x86c] sm:$0xf0]  ;;  %v4426_v10 = vld [vmem:[%s5648_s6 + $0x7b0] sm:$0xf0]  ;;  %v4173_v15 = vor.u32 %v5163_v6, %v4170_v7 }
 0x156   : > { %v4776_v29 = vld [vmem:[%s5648_s6 + $0xa50] sm:$0xf]  ;;  %v4521_v41 = vor.u32 %v5255_v28, %v4520_v23  ;;  %2997 = vmatpush.bf16.msrb.mxu1 %v4809_v26  ;;  %3023 = vmatpush.bf16.msrb.mxu3 %v3789_v32  ;;  %v5291_v11 = vld [vmem:[%s5648_s6 + $0x994] sm:$0xf]  ;;  %v4429_v16 = vor.u32 %v5227_v8, %v4426_v10 }
 0x157   : > { %v5319_v30 = vld [vmem:[%s5648_s6 + $0xa6c] sm:$0xf0]  ;;  %v4682_v12 = vld [vmem:[%s5648_s6 + $0x9b0] sm:$0xf0] }
 0x158   : > { %v4488_v42 = vld [vmem:[%s5648_s6 + $0x810] sm:$0xf]  ;;  %v4777_v45 = vor.u32 %v5319_v30, %v4776_v29  ;;  %2985 = vmatpush.bf16.msrb.mxu0 %v4521_v41  ;;  %3011 = vmatpush.bf16.msrb.mxu2 %v3501_v46  ;;  %v5355_v13 = vld [vmem:[%s5648_s6 + $0xb94] sm:$0xf]  ;;  %v4685_v21 = vor.u32 %v5291_v11, %v4682_v12 }
 0x159   : > { %v5247_v43 = vld [vmem:[%s5648_s6 + $0x82c] sm:$0xf0]  ;;  %v5155_v23 = vld [vmem:[%s5648_s6 + $0x554] sm:$0xf]  ;;  %v4941_v27 = vor.u32 %v5355_v13, %v4938_v14 }
 0x15a   : > { %v4744_v44 = vld [vmem:[%s5648_s6 + $0xa10] sm:$0xf]  ;;  %v4489_v58 = vor.u32 %v5247_v43, %v4488_v42  ;;  %2998 = vmatpush.bf16.msrb.mxu1 %v4777_v45  ;;  %3024 = vmatpush.bf16.msrb.mxu3 %v3757_v50  ;;  %v4138_v25 = vld [vmem:[%s5648_s6 + $0x570] sm:$0xf0]  ;;  %v6307_v6 = vpop.f32.mrf.mxu2  ;;  %v2795_v12 = vpop.f32.mrf.mxu1 }
 0x15b   : > { %v5311_v47 = vld [vmem:[%s5648_s6 + $0xa2c] sm:$0xf0]  ;;  %v5219_v26 = vld [vmem:[%s5648_s6 + $0x754] sm:$0xf]  ;;  %v4141_v33 = vor.u32 %v5155_v23, %v4138_v25  ;;  %v3632_v12 = vld [vmem:[%s5648_s6 + $0x158] sm:$0xf] }
 0x15c   : > { %v4745_v62 = vor.u32 %v5311_v47, %v4744_v44  ;;  %2986 = vmatpush.bf16.msrb.mxu0 %v4489_v58  ;;  %3012 = vmatpush.bf16.msrb.mxu2 %v3469_v63  ;;  %v4394_v28 = vld [vmem:[%s5648_s6 + $0x770] sm:$0xf0]  ;;  %v6289_v47 = vpop.f32.mrf.mxu0  ;;  %v6311_v10 = vpop.f32.mrf.mxu3 }
 0x15d   : > { %v5283_v29 = vld [vmem:[%s5648_s6 + $0x954] sm:$0xf]  ;;  %v4397_v34 = vor.u32 %v5219_v26, %v4394_v28 }
 0x15e   : > { %2999 = vmatpush.bf16.msrb.mxu1 %v4745_v62  ;;  %3025 = vmatpush.bf16.msrb.mxu3 %v3725_v2  ;;  %v4650_v30 = vld [vmem:[%s5648_s6 + $0x970] sm:$0xf0] }
 0x15f   : > { %2987 = vmatmul.bf16.vlgmr.msrb.gmra.mxu0 %v5823_v35  ;;  %v5347_v31 = vld [vmem:[%s5648_s6 + $0xb54] sm:$0xf]  ;;  %3013 = vmatmul.bf16.vlgmr.msrb.gmra.mxu2 %v5762_v18  ;;  %v4653_v36 = vor.u32 %v5283_v29, %v4650_v30 }
 0x160   : > { %3031 = vmatpush.bf16.msra.mxu0 %v4205_v3  ;;  %3057 = vmatpush.bf16.msra.mxu2 %v4717_v5  ;;  %v4906_v32 = vld [vmem:[%s5648_s6 + $0xb70] sm:$0xf0] }
 0x161   : > { %3000 = vmatmul.bf16.vlgmr.msrb.gmra.mxu1 %v5827_v38  ;;  %3026 = vmatmul.bf16.vlgmr.msrb.gmra.mxu3 %v5766_v20  ;;  %v5147_v37 = vld [vmem:[%s5648_s6 + $0x514] sm:$0xf]  ;;  %v4909_v41 = vor.u32 %v5347_v31, %v4906_v32 }
 0x162   : > { %3044 = vmatpush.bf16.msra.mxu1 %v4461_v4  ;;  %3070 = vmatpush.bf16.msra.mxu3 %v4973_v9  ;;  %v4106_v39 = vld [vmem:[%s5648_s6 + $0x530] sm:$0xf0] }
 0x163   : > { %v5211_v40 = vld [vmem:[%s5648_s6 + $0x714] sm:$0xf]  ;;  %v4109_v48 = vor.u32 %v5147_v37, %v4106_v39 }
 0x164   : > { %3032 = vmatpush.bf16.msra.mxu0 %v4173_v15  ;;  %3058 = vmatpush.bf16.msra.mxu2 %v4685_v21  ;;  %v4362_v42 = vld [vmem:[%s5648_s6 + $0x730] sm:$0xf0]  ;;  %v2782_v9 = vpop.f32.mrf.mxu0 }
 0x165   : > { %v5275_v43 = vld [vmem:[%s5648_s6 + $0x914] sm:$0xf]  ;;  %v4365_v17 = vor.u32 %v5211_v40, %v4362_v42 }
 0x166   : > { %3045 = vmatpush.bf16.msra.mxu1 %v4429_v16  ;;  %3071 = vmatpush.bf16.msra.mxu3 %v4941_v27  ;;  %v4618_v44 = vld [vmem:[%s5648_s6 + $0x930] sm:$0xf0] }
 0x167   : > { %v5339_v45 = vld [vmem:[%s5648_s6 + $0xb14] sm:$0xf]  ;;  %v4621_v24 = vor.u32 %v5275_v43, %v4618_v44  ;;  %v2808_v44 = vpop.f32.mrf.mxu2 }
 0x168   : > { %v4874_v46 = vld [vmem:[%s5648_s6 + $0xb30] sm:$0xf0]  ;;  %3033 = vmatpush.bf16.msra.mxu0 %v4141_v33  ;;  %3059 = vmatpush.bf16.msra.mxu2 %v4653_v36 }
 0x169   : > { %v5139_v50 = vld [vmem:[%s5648_s6 + $0x4d4] sm:$0xf]  ;;  %v4877_v53 = vor.u32 %v5339_v45, %v4874_v46  ;;  %v3696_v45 = vld [vmem:[%s5648_s6 + $0x1d8] sm:$0xf] }
 0x16a   : > { %3046 = vmatpush.bf16.msra.mxu1 %v4397_v34  ;;  %v4074_v51 = vld [vmem:[%s5648_s6 + $0x4f0] sm:$0xf0]  ;;  %3072 = vmatpush.bf16.msra.mxu3 %v4909_v41  ;;  %v5048_v46 = vld [vmem:[%s5648_s6 + $0x1f4] sm:$0xf0] }
 0x16b   : > { %v5203_v52 = vld [vmem:[%s5648_s6 + $0x6d4] sm:$0xf]  ;;  %v4077_v59 = vor.u32 %v5139_v50, %v4074_v51  ;;  %v5112_v50 = vld [vmem:[%s5648_s6 + $0x3f4] sm:$0xf0] }
 0x16c   : > { %v4330_v54 = vld [vmem:[%s5648_s6 + $0x6f0] sm:$0xf0]  ;;  %3034 = vmatpush.bf16.msra.mxu0 %v4109_v48  ;;  %3060 = vmatpush.bf16.msra.mxu2 %v4621_v24  ;;  %v3952_v48 = vld [vmem:[%s5648_s6 + $0x3d8] sm:$0xf] }
 0x16d   : > { %v5267_v55 = vld [vmem:[%s5648_s6 + $0x8d4] sm:$0xf]  ;;  %v4333_v60 = vor.u32 %v5203_v52, %v4330_v54  ;;  %v4208_v51 = vld [vmem:[%s5648_s6 + $0x5d8] sm:$0xf] }
 0x16e   : > { %v4586_v56 = vld [vmem:[%s5648_s6 + $0x8f0] sm:$0xf0]  ;;  %3047 = vmatpush.bf16.msra.mxu1 %v4365_v17  ;;  %3073 = vmatpush.bf16.msra.mxu3 %v4877_v53  ;;  %v2821_v17 = vpop.f32.mrf.mxu3  ;;  %v5176_v52 = vld [vmem:[%s5648_s6 + $0x5f4] sm:$0xf0] }
 0x16f   : > { %v5331_v57 = vld [vmem:[%s5648_s6 + $0xad4] sm:$0xf]  ;;  %v4589_v62 = vor.u32 %v5267_v55, %v4586_v56  ;;  %v4464_v55 = vld [vmem:[%s5648_s6 + $0x7d8] sm:$0xf] }
 0x170   : > { %v4842_v58 = vld [vmem:[%s5648_s6 + $0xaf0] sm:$0xf0]  ;;  %3035 = vmatpush.bf16.msra.mxu0 %v4077_v59  ;;  %v5240_v56 = vld [vmem:[%s5648_s6 + $0x7f4] sm:$0xf0]  ;;  %v2794_v59 = vadd.f32 %v6291_v49, %v6289_v47 }
 0x171   : > { %v5131_v63 = vld [vmem:[%s5648_s6 + $0x494] sm:$0xf]  ;;  %v4845_v2 = vor.u32 %v5331_v57, %v4842_v58  ;;  %3061 = vmatpush.bf16.msra.mxu2 %v4589_v62  ;;  %v3697_v58 = vor.u32 %v5048_v46, %v3696_v45  ;;  %v4209_v62 = vor.u32 %v5176_v52, %v4208_v51  ;;  %v3568_v46 = vld [vmem:[%s5648_s6 + $0xd8] sm:$0xf] }
 0x172   : > { %v4042_v0 = vld [vmem:[%s5648_s6 + $0x4b0] sm:$0xf0]  ;;  %3048 = vmatpush.bf16.msra.mxu1 %v4333_v60  ;;  %v3953_v60 = vor.u32 %v5112_v50, %v3952_v48  ;;  %v2807_v49 = vadd.f32 %v6307_v6, %v2794_v59  ;;  %v4400_v6 = vld [vmem:[%s5648_s6 + $0x758] sm:$0xf] }
 0x173   : > { %v5195_v1 = vld [vmem:[%s5648_s6 + $0x694] sm:$0xf]  ;;  %v4045_v11 = vor.u32 %v5131_v63, %v4042_v0  ;;  %3074 = vmatpush.bf16.msra.mxu3 %v4845_v2  ;;  %v3664_v63 = vld [vmem:[%s5648_s6 + $0x198] sm:$0xf]  ;;  %v4465_v2 = vor.u32 %v5240_v56, %v4464_v55 }
 0x174   : > { %v4298_v3 = vld [vmem:[%s5648_s6 + $0x6b0] sm:$0xf0]  ;;  %v5040_v0 = vld [vmem:[%s5648_s6 + $0x1b4] sm:$0xf0] }
 0x175   : > { %v5259_v4 = vld [vmem:[%s5648_s6 + $0x894] sm:$0xf]  ;;  %v4301_v13 = vor.u32 %v5195_v1, %v4298_v3  ;;  %3036 = vmatpush.bf16.msra.mxu0 %v4045_v11  ;;  %v3920_v1 = vld [vmem:[%s5648_s6 + $0x398] sm:$0xf]  ;;  %v3665_v47 = vor.u32 %v5040_v0, %v3664_v63 }
 0x176   : > { %v4554_v5 = vld [vmem:[%s5648_s6 + $0x8b0] sm:$0xf0]  ;;  %v5104_v3 = vld [vmem:[%s5648_s6 + $0x3b4] sm:$0xf0] }
 0x177   : > { %v5323_v7 = vld [vmem:[%s5648_s6 + $0xa94] sm:$0xf]  ;;  %v4557_v14 = vor.u32 %v5259_v4, %v4554_v5  ;;  %3049 = vmatpush.bf16.msra.mxu1 %v4301_v13  ;;  %v4176_v4 = vld [vmem:[%s5648_s6 + $0x598] sm:$0xf]  ;;  %v3921_v9 = vor.u32 %v5104_v3, %v3920_v1 }
 0x178   : > { %v4810_v8 = vld [vmem:[%s5648_s6 + $0xab0] sm:$0xf0]  ;;  %v5168_v5 = vld [vmem:[%s5648_s6 + $0x5b4] sm:$0xf0] }
 0x179   : > { %v5123_v15 = vld [vmem:[%s5648_s6 + $0x454] sm:$0xf]  ;;  %v4813_v23 = vor.u32 %v5323_v7, %v4810_v8  ;;  %3062 = vmatpush.bf16.msra.mxu2 %v4557_v14  ;;  %v4432_v7 = vld [vmem:[%s5648_s6 + $0x798] sm:$0xf]  ;;  %v4177_v11 = vor.u32 %v5168_v5, %v4176_v4 }
 0x17a   : > { %v4010_v16 = vld [vmem:[%s5648_s6 + $0x470] sm:$0xf0]  ;;  %v5232_v8 = vld [vmem:[%s5648_s6 + $0x7b4] sm:$0xf0]  ;;  %v6384_v5 = vpop.f32.mrf.mxu2 }
 0x17b   : > { %v5187_v21 = vld [vmem:[%s5648_s6 + $0x654] sm:$0xf]  ;;  %v4013_v30 = vor.u32 %v5123_v15, %v4010_v16  ;;  %3075 = vmatpush.bf16.msra.mxu3 %v4813_v23  ;;  %v5032_v13 = vld [vmem:[%s5648_s6 + $0x174] sm:$0xf0]  ;;  %v4433_v15 = vor.u32 %v5232_v8, %v4432_v7 }
 0x17c   : > { %v4266_v25 = vld [vmem:[%s5648_s6 + $0x670] sm:$0xf0]  ;;  %v3888_v14 = vld [vmem:[%s5648_s6 + $0x358] sm:$0xf]  ;;  %v6388_v8 = vpop.f32.mrf.mxu3 }
 0x17d   : > { %v5251_v26 = vld [vmem:[%s5648_s6 + $0x854] sm:$0xf]  ;;  %v4269_v33 = vor.u32 %v5187_v21, %v4266_v25  ;;  %3037 = vmatpush.bf16.msra.mxu0 %v4013_v30  ;;  %v5096_v16 = vld [vmem:[%s5648_s6 + $0x374] sm:$0xf0] }
 0x17e   : > { %v4522_v27 = vld [vmem:[%s5648_s6 + $0x870] sm:$0xf0]  ;;  %v4144_v21 = vld [vmem:[%s5648_s6 + $0x558] sm:$0xf] }
 0x17f   : > { %v5315_v28 = vld [vmem:[%s5648_s6 + $0xa54] sm:$0xf]  ;;  %v4525_v34 = vor.u32 %v5251_v26, %v4522_v27  ;;  %3050 = vmatpush.bf16.msra.mxu1 %v4269_v33  ;;  %v5160_v23 = vld [vmem:[%s5648_s6 + $0x574] sm:$0xf0]  ;;  %v3633_v26 = vor.u32 %v5032_v13, %v3632_v12  ;;  %v2820_v27 = vadd.f32 %v6311_v10, %v2807_v49 }
 0x180   : > { %v4778_v29 = vld [vmem:[%s5648_s6 + $0xa70] sm:$0xf0]  ;;  %v5224_v25 = vld [vmem:[%s5648_s6 + $0x774] sm:$0xf0] }
 0x181   : > { %v5115_v31 = vld [vmem:[%s5648_s6 + $0x414] sm:$0xf]  ;;  %v4781_v40 = vor.u32 %v5315_v28, %v4778_v29  ;;  %3063 = vmatpush.bf16.msra.mxu2 %v4525_v34  ;;  %v3889_v28 = vor.u32 %v5096_v16, %v3888_v14  ;;  %v4145_v29 = vor.u32 %v5160_v23, %v4144_v21  ;;  %v3600_v30 = vld [vmem:[%s5648_s6 + $0x118] sm:$0xf]  ;;  %v4401_v33 = vor.u32 %v5224_v25, %v4400_v6 }
 0x182   : > { %v3978_v32 = vld [vmem:[%s5648_s6 + $0x430] sm:$0xf0]  ;;  %v5088_v34 = vld [vmem:[%s5648_s6 + $0x334] sm:$0xf0] }
 0x183   : > { %v5179_v36 = vld [vmem:[%s5648_s6 + $0x614] sm:$0xf]  ;;  %v3981_v24 = vor.u32 %v5115_v31, %v3978_v32  ;;  %3076 = vmatpush.bf16.msra.mxu3 %v4781_v40  ;;  %v5024_v31 = vld [vmem:[%s5648_s6 + $0x134] sm:$0xf0]  ;;  %v2832_v40 = vpop.f32.mrf.mxu0 }
 0x184   : > { %v4234_v37 = vld [vmem:[%s5648_s6 + $0x630] sm:$0xf0]  ;;  %v3856_v32 = vld [vmem:[%s5648_s6 + $0x318] sm:$0xf] }
 0x185   : > { %v5243_v39 = vld [vmem:[%s5648_s6 + $0x814] sm:$0xf]  ;;  %v4237_v53 = vor.u32 %v5179_v36, %v4234_v37  ;;  %3038 = vmatpush.bf16.msra.mxu0 %v3981_v24  ;;  %v4112_v36 = vld [vmem:[%s5648_s6 + $0x518] sm:$0xf]  ;;  %v3857_v44 = vor.u32 %v5088_v34, %v3856_v32 }
 0x186   : > { %v4490_v41 = vld [vmem:[%s5648_s6 + $0x830] sm:$0xf0]  ;;  %v5152_v37 = vld [vmem:[%s5648_s6 + $0x534] sm:$0xf0] }
 0x187   : > { %v5307_v42 = vld [vmem:[%s5648_s6 + $0xa14] sm:$0xf]  ;;  %v4493_v54 = vor.u32 %v5243_v39, %v4490_v41  ;;  %3051 = vmatpush.bf16.msra.mxu1 %v4237_v53  ;;  %v4368_v39 = vld [vmem:[%s5648_s6 + $0x718] sm:$0xf]  ;;  %v3601_v41 = vor.u32 %v5024_v31, %v3600_v30  ;;  %v4113_v45 = vor.u32 %v5152_v37, %v4112_v36 }
 0x188   : > { %v4746_v43 = vld [vmem:[%s5648_s6 + $0xa30] sm:$0xf0]  ;;  %3039 = vmatmul.bf16.vlgmr.msra.gmra.mxu0 %v5764_v19  ;;  %v5216_v10 = vld [vmem:[%s5648_s6 + $0x734] sm:$0xf0] }
 0x189   : > { %v4749_v57 = vor.u32 %v5307_v42, %v4746_v43  ;;  %3064 = vmatpush.bf16.msra.mxu2 %v4493_v54  ;;  %3083 = vmatpush.bf16.msrb.mxu0 %v3697_v58  ;;  %v2833_v42 = vadd.f32 %v2832_v40, %v2820_v27  ;;  %v2845_v43 = vpop.f32.mrf.mxu1  ;;  %v5016_v48 = vld [vmem:[%s5648_s6 + $0xf4] sm:$0xf0]  ;;  %v4369_v24 = vor.u32 %v5216_v10, %v4368_v39  ;;  %v3286_v58 = vperm.slane %v6138_v61, 2 }
 0x18a   : > { %3052 = vmatmul.bf16.vlgmr.msra.gmra.mxu1 %v5768_v22  ;;  %v3824_v17 = vld [vmem:[%s5648_s6 + $0x2d8] sm:$0xf]  ;;  %v3569_v56 = vor.u32 %v5016_v48, %v3568_v46 }
 0x18b   : > { %3077 = vmatpush.bf16.msra.mxu3 %v4749_v57  ;;  %3096 = vmatpush.bf16.msrb.mxu1 %v3953_v60  ;;  %v5080_v50 = vld [vmem:[%s5648_s6 + $0x2f4] sm:$0xf0]  ;;  %v2846_v53 = vadd.f32 %v2845_v43, %v2833_v42 }
 0x18c   : > { %3065 = vmatmul.bf16.vlgmr.msra.gmra.mxu2 %v5823_v35  ;;  %v4080_v51 = vld [vmem:[%s5648_s6 + $0x4d8] sm:$0xf]  ;;  %v3825_v59 = vor.u32 %v5080_v50, %v3824_v17  ;;  %v5044_v17 = vld [vmem:[%s5648_s6 + $0x1dc] sm:$0xf] }
 0x18d   : > { %3109 = vmatpush.bf16.msrb.mxu2 %v4209_v62  ;;  %3084 = vmatpush.bf16.msrb.mxu0 %v3665_v47  ;;  %v5144_v52 = vld [vmem:[%s5648_s6 + $0x4f4] sm:$0xf0]  ;;  %v3249_v57 = vmul.f32 -2.0, %v2846_v53  ;;  %v2834_v47 = vpop.f32.mrf.mxu0  ;;  %v3954_v53 = vld [vmem:[%s5648_s6 + $0x3f8] sm:$0xf0] }
 0x18e   : > { %3078 = vmatmul.bf16.vlgmr.msra.gmra.mxu3 %v5827_v38  ;;  %v4336_v54 = vld [vmem:[%s5648_s6 + $0x6d8] sm:$0xf]  ;;  %v4081_v60 = vor.u32 %v5144_v52, %v4080_v51  ;;  %v5108_v52 = vld [vmem:[%s5648_s6 + $0x3dc] sm:$0xf] }
 0x18f   : > { %3122 = vmatpush.bf16.msrb.mxu3 %v4465_v2  ;;  %3097 = vmatpush.bf16.msrb.mxu1 %v3921_v9  ;;  %v5208_v55 = vld [vmem:[%s5648_s6 + $0x6f4] sm:$0xf0]  ;;  %v3302_v49 = vadd.f32 %v3286_v58, %v3249_v57 }
 0x190   : > { %v3536_v62 = vld [vmem:[%s5648_s6 + $0x98] sm:$0xf]  ;;  %v4337_v1 = vor.u32 %v5208_v55, %v4336_v54 }
 0x191   : > { %3110 = vmatpush.bf16.msrb.mxu2 %v4177_v11  ;;  %3085 = vmatpush.bf16.msrb.mxu0 %v3633_v26  ;;  %v5008_v63 = vld [vmem:[%s5648_s6 + $0xb4] sm:$0xf0]  ;;  %v2847_v12 = vpop.f32.mrf.mxu1  ;;  %3310 = vst [vmem:[%s6158_s26 + $0x10] sm:$0xff] %v3302_v49 }
 0x192   : > { %v3792_v0 = vld [vmem:[%s5648_s6 + $0x298] sm:$0xf]  ;;  %v3537_v9 = vor.u32 %v5008_v63, %v3536_v62  ;;  %v3957_v62 = vor.u32 %v5108_v52, %v3954_v53 }
 0x193   : > { %3123 = vmatpush.bf16.msrb.mxu3 %v4433_v15  ;;  %3098 = vmatpush.bf16.msrb.mxu1 %v3889_v28  ;;  %v5072_v2 = vld [vmem:[%s5648_s6 + $0x2b4] sm:$0xf0] }
 0x194   : > { %v4048_v3 = vld [vmem:[%s5648_s6 + $0x498] sm:$0xf]  ;;  %v3793_v13 = vor.u32 %v5072_v2, %v3792_v0  ;;  %v5036_v0 = vld [vmem:[%s5648_s6 + $0x19c] sm:$0xf] }
 0x195   : > { %3111 = vmatpush.bf16.msrb.mxu2 %v4145_v29  ;;  %3086 = vmatpush.bf16.msrb.mxu0 %v3601_v41  ;;  %v5136_v4 = vld [vmem:[%s5648_s6 + $0x4b4] sm:$0xf0]  ;;  %v2860_v41 = vpop.f32.mrf.mxu2  ;;  %v5100_v2 = vld [vmem:[%s5648_s6 + $0x39c] sm:$0xf] }
 0x196   : > { %v4304_v7 = vld [vmem:[%s5648_s6 + $0x698] sm:$0xf]  ;;  %v4049_v14 = vor.u32 %v5136_v4, %v4048_v3  ;;  %v3922_v3 = vld [vmem:[%s5648_s6 + $0x3b8] sm:$0xf0] }
 0x197   : > { %3124 = vmatpush.bf16.msrb.mxu3 %v4401_v33  ;;  %3099 = vmatpush.bf16.msrb.mxu1 %v3857_v44  ;;  %v5200_v61 = vld [vmem:[%s5648_s6 + $0x6b4] sm:$0xf0] }
 0x198   : > { %v3504_v11 = vld [vmem:[%s5648_s6 + $0x58] sm:$0xf]  ;;  %v4305_v23 = vor.u32 %v5200_v61, %v4304_v7 }
 0x199   : > { %3112 = vmatpush.bf16.msrb.mxu2 %v4113_v45  ;;  %3087 = vmatpush.bf16.msrb.mxu0 %v3569_v56  ;;  %v5000_v15 = vld [vmem:[%s5648_s6 + $0x74] sm:$0xf0]  ;;  %v2873_v45 = vpop.f32.mrf.mxu3 }
 0x19a   : > { %v3760_v16 = vld [vmem:[%s5648_s6 + $0x258] sm:$0xf]  ;;  %v3505_v28 = vor.u32 %v5000_v15, %v3504_v11  ;;  %v3925_v11 = vor.u32 %v5100_v2, %v3922_v3  ;;  %v5092_v15 = vld [vmem:[%s5648_s6 + $0x35c] sm:$0xf] }
 0x19b   : > { %3125 = vmatpush.bf16.msrb.mxu3 %v4369_v24  ;;  %3100 = vmatpush.bf16.msrb.mxu1 %v3825_v59  ;;  %v5064_v21 = vld [vmem:[%s5648_s6 + $0x274] sm:$0xf0]  ;;  %v3698_v24 = vld [vmem:[%s5648_s6 + $0x1f8] sm:$0xf0] }
 0x19c   : > { %v4016_v6 = vld [vmem:[%s5648_s6 + $0x458] sm:$0xf]  ;;  %v3761_v31 = vor.u32 %v5064_v21, %v3760_v16  ;;  %v3701_v57 = vor.u32 %v5044_v17, %v3698_v24  ;;  %v3890_v16 = vld [vmem:[%s5648_s6 + $0x378] sm:$0xf0] }
 0x19d   : > { %3113 = vmatpush.bf16.msrb.mxu2 %v4081_v60  ;;  %v5128_v25 = vld [vmem:[%s5648_s6 + $0x474] sm:$0xf0]  ;;  %3088 = vmatpush.bf16.msrb.mxu0 %v3537_v9  ;;  %v5012_v45 = vld [vmem:[%s5648_s6 + $0xdc] sm:$0xf] }
 0x19e   : > { %v4272_v26 = vld [vmem:[%s5648_s6 + $0x658] sm:$0xf]  ;;  %v4017_v32 = vor.u32 %v5128_v25, %v4016_v6  ;;  %v3826_v17 = vld [vmem:[%s5648_s6 + $0x2f8] sm:$0xf0] }
 0x19f   : > { %3126 = vmatpush.bf16.msrb.mxu3 %v4337_v1  ;;  %v5192_v27 = vld [vmem:[%s5648_s6 + $0x674] sm:$0xf0]  ;;  %3101 = vmatpush.bf16.msrb.mxu1 %v3793_v13  ;;  %v3666_v1 = vld [vmem:[%s5648_s6 + $0x1b8] sm:$0xf0] }
 0x1a0   : > { %v3472_v29 = vld [vmem:[%s5648_s6 + $0x18] sm:$0xf]  ;;  %v4273_v37 = vor.u32 %v5192_v27, %v4272_v26  ;;  %v3669_v61 = vor.u32 %v5036_v0, %v3666_v1  ;;  %v5028_v13 = vld [vmem:[%s5648_s6 + $0x15c] sm:$0xf] }
 0x1a1   : > { %v4992_v30 = vld [vmem:[%s5648_s6 + $0x34] sm:$0xf0]  ;;  %3114 = vmatpush.bf16.msrb.mxu2 %v4049_v14  ;;  %3089 = vmatpush.bf16.msrb.mxu0 %v3505_v28  ;;  %v3634_v14 = vld [vmem:[%s5648_s6 + $0x178] sm:$0xf0] }
 0x1a2   : > { %v3728_v33 = vld [vmem:[%s5648_s6 + $0x218] sm:$0xf]  ;;  %v3473_v46 = vor.u32 %v4992_v30, %v3472_v29  ;;  %v3637_v25 = vor.u32 %v5028_v13, %v3634_v14  ;;  %v3893_v29 = vor.u32 %v5092_v15, %v3890_v16  ;;  %v5068_v0 = vld [vmem:[%s5648_s6 + $0x29c] sm:$0xf]  ;;  %v6466_v15 = vld [vmem:[%s5654_s9] sm:$0xff] }
 0x1a3   : > { %v5056_v34 = vld [vmem:[%s5648_s6 + $0x234] sm:$0xf0]  ;;  %3127 = vmatpush.bf16.msrb.mxu3 %v4305_v23  ;;  %3102 = vmatpush.bf16.msrb.mxu1 %v3761_v31  ;;  %v2872_v23 = vadd.f32 %v6388_v8, %v6384_v5  ;;  %v5020_v31 = vld [vmem:[%s5648_s6 + $0x11c] sm:$0xf]  ;;  %v2884_v8 = vpop.f32.mrf.mxu0  ;;  %v3287_v16 = vperm.slane %v6466_v15, 3 }
 0x1a4   : > { %v3984_v36 = vld [vmem:[%s5648_s6 + $0x418] sm:$0xf]  ;;  %v3729_v50 = vor.u32 %v5056_v34, %v3728_v33  ;;  %v5084_v33 = vld [vmem:[%s5648_s6 + $0x31c] sm:$0xf] }
 0x1a5   : > { %v5120_v39 = vld [vmem:[%s5648_s6 + $0x434] sm:$0xf0]  ;;  %3115 = vmatpush.bf16.msrb.mxu2 %v4017_v32  ;;  %3090 = vmatpush.bf16.msrb.mxu0 %v3473_v46  ;;  %v3602_v32 = vld [vmem:[%s5648_s6 + $0x138] sm:$0xf0]  ;;  %v2885_v41 = vadd.f32 %v2884_v8, %v2872_v23 }
 0x1a6   : > { %v4240_v10 = vld [vmem:[%s5648_s6 + $0x618] sm:$0xf]  ;;  %v3985_v51 = vor.u32 %v5120_v39, %v3984_v36  ;;  %v3858_v34 = vld [vmem:[%s5648_s6 + $0x338] sm:$0xf0] }
 0x1a7   : > { %v5184_v40 = vld [vmem:[%s5648_s6 + $0x634] sm:$0xf0]  ;;  %3128 = vmatpush.bf16.msrb.mxu3 %v4273_v37  ;;  %3103 = vmatpush.bf16.msrb.mxu1 %v3729_v50  ;;  %v3605_v37 = vor.u32 %v5020_v31, %v3602_v32  ;;  %v3570_v46 = vld [vmem:[%s5648_s6 + $0xf8] sm:$0xf0] }
 0x1a8   : > { %v4720_v42 = vld [vmem:[%s5648_s6 + $0x9d8] sm:$0xf]  ;;  %v4241_v54 = vor.u32 %v5184_v40, %v4240_v10  ;;  %3091 = vmatmul.bf16.vlgmr.msrb.gmra.mxu0 %v5762_v18  ;;  %v3573_v52 = vor.u32 %v5012_v45, %v3570_v46  ;;  %v3794_v1 = vld [vmem:[%s5648_s6 + $0x2b8] sm:$0xf0] }
 0x1a9   : > { %v5304_v43 = vld [vmem:[%s5648_s6 + $0x9f4] sm:$0xf0]  ;;  %3116 = vmatpush.bf16.msrb.mxu2 %v3985_v51  ;;  %v3797_v13 = vor.u32 %v5068_v0, %v3794_v1  ;;  %v3506_v23 = vld [vmem:[%s5648_s6 + $0x78] sm:$0xf0] }
 0x1aa   : > { %v4976_v44 = vld [vmem:[%s5648_s6 + $0xbd8] sm:$0xf]  ;;  %v4721_v55 = vor.u32 %v5304_v43, %v4720_v42  ;;  %3104 = vmatmul.bf16.vlgmr.msrb.gmra.mxu1 %v5766_v20  ;;  %v2897_v42 = vpop.f32.mrf.mxu1  ;;  %v3861_v43 = vor.u32 %v5084_v33, %v3858_v34  ;;  %v4988_v33 = vld [vmem:[%s5648_s6 + $0x1c] sm:$0xf] }
 0x1ab   : > { %v5368_v48 = vld [vmem:[%s5648_s6 + $0xbf4] sm:$0xf0]  ;;  %3129 = vmatpush.bf16.msrb.mxu3 %v4241_v54  ;;  %v2898_v24 = vadd.f32 %v2897_v42, %v2885_v41  ;;  %v3474_v34 = vld [vmem:[%s5648_s6 + $0x38] sm:$0xf0] }
 0x1ac   : > { %v4977_v56 = vor.u32 %v5368_v48, %v4976_v44  ;;  %v4688_v58 = vld [vmem:[%s5648_s6 + $0x998] sm:$0xf]  ;;  %3135 = vmatpush.bf16.msra.mxu0 %v4721_v55  ;;  %3117 = vmatmul.bf16.vlgmr.msrb.gmra.mxu2 %v5764_v19  ;;  %v5076_v48 = vld [vmem:[%s5648_s6 + $0x2dc] sm:$0xf] }
 0x1ad   : > { %v5296_v59 = vld [vmem:[%s5648_s6 + $0x9b4] sm:$0xf0]  ;;  %3161 = vmatpush.bf16.msra.mxu2 %v3701_v57  ;;  %v3829_v57 = vor.u32 %v5076_v48, %v3826_v17  ;;  %v4210_v41 = vld [vmem:[%s5648_s6 + $0x5f8] sm:$0xf0]  ;;  %v3477_v17 = vor.u32 %v4988_v33, %v3474_v34 }
 0x1ae   : > { %v4944_v60 = vld [vmem:[%s5648_s6 + $0xb98] sm:$0xf]  ;;  %v4689_v4 = vor.u32 %v5296_v59, %v4688_v58  ;;  %3148 = vmatpush.bf16.msra.mxu1 %v4977_v56  ;;  %3130 = vmatmul.bf16.vlgmr.msrb.gmra.mxu3 %v5768_v22  ;;  %v2910_v56 = vpop.f32.mrf.mxu2  ;;  %v5004_v59 = vld [vmem:[%s5648_s6 + $0x9c] sm:$0xf] }
 0x1af   : > { %v5360_v63 = vld [vmem:[%s5648_s6 + $0xbb4] sm:$0xf0]  ;;  %3174 = vmatpush.bf16.msra.mxu3 %v3957_v62  ;;  %v2911_v62 = vadd.f32 %v2910_v56, %v2898_v24  ;;  %v5236_v42 = vld [vmem:[%s5648_s6 + $0x7dc] sm:$0xf] }
 0x1b0   : > { %v4945_v7 = vor.u32 %v5360_v63, %v4944_v60  ;;  %v4656_v47 = vld [vmem:[%s5648_s6 + $0x958] sm:$0xf]  ;;  %3136 = vmatpush.bf16.msra.mxu0 %v4689_v4  ;;  %v3538_v60 = vld [vmem:[%s5648_s6 + $0xb8] sm:$0xf0]  ;;  %v2923_v63 = vpop.f32.mrf.mxu3 }
 0x1b1   : > { %v5288_v49 = vld [vmem:[%s5648_s6 + $0x974] sm:$0xf0]  ;;  %3162 = vmatpush.bf16.msra.mxu2 %v3669_v61  ;;  %v2924_v3 = vadd.f32 %v2923_v63, %v2911_v62  ;;  %v5300_v45 = vld [vmem:[%s5648_s6 + $0x9dc] sm:$0xf] }
 0x1b2   : > { %v4912_v9 = vld [vmem:[%s5648_s6 + $0xb58] sm:$0xf]  ;;  %v4657_v21 = vor.u32 %v5288_v49, %v4656_v47  ;;  %3149 = vmatpush.bf16.msra.mxu1 %v4945_v7  ;;  %v2886_v7 = vpop.f32.mrf.mxu0  ;;  %v3541_v47 = vor.u32 %v5004_v59, %v3538_v60  ;;  %v4722_v46 = vld [vmem:[%s5648_s6 + $0x9f8] sm:$0xf0] }
 0x1b3   : > { %v5352_v12 = vld [vmem:[%s5648_s6 + $0xb74] sm:$0xf0]  ;;  %3175 = vmatpush.bf16.msra.mxu3 %v3925_v11  ;;  %v3250_v14 = vmul.f32 -2.0, %v2924_v3  ;;  %v5364_v24 = vld [vmem:[%s5648_s6 + $0xbdc] sm:$0xf] }
 0x1b4   : > { %v4913_v6 = vor.u32 %v5352_v12, %v4912_v9  ;;  %v4624_v26 = vld [vmem:[%s5648_s6 + $0x918] sm:$0xf]  ;;  %3137 = vmatpush.bf16.msra.mxu0 %v4657_v21  ;;  %v2899_v12 = vpop.f32.mrf.mxu1  ;;  %v4996_v21 = vld [vmem:[%s5648_s6 + $0x5c] sm:$0xf] }
 0x1b5   : > { %v5280_v27 = vld [vmem:[%s5648_s6 + $0x934] sm:$0xf0]  ;;  %3163 = vmatpush.bf16.msra.mxu2 %v3637_v25  ;;  %v3762_v25 = vld [vmem:[%s5648_s6 + $0x278] sm:$0xf0]  ;;  %v3509_v31 = vor.u32 %v4996_v21, %v3506_v23  ;;  %v3303_v8 = vadd.f32 %v3287_v16, %v3250_v14 }
 0x1b6   : > { %v4880_v28 = vld [vmem:[%s5648_s6 + $0xb18] sm:$0xf]  ;;  %v4625_v5 = vor.u32 %v5280_v27, %v4624_v26  ;;  %3150 = vmatpush.bf16.msra.mxu1 %v4913_v6  ;;  %v5060_v6 = vld [vmem:[%s5648_s6 + $0x25c] sm:$0xf] }
 0x1b7   : > { %v5344_v30 = vld [vmem:[%s5648_s6 + $0xb34] sm:$0xf0]  ;;  %3176 = vmatpush.bf16.msra.mxu3 %v3893_v29  ;;  %3311 = vst [vmem:[%s6158_s26 + $0x18] sm:$0xff] %v3303_v8  ;;  %v4178_v56 = vld [vmem:[%s5648_s6 + $0x5b8] sm:$0xf0] }
 0x1b8   : > { %v4881_v36 = vor.u32 %v5344_v30, %v4880_v28  ;;  %v4592_v39 = vld [vmem:[%s5648_s6 + $0x8d8] sm:$0xf]  ;;  %3138 = vmatpush.bf16.msra.mxu0 %v4625_v5  ;;  %v2912_v5 = vpop.f32.mrf.mxu2  ;;  %v4434_v59 = vld [vmem:[%s5648_s6 + $0x7b8] sm:$0xf0] }
 0x1b9   : > { %v5272_v10 = vld [vmem:[%s5648_s6 + $0x8f4] sm:$0xf0]  ;;  %3164 = vmatpush.bf16.msra.mxu2 %v3605_v37  ;;  %v5052_v37 = vld [vmem:[%s5648_s6 + $0x21c] sm:$0xf] }
 0x1ba   : > { %v4848_v40 = vld [vmem:[%s5648_s6 + $0xad8] sm:$0xf]  ;;  %v4593_v50 = vor.u32 %v5272_v10, %v4592_v39  ;;  %3151 = vmatpush.bf16.msra.mxu1 %v4881_v36  ;;  %v3765_v36 = vor.u32 %v5060_v6, %v3762_v25  ;;  %v3730_v39 = vld [vmem:[%s5648_s6 + $0x238] sm:$0xf0] }
 0x1bb   : > { %v5336_v44 = vld [vmem:[%s5648_s6 + $0xaf4] sm:$0xf0]  ;;  %3177 = vmatpush.bf16.msra.mxu3 %v3861_v43  ;;  %v5172_v10 = vld [vmem:[%s5648_s6 + $0x5dc] sm:$0xf] }
 0x1bc   : > { %v4849_v51 = vor.u32 %v5336_v44, %v4848_v40  ;;  %v4560_v53 = vld [vmem:[%s5648_s6 + $0x898] sm:$0xf]  ;;  %3139 = vmatpush.bf16.msra.mxu0 %v4593_v50  ;;  %v2925_v40 = vpop.f32.mrf.mxu3  ;;  %v4466_v43 = vld [vmem:[%s5648_s6 + $0x7f8] sm:$0xf0] }
 0x1bd   : > { %v5264_v54 = vld [vmem:[%s5648_s6 + $0x8b4] sm:$0xf0]  ;;  %3165 = vmatpush.bf16.msra.mxu2 %v3573_v52  ;;  %v4978_v50 = vld [vmem:[%s5648_s6 + $0xbf8] sm:$0xf0]  ;;  %v4213_v52 = vor.u32 %v5172_v10, %v4210_v41 }
 0x1be   : > { %v4816_v55 = vld [vmem:[%s5648_s6 + $0xa98] sm:$0xf]  ;;  %v4561_v2 = vor.u32 %v5264_v54, %v4560_v53  ;;  %3152 = vmatpush.bf16.msra.mxu1 %v4849_v51  ;;  %v3733_v51 = vor.u32 %v5052_v37, %v3730_v39  ;;  %v4469_v53 = vor.u32 %v5236_v42, %v4466_v43  ;;  %v4725_v54 = vor.u32 %v5300_v45, %v4722_v46  ;;  %v5292_v60 = vld [vmem:[%s5648_s6 + $0x99c] sm:$0xf] }
 0x1bf   : > { %v5328_v58 = vld [vmem:[%s5648_s6 + $0xab4] sm:$0xf0]  ;;  %3178 = vmatpush.bf16.msra.mxu3 %v3829_v57  ;;  %v5228_v57 = vld [vmem:[%s5648_s6 + $0x79c] sm:$0xf] }
 0x1c0   : > { %v4528_v4 = vld [vmem:[%s5648_s6 + $0x858] sm:$0xf]  ;;  %v4817_v61 = vor.u32 %v5328_v58, %v4816_v55  ;;  %3140 = vmatpush.bf16.msra.mxu0 %v4561_v2  ;;  %v5164_v55 = vld [vmem:[%s5648_s6 + $0x59c] sm:$0xf]  ;;  %v4981_v58 = vor.u32 %v5364_v24, %v4978_v50  ;;  %v4437_v2 = vor.u32 %v5228_v57, %v4434_v59 }
 0x1c1   : > { %v5256_v49 = vld [vmem:[%s5648_s6 + $0x874] sm:$0xf0]  ;;  %3166 = vmatpush.bf16.msra.mxu2 %v3541_v47  ;;  %v4690_v62 = vld [vmem:[%s5648_s6 + $0x9b8] sm:$0xf0]  ;;  %v4181_v1 = vor.u32 %v5164_v55, %v4178_v56 }
 0x1c2   : > { %v4784_v9 = vld [vmem:[%s5648_s6 + $0xa58] sm:$0xf]  ;;  %v4529_v26 = vor.u32 %v5256_v49, %v4528_v4  ;;  %3153 = vmatpush.bf16.msra.mxu1 %v4817_v61  ;;  %v5356_v63 = vld [vmem:[%s5648_s6 + $0xb9c] sm:$0xf]  ;;  %v4693_v3 = vor.u32 %v5292_v60, %v4690_v62 }
 0x1c3   : > { %v5320_v11 = vld [vmem:[%s5648_s6 + $0xa74] sm:$0xf0]  ;;  %3179 = vmatpush.bf16.msra.mxu3 %v3797_v13  ;;  %v4946_v0 = vld [vmem:[%s5648_s6 + $0xbb8] sm:$0xf0] }
 0x1c4   : > { %v4496_v27 = vld [vmem:[%s5648_s6 + $0x818] sm:$0xf]  ;;  %v4785_v30 = vor.u32 %v5320_v11, %v4784_v9  ;;  %3141 = vmatpush.bf16.msra.mxu0 %v4529_v26  ;;  %v5156_v4 = vld [vmem:[%s5648_s6 + $0x55c] sm:$0xf]  ;;  %v4949_v47 = vor.u32 %v5356_v63, %v4946_v0  ;;  %v2975_v57 = vpop.f32.mrf.mxu3 }
 0x1c5   : > { %v5248_v28 = vld [vmem:[%s5648_s6 + $0x834] sm:$0xf0]  ;;  %3167 = vmatpush.bf16.msra.mxu2 %v3509_v31  ;;  %v4146_v7 = vld [vmem:[%s5648_s6 + $0x578] sm:$0xf0] }
 0x1c6   : > { %v4752_v29 = vld [vmem:[%s5648_s6 + $0xa18] sm:$0xf]  ;;  %v4497_v44 = vor.u32 %v5248_v28, %v4496_v27  ;;  %3154 = vmatpush.bf16.msra.mxu1 %v4785_v30  ;;  %v5220_v61 = vld [vmem:[%s5648_s6 + $0x75c] sm:$0xf]  ;;  %v4149_v14 = vor.u32 %v5156_v4, %v4146_v7 }
 0x1c7   : > { %v5312_v32 = vld [vmem:[%s5648_s6 + $0xa34] sm:$0xf0]  ;;  %3180 = vmatpush.bf16.msra.mxu3 %v3765_v36  ;;  %v4402_v49 = vld [vmem:[%s5648_s6 + $0x778] sm:$0xf0] }
 0x1c8   : > { %v4753_v48 = vor.u32 %v5312_v32, %v4752_v29  ;;  %3142 = vmatpush.bf16.msra.mxu0 %v4497_v44  ;;  %v5284_v9 = vld [vmem:[%s5648_s6 + $0x95c] sm:$0xf]  ;;  %v4405_v16 = vor.u32 %v5220_v61, %v4402_v49  ;;  %v6520_v32 = vpop.f32.mrf.mxu1 }
 0x1c9   : > { %3168 = vmatpush.bf16.msra.mxu2 %v3477_v17  ;;  %v4658_v11 = vld [vmem:[%s5648_s6 + $0x978] sm:$0xf0] }
 0x1ca   : > { %3155 = vmatpush.bf16.msra.mxu1 %v4753_v48  ;;  %v5348_v12 = vld [vmem:[%s5648_s6 + $0xb5c] sm:$0xf]  ;;  %v4661_v21 = vor.u32 %v5284_v9, %v4658_v11 }
 0x1cb   : > { %3181 = vmatpush.bf16.msra.mxu3 %v3733_v51  ;;  %3143 = vmatmul.bf16.vlgmr.msra.gmra.mxu0 %v5823_v35  ;;  %v4914_v13 = vld [vmem:[%s5648_s6 + $0xb78] sm:$0xf0] }
 0x1cc   : > { %3187 = vmatpush.bf16.msrb.mxu0 %v4213_v52  ;;  %3169 = vmatmul.bf16.vlgmr.msra.gmra.mxu2 %v5762_v18  ;;  %v5148_v23 = vld [vmem:[%s5648_s6 + $0x51c] sm:$0xf]  ;;  %v4917_v25 = vor.u32 %v5348_v12, %v4914_v13 }
 0x1cd   : > { %3213 = vmatpush.bf16.msrb.mxu2 %v4725_v54  ;;  %3156 = vmatmul.bf16.vlgmr.msra.gmra.mxu1 %v5827_v38  ;;  %v4114_v6 = vld [vmem:[%s5648_s6 + $0x538] sm:$0xf0] }
 0x1ce   : > { %3200 = vmatpush.bf16.msrb.mxu1 %v4469_v53  ;;  %3182 = vmatmul.bf16.vlgmr.msra.gmra.mxu3 %v5766_v20  ;;  %v5212_v18 = vld [vmem:[%s5648_s6 + $0x71c] sm:$0xf]  ;;  %v6518_v20 = vpop.f32.mrf.mxu0  ;;  %v4117_v31 = vor.u32 %v5148_v23, %v4114_v6  ;;  %v2962_v53 = vpop.f32.mrf.mxu2 }
 0x1cf   : > { %3226 = vmatpush.bf16.msrb.mxu3 %v4981_v58  ;;  %v4370_v26 = vld [vmem:[%s5648_s6 + $0x738] sm:$0xf0] }
 0x1d0   : > { %3188 = vmatpush.bf16.msrb.mxu0 %v4181_v1  ;;  %v5276_v27 = vld [vmem:[%s5648_s6 + $0x91c] sm:$0xf]  ;;  %v4373_v33 = vor.u32 %v5212_v18, %v4370_v26  ;;  %v2951_v59 = vpop.f32.mrf.mxu1 }
 0x1d1   : > { %3214 = vmatpush.bf16.msrb.mxu2 %v4693_v3  ;;  %v4626_v28 = vld [vmem:[%s5648_s6 + $0x938] sm:$0xf0] }
 0x1d2   : > { %3201 = vmatpush.bf16.msrb.mxu1 %v4437_v2  ;;  %v5340_v29 = vld [vmem:[%s5648_s6 + $0xb1c] sm:$0xf]  ;;  %v4629_v34 = vor.u32 %v5276_v27, %v4626_v28  ;;  %v2977_v27 = vpop.f32.mrf.mxu3 }
 0x1d3   : > { %3227 = vmatpush.bf16.msrb.mxu3 %v4949_v47  ;;  %v4882_v30 = vld [vmem:[%s5648_s6 + $0xb38] sm:$0xf0] }
 0x1d4   : > { %3189 = vmatpush.bf16.msrb.mxu0 %v4149_v14  ;;  %v5140_v5 = vld [vmem:[%s5648_s6 + $0x4dc] sm:$0xf]  ;;  %v4885_v37 = vor.u32 %v5340_v29, %v4882_v30 }
 0x1d5   : > { %3215 = vmatpush.bf16.msrb.mxu2 %v4661_v21  ;;  %v4082_v8 = vld [vmem:[%s5648_s6 + $0x4f8] sm:$0xf0] }
 0x1d6   : > { %3202 = vmatpush.bf16.msrb.mxu1 %v4405_v16  ;;  %v5204_v36 = vld [vmem:[%s5648_s6 + $0x6dc] sm:$0xf]  ;;  %v4085_v43 = vor.u32 %v5140_v5, %v4082_v8  ;;  %v2938_v56 = vpop.f32.mrf.mxu0  ;;  %v2964_v18 = vpop.f32.mrf.mxu2 }
 0x1d7   : > { %3228 = vmatpush.bf16.msrb.mxu3 %v4917_v25  ;;  %v4338_v39 = vld [vmem:[%s5648_s6 + $0x6f8] sm:$0xf0] }
 0x1d8   : > { %v5268_v10 = vld [vmem:[%s5648_s6 + $0x8dc] sm:$0xf]  ;;  %3190 = vmatpush.bf16.msrb.mxu0 %v4117_v31  ;;  %v4341_v44 = vor.u32 %v5204_v36, %v4338_v39 }
 0x1d9   : > { %v4594_v40 = vld [vmem:[%s5648_s6 + $0x8f8] sm:$0xf0]  ;;  %3216 = vmatpush.bf16.msrb.mxu2 %v4629_v34 }
 0x1da   : > { %v5332_v41 = vld [vmem:[%s5648_s6 + $0xadc] sm:$0xf]  ;;  %3203 = vmatpush.bf16.msrb.mxu1 %v4373_v33  ;;  %v4597_v45 = vor.u32 %v5268_v10, %v4594_v40  ;;  %v2950_v33 = vadd.f32 %v6520_v32, %v6518_v20  ;;  %v3288_v32 = vperm.slane %v6466_v15, 4 }
 0x1db   : > { %v4850_v42 = vld [vmem:[%s5648_s6 + $0xaf8] sm:$0xf0]  ;;  %3229 = vmatpush.bf16.msrb.mxu3 %v4885_v37 }
 0x1dc   : > { %v5132_v46 = vld [vmem:[%s5648_s6 + $0x49c] sm:$0xf]  ;;  %v4853_v24 = vor.u32 %v5332_v41, %v4850_v42  ;;  %3191 = vmatpush.bf16.msrb.mxu0 %v4085_v43  ;;  %v2963_v34 = vadd.f32 %v2962_v53, %v2950_v33 }
 0x1dd   : > { %v4050_v48 = vld [vmem:[%s5648_s6 + $0x4b8] sm:$0xf0]  ;;  %3217 = vmatpush.bf16.msrb.mxu2 %v4597_v45 }
 0x1de   : > { %v5196_v17 = vld [vmem:[%s5648_s6 + $0x69c] sm:$0xf]  ;;  %v4053_v58 = vor.u32 %v5132_v46, %v4050_v48  ;;  %3204 = vmatpush.bf16.msrb.mxu1 %v4341_v44  ;;  %v2976_v5 = vadd.f32 %v2975_v57, %v2963_v34  ;;  %v2988_v8 = vpop.f32.mrf.mxu0  ;;  %v3001_v37 = vpop.f32.mrf.mxu1 }
 0x1df   : > { %v4306_v50 = vld [vmem:[%s5648_s6 + $0x6b8] sm:$0xf0]  ;;  %3230 = vmatpush.bf16.msrb.mxu3 %v4853_v24 }
 0x1e0   : > { %v5260_v51 = vld [vmem:[%s5648_s6 + $0x89c] sm:$0xf]  ;;  %v4309_v60 = vor.u32 %v5196_v17, %v4306_v50  ;;  %3192 = vmatpush.bf16.msrb.mxu0 %v4053_v58  ;;  %v2989_v36 = vadd.f32 %v2988_v8, %v2976_v5 }
 0x1e1   : > { %v4562_v52 = vld [vmem:[%s5648_s6 + $0x8b8] sm:$0xf0] }
 0x1e2   : > { %v5324_v54 = vld [vmem:[%s5648_s6 + $0xa9c] sm:$0xf]  ;;  %v4565_v62 = vor.u32 %v5260_v51, %v4562_v52  ;;  %3205 = vmatpush.bf16.msrb.mxu1 %v4309_v60  ;;  %v3002_v39 = vadd.f32 %v3001_v37, %v2989_v36  ;;  %v3014_v10 = vpop.f32.mrf.mxu2  ;;  %v3291_v37 = vperm.slane %v6466_v15, 7 }
 0x1e3   : > { %v4818_v55 = vld [vmem:[%s5648_s6 + $0xab8] sm:$0xf0] }
 0x1e4   : > { %v5124_v63 = vld [vmem:[%s5648_s6 + $0x45c] sm:$0xf]  ;;  %v4821_v2 = vor.u32 %v5324_v54, %v4818_v55  ;;  %3218 = vmatpush.bf16.msrb.mxu2 %v4565_v62  ;;  %v3251_v20 = vmul.f32 -2.0, %v3002_v39  ;;  %v3027_v40 = vpop.f32.mrf.mxu3  ;;  %v3289_v54 = vperm.slane %v6466_v15, 5 }
 0x1e5   : > { %v4018_v0 = vld [vmem:[%s5648_s6 + $0x478] sm:$0xf0]  ;;  %v3028_v44 = vadd.f32 %v3027_v40, %v3014_v10 }
 0x1e6   : > { %v5188_v1 = vld [vmem:[%s5648_s6 + $0x65c] sm:$0xf]  ;;  %v4021_v49 = vor.u32 %v5124_v63, %v4018_v0  ;;  %3231 = vmatpush.bf16.msrb.mxu3 %v4821_v2  ;;  %v2990_v41 = vpop.f32.mrf.mxu0  ;;  %v3304_v42 = vadd.f32 %v3288_v32, %v3251_v20 }
 0x1e7   : > { %v4274_v3 = vld [vmem:[%s5648_s6 + $0x678] sm:$0xf0] }
 0x1e8   : > { %v5252_v4 = vld [vmem:[%s5648_s6 + $0x85c] sm:$0xf]  ;;  %v4277_v9 = vor.u32 %v5188_v1, %v4274_v3  ;;  %3193 = vmatpush.bf16.msrb.mxu0 %v4021_v49  ;;  %3312 = vst [vmem:[%s6158_s26 + $0x20] sm:$0xff] %v3304_v42 }
 0x1e9   : > { %v4530_v7 = vld [vmem:[%s5648_s6 + $0x878] sm:$0xf0] }
 0x1ea   : > { %v5316_v61 = vld [vmem:[%s5648_s6 + $0xa5c] sm:$0xf]  ;;  %v4533_v11 = vor.u32 %v5252_v4, %v4530_v7  ;;  %3206 = vmatpush.bf16.msrb.mxu1 %v4277_v9  ;;  %v3016_v43 = vpop.f32.mrf.mxu2 }
 0x1eb   : > { %v4786_v47 = vld [vmem:[%s5648_s6 + $0xa78] sm:$0xf0] }
 0x1ec   : > { %v5116_v12 = vld [vmem:[%s5648_s6 + $0x41c] sm:$0xf]  ;;  %v4789_v16 = vor.u32 %v5316_v61, %v4786_v47  ;;  %3219 = vmatpush.bf16.msrb.mxu2 %v4533_v11 }
 0x1ed   : > { %v3986_v13 = vld [vmem:[%s5648_s6 + $0x438] sm:$0xf0] }
 0x1ee   : > { %v5180_v14 = vld [vmem:[%s5648_s6 + $0x61c] sm:$0xf]  ;;  %v3989_v28 = vor.u32 %v5116_v12, %v3986_v13  ;;  %3232 = vmatpush.bf16.msrb.mxu3 %v4789_v16  ;;  %v3290_v12 = vperm.slane %v6466_v15, 6 }
 0x1ef   : > { %v4242_v21 = vld [vmem:[%s5648_s6 + $0x638] sm:$0xf0] }
 0x1f0   : > { %v5244_v23 = vld [vmem:[%s5648_s6 + $0x81c] sm:$0xf]  ;;  %v4245_v29 = vor.u32 %v5180_v14, %v4242_v21  ;;  %3194 = vmatpush.bf16.msrb.mxu0 %v3989_v28 }
 0x1f1   : > { %v4498_v6 = vld [vmem:[%s5648_s6 + $0x838] sm:$0xf0] }
 0x1f2   : > { %v5308_v25 = vld [vmem:[%s5648_s6 + $0xa1c] sm:$0xf]  ;;  %v4501_v30 = vor.u32 %v5244_v23, %v4498_v6  ;;  %3207 = vmatpush.bf16.msrb.mxu1 %v4245_v29 }
 0x1f3   : > { %v4754_v26 = vld [vmem:[%s5648_s6 + $0xa38] sm:$0xf0]  ;;  %3195 = vmatmul.bf16.vlgmr.msrb.gmra.mxu0 %v5764_v19  ;;  %v3003_v19 = vpop.f32.mrf.mxu1 }
 0x1f4   : > { %v4757_v31 = vor.u32 %v5308_v25, %v4754_v26  ;;  %3220 = vmatpush.bf16.msrb.mxu2 %v4501_v30 }
 0x1f5   : > { %3208 = vmatmul.bf16.vlgmr.msrb.gmra.mxu1 %v5768_v22  ;;  %v3029_v22 = vpop.f32.mrf.mxu3 }
 0x1f6   : > { %3233 = vmatpush.bf16.msrb.mxu3 %v4757_v31 }
 0x1f7   : > { %3221 = vmatmul.bf16.vlgmr.msrb.gmra.mxu2 %v5823_v35 }
 0x1f9   : > { %3234 = vmatmul.bf16.vlgmr.msrb.gmra.mxu3 %v5827_v38 }
 0x205   : > { %v3040_v35 = vpop.f32.mrf.mxu0 }
 0x206   : > { %v3041_v38 = vadd.f32 %v3040_v35, %v3028_v44 }
 0x207   : > { %v3053_v45 = vpop.f32.mrf.mxu1 }
 0x208   : > { %v3054_v46 = vadd.f32 %v3053_v45, %v3041_v38 }
 0x20d   : > { %v3042_v51 = vpop.f32.mrf.mxu0 }
 0x20f   : > { %v3066_v48 = vpop.f32.mrf.mxu2  ;;  %v3055_v52 = vpop.f32.mrf.mxu1 }
 0x210   : > { %v3067_v17 = vadd.f32 %v3066_v48, %v3054_v46 }
 0x211   : > { %v3079_v24 = vpop.f32.mrf.mxu3 }
 0x212   : > { %v3080_v50 = vadd.f32 %v3079_v24, %v3067_v17 }
 0x214   : > { %v3252_v53 = vmul.f32 -2.0, %v3080_v50 }
 0x216   : > { %v3305_v56 = vadd.f32 %v3289_v54, %v3252_v53 }
 0x217   : > { %v3068_v55 = vpop.f32.mrf.mxu2 }
 0x218   : > { %3313 = vst [vmem:[%s6158_s26 + $0x28] sm:$0xff] %v3305_v56 }
 0x219   : > { %v3081_v57 = vpop.f32.mrf.mxu3 }
 0x225   : > { %v3092_v58 = vpop.f32.mrf.mxu0 }
 0x227   : > { %v3105_v59 = vpop.f32.mrf.mxu1 }
 0x228   : > { %v3106_v3 = vadd.f32 %v3105_v59, %v3092_v58 }
 0x22d   : > { %v3094_v62 = vpop.f32.mrf.mxu0 }
 0x22f   : > { %v3118_v60 = vpop.f32.mrf.mxu2  ;;  %v3107_v0 = vpop.f32.mrf.mxu1 }
 0x230   : > { %v3119_v4 = vadd.f32 %v3118_v60, %v3106_v3 }
 0x231   : > { %v3131_v63 = vpop.f32.mrf.mxu3 }
 0x232   : > { %v3132_v7 = vadd.f32 %v3131_v63, %v3119_v4 }
 0x237   : > { %v3120_v1 = vpop.f32.mrf.mxu2 }
 0x239   : > { %v3133_v2 = vpop.f32.mrf.mxu3 }
 0x248   : > { %v3144_v61 = vpop.f32.mrf.mxu0 }
 0x249   : > { %v3145_v47 = vadd.f32 %v3144_v61, %v3132_v7 }
 0x24a   : > { %v3157_v49 = vpop.f32.mrf.mxu1 }
 0x24b   : > { %v3158_v9 = vadd.f32 %v3157_v49, %v3145_v47 }
 0x24d   : > { %v3253_v11 = vmul.f32 -2.0, %v3158_v9 }
 0x24f   : > { %v3170_v13 = vpop.f32.mrf.mxu2  ;;  %v3306_v21 = vadd.f32 %v3290_v12, %v3253_v11 }
 0x250   : > { %v3146_v16 = vpop.f32.mrf.mxu0 }
 0x251   : > { %v3183_v14 = vpop.f32.mrf.mxu3  ;;  %3314 = vst [vmem:[%s6158_s26 + $0x30] sm:$0xff] %v3306_v21 }
 0x252   : > { %v3159_v23 = vpop.f32.mrf.mxu1  ;;  %v3184_v25 = vadd.f32 %v3183_v14, %v3170_v13 }
 0x257   : > { %v3172_v6 = vpop.f32.mrf.mxu2 }
 0x259   : > { %v3185_v18 = vpop.f32.mrf.mxu3 }
 0x270   : > { %v3196_v26 = vpop.f32.mrf.mxu0 }
 0x271   : > { %v3197_v28 = vadd.f32 %v3196_v26, %v3184_v25 }
 0x272   : > { %v3209_v27 = vpop.f32.mrf.mxu1 }
 0x273   : > { %v3210_v29 = vadd.f32 %v3209_v27, %v3197_v28 }
 0x278   : > { %v3198_v34 = vpop.f32.mrf.mxu0 }
 0x27a   : > { %v3222_v30 = vpop.f32.mrf.mxu2  ;;  %v3211_v5 = vpop.f32.mrf.mxu1 }
 0x27b   : > { %v3223_v31 = vadd.f32 %v3222_v30, %v3210_v29 }
 0x27c   : > { %v3235_v33 = vpop.f32.mrf.mxu3 }
 0x27d   : > { %v3236_v8 = vadd.f32 %v3235_v33, %v3223_v31 }
 0x27f   : > { %v3254_v36 = vmul.f32 -2.0, %v3236_v8 }
 0x281   : > { %v3307_v20 = vadd.f32 %v3291_v37, %v3254_v36 }
 0x282   : > { %v3224_v39 = vpop.f32.mrf.mxu2 }
 0x283   : > { %3315 = vst [vmem:[%s6158_s26 + $0x38] sm:$0xff] %v3307_v20 }
 0x284   : > { %v3237_v32 = vpop.f32.mrf.mxu3 }
 0x285 PF: > { %s19_s17 = sadd.s32 1, %s5550_s17   ;;  %s6593_s12 = smov %s5534_s13 }
 0x286   : > { %p16_p0 = scmp.ge.s32.totalorder %s19_s17, 4   ;;  %s6594_s13 = smov %s5538_s14 }
 0x287   : > { %s6595_s14 = smov %s5620_s23  ;;  %s6596_s15 = smov %s5546_s16 }
 0x288   : > { %s6597_s16 = smov %s6599_s19  ;;  %18 = sbr.rel (!%p16_p0) target bundleno = 6 (0x6), region = 96 }
 0x28d   :  { %3338 = vsyncpa [#allocation3], 1 }
 0x28e   :  { %3340 = vsyncpa [#allocation3 + $0x1], 1 }
 0x28f   :  { %3341 = vsyncpa [#allocation5], 1 }
 0x290   :  { %3343 = vsyncpa [#allocation5 + $0x1], 1 }

</bundles_post_ra>
